<compile_context>
chip_gen: v6e
topology: v6e:2x2x1
jax: 0.10.0
libtpu: 0.0.40
codegen_flags: <defaults>
</compile_context>

<pallas_src>
import jax
import jax.numpy as jnp
from jax.experimental import pallas as pl
from jax.experimental.pallas import tpu as pltpu

H_IN = 80        # conv2d kernel height == input height (true frequency width, no lane pad)
W_IN = 254       # => flatten size 32 * 60 = 1920, matching nn.Linear(1920, 256)

L0 = W_IN - 2    # 252 after Conv2d (kw = 3)
L1 = L0 - 2      # 250 after Conv1d(64,64,3)
L2 = L1 - 2      # 248 after Conv1d(64,32,3)
L3 = L2 // 2     # 124 after MaxPool1d(2)
L4 = L3 - 2      # 122 after Conv1d(32,32,3)
L5 = L4 - 2      # 120 after Conv1d(32,32,3)
L6 = L5 // 2     # 60  after MaxPool1d(2)

FEAT_STRIDE = 64  # per-image feature rows padded 60 -> 64 (8-aligned sublane stride)


def fused_kernel(x_ref, w2d_ref, b2d_ref, w1_ref, b1_ref, w2_ref, b2_ref,
                 w3_ref, b3_ref, w4_ref, b4_ref,
                 fc1w_ref, fc1b_ref, fc2w_ref, fc2b_ref, fc3w_ref, fc3b_ref,
                 out_ref, feat_ref, col_ref, pool_ref):
    b = pl.program_id(1)          # image index within the current batch tile

    def fused_conv(h_bf, l_out, cin, w_ref, b_ref):
        """Valid conv (kernel 3) as ONE matmul: im2col along K via the bf16 staging scratch.

        h_bf: (l_out + 2, cin) bf16.  Returns (l_out, cout) f32 (bias added, no activation).
        """
        col_ref[0:l_out, 0:cin] = h_bf[0:l_out]
        col_ref[0:l_out, cin:2 * cin] = h_bf[1:1 + l_out]
        col_ref[0:l_out, 2 * cin:3 * cin] = h_bf[2:2 + l_out]
        return jnp.dot(col_ref[0:l_out, 0:3 * cin], w_ref[...],
                       preferred_element_type=jnp.float32) + b_ref[...]

    def maxpool2(h, l_out):
        """MaxPool1d(2) via stride-2 reads from the f32 staging scratch."""
        pool_ref[0:2 * l_out, :] = h
        return jnp.maximum(pool_ref[pl.ds(0, l_out, stride=2), :],
                           pool_ref[pl.ds(1, l_out, stride=2), :])

    # ---------------- feature extractor: one image per grid step ----------------
    x = x_ref[...]                                                          # (254, 80) bf16
    # Conv2d(1, 64, (80, 3)) + ReLU   (K = 3*80 = 240)
    h0 = jnp.maximum(fused_conv(x, L0, H_IN, w2d_ref, b2d_ref), 0.0)        # (252, 64)
    # Conv1d(64, 64, 3)               (K = 192, no ReLU in the torch Sequential)
    h1 = fused_conv(h0.astype(jnp.bfloat16), L1, 64, w1_ref, b1_ref)        # (250, 64)
    # Conv1d(64, 32, 3) + ReLU        (K = 192)
    h2 = jnp.maximum(fused_conv(h1.astype(jnp.bfloat16), L2, 64,
                                w2_ref, b2_ref), 0.0)                       # (248, 32)
    p1 = maxpool2(h2, L3)                                                   # (124, 32)
    # Conv1d(32, 32, 3)               (K = 96, no ReLU)
    h3 = fused_conv(p1.astype(jnp.bfloat16), L4, 32, w3_ref, b3_ref)        # (122, 32)
    # Conv1d(32, 32, 3) + ReLU        (K = 96)
    h4 = jnp.maximum(fused_conv(h3.astype(jnp.bfloat16), L5, 32,
                                w4_ref, b4_ref), 0.0)                       # (120, 32)
    p2 = maxpool2(h4, L6)                                                   # (60, 32)

    # Stash this image's features (contiguous write at an 8-aligned per-image stride).
    feat_ref[b, pl.ds(0, L6), :] = p2

    # ---------------- classifier: once per tile, on all B_TILE images ----------------
    @pl.when(b == pl.num_programs(1) - 1)
    def _():
        bt = feat_ref.shape[0]
        # fc1 contracts over 1920 = 60*32 features: the host-side permuted weight slab
        # fc1w_ref[l] (32, 256) consumes the kernel's (L, C) flatten order directly.
        acc = jnp.zeros((bt, 256), jnp.float32)
        for l in range(L6):
            f_l = feat_ref[:, l, :].astype(jnp.bfloat16)                    # (bt, 32)
            acc = acc + jnp.dot(f_l, fc1w_ref[l], preferred_element_type=jnp.float32)
        h = jnp.maximum(acc + fc1b_ref[...], 0.0).astype(jnp.bfloat16)      # (bt, 256)
        h = jnp.maximum(jnp.dot(h, fc2w_ref[...], preferred_element_type=jnp.float32)
                        + fc2b_ref[...], 0.0).astype(jnp.bfloat16)          # (bt, 128)
        # fc3 padded to 128 output lanes (cols >= 2 have zero weight & bias): lane-dense store.
        out_ref[...] = (jnp.dot(h, fc3w_ref[...], preferred_element_type=jnp.float32)
                        + fc3b_ref[...])


def fused_forward(x_whp, p, b_tile):
    """x_whp: (N_pad, 254, 80) bf16 with N_pad % b_tile == 0.  Returns (N_pad//b_tile, b_tile, 128) f32."""
    n_pad = x_whp.shape[0]
    assert n_pad % b_tile == 0
    n_outer = n_pad // b_tile

    def _const(shape):
        return pl.BlockSpec(shape, lambda i, b: (0,) * len(shape))

    grid_spec = pltpu.PrefetchScalarGridSpec(
        num_scalar_prefetch=0,
        grid=(n_outer, b_tile),
        in_specs=[
            # one image per (i, b) grid step; last two dims are the full array dims
            pl.BlockSpec((None, W_IN, H_IN), lambda i, b: (i * b_tile + b, 0, 0)),
            _const((3 * H_IN, 64)), _const((1, 64)),     # conv2d (tap-fused, K=240)
            _const((192, 64)), _const((1, 64)),          # conv1d 64->64 (K=192)
            _const((192, 32)), _const((1, 32)),          # conv1d 64->32 (K=192)
            _const((96, 32)), _const((1, 32)),           # conv1d 32->32 (K=96)
            _const((96, 32)), _const((1, 32)),           # conv1d 32->32 (K=96)
            _const((L6, 32, 256)), _const((1, 256)),     # fc1 (permuted for (L,C) flatten order)
            _const((256, 128)), _const((1, 128)),        # fc2
            _const((128, 128)), _const((1, 128)),        # fc3 (padded to 128 lanes)
        ],
        out_specs=pl.BlockSpec((None, b_tile, 128), lambda i, b: (i, 0, 0)),
        scratch_shapes=[
            pltpu.VMEM((b_tile, FEAT_STRIDE, 32), jnp.float32),  # per-tile pooled features
            pltpu.VMEM((L0, 3 * H_IN), jnp.bfloat16),            # im2col staging (reused per layer)
            pltpu.VMEM((L2, 32), jnp.float32),                   # maxpool staging (reused)
        ],
    )
    return pl.pallas_call(
        fused_kernel,
        out_shape=jax.ShapeDtypeStruct((n_outer, b_tile, 128), jnp.float32),
        grid_spec=grid_spec,
        compiler_params=pltpu.CompilerParams(
            dimension_semantics=("parallel", "arbitrary")),
    )(x_whp, p["w2d"], p["b2d"], p["w1"], p["b1"], p["w2"], p["b2"],
      p["w3"], p["b3"], p["w4"], p["b4"],
      p["fc1_w"], p["fc1_b"], p["fc2_w"], p["fc2_b"], p["fc3_w"], p["fc3_b"])


def _pick_b_tile(n):
    """Big tiles amortize grid-step overhead and give the classifier a decent M; for small
    batches keep the outer ("parallel") grid axis >= 2 so v7x can use both TensorCores."""
    if n >= 64:
        return 32
    return max(1, n // 2)


@jax.jit
def long_filter_cnn_forward(x, p):
    """x: (N, 1, 80, 254) float32, NCHW like PyTorch.  Returns (N, 2) float32 logits."""
    n = x.shape[0]
    b_tile = _pick_b_tile(n)
    n_pad = pl.cdiv(n, b_tile) * b_tile
    x_wh = jnp.transpose(x[:, 0, :, :], (0, 2, 1)).astype(jnp.bfloat16)     # (N, 254, 80)
    x_whp = jnp.pad(x_wh, ((0, n_pad - n), (0, 0), (0, 0)))                 # (N_pad, 254, 80)
    logits = fused_forward(x_whp, p, b_tile)                                # (outer, b_tile, 128)
    return logits.reshape(n_pad, 128)[:n, :2]


def init_torch_like_params(key):
    """Deterministic synthetic weights in PyTorch shape conventions."""
    ks = jax.random.split(key, 16)

    def dense(k, shape, fan_in):
        return jax.random.normal(k, shape, jnp.float32) * (1.0 / jnp.sqrt(float(fan_in)))

    return {
        "conv2d.w": dense(ks[0], (64, 1, 80, 3), 240),   # (Cout, Cin, KH, KW)
        "conv2d.b": dense(ks[1], (64,), 240),
        "c1.w": dense(ks[2], (64, 64, 3), 192),          # (Cout, Cin, K)
        "c1.b": dense(ks[3], (64,), 192),
        "c2.w": dense(ks[4], (32, 64, 3), 192),
        "c2.b": dense(ks[5], (32,), 192),
        "c3.w": dense(ks[6], (32, 32, 3), 96),
        "c3.b": dense(ks[7], (32,), 96),
        "c4.w": dense(ks[8], (32, 32, 3), 96),
        "c4.b": dense(ks[9], (32,), 96),
        "fc1.w": dense(ks[10], (256, 1920), 1920),       # (out, in)
        "fc1.b": dense(ks[11], (256,), 1920),
        "fc2.w": dense(ks[12], (128, 256), 256),
        "fc2.b": dense(ks[13], (128,), 256),
        "fc3.w": dense(ks[14], (2, 128), 128),
        "fc3.b": dense(ks[15], (2,), 128),
    }


def to_kernel_params(pt):
    """Rearrange PyTorch-convention weights into the kernel's tap-fused bf16 layouts."""
    bf = jnp.bfloat16

    # Conv2d: (64,1,80,3) -> (3, 80, 64) -> (240, 64); im2col row index = t*80 + f.
    w2d = jnp.transpose(pt["conv2d.w"][:, 0, :, :], (2, 1, 0)).reshape(3 * H_IN, 64).astype(bf)

    def fuse1d(w):  # (Cout, Cin, 3) -> (3*Cin, Cout); im2col row index = t*Cin + c
        cout, cin, k = w.shape
        return jnp.transpose(w, (2, 1, 0)).reshape(k * cin, cout).astype(bf)

    # fc1: (256, 1920) with columns c*60 + l (torch channel-major flatten) -> (60, 32, 256)
    # so the kernel's (L, C) feature order is consumed directly.
    fc1_w = pt["fc1.w"].reshape(256, 32, L6).transpose(2, 1, 0).astype(bf)
    # fc3 padded to 128 output lanes (extra columns zero weight / zero bias).
    fc3_w = jnp.pad(pt["fc3.w"].T, ((0, 0), (0, 128 - 2))).astype(bf)
    fc3_b = jnp.pad(pt["fc3.b"], (0, 128 - 2)).reshape(1, 128)
    return {
        "w2d": w2d, "b2d": pt["conv2d.b"].reshape(1, 64),
        "w1": fuse1d(pt["c1.w"]), "b1": pt["c1.b"].reshape(1, 64),
        "w2": fuse1d(pt["c2.w"]), "b2": pt["c2.b"].reshape(1, 32),
        "w3": fuse1d(pt["c3.w"]), "b3": pt["c3.b"].reshape(1, 32),
        "w4": fuse1d(pt["c4.w"]), "b4": pt["c4.b"].reshape(1, 32),
        "fc1_w": fc1_w, "fc1_b": pt["fc1.b"].reshape(1, 256),
        "fc2_w": pt["fc2.w"].T.astype(bf), "fc2_b": pt["fc2.b"].reshape(1, 128),
        "fc3_w": fc3_w, "fc3_b": fc3_b,
    }


if __name__ == "__main__":
    key = jax.random.PRNGKey(0)
    kp, kx = jax.random.split(key)
    pt_params = init_torch_like_params(kp)
    kparams = to_kernel_params(pt_params)

    # Smallest shape consistent with the module: H=80 (filter height), W=254 (=> 1920 features).
    x = jax.random.normal(kx, (2, 1, H_IN, W_IN), jnp.float32)   # NCHW, batch=2

    out = long_filter_cnn_forward(x, kparams)
    out = jax.block_until_ready(out)

    assert out.shape == (2, 2), out.shape
    assert bool(jnp.all(jnp.isfinite(out)))
    print("KERNEL_OK")
</pallas_src>

<mosaic_0001>
module attributes {stable_mosaic.version = 11 : i64} {
  func.func @fused_kernel(%arg0: i32, %arg1: i32, %arg2: memref<1x254x80xbf16, #tpu.memory_space<vmem>>, %arg3: memref<240x64xbf16, #tpu.memory_space<vmem>>, %arg4: memref<1x64xf32, #tpu.memory_space<vmem>>, %arg5: memref<192x64xbf16, #tpu.memory_space<vmem>>, %arg6: memref<1x64xf32, #tpu.memory_space<vmem>>, %arg7: memref<192x32xbf16, #tpu.memory_space<vmem>>, %arg8: memref<1x32xf32, #tpu.memory_space<vmem>>, %arg9: memref<96x32xbf16, #tpu.memory_space<vmem>>, %arg10: memref<1x32xf32, #tpu.memory_space<vmem>>, %arg11: memref<96x32xbf16, #tpu.memory_space<vmem>>, %arg12: memref<1x32xf32, #tpu.memory_space<vmem>>, %arg13: memref<60x32x256xbf16, #tpu.memory_space<vmem>>, %arg14: memref<1x256xf32, #tpu.memory_space<vmem>>, %arg15: memref<256x128xbf16, #tpu.memory_space<vmem>>, %arg16: memref<1x128xf32, #tpu.memory_space<vmem>>, %arg17: memref<128x128xbf16, #tpu.memory_space<vmem>>, %arg18: memref<1x128xf32, #tpu.memory_space<vmem>>, %arg19: memref<1x1x128xf32, #tpu.memory_space<vmem>>, %arg20: memref<1x64x32xf32, #tpu.memory_space<vmem>>, %arg21: memref<252x240xbf16, #tpu.memory_space<vmem>>, %arg22: memref<248x32xf32, #tpu.memory_space<vmem>>) attributes {dimension_semantics = [#tpu.dimension_semantics<parallel>, #tpu.dimension_semantics<arbitrary>], iteration_bounds = array<i64: 2, 1>, scalar_prefetch = 0 : i64, scratch_operands = 3 : i64, tpu.core_type = #tpu.core_type<tc>, window_params = [{transform_indices = @transform_0, window_bounds = array<i64: 1, 254, 80>}, {pipeline_mode = #tpu.pipeline_mode<synchronous>, transform_indices = @transform_1, window_bounds = array<i64: 240, 64>}, {pipeline_mode = #tpu.pipeline_mode<synchronous>, transform_indices = @transform_2, window_bounds = array<i64: 1, 64>}, {pipeline_mode = #tpu.pipeline_mode<synchronous>, transform_indices = @transform_3, window_bounds = array<i64: 192, 64>}, {pipeline_mode = #tpu.pipeline_mode<synchronous>, transform_indices = @transform_4, window_bounds = array<i64: 1, 64>}, {pipeline_mode = #tpu.pipeline_mode<synchronous>, transform_indices = @transform_5, window_bounds = array<i64: 192, 32>}, {pipeline_mode = #tpu.pipeline_mode<synchronous>, transform_indices = @transform_6, window_bounds = array<i64: 1, 32>}, {pipeline_mode = #tpu.pipeline_mode<synchronous>, transform_indices = @transform_7, window_bounds = array<i64: 96, 32>}, {pipeline_mode = #tpu.pipeline_mode<synchronous>, transform_indices = @transform_8, window_bounds = array<i64: 1, 32>}, {pipeline_mode = #tpu.pipeline_mode<synchronous>, transform_indices = @transform_9, window_bounds = array<i64: 96, 32>}, {pipeline_mode = #tpu.pipeline_mode<synchronous>, transform_indices = @transform_10, window_bounds = array<i64: 1, 32>}, {pipeline_mode = #tpu.pipeline_mode<synchronous>, transform_indices = @transform_11, window_bounds = array<i64: 60, 32, 256>}, {pipeline_mode = #tpu.pipeline_mode<synchronous>, transform_indices = @transform_12, window_bounds = array<i64: 1, 256>}, {pipeline_mode = #tpu.pipeline_mode<synchronous>, transform_indices = @transform_13, window_bounds = array<i64: 256, 128>}, {pipeline_mode = #tpu.pipeline_mode<synchronous>, transform_indices = @transform_14, window_bounds = array<i64: 1, 128>}, {pipeline_mode = #tpu.pipeline_mode<synchronous>, transform_indices = @transform_15, window_bounds = array<i64: 128, 128>}, {pipeline_mode = #tpu.pipeline_mode<synchronous>, transform_indices = @transform_16, window_bounds = array<i64: 1, 128>}, {transform_indices = @transform_17, window_bounds = array<i64: 1, 1, 128>}]} {
    %c0 = arith.constant 0 : index
    %c0_0 = arith.constant 0 : index
    %c0_1 = arith.constant 0 : index
    %0 = vector.load %arg2[%c0, %c0_0, %c0_1] : memref<1x254x80xbf16, #tpu.memory_space<vmem>>, vector<1x254x80xbf16>
    %1 = vector.shape_cast %0 : vector<1x254x80xbf16> to vector<254x80xbf16>
    %2 = vector.extract_strided_slice %1 {offsets = [0, 0], sizes = [252, 80], strides = [1, 1]} : vector<254x80xbf16> to vector<252x80xbf16>
    %c0_2 = arith.constant 0 : index
    %c0_3 = arith.constant 0 : index
    %3 = vector.load %arg21[%c0_2, %c0_3] : memref<252x240xbf16, #tpu.memory_space<vmem>>, vector<252x80xbf16>
    tpu.vector_store %arg21[%c0_2, %c0_3], %2 {strides = array<i32>} : memref<252x240xbf16, #tpu.memory_space<vmem>>, vector<252x80xbf16>,
    %4 = vector.extract_strided_slice %1 {offsets = [1, 0], sizes = [252, 80], strides = [1, 1]} : vector<254x80xbf16> to vector<252x80xbf16>
    %c0_4 = arith.constant 0 : index
    %c80 = arith.constant 80 : index
    %5 = vector.load %arg21[%c0_4, %c80] : memref<252x240xbf16, #tpu.memory_space<vmem>>, vector<252x80xbf16>
    tpu.vector_store %arg21[%c0_4, %c80], %4 {strides = array<i32>} : memref<252x240xbf16, #tpu.memory_space<vmem>>, vector<252x80xbf16>,
    %6 = vector.extract_strided_slice %1 {offsets = [2, 0], sizes = [252, 80], strides = [1, 1]} : vector<254x80xbf16> to vector<252x80xbf16>
    %c0_5 = arith.constant 0 : index
    %c160 = arith.constant 160 : index
    %7 = vector.load %arg21[%c0_5, %c160] : memref<252x240xbf16, #tpu.memory_space<vmem>>, vector<252x80xbf16>
    tpu.vector_store %arg21[%c0_5, %c160], %6 {strides = array<i32>} : memref<252x240xbf16, #tpu.memory_space<vmem>>, vector<252x80xbf16>,
    %c0_6 = arith.constant 0 : index
    %c0_7 = arith.constant 0 : index
    %8 = vector.load %arg21[%c0_6, %c0_7] : memref<252x240xbf16, #tpu.memory_space<vmem>>, vector<252x240xbf16>
    %c0_8 = arith.constant 0 : index
    %c0_9 = arith.constant 0 : index
    %9 = vector.load %arg3[%c0_8, %c0_9] : memref<240x64xbf16, #tpu.memory_space<vmem>>, vector<240x64xbf16>
    %cst = arith.constant dense<0.000000e+00> : vector<252x64xf32>
    %10 = tpu.matmul %8, %9, %cst {dimension_numbers = #tpu.dot_dimension_numbers<[1], [0], [0], [1], [0, 0, 1, 1], [], []>} : vector<252x240xbf16>, vector<240x64xbf16>, vector<252x64xf32> -> vector<252x64xf32>
    %c0_10 = arith.constant 0 : index
    %c0_11 = arith.constant 0 : index
    %11 = vector.load %arg4[%c0_10, %c0_11] : memref<1x64xf32, #tpu.memory_space<vmem>>, vector<1x64xf32>
    %12 = vector.broadcast %11 : vector<1x64xf32> to vector<252x64xf32>
    %13 = arith.addf %10, %12 : vector<252x64xf32>
    %cst_12 = arith.constant 0.000000e+00 : f32
    %14 = vector.broadcast %cst_12 : f32 to vector<252x64xf32>
    %15 = arith.maximumf %13, %14 : vector<252x64xf32>
    %16 = arith.truncf %15 : vector<252x64xf32> to vector<252x64xbf16>
    %17 = vector.extract_strided_slice %16 {offsets = [0, 0], sizes = [250, 64], strides = [1, 1]} : vector<252x64xbf16> to vector<250x64xbf16>
    %c0_13 = arith.constant 0 : index
    %c0_14 = arith.constant 0 : index
    %18 = vector.load %arg21[%c0_13, %c0_14] : memref<252x240xbf16, #tpu.memory_space<vmem>>, vector<250x64xbf16>
    tpu.vector_store %arg21[%c0_13, %c0_14], %17 {strides = array<i32>} : memref<252x240xbf16, #tpu.memory_space<vmem>>, vector<250x64xbf16>,
    %19 = vector.extract_strided_slice %16 {offsets = [1, 0], sizes = [250, 64], strides = [1, 1]} : vector<252x64xbf16> to vector<250x64xbf16>
    %c0_15 = arith.constant 0 : index
    %c64 = arith.constant 64 : index
    %20 = vector.load %arg21[%c0_15, %c64] : memref<252x240xbf16, #tpu.memory_space<vmem>>, vector<250x64xbf16>
    tpu.vector_store %arg21[%c0_15, %c64], %19 {strides = array<i32>} : memref<252x240xbf16, #tpu.memory_space<vmem>>, vector<250x64xbf16>,
    %21 = vector.extract_strided_slice %16 {offsets = [2, 0], sizes = [250, 64], strides = [1, 1]} : vector<252x64xbf16> to vector<250x64xbf16>
    %c0_16 = arith.constant 0 : index
    %c128 = arith.constant 128 : index
    %22 = vector.load %arg21[%c0_16, %c128] : memref<252x240xbf16, #tpu.memory_space<vmem>>, vector<250x64xbf16>
    tpu.vector_store %arg21[%c0_16, %c128], %21 {strides = array<i32>} : memref<252x240xbf16, #tpu.memory_space<vmem>>, vector<250x64xbf16>,
    %c0_17 = arith.constant 0 : index
    %c0_18 = arith.constant 0 : index
    %23 = vector.load %arg21[%c0_17, %c0_18] : memref<252x240xbf16, #tpu.memory_space<vmem>>, vector<250x192xbf16>
    %c0_19 = arith.constant 0 : index
    %c0_20 = arith.constant 0 : index
    %24 = vector.load %arg5[%c0_19, %c0_20] : memref<192x64xbf16, #tpu.memory_space<vmem>>, vector<192x64xbf16>
    %cst_21 = arith.constant dense<0.000000e+00> : vector<250x64xf32>
    %25 = tpu.matmul %23, %24, %cst_21 {dimension_numbers = #tpu.dot_dimension_numbers<[1], [0], [0], [1], [0, 0, 1, 1], [], []>} : vector<250x192xbf16>, vector<192x64xbf16>, vector<250x64xf32> -> vector<250x64xf32>
    %c0_22 = arith.constant 0 : index
    %c0_23 = arith.constant 0 : index
    %26 = vector.load %arg6[%c0_22, %c0_23] : memref<1x64xf32, #tpu.memory_space<vmem>>, vector<1x64xf32>
    %27 = vector.broadcast %26 : vector<1x64xf32> to vector<250x64xf32>
    %28 = arith.addf %25, %27 : vector<250x64xf32>
    %29 = arith.truncf %28 : vector<250x64xf32> to vector<250x64xbf16>
    %30 = vector.extract_strided_slice %29 {offsets = [0, 0], sizes = [248, 64], strides = [1, 1]} : vector<250x64xbf16> to vector<248x64xbf16>
    %c0_24 = arith.constant 0 : index
    %c0_25 = arith.constant 0 : index
    %31 = vector.load %arg21[%c0_24, %c0_25] : memref<252x240xbf16, #tpu.memory_space<vmem>>, vector<248x64xbf16>
    tpu.vector_store %arg21[%c0_24, %c0_25], %30 {strides = array<i32>} : memref<252x240xbf16, #tpu.memory_space<vmem>>, vector<248x64xbf16>,
    %32 = vector.extract_strided_slice %29 {offsets = [1, 0], sizes = [248, 64], strides = [1, 1]} : vector<250x64xbf16> to vector<248x64xbf16>
    %c0_26 = arith.constant 0 : index
    %c64_27 = arith.constant 64 : index
    %33 = vector.load %arg21[%c0_26, %c64_27] : memref<252x240xbf16, #tpu.memory_space<vmem>>, vector<248x64xbf16>
    tpu.vector_store %arg21[%c0_26, %c64_27], %32 {strides = array<i32>} : memref<252x240xbf16, #tpu.memory_space<vmem>>, vector<248x64xbf16>,
    %34 = vector.extract_strided_slice %29 {offsets = [2, 0], sizes = [248, 64], strides = [1, 1]} : vector<250x64xbf16> to vector<248x64xbf16>
    %c0_28 = arith.constant 0 : index
    %c128_29 = arith.constant 128 : index
    %35 = vector.load %arg21[%c0_28, %c128_29] : memref<252x240xbf16, #tpu.memory_space<vmem>>, vector<248x64xbf16>
    tpu.vector_store %arg21[%c0_28, %c128_29], %34 {strides = array<i32>} : memref<252x240xbf16, #tpu.memory_space<vmem>>, vector<248x64xbf16>,
    %c0_30 = arith.constant 0 : index
    %c0_31 = arith.constant 0 : index
    %36 = vector.load %arg21[%c0_30, %c0_31] : memref<252x240xbf16, #tpu.memory_space<vmem>>, vector<248x192xbf16>
    %c0_32 = arith.constant 0 : index
    %c0_33 = arith.constant 0 : index
    %37 = vector.load %arg7[%c0_32, %c0_33] : memref<192x32xbf16, #tpu.memory_space<vmem>>, vector<192x32xbf16>
    %cst_34 = arith.constant dense<0.000000e+00> : vector<248x32xf32>
    %38 = tpu.matmul %36, %37, %cst_34 {dimension_numbers = #tpu.dot_dimension_numbers<[1], [0], [0], [1], [0, 0, 1, 1], [], []>} : vector<248x192xbf16>, vector<192x32xbf16>, vector<248x32xf32> -> vector<248x32xf32>
    %c0_35 = arith.constant 0 : index
    %c0_36 = arith.constant 0 : index
    %39 = vector.load %arg8[%c0_35, %c0_36] : memref<1x32xf32, #tpu.memory_space<vmem>>, vector<1x32xf32>
    %40 = vector.broadcast %39 : vector<1x32xf32> to vector<248x32xf32>
    %41 = arith.addf %38, %40 : vector<248x32xf32>
    %cst_37 = arith.constant 0.000000e+00 : f32
    %42 = vector.broadcast %cst_37 : f32 to vector<248x32xf32>
    %43 = arith.maximumf %41, %42 : vector<248x32xf32>
    %c0_38 = arith.constant 0 : index
    %c0_39 = arith.constant 0 : index
    %44 = vector.load %arg22[%c0_38, %c0_39] : memref<248x32xf32, #tpu.memory_space<vmem>>, vector<248x32xf32>
    tpu.vector_store %arg22[%c0_38, %c0_39], %43 {strides = array<i32>} : memref<248x32xf32, #tpu.memory_space<vmem>>, vector<248x32xf32>,
    %c0_40 = arith.constant 0 : index
    %c0_41 = arith.constant 0 : index
    %45 = tpu.strided_load %arg22[%c0_40, %c0_41] {strides = array<i32: 2, 1>} : memref<248x32xf32, #tpu.memory_space<vmem>>, vector<124x32xf32>
    %c1 = arith.constant 1 : index
    %c0_42 = arith.constant 0 : index
    %46 = tpu.strided_load %arg22[%c1, %c0_42] {strides = array<i32: 2, 1>} : memref<248x32xf32, #tpu.memory_space<vmem>>, vector<124x32xf32>
    %47 = arith.maximumf %45, %46 : vector<124x32xf32>
    %48 = arith.truncf %47 : vector<124x32xf32> to vector<124x32xbf16>
    %49 = vector.extract_strided_slice %48 {offsets = [0, 0], sizes = [122, 32], strides = [1, 1]} : vector<124x32xbf16> to vector<122x32xbf16>
    %c0_43 = arith.constant 0 : index
    %c0_44 = arith.constant 0 : index
    %50 = vector.load %arg21[%c0_43, %c0_44] : memref<252x240xbf16, #tpu.memory_space<vmem>>, vector<122x32xbf16>
    tpu.vector_store %arg21[%c0_43, %c0_44], %49 {strides = array<i32>} : memref<252x240xbf16, #tpu.memory_space<vmem>>, vector<122x32xbf16>,
    %51 = vector.extract_strided_slice %48 {offsets = [1, 0], sizes = [122, 32], strides = [1, 1]} : vector<124x32xbf16> to vector<122x32xbf16>
    %c0_45 = arith.constant 0 : index
    %c32 = arith.constant 32 : index
    %52 = vector.load %arg21[%c0_45, %c32] : memref<252x240xbf16, #tpu.memory_space<vmem>>, vector<122x32xbf16>
    tpu.vector_store %arg21[%c0_45, %c32], %51 {strides = array<i32>} : memref<252x240xbf16, #tpu.memory_space<vmem>>, vector<122x32xbf16>,
    %53 = vector.extract_strided_slice %48 {offsets = [2, 0], sizes = [122, 32], strides = [1, 1]} : vector<124x32xbf16> to vector<122x32xbf16>
    %c0_46 = arith.constant 0 : index
    %c64_47 = arith.constant 64 : index
    %54 = vector.load %arg21[%c0_46, %c64_47] : memref<252x240xbf16, #tpu.memory_space<vmem>>, vector<122x32xbf16>
    tpu.vector_store %arg21[%c0_46, %c64_47], %53 {strides = array<i32>} : memref<252x240xbf16, #tpu.memory_space<vmem>>, vector<122x32xbf16>,
    %c0_48 = arith.constant 0 : index
    %c0_49 = arith.constant 0 : index
    %55 = vector.load %arg21[%c0_48, %c0_49] : memref<252x240xbf16, #tpu.memory_space<vmem>>, vector<122x96xbf16>
    %c0_50 = arith.constant 0 : index
    %c0_51 = arith.constant 0 : index
    %56 = vector.load %arg9[%c0_50, %c0_51] : memref<96x32xbf16, #tpu.memory_space<vmem>>, vector<96x32xbf16>
    %cst_52 = arith.constant dense<0.000000e+00> : vector<122x32xf32>
    %57 = tpu.matmul %55, %56, %cst_52 {dimension_numbers = #tpu.dot_dimension_numbers<[1], [0], [0], [1], [0, 0, 1, 1], [], []>} : vector<122x96xbf16>, vector<96x32xbf16>, vector<122x32xf32> -> vector<122x32xf32>
    %c0_53 = arith.constant 0 : index
    %c0_54 = arith.constant 0 : index
    %58 = vector.load %arg10[%c0_53, %c0_54] : memref<1x32xf32, #tpu.memory_space<vmem>>, vector<1x32xf32>
    %59 = vector.broadcast %58 : vector<1x32xf32> to vector<122x32xf32>
    %60 = arith.addf %57, %59 : vector<122x32xf32>
    %61 = arith.truncf %60 : vector<122x32xf32> to vector<122x32xbf16>
    %62 = vector.extract_strided_slice %61 {offsets = [0, 0], sizes = [120, 32], strides = [1, 1]} : vector<122x32xbf16> to vector<120x32xbf16>
    %c0_55 = arith.constant 0 : index
    %c0_56 = arith.constant 0 : index
    %63 = vector.load %arg21[%c0_55, %c0_56] : memref<252x240xbf16, #tpu.memory_space<vmem>>, vector<120x32xbf16>
    tpu.vector_store %arg21[%c0_55, %c0_56], %62 {strides = array<i32>} : memref<252x240xbf16, #tpu.memory_space<vmem>>, vector<120x32xbf16>,
    %64 = vector.extract_strided_slice %61 {offsets = [1, 0], sizes = [120, 32], strides = [1, 1]} : vector<122x32xbf16> to vector<120x32xbf16>
    %c0_57 = arith.constant 0 : index
    %c32_58 = arith.constant 32 : index
    %65 = vector.load %arg21[%c0_57, %c32_58] : memref<252x240xbf16, #tpu.memory_space<vmem>>, vector<120x32xbf16>
    tpu.vector_store %arg21[%c0_57, %c32_58], %64 {strides = array<i32>} : memref<252x240xbf16, #tpu.memory_space<vmem>>, vector<120x32xbf16>,
    %66 = vector.extract_strided_slice %61 {offsets = [2, 0], sizes = [120, 32], strides = [1, 1]} : vector<122x32xbf16> to vector<120x32xbf16>
    %c0_59 = arith.constant 0 : index
    %c64_60 = arith.constant 64 : index
    %67 = vector.load %arg21[%c0_59, %c64_60] : memref<252x240xbf16, #tpu.memory_space<vmem>>, vector<120x32xbf16>
    tpu.vector_store %arg21[%c0_59, %c64_60], %66 {strides = array<i32>} : memref<252x240xbf16, #tpu.memory_space<vmem>>, vector<120x32xbf16>,
    %c0_61 = arith.constant 0 : index
    %c0_62 = arith.constant 0 : index
    %68 = vector.load %arg21[%c0_61, %c0_62] : memref<252x240xbf16, #tpu.memory_space<vmem>>, vector<120x96xbf16>
    %c0_63 = arith.constant 0 : index
    %c0_64 = arith.constant 0 : index
    %69 = vector.load %arg11[%c0_63, %c0_64] : memref<96x32xbf16, #tpu.memory_space<vmem>>, vector<96x32xbf16>
    %cst_65 = arith.constant dense<0.000000e+00> : vector<120x32xf32>
    %70 = tpu.matmul %68, %69, %cst_65 {dimension_numbers = #tpu.dot_dimension_numbers<[1], [0], [0], [1], [0, 0, 1, 1], [], []>} : vector<120x96xbf16>, vector<96x32xbf16>, vector<120x32xf32> -> vector<120x32xf32>
    %c0_66 = arith.constant 0 : index
    %c0_67 = arith.constant 0 : index
    %71 = vector.load %arg12[%c0_66, %c0_67] : memref<1x32xf32, #tpu.memory_space<vmem>>, vector<1x32xf32>
    %72 = vector.broadcast %71 : vector<1x32xf32> to vector<120x32xf32>
    %73 = arith.addf %70, %72 : vector<120x32xf32>
    %cst_68 = arith.constant 0.000000e+00 : f32
    %74 = vector.broadcast %cst_68 : f32 to vector<120x32xf32>
    %75 = arith.maximumf %73, %74 : vector<120x32xf32>
    %c0_69 = arith.constant 0 : index
    %c0_70 = arith.constant 0 : index
    %76 = vector.load %arg22[%c0_69, %c0_70] : memref<248x32xf32, #tpu.memory_space<vmem>>, vector<120x32xf32>
    tpu.vector_store %arg22[%c0_69, %c0_70], %75 {strides = array<i32>} : memref<248x32xf32, #tpu.memory_space<vmem>>, vector<120x32xf32>,
    %c0_71 = arith.constant 0 : index
    %c0_72 = arith.constant 0 : index
    %77 = tpu.strided_load %arg22[%c0_71, %c0_72] {strides = array<i32: 2, 1>} : memref<248x32xf32, #tpu.memory_space<vmem>>, vector<60x32xf32>
    %c1_73 = arith.constant 1 : index
    %c0_74 = arith.constant 0 : index
    %78 = tpu.strided_load %arg22[%c1_73, %c0_74] {strides = array<i32: 2, 1>} : memref<248x32xf32, #tpu.memory_space<vmem>>, vector<60x32xf32>
    %79 = arith.maximumf %77, %78 : vector<60x32xf32>
    %80 = arith.index_cast %arg1 : i32 to index
    %c0_75 = arith.constant 0 : index
    %c0_76 = arith.constant 0 : index
    %81 = vector.load %arg20[%80, %c0_75, %c0_76] : memref<1x64x32xf32, #tpu.memory_space<vmem>>, vector<1x60x32xf32>
    %82 = vector.shape_cast %81 : vector<1x60x32xf32> to vector<60x32xf32>
    %83 = vector.shape_cast %79 : vector<60x32xf32> to vector<1x60x32xf32>
    tpu.vector_store %arg20[%80, %c0_75, %c0_76], %83 {strides = array<i32>} : memref<1x64x32xf32, #tpu.memory_space<vmem>>, vector<1x60x32xf32>,
    %c0_i32 = arith.constant 0 : i32
    %84 = arith.cmpi eq, %arg1, %c0_i32 : i32
    %85 = arith.extui %84 : i1 to i32
    %c0_i32_77 = arith.constant 0 : i32
    %86 = arith.cmpi ne, %85, %c0_i32_77 : i32
    scf.if %86 {
      %cst_78 = arith.constant 0.000000e+00 : f32
      %87 = vector.broadcast %cst_78 : f32 to vector<1x256xf32>
      %c0_79 = arith.constant 0 : index
      %c0_80 = arith.constant 0 : index
      %c0_81 = arith.constant 0 : index
      %88 = vector.load %arg20[%c0_79, %c0_80, %c0_81] : memref<1x64x32xf32, #tpu.memory_space<vmem>>, vector<1x1x32xf32>
      %89 = vector.shape_cast %88 : vector<1x1x32xf32> to vector<1x32xf32>
      %90 = arith.truncf %89 : vector<1x32xf32> to vector<1x32xbf16>
      %c0_82 = arith.constant 0 : index
      %c0_83 = arith.constant 0 : index
      %c0_84 = arith.constant 0 : index
      %91 = vector.load %arg13[%c0_82, %c0_83, %c0_84] : memref<60x32x256xbf16, #tpu.memory_space<vmem>>, vector<1x32x256xbf16>
      %92 = vector.shape_cast %91 : vector<1x32x256xbf16> to vector<32x256xbf16>
      %cst_85 = arith.constant dense<0.000000e+00> : vector<1x256xf32>
      %93 = tpu.matmul %90, %92, %cst_85 {dimension_numbers = #tpu.dot_dimension_numbers<[1], [0], [0], [1], [0, 0, 1, 1], [], []>} : vector<1x32xbf16>, vector<32x256xbf16>, vector<1x256xf32> -> vector<1x256xf32>
      %94 = arith.addf %87, %93 : vector<1x256xf32>
      %c0_86 = arith.constant 0 : index
      %c1_87 = arith.constant 1 : index
      %c0_88 = arith.constant 0 : index
      %95 = vector.load %arg20[%c0_86, %c1_87, %c0_88] : memref<1x64x32xf32, #tpu.memory_space<vmem>>, vector<1x1x32xf32>
      %96 = vector.shape_cast %95 : vector<1x1x32xf32> to vector<1x32xf32>
      %97 = arith.truncf %96 : vector<1x32xf32> to vector<1x32xbf16>
      %c1_89 = arith.constant 1 : index
      %c0_90 = arith.constant 0 : index
      %c0_91 = arith.constant 0 : index
      %98 = vector.load %arg13[%c1_89, %c0_90, %c0_91] : memref<60x32x256xbf16, #tpu.memory_space<vmem>>, vector<1x32x256xbf16>
      %99 = vector.shape_cast %98 : vector<1x32x256xbf16> to vector<32x256xbf16>
      %cst_92 = arith.constant dense<0.000000e+00> : vector<1x256xf32>
      %100 = tpu.matmul %97, %99, %cst_92 {dimension_numbers = #tpu.dot_dimension_numbers<[1], [0], [0], [1], [0, 0, 1, 1], [], []>} : vector<1x32xbf16>, vector<32x256xbf16>, vector<1x256xf32> -> vector<1x256xf32>
      %101 = arith.addf %94, %100 : vector<1x256xf32>
      %c0_93 = arith.constant 0 : index
      %c2 = arith.constant 2 : index
      %c0_94 = arith.constant 0 : index
      %102 = vector.load %arg20[%c0_93, %c2, %c0_94] : memref<1x64x32xf32, #tpu.memory_space<vmem>>, vector<1x1x32xf32>
      %103 = vector.shape_cast %102 : vector<1x1x32xf32> to vector<1x32xf32>
      %104 = arith.truncf %103 : vector<1x32xf32> to vector<1x32xbf16>
      %c2_95 = arith.constant 2 : index
      %c0_96 = arith.constant 0 : index
      %c0_97 = arith.constant 0 : index
      %105 = vector.load %arg13[%c2_95, %c0_96, %c0_97] : memref<60x32x256xbf16, #tpu.memory_space<vmem>>, vector<1x32x256xbf16>
      %106 = vector.shape_cast %105 : vector<1x32x256xbf16> to vector<32x256xbf16>
      %cst_98 = arith.constant dense<0.000000e+00> : vector<1x256xf32>
      %107 = tpu.matmul %104, %106, %cst_98 {dimension_numbers = #tpu.dot_dimension_numbers<[1], [0], [0], [1], [0, 0, 1, 1], [], []>} : vector<1x32xbf16>, vector<32x256xbf16>, vector<1x256xf32> -> vector<1x256xf32>
      %108 = arith.addf %101, %107 : vector<1x256xf32>
      %c0_99 = arith.constant 0 : index
      %c3 = arith.constant 3 : index
      %c0_100 = arith.constant 0 : index
      %109 = vector.load %arg20[%c0_99, %c3, %c0_100] : memref<1x64x32xf32, #tpu.memory_space<vmem>>, vector<1x1x32xf32>
      %110 = vector.shape_cast %109 : vector<1x1x32xf32> to vector<1x32xf32>
      %111 = arith.truncf %110 : vector<1x32xf32> to vector<1x32xbf16>
      %c3_101 = arith.constant 3 : index
      %c0_102 = arith.constant 0 : index
      %c0_103 = arith.constant 0 : index
      %112 = vector.load %arg13[%c3_101, %c0_102, %c0_103] : memref<60x32x256xbf16, #tpu.memory_space<vmem>>, vector<1x32x256xbf16>
      %113 = vector.shape_cast %112 : vector<1x32x256xbf16> to vector<32x256xbf16>
      %cst_104 = arith.constant dense<0.000000e+00> : vector<1x256xf32>
      %114 = tpu.matmul %111, %113, %cst_104 {dimension_numbers = #tpu.dot_dimension_numbers<[1], [0], [0], [1], [0, 0, 1, 1], [], []>} : vector<1x32xbf16>, vector<32x256xbf16>, vector<1x256xf32> -> vector<1x256xf32>
      %115 = arith.addf %108, %114 : vector<1x256xf32>
      %c0_105 = arith.constant 0 : index
      %c4 = arith.constant 4 : index
      %c0_106 = arith.constant 0 : index
      %116 = vector.load %arg20[%c0_105, %c4, %c0_106] : memref<1x64x32xf32, #tpu.memory_space<vmem>>, vector<1x1x32xf32>
      %117 = vector.shape_cast %116 : vector<1x1x32xf32> to vector<1x32xf32>
      %118 = arith.truncf %117 : vector<1x32xf32> to vector<1x32xbf16>
      %c4_107 = arith.constant 4 : index
      %c0_108 = arith.constant 0 : index
      %c0_109 = arith.constant 0 : index
      %119 = vector.load %arg13[%c4_107, %c0_108, %c0_109] : memref<60x32x256xbf16, #tpu.memory_space<vmem>>, vector<1x32x256xbf16>
      %120 = vector.shape_cast %119 : vector<1x32x256xbf16> to vector<32x256xbf16>
      %cst_110 = arith.constant dense<0.000000e+00> : vector<1x256xf32>
      %121 = tpu.matmul %118, %120, %cst_110 {dimension_numbers = #tpu.dot_dimension_numbers<[1], [0], [0], [1], [0, 0, 1, 1], [], []>} : vector<1x32xbf16>, vector<32x256xbf16>, vector<1x256xf32> -> vector<1x256xf32>
      %122 = arith.addf %115, %121 : vector<1x256xf32>
      %c0_111 = arith.constant 0 : index
      %c5 = arith.constant 5 : index
      %c0_112 = arith.constant 0 : index
      %123 = vector.load %arg20[%c0_111, %c5, %c0_112] : memref<1x64x32xf32, #tpu.memory_space<vmem>>, vector<1x1x32xf32>
      %124 = vector.shape_cast %123 : vector<1x1x32xf32> to vector<1x32xf32>
      %125 = arith.truncf %124 : vector<1x32xf32> to vector<1x32xbf16>
      %c5_113 = arith.constant 5 : index
      %c0_114 = arith.constant 0 : index
      %c0_115 = arith.constant 0 : index
      %126 = vector.load %arg13[%c5_113, %c0_114, %c0_115] : memref<60x32x256xbf16, #tpu.memory_space<vmem>>, vector<1x32x256xbf16>
      %127 = vector.shape_cast %126 : vector<1x32x256xbf16> to vector<32x256xbf16>
      %cst_116 = arith.constant dense<0.000000e+00> : vector<1x256xf32>
      %128 = tpu.matmul %125, %127, %cst_116 {dimension_numbers = #tpu.dot_dimension_numbers<[1], [0], [0], [1], [0, 0, 1, 1], [], []>} : vector<1x32xbf16>, vector<32x256xbf16>, vector<1x256xf32> -> vector<1x256xf32>
      %129 = arith.addf %122, %128 : vector<1x256xf32>
      %c0_117 = arith.constant 0 : index
      %c6 = arith.constant 6 : index
      %c0_118 = arith.constant 0 : index
      %130 = vector.load %arg20[%c0_117, %c6, %c0_118] : memref<1x64x32xf32, #tpu.memory_space<vmem>>, vector<1x1x32xf32>
      %131 = vector.shape_cast %130 : vector<1x1x32xf32> to vector<1x32xf32>
      %132 = arith.truncf %131 : vector<1x32xf32> to vector<1x32xbf16>
      %c6_119 = arith.constant 6 : index
      %c0_120 = arith.constant 0 : index
      %c0_121 = arith.constant 0 : index
      %133 = vector.load %arg13[%c6_119, %c0_120, %c0_121] : memref<60x32x256xbf16, #tpu.memory_space<vmem>>, vector<1x32x256xbf16>
      %134 = vector.shape_cast %133 : vector<1x32x256xbf16> to vector<32x256xbf16>
      %cst_122 = arith.constant dense<0.000000e+00> : vector<1x256xf32>
      %135 = tpu.matmul %132, %134, %cst_122 {dimension_numbers = #tpu.dot_dimension_numbers<[1], [0], [0], [1], [0, 0, 1, 1], [], []>} : vector<1x32xbf16>, vector<32x256xbf16>, vector<1x256xf32> -> vector<1x256xf32>
      %136 = arith.addf %129, %135 : vector<1x256xf32>
      %c0_123 = arith.constant 0 : index
      %c7 = arith.constant 7 : index
      %c0_124 = arith.constant 0 : index
      %137 = vector.load %arg20[%c0_123, %c7, %c0_124] : memref<1x64x32xf32, #tpu.memory_space<vmem>>, vector<1x1x32xf32>
      %138 = vector.shape_cast %137 : vector<1x1x32xf32> to vector<1x32xf32>
      %139 = arith.truncf %138 : vector<1x32xf32> to vector<1x32xbf16>
      %c7_125 = arith.constant 7 : index
      %c0_126 = arith.constant 0 : index
      %c0_127 = arith.constant 0 : index
      %140 = vector.load %arg13[%c7_125, %c0_126, %c0_127] : memref<60x32x256xbf16, #tpu.memory_space<vmem>>, vector<1x32x256xbf16>
      %141 = vector.shape_cast %140 : vector<1x32x256xbf16> to vector<32x256xbf16>
      %cst_128 = arith.constant dense<0.000000e+00> : vector<1x256xf32>
      %142 = tpu.matmul %139, %141, %cst_128 {dimension_numbers = #tpu.dot_dimension_numbers<[1], [0], [0], [1], [0, 0, 1, 1], [], []>} : vector<1x32xbf16>, vector<32x256xbf16>, vector<1x256xf32> -> vector<1x256xf32>
      %143 = arith.addf %136, %142 : vector<1x256xf32>
      %c0_129 = arith.constant 0 : index
      %c8 = arith.constant 8 : index
      %c0_130 = arith.constant 0 : index
      %144 = vector.load %arg20[%c0_129, %c8, %c0_130] : memref<1x64x32xf32, #tpu.memory_space<vmem>>, vector<1x1x32xf32>
      %145 = vector.shape_cast %144 : vector<1x1x32xf32> to vector<1x32xf32>
      %146 = arith.truncf %145 : vector<1x32xf32> to vector<1x32xbf16>
      %c8_131 = arith.constant 8 : index
      %c0_132 = arith.constant 0 : index
      %c0_133 = arith.constant 0 : index
      %147 = vector.load %arg13[%c8_131, %c0_132, %c0_133] : memref<60x32x256xbf16, #tpu.memory_space<vmem>>, vector<1x32x256xbf16>
      %148 = vector.shape_cast %147 : vector<1x32x256xbf16> to vector<32x256xbf16>
      %cst_134 = arith.constant dense<0.000000e+00> : vector<1x256xf32>
      %149 = tpu.matmul %146, %148, %cst_134 {dimension_numbers = #tpu.dot_dimension_numbers<[1], [0], [0], [1], [0, 0, 1, 1], [], []>} : vector<1x32xbf16>, vector<32x256xbf16>, vector<1x256xf32> -> vector<1x256xf32>
      %150 = arith.addf %143, %149 : vector<1x256xf32>
      %c0_135 = arith.constant 0 : index
      %c9 = arith.constant 9 : index
      %c0_136 = arith.constant 0 : index
      %151 = vector.load %arg20[%c0_135, %c9, %c0_136] : memref<1x64x32xf32, #tpu.memory_space<vmem>>, vector<1x1x32xf32>
      %152 = vector.shape_cast %151 : vector<1x1x32xf32> to vector<1x32xf32>
      %153 = arith.truncf %152 : vector<1x32xf32> to vector<1x32xbf16>
      %c9_137 = arith.constant 9 : index
      %c0_138 = arith.constant 0 : index
      %c0_139 = arith.constant 0 : index
      %154 = vector.load %arg13[%c9_137, %c0_138, %c0_139] : memref<60x32x256xbf16, #tpu.memory_space<vmem>>, vector<1x32x256xbf16>
      %155 = vector.shape_cast %154 : vector<1x32x256xbf16> to vector<32x256xbf16>
      %cst_140 = arith.constant dense<0.000000e+00> : vector<1x256xf32>
      %156 = tpu.matmul %153, %155, %cst_140 {dimension_numbers = #tpu.dot_dimension_numbers<[1], [0], [0], [1], [0, 0, 1, 1], [], []>} : vector<1x32xbf16>, vector<32x256xbf16>, vector<1x256xf32> -> vector<1x256xf32>
      %157 = arith.addf %150, %156 : vector<1x256xf32>
      %c0_141 = arith.constant 0 : index
      %c10 = arith.constant 10 : index
      %c0_142 = arith.constant 0 : index
      %158 = vector.load %arg20[%c0_141, %c10, %c0_142] : memref<1x64x32xf32, #tpu.memory_space<vmem>>, vector<1x1x32xf32>
      %159 = vector.shape_cast %158 : vector<1x1x32xf32> to vector<1x32xf32>
      %160 = arith.truncf %159 : vector<1x32xf32> to vector<1x32xbf16>
      %c10_143 = arith.constant 10 : index
      %c0_144 = arith.constant 0 : index
      %c0_145 = arith.constant 0 : index
      %161 = vector.load %arg13[%c10_143, %c0_144, %c0_145] : memref<60x32x256xbf16, #tpu.memory_space<vmem>>, vector<1x32x256xbf16>
      %162 = vector.shape_cast %161 : vector<1x32x256xbf16> to vector<32x256xbf16>
      %cst_146 = arith.constant dense<0.000000e+00> : vector<1x256xf32>
      %163 = tpu.matmul %160, %162, %cst_146 {dimension_numbers = #tpu.dot_dimension_numbers<[1], [0], [0], [1], [0, 0, 1, 1], [], []>} : vector<1x32xbf16>, vector<32x256xbf16>, vector<1x256xf32> -> vector<1x256xf32>
      %164 = arith.addf %157, %163 : vector<1x256xf32>
      %c0_147 = arith.constant 0 : index
      %c11 = arith.constant 11 : index
      %c0_148 = arith.constant 0 : index
      %165 = vector.load %arg20[%c0_147, %c11, %c0_148] : memref<1x64x32xf32, #tpu.memory_space<vmem>>, vector<1x1x32xf32>
      %166 = vector.shape_cast %165 : vector<1x1x32xf32> to vector<1x32xf32>
      %167 = arith.truncf %166 : vector<1x32xf32> to vector<1x32xbf16>
      %c11_149 = arith.constant 11 : index
      %c0_150 = arith.constant 0 : index
      %c0_151 = arith.constant 0 : index
      %168 = vector.load %arg13[%c11_149, %c0_150, %c0_151] : memref<60x32x256xbf16, #tpu.memory_space<vmem>>, vector<1x32x256xbf16>
      %169 = vector.shape_cast %168 : vector<1x32x256xbf16> to vector<32x256xbf16>
      %cst_152 = arith.constant dense<0.000000e+00> : vector<1x256xf32>
      %170 = tpu.matmul %167, %169, %cst_152 {dimension_numbers = #tpu.dot_dimension_numbers<[1], [0], [0], [1], [0, 0, 1, 1], [], []>} : vector<1x32xbf16>, vector<32x256xbf16>, vector<1x256xf32> -> vector<1x256xf32>
      %171 = arith.addf %164, %170 : vector<1x256xf32>
      %c0_153 = arith.constant 0 : index
      %c12 = arith.constant 12 : index
      %c0_154 = arith.constant 0 : index
      %172 = vector.load %arg20[%c0_153, %c12, %c0_154] : memref<1x64x32xf32, #tpu.memory_space<vmem>>, vector<1x1x32xf32>
      %173 = vector.shape_cast %172 : vector<1x1x32xf32> to vector<1x32xf32>
      %174 = arith.truncf %173 : vector<1x32xf32> to vector<1x32xbf16>
      %c12_155 = arith.constant 12 : index
      %c0_156 = arith.constant 0 : index
      %c0_157 = arith.constant 0 : index
      %175 = vector.load %arg13[%c12_155, %c0_156, %c0_157] : memref<60x32x256xbf16, #tpu.memory_space<vmem>>, vector<1x32x256xbf16>
      %176 = vector.shape_cast %175 : vector<1x32x256xbf16> to vector<32x256xbf16>
      %cst_158 = arith.constant dense<0.000000e+00> : vector<1x256xf32>
      %177 = tpu.matmul %174, %176, %cst_158 {dimension_numbers = #tpu.dot_dimension_numbers<[1], [0], [0], [1], [0, 0, 1, 1], [], []>} : vector<1x32xbf16>, vector<32x256xbf16>, vector<1x256xf32> -> vector<1x256xf32>
      %178 = arith.addf %171, %177 : vector<1x256xf32>
      %c0_159 = arith.constant 0 : index
      %c13 = arith.constant 13 : index
      %c0_160 = arith.constant 0 : index
      %179 = vector.load %arg20[%c0_159, %c13, %c0_160] : memref<1x64x32xf32, #tpu.memory_space<vmem>>, vector<1x1x32xf32>
      %180 = vector.shape_cast %179 : vector<1x1x32xf32> to vector<1x32xf32>
      %181 = arith.truncf %180 : vector<1x32xf32> to vector<1x32xbf16>
      %c13_161 = arith.constant 13 : index
      %c0_162 = arith.constant 0 : index
      %c0_163 = arith.constant 0 : index
      %182 = vector.load %arg13[%c13_161, %c0_162, %c0_163] : memref<60x32x256xbf16, #tpu.memory_space<vmem>>, vector<1x32x256xbf16>
      %183 = vector.shape_cast %182 : vector<1x32x256xbf16> to vector<32x256xbf16>
      %cst_164 = arith.constant dense<0.000000e+00> : vector<1x256xf32>
      %184 = tpu.matmul %181, %183, %cst_164 {dimension_numbers = #tpu.dot_dimension_numbers<[1], [0], [0], [1], [0, 0, 1, 1], [], []>} : vector<1x32xbf16>, vector<32x256xbf16>, vector<1x256xf32> -> vector<1x256xf32>
      %185 = arith.addf %178, %184 : vector<1x256xf32>
      %c0_165 = arith.constant 0 : index
      %c14 = arith.constant 14 : index
      %c0_166 = arith.constant 0 : index
      %186 = vector.load %arg20[%c0_165, %c14, %c0_166] : memref<1x64x32xf32, #tpu.memory_space<vmem>>, vector<1x1x32xf32>
      %187 = vector.shape_cast %186 : vector<1x1x32xf32> to vector<1x32xf32>
      %188 = arith.truncf %187 : vector<1x32xf32> to vector<1x32xbf16>
      %c14_167 = arith.constant 14 : index
      %c0_168 = arith.constant 0 : index
      %c0_169 = arith.constant 0 : index
      %189 = vector.load %arg13[%c14_167, %c0_168, %c0_169] : memref<60x32x256xbf16, #tpu.memory_space<vmem>>, vector<1x32x256xbf16>
      %190 = vector.shape_cast %189 : vector<1x32x256xbf16> to vector<32x256xbf16>
      %cst_170 = arith.constant dense<0.000000e+00> : vector<1x256xf32>
      %191 = tpu.matmul %188, %190, %cst_170 {dimension_numbers = #tpu.dot_dimension_numbers<[1], [0], [0], [1], [0, 0, 1, 1], [], []>} : vector<1x32xbf16>, vector<32x256xbf16>, vector<1x256xf32> -> vector<1x256xf32>
      %192 = arith.addf %185, %191 : vector<1x256xf32>
      %c0_171 = arith.constant 0 : index
      %c15 = arith.constant 15 : index
      %c0_172 = arith.constant 0 : index
      %193 = vector.load %arg20[%c0_171, %c15, %c0_172] : memref<1x64x32xf32, #tpu.memory_space<vmem>>, vector<1x1x32xf32>
      %194 = vector.shape_cast %193 : vector<1x1x32xf32> to vector<1x32xf32>
      %195 = arith.truncf %194 : vector<1x32xf32> to vector<1x32xbf16>
      %c15_173 = arith.constant 15 : index
      %c0_174 = arith.constant 0 : index
      %c0_175 = arith.constant 0 : index
      %196 = vector.load %arg13[%c15_173, %c0_174, %c0_175] : memref<60x32x256xbf16, #tpu.memory_space<vmem>>, vector<1x32x256xbf16>
      %197 = vector.shape_cast %196 : vector<1x32x256xbf16> to vector<32x256xbf16>
      %cst_176 = arith.constant dense<0.000000e+00> : vector<1x256xf32>
      %198 = tpu.matmul %195, %197, %cst_176 {dimension_numbers = #tpu.dot_dimension_numbers<[1], [0], [0], [1], [0, 0, 1, 1], [], []>} : vector<1x32xbf16>, vector<32x256xbf16>, vector<1x256xf32> -> vector<1x256xf32>
      %199 = arith.addf %192, %198 : vector<1x256xf32>
      %c0_177 = arith.constant 0 : index
      %c16 = arith.constant 16 : index
      %c0_178 = arith.constant 0 : index
      %200 = vector.load %arg20[%c0_177, %c16, %c0_178] : memref<1x64x32xf32, #tpu.memory_space<vmem>>, vector<1x1x32xf32>
      %201 = vector.shape_cast %200 : vector<1x1x32xf32> to vector<1x32xf32>
      %202 = arith.truncf %201 : vector<1x32xf32> to vector<1x32xbf16>
      %c16_179 = arith.constant 16 : index
      %c0_180 = arith.constant 0 : index
      %c0_181 = arith.constant 0 : index
      %203 = vector.load %arg13[%c16_179, %c0_180, %c0_181] : memref<60x32x256xbf16, #tpu.memory_space<vmem>>, vector<1x32x256xbf16>
      %204 = vector.shape_cast %203 : vector<1x32x256xbf16> to vector<32x256xbf16>
      %cst_182 = arith.constant dense<0.000000e+00> : vector<1x256xf32>
      %205 = tpu.matmul %202, %204, %cst_182 {dimension_numbers = #tpu.dot_dimension_numbers<[1], [0], [0], [1], [0, 0, 1, 1], [], []>} : vector<1x32xbf16>, vector<32x256xbf16>, vector<1x256xf32> -> vector<1x256xf32>
      %206 = arith.addf %199, %205 : vector<1x256xf32>
      %c0_183 = arith.constant 0 : index
      %c17 = arith.constant 17 : index
      %c0_184 = arith.constant 0 : index
      %207 = vector.load %arg20[%c0_183, %c17, %c0_184] : memref<1x64x32xf32, #tpu.memory_space<vmem>>, vector<1x1x32xf32>
      %208 = vector.shape_cast %207 : vector<1x1x32xf32> to vector<1x32xf32>
      %209 = arith.truncf %208 : vector<1x32xf32> to vector<1x32xbf16>
      %c17_185 = arith.constant 17 : index
      %c0_186 = arith.constant 0 : index
      %c0_187 = arith.constant 0 : index
      %210 = vector.load %arg13[%c17_185, %c0_186, %c0_187] : memref<60x32x256xbf16, #tpu.memory_space<vmem>>, vector<1x32x256xbf16>
      %211 = vector.shape_cast %210 : vector<1x32x256xbf16> to vector<32x256xbf16>
      %cst_188 = arith.constant dense<0.000000e+00> : vector<1x256xf32>
      %212 = tpu.matmul %209, %211, %cst_188 {dimension_numbers = #tpu.dot_dimension_numbers<[1], [0], [0], [1], [0, 0, 1, 1], [], []>} : vector<1x32xbf16>, vector<32x256xbf16>, vector<1x256xf32> -> vector<1x256xf32>
      %213 = arith.addf %206, %212 : vector<1x256xf32>
      %c0_189 = arith.constant 0 : index
      %c18 = arith.constant 18 : index
      %c0_190 = arith.constant 0 : index
      %214 = vector.load %arg20[%c0_189, %c18, %c0_190] : memref<1x64x32xf32, #tpu.memory_space<vmem>>, vector<1x1x32xf32>
      %215 = vector.shape_cast %214 : vector<1x1x32xf32> to vector<1x32xf32>
      %216 = arith.truncf %215 : vector<1x32xf32> to vector<1x32xbf16>
      %c18_191 = arith.constant 18 : index
      %c0_192 = arith.constant 0 : index
      %c0_193 = arith.constant 0 : index
      %217 = vector.load %arg13[%c18_191, %c0_192, %c0_193] : memref<60x32x256xbf16, #tpu.memory_space<vmem>>, vector<1x32x256xbf16>
      %218 = vector.shape_cast %217 : vector<1x32x256xbf16> to vector<32x256xbf16>
      %cst_194 = arith.constant dense<0.000000e+00> : vector<1x256xf32>
      %219 = tpu.matmul %216, %218, %cst_194 {dimension_numbers = #tpu.dot_dimension_numbers<[1], [0], [0], [1], [0, 0, 1, 1], [], []>} : vector<1x32xbf16>, vector<32x256xbf16>, vector<1x256xf32> -> vector<1x256xf32>
      %220 = arith.addf %213, %219 : vector<1x256xf32>
      %c0_195 = arith.constant 0 : index
      %c19 = arith.constant 19 : index
      %c0_196 = arith.constant 0 : index
      %221 = vector.load %arg20[%c0_195, %c19, %c0_196] : memref<1x64x32xf32, #tpu.memory_space<vmem>>, vector<1x1x32xf32>
      %222 = vector.shape_cast %221 : vector<1x1x32xf32> to vector<1x32xf32>
      %223 = arith.truncf %222 : vector<1x32xf32> to vector<1x32xbf16>
      %c19_197 = arith.constant 19 : index
      %c0_198 = arith.constant 0 : index
      %c0_199 = arith.constant 0 : index
      %224 = vector.load %arg13[%c19_197, %c0_198, %c0_199] : memref<60x32x256xbf16, #tpu.memory_space<vmem>>, vector<1x32x256xbf16>
      %225 = vector.shape_cast %224 : vector<1x32x256xbf16> to vector<32x256xbf16>
      %cst_200 = arith.constant dense<0.000000e+00> : vector<1x256xf32>
      %226 = tpu.matmul %223, %225, %cst_200 {dimension_numbers = #tpu.dot_dimension_numbers<[1], [0], [0], [1], [0, 0, 1, 1], [], []>} : vector<1x32xbf16>, vector<32x256xbf16>, vector<1x256xf32> -> vector<1x256xf32>
      %227 = arith.addf %220, %226 : vector<1x256xf32>
      %c0_201 = arith.constant 0 : index
      %c20 = arith.constant 20 : index
      %c0_202 = arith.constant 0 : index
      %228 = vector.load %arg20[%c0_201, %c20, %c0_202] : memref<1x64x32xf32, #tpu.memory_space<vmem>>, vector<1x1x32xf32>
      %229 = vector.shape_cast %228 : vector<1x1x32xf32> to vector<1x32xf32>
      %230 = arith.truncf %229 : vector<1x32xf32> to vector<1x32xbf16>
      %c20_203 = arith.constant 20 : index
      %c0_204 = arith.constant 0 : index
      %c0_205 = arith.constant 0 : index
      %231 = vector.load %arg13[%c20_203, %c0_204, %c0_205] : memref<60x32x256xbf16, #tpu.memory_space<vmem>>, vector<1x32x256xbf16>
      %232 = vector.shape_cast %231 : vector<1x32x256xbf16> to vector<32x256xbf16>
      %cst_206 = arith.constant dense<0.000000e+00> : vector<1x256xf32>
      %233 = tpu.matmul %230, %232, %cst_206 {dimension_numbers = #tpu.dot_dimension_numbers<[1], [0], [0], [1], [0, 0, 1, 1], [], []>} : vector<1x32xbf16>, vector<32x256xbf16>, vector<1x256xf32> -> vector<1x256xf32>
      %234 = arith.addf %227, %233 : vector<1x256xf32>
      %c0_207 = arith.constant 0 : index
      %c21 = arith.constant 21 : index
      %c0_208 = arith.constant 0 : index
      %235 = vector.load %arg20[%c0_207, %c21, %c0_208] : memref<1x64x32xf32, #tpu.memory_space<vmem>>, vector<1x1x32xf32>
      %236 = vector.shape_cast %235 : vector<1x1x32xf32> to vector<1x32xf32>
      %237 = arith.truncf %236 : vector<1x32xf32> to vector<1x32xbf16>
      %c21_209 = arith.constant 21 : index
      %c0_210 = arith.constant 0 : index
      %c0_211 = arith.constant 0 : index
      %238 = vector.load %arg13[%c21_209, %c0_210, %c0_211] : memref<60x32x256xbf16, #tpu.memory_space<vmem>>, vector<1x32x256xbf16>
      %239 = vector.shape_cast %238 : vector<1x32x256xbf16> to vector<32x256xbf16>
      %cst_212 = arith.constant dense<0.000000e+00> : vector<1x256xf32>
      %240 = tpu.matmul %237, %239, %cst_212 {dimension_numbers = #tpu.dot_dimension_numbers<[1], [0], [0], [1], [0, 0, 1, 1], [], []>} : vector<1x32xbf16>, vector<32x256xbf16>, vector<1x256xf32> -> vector<1x256xf32>
      %241 = arith.addf %234, %240 : vector<1x256xf32>
      %c0_213 = arith.constant 0 : index
      %c22 = arith.constant 22 : index
      %c0_214 = arith.constant 0 : index
      %242 = vector.load %arg20[%c0_213, %c22, %c0_214] : memref<1x64x32xf32, #tpu.memory_space<vmem>>, vector<1x1x32xf32>
      %243 = vector.shape_cast %242 : vector<1x1x32xf32> to vector<1x32xf32>
      %244 = arith.truncf %243 : vector<1x32xf32> to vector<1x32xbf16>
      %c22_215 = arith.constant 22 : index
      %c0_216 = arith.constant 0 : index
      %c0_217 = arith.constant 0 : index
      %245 = vector.load %arg13[%c22_215, %c0_216, %c0_217] : memref<60x32x256xbf16, #tpu.memory_space<vmem>>, vector<1x32x256xbf16>
      %246 = vector.shape_cast %245 : vector<1x32x256xbf16> to vector<32x256xbf16>
      %cst_218 = arith.constant dense<0.000000e+00> : vector<1x256xf32>
      %247 = tpu.matmul %244, %246, %cst_218 {dimension_numbers = #tpu.dot_dimension_numbers<[1], [0], [0], [1], [0, 0, 1, 1], [], []>} : vector<1x32xbf16>, vector<32x256xbf16>, vector<1x256xf32> -> vector<1x256xf32>
      %248 = arith.addf %241, %247 : vector<1x256xf32>
      %c0_219 = arith.constant 0 : index
      %c23 = arith.constant 23 : index
      %c0_220 = arith.constant 0 : index
      %249 = vector.load %arg20[%c0_219, %c23, %c0_220] : memref<1x64x32xf32, #tpu.memory_space<vmem>>, vector<1x1x32xf32>
      %250 = vector.shape_cast %249 : vector<1x1x32xf32> to vector<1x32xf32>
      %251 = arith.truncf %250 : vector<1x32xf32> to vector<1x32xbf16>
      %c23_221 = arith.constant 23 : index
      %c0_222 = arith.constant 0 : index
      %c0_223 = arith.constant 0 : index
      %252 = vector.load %arg13[%c23_221, %c0_222, %c0_223] : memref<60x32x256xbf16, #tpu.memory_space<vmem>>, vector<1x32x256xbf16>
      %253 = vector.shape_cast %252 : vector<1x32x256xbf16> to vector<32x256xbf16>
      %cst_224 = arith.constant dense<0.000000e+00> : vector<1x256xf32>
      %254 = tpu.matmul %251, %253, %cst_224 {dimension_numbers = #tpu.dot_dimension_numbers<[1], [0], [0], [1], [0, 0, 1, 1], [], []>} : vector<1x32xbf16>, vector<32x256xbf16>, vector<1x256xf32> -> vector<1x256xf32>
      %255 = arith.addf %248, %254 : vector<1x256xf32>
      %c0_225 = arith.constant 0 : index
      %c24 = arith.constant 24 : index
      %c0_226 = arith.constant 0 : index
      %256 = vector.load %arg20[%c0_225, %c24, %c0_226] : memref<1x64x32xf32, #tpu.memory_space<vmem>>, vector<1x1x32xf32>
      %257 = vector.shape_cast %256 : vector<1x1x32xf32> to vector<1x32xf32>
      %258 = arith.truncf %257 : vector<1x32xf32> to vector<1x32xbf16>
      %c24_227 = arith.constant 24 : index
      %c0_228 = arith.constant 0 : index
      %c0_229 = arith.constant 0 : index
      %259 = vector.load %arg13[%c24_227, %c0_228, %c0_229] : memref<60x32x256xbf16, #tpu.memory_space<vmem>>, vector<1x32x256xbf16>
      %260 = vector.shape_cast %259 : vector<1x32x256xbf16> to vector<32x256xbf16>
      %cst_230 = arith.constant dense<0.000000e+00> : vector<1x256xf32>
      %261 = tpu.matmul %258, %260, %cst_230 {dimension_numbers = #tpu.dot_dimension_numbers<[1], [0], [0], [1], [0, 0, 1, 1], [], []>} : vector<1x32xbf16>, vector<32x256xbf16>, vector<1x256xf32> -> vector<1x256xf32>
      %262 = arith.addf %255, %261 : vector<1x256xf32>
      %c0_231 = arith.constant 0 : index
      %c25 = arith.constant 25 : index
      %c0_232 = arith.constant 0 : index
      %263 = vector.load %arg20[%c0_231, %c25, %c0_232] : memref<1x64x32xf32, #tpu.memory_space<vmem>>, vector<1x1x32xf32>
      %264 = vector.shape_cast %263 : vector<1x1x32xf32> to vector<1x32xf32>
      %265 = arith.truncf %264 : vector<1x32xf32> to vector<1x32xbf16>
      %c25_233 = arith.constant 25 : index
      %c0_234 = arith.constant 0 : index
      %c0_235 = arith.constant 0 : index
      %266 = vector.load %arg13[%c25_233, %c0_234, %c0_235] : memref<60x32x256xbf16, #tpu.memory_space<vmem>>, vector<1x32x256xbf16>
      %267 = vector.shape_cast %266 : vector<1x32x256xbf16> to vector<32x256xbf16>
      %cst_236 = arith.constant dense<0.000000e+00> : vector<1x256xf32>
      %268 = tpu.matmul %265, %267, %cst_236 {dimension_numbers = #tpu.dot_dimension_numbers<[1], [0], [0], [1], [0, 0, 1, 1], [], []>} : vector<1x32xbf16>, vector<32x256xbf16>, vector<1x256xf32> -> vector<1x256xf32>
      %269 = arith.addf %262, %268 : vector<1x256xf32>
      %c0_237 = arith.constant 0 : index
      %c26 = arith.constant 26 : index
      %c0_238 = arith.constant 0 : index
      %270 = vector.load %arg20[%c0_237, %c26, %c0_238] : memref<1x64x32xf32, #tpu.memory_space<vmem>>, vector<1x1x32xf32>
      %271 = vector.shape_cast %270 : vector<1x1x32xf32> to vector<1x32xf32>
      %272 = arith.truncf %271 : vector<1x32xf32> to vector<1x32xbf16>
      %c26_239 = arith.constant 26 : index
      %c0_240 = arith.constant 0 : index
      %c0_241 = arith.constant 0 : index
      %273 = vector.load %arg13[%c26_239, %c0_240, %c0_241] : memref<60x32x256xbf16, #tpu.memory_space<vmem>>, vector<1x32x256xbf16>
      %274 = vector.shape_cast %273 : vector<1x32x256xbf16> to vector<32x256xbf16>
      %cst_242 = arith.constant dense<0.000000e+00> : vector<1x256xf32>
      %275 = tpu.matmul %272, %274, %cst_242 {dimension_numbers = #tpu.dot_dimension_numbers<[1], [0], [0], [1], [0, 0, 1, 1], [], []>} : vector<1x32xbf16>, vector<32x256xbf16>, vector<1x256xf32> -> vector<1x256xf32>
      %276 = arith.addf %269, %275 : vector<1x256xf32>
      %c0_243 = arith.constant 0 : index
      %c27 = arith.constant 27 : index
      %c0_244 = arith.constant 0 : index
      %277 = vector.load %arg20[%c0_243, %c27, %c0_244] : memref<1x64x32xf32, #tpu.memory_space<vmem>>, vector<1x1x32xf32>
      %278 = vector.shape_cast %277 : vector<1x1x32xf32> to vector<1x32xf32>
      %279 = arith.truncf %278 : vector<1x32xf32> to vector<1x32xbf16>
      %c27_245 = arith.constant 27 : index
      %c0_246 = arith.constant 0 : index
      %c0_247 = arith.constant 0 : index
      %280 = vector.load %arg13[%c27_245, %c0_246, %c0_247] : memref<60x32x256xbf16, #tpu.memory_space<vmem>>, vector<1x32x256xbf16>
      %281 = vector.shape_cast %280 : vector<1x32x256xbf16> to vector<32x256xbf16>
      %cst_248 = arith.constant dense<0.000000e+00> : vector<1x256xf32>
      %282 = tpu.matmul %279, %281, %cst_248 {dimension_numbers = #tpu.dot_dimension_numbers<[1], [0], [0], [1], [0, 0, 1, 1], [], []>} : vector<1x32xbf16>, vector<32x256xbf16>, vector<1x256xf32> -> vector<1x256xf32>
      %283 = arith.addf %276, %282 : vector<1x256xf32>
      %c0_249 = arith.constant 0 : index
      %c28 = arith.constant 28 : index
      %c0_250 = arith.constant 0 : index
      %284 = vector.load %arg20[%c0_249, %c28, %c0_250] : memref<1x64x32xf32, #tpu.memory_space<vmem>>, vector<1x1x32xf32>
      %285 = vector.shape_cast %284 : vector<1x1x32xf32> to vector<1x32xf32>
      %286 = arith.truncf %285 : vector<1x32xf32> to vector<1x32xbf16>
      %c28_251 = arith.constant 28 : index
      %c0_252 = arith.constant 0 : index
      %c0_253 = arith.constant 0 : index
      %287 = vector.load %arg13[%c28_251, %c0_252, %c0_253] : memref<60x32x256xbf16, #tpu.memory_space<vmem>>, vector<1x32x256xbf16>
      %288 = vector.shape_cast %287 : vector<1x32x256xbf16> to vector<32x256xbf16>
      %cst_254 = arith.constant dense<0.000000e+00> : vector<1x256xf32>
      %289 = tpu.matmul %286, %288, %cst_254 {dimension_numbers = #tpu.dot_dimension_numbers<[1], [0], [0], [1], [0, 0, 1, 1], [], []>} : vector<1x32xbf16>, vector<32x256xbf16>, vector<1x256xf32> -> vector<1x256xf32>
      %290 = arith.addf %283, %289 : vector<1x256xf32>
      %c0_255 = arith.constant 0 : index
      %c29 = arith.constant 29 : index
      %c0_256 = arith.constant 0 : index
      %291 = vector.load %arg20[%c0_255, %c29, %c0_256] : memref<1x64x32xf32, #tpu.memory_space<vmem>>, vector<1x1x32xf32>
      %292 = vector.shape_cast %291 : vector<1x1x32xf32> to vector<1x32xf32>
      %293 = arith.truncf %292 : vector<1x32xf32> to vector<1x32xbf16>
      %c29_257 = arith.constant 29 : index
      %c0_258 = arith.constant 0 : index
      %c0_259 = arith.constant 0 : index
      %294 = vector.load %arg13[%c29_257, %c0_258, %c0_259] : memref<60x32x256xbf16, #tpu.memory_space<vmem>>, vector<1x32x256xbf16>
      %295 = vector.shape_cast %294 : vector<1x32x256xbf16> to vector<32x256xbf16>
      %cst_260 = arith.constant dense<0.000000e+00> : vector<1x256xf32>
      %296 = tpu.matmul %293, %295, %cst_260 {dimension_numbers = #tpu.dot_dimension_numbers<[1], [0], [0], [1], [0, 0, 1, 1], [], []>} : vector<1x32xbf16>, vector<32x256xbf16>, vector<1x256xf32> -> vector<1x256xf32>
      %297 = arith.addf %290, %296 : vector<1x256xf32>
      %c0_261 = arith.constant 0 : index
      %c30 = arith.constant 30 : index
      %c0_262 = arith.constant 0 : index
      %298 = vector.load %arg20[%c0_261, %c30, %c0_262] : memref<1x64x32xf32, #tpu.memory_space<vmem>>, vector<1x1x32xf32>
      %299 = vector.shape_cast %298 : vector<1x1x32xf32> to vector<1x32xf32>
      %300 = arith.truncf %299 : vector<1x32xf32> to vector<1x32xbf16>
      %c30_263 = arith.constant 30 : index
      %c0_264 = arith.constant 0 : index
      %c0_265 = arith.constant 0 : index
      %301 = vector.load %arg13[%c30_263, %c0_264, %c0_265] : memref<60x32x256xbf16, #tpu.memory_space<vmem>>, vector<1x32x256xbf16>
      %302 = vector.shape_cast %301 : vector<1x32x256xbf16> to vector<32x256xbf16>
      %cst_266 = arith.constant dense<0.000000e+00> : vector<1x256xf32>
      %303 = tpu.matmul %300, %302, %cst_266 {dimension_numbers = #tpu.dot_dimension_numbers<[1], [0], [0], [1], [0, 0, 1, 1], [], []>} : vector<1x32xbf16>, vector<32x256xbf16>, vector<1x256xf32> -> vector<1x256xf32>
      %304 = arith.addf %297, %303 : vector<1x256xf32>
      %c0_267 = arith.constant 0 : index
      %c31 = arith.constant 31 : index
      %c0_268 = arith.constant 0 : index
      %305 = vector.load %arg20[%c0_267, %c31, %c0_268] : memref<1x64x32xf32, #tpu.memory_space<vmem>>, vector<1x1x32xf32>
      %306 = vector.shape_cast %305 : vector<1x1x32xf32> to vector<1x32xf32>
      %307 = arith.truncf %306 : vector<1x32xf32> to vector<1x32xbf16>
      %c31_269 = arith.constant 31 : index
      %c0_270 = arith.constant 0 : index
      %c0_271 = arith.constant 0 : index
      %308 = vector.load %arg13[%c31_269, %c0_270, %c0_271] : memref<60x32x256xbf16, #tpu.memory_space<vmem>>, vector<1x32x256xbf16>
      %309 = vector.shape_cast %308 : vector<1x32x256xbf16> to vector<32x256xbf16>
      %cst_272 = arith.constant dense<0.000000e+00> : vector<1x256xf32>
      %310 = tpu.matmul %307, %309, %cst_272 {dimension_numbers = #tpu.dot_dimension_numbers<[1], [0], [0], [1], [0, 0, 1, 1], [], []>} : vector<1x32xbf16>, vector<32x256xbf16>, vector<1x256xf32> -> vector<1x256xf32>
      %311 = arith.addf %304, %310 : vector<1x256xf32>
      %c0_273 = arith.constant 0 : index
      %c32_274 = arith.constant 32 : index
      %c0_275 = arith.constant 0 : index
      %312 = vector.load %arg20[%c0_273, %c32_274, %c0_275] : memref<1x64x32xf32, #tpu.memory_space<vmem>>, vector<1x1x32xf32>
      %313 = vector.shape_cast %312 : vector<1x1x32xf32> to vector<1x32xf32>
      %314 = arith.truncf %313 : vector<1x32xf32> to vector<1x32xbf16>
      %c32_276 = arith.constant 32 : index
      %c0_277 = arith.constant 0 : index
      %c0_278 = arith.constant 0 : index
      %315 = vector.load %arg13[%c32_276, %c0_277, %c0_278] : memref<60x32x256xbf16, #tpu.memory_space<vmem>>, vector<1x32x256xbf16>
      %316 = vector.shape_cast %315 : vector<1x32x256xbf16> to vector<32x256xbf16>
      %cst_279 = arith.constant dense<0.000000e+00> : vector<1x256xf32>
      %317 = tpu.matmul %314, %316, %cst_279 {dimension_numbers = #tpu.dot_dimension_numbers<[1], [0], [0], [1], [0, 0, 1, 1], [], []>} : vector<1x32xbf16>, vector<32x256xbf16>, vector<1x256xf32> -> vector<1x256xf32>
      %318 = arith.addf %311, %317 : vector<1x256xf32>
      %c0_280 = arith.constant 0 : index
      %c33 = arith.constant 33 : index
      %c0_281 = arith.constant 0 : index
      %319 = vector.load %arg20[%c0_280, %c33, %c0_281] : memref<1x64x32xf32, #tpu.memory_space<vmem>>, vector<1x1x32xf32>
      %320 = vector.shape_cast %319 : vector<1x1x32xf32> to vector<1x32xf32>
      %321 = arith.truncf %320 : vector<1x32xf32> to vector<1x32xbf16>
      %c33_282 = arith.constant 33 : index
      %c0_283 = arith.constant 0 : index
      %c0_284 = arith.constant 0 : index
      %322 = vector.load %arg13[%c33_282, %c0_283, %c0_284] : memref<60x32x256xbf16, #tpu.memory_space<vmem>>, vector<1x32x256xbf16>
      %323 = vector.shape_cast %322 : vector<1x32x256xbf16> to vector<32x256xbf16>
      %cst_285 = arith.constant dense<0.000000e+00> : vector<1x256xf32>
      %324 = tpu.matmul %321, %323, %cst_285 {dimension_numbers = #tpu.dot_dimension_numbers<[1], [0], [0], [1], [0, 0, 1, 1], [], []>} : vector<1x32xbf16>, vector<32x256xbf16>, vector<1x256xf32> -> vector<1x256xf32>
      %325 = arith.addf %318, %324 : vector<1x256xf32>
      %c0_286 = arith.constant 0 : index
      %c34 = arith.constant 34 : index
      %c0_287 = arith.constant 0 : index
      %326 = vector.load %arg20[%c0_286, %c34, %c0_287] : memref<1x64x32xf32, #tpu.memory_space<vmem>>, vector<1x1x32xf32>
      %327 = vector.shape_cast %326 : vector<1x1x32xf32> to vector<1x32xf32>
      %328 = arith.truncf %327 : vector<1x32xf32> to vector<1x32xbf16>
      %c34_288 = arith.constant 34 : index
      %c0_289 = arith.constant 0 : index
      %c0_290 = arith.constant 0 : index
      %329 = vector.load %arg13[%c34_288, %c0_289, %c0_290] : memref<60x32x256xbf16, #tpu.memory_space<vmem>>, vector<1x32x256xbf16>
      %330 = vector.shape_cast %329 : vector<1x32x256xbf16> to vector<32x256xbf16>
      %cst_291 = arith.constant dense<0.000000e+00> : vector<1x256xf32>
      %331 = tpu.matmul %328, %330, %cst_291 {dimension_numbers = #tpu.dot_dimension_numbers<[1], [0], [0], [1], [0, 0, 1, 1], [], []>} : vector<1x32xbf16>, vector<32x256xbf16>, vector<1x256xf32> -> vector<1x256xf32>
      %332 = arith.addf %325, %331 : vector<1x256xf32>
      %c0_292 = arith.constant 0 : index
      %c35 = arith.constant 35 : index
      %c0_293 = arith.constant 0 : index
      %333 = vector.load %arg20[%c0_292, %c35, %c0_293] : memref<1x64x32xf32, #tpu.memory_space<vmem>>, vector<1x1x32xf32>
      %334 = vector.shape_cast %333 : vector<1x1x32xf32> to vector<1x32xf32>
      %335 = arith.truncf %334 : vector<1x32xf32> to vector<1x32xbf16>
      %c35_294 = arith.constant 35 : index
      %c0_295 = arith.constant 0 : index
      %c0_296 = arith.constant 0 : index
      %336 = vector.load %arg13[%c35_294, %c0_295, %c0_296] : memref<60x32x256xbf16, #tpu.memory_space<vmem>>, vector<1x32x256xbf16>
      %337 = vector.shape_cast %336 : vector<1x32x256xbf16> to vector<32x256xbf16>
      %cst_297 = arith.constant dense<0.000000e+00> : vector<1x256xf32>
      %338 = tpu.matmul %335, %337, %cst_297 {dimension_numbers = #tpu.dot_dimension_numbers<[1], [0], [0], [1], [0, 0, 1, 1], [], []>} : vector<1x32xbf16>, vector<32x256xbf16>, vector<1x256xf32> -> vector<1x256xf32>
      %339 = arith.addf %332, %338 : vector<1x256xf32>
      %c0_298 = arith.constant 0 : index
      %c36 = arith.constant 36 : index
      %c0_299 = arith.constant 0 : index
      %340 = vector.load %arg20[%c0_298, %c36, %c0_299] : memref<1x64x32xf32, #tpu.memory_space<vmem>>, vector<1x1x32xf32>
      %341 = vector.shape_cast %340 : vector<1x1x32xf32> to vector<1x32xf32>
      %342 = arith.truncf %341 : vector<1x32xf32> to vector<1x32xbf16>
      %c36_300 = arith.constant 36 : index
      %c0_301 = arith.constant 0 : index
      %c0_302 = arith.constant 0 : index
      %343 = vector.load %arg13[%c36_300, %c0_301, %c0_302] : memref<60x32x256xbf16, #tpu.memory_space<vmem>>, vector<1x32x256xbf16>
      %344 = vector.shape_cast %343 : vector<1x32x256xbf16> to vector<32x256xbf16>
      %cst_303 = arith.constant dense<0.000000e+00> : vector<1x256xf32>
      %345 = tpu.matmul %342, %344, %cst_303 {dimension_numbers = #tpu.dot_dimension_numbers<[1], [0], [0], [1], [0, 0, 1, 1], [], []>} : vector<1x32xbf16>, vector<32x256xbf16>, vector<1x256xf32> -> vector<1x256xf32>
      %346 = arith.addf %339, %345 : vector<1x256xf32>
      %c0_304 = arith.constant 0 : index
      %c37 = arith.constant 37 : index
      %c0_305 = arith.constant 0 : index
      %347 = vector.load %arg20[%c0_304, %c37, %c0_305] : memref<1x64x32xf32, #tpu.memory_space<vmem>>, vector<1x1x32xf32>
      %348 = vector.shape_cast %347 : vector<1x1x32xf32> to vector<1x32xf32>
      %349 = arith.truncf %348 : vector<1x32xf32> to vector<1x32xbf16>
      %c37_306 = arith.constant 37 : index
      %c0_307 = arith.constant 0 : index
      %c0_308 = arith.constant 0 : index
      %350 = vector.load %arg13[%c37_306, %c0_307, %c0_308] : memref<60x32x256xbf16, #tpu.memory_space<vmem>>, vector<1x32x256xbf16>
      %351 = vector.shape_cast %350 : vector<1x32x256xbf16> to vector<32x256xbf16>
      %cst_309 = arith.constant dense<0.000000e+00> : vector<1x256xf32>
      %352 = tpu.matmul %349, %351, %cst_309 {dimension_numbers = #tpu.dot_dimension_numbers<[1], [0], [0], [1], [0, 0, 1, 1], [], []>} : vector<1x32xbf16>, vector<32x256xbf16>, vector<1x256xf32> -> vector<1x256xf32>
      %353 = arith.addf %346, %352 : vector<1x256xf32>
      %c0_310 = arith.constant 0 : index
      %c38 = arith.constant 38 : index
      %c0_311 = arith.constant 0 : index
      %354 = vector.load %arg20[%c0_310, %c38, %c0_311] : memref<1x64x32xf32, #tpu.memory_space<vmem>>, vector<1x1x32xf32>
      %355 = vector.shape_cast %354 : vector<1x1x32xf32> to vector<1x32xf32>
      %356 = arith.truncf %355 : vector<1x32xf32> to vector<1x32xbf16>
      %c38_312 = arith.constant 38 : index
      %c0_313 = arith.constant 0 : index
      %c0_314 = arith.constant 0 : index
      %357 = vector.load %arg13[%c38_312, %c0_313, %c0_314] : memref<60x32x256xbf16, #tpu.memory_space<vmem>>, vector<1x32x256xbf16>
      %358 = vector.shape_cast %357 : vector<1x32x256xbf16> to vector<32x256xbf16>
      %cst_315 = arith.constant dense<0.000000e+00> : vector<1x256xf32>
      %359 = tpu.matmul %356, %358, %cst_315 {dimension_numbers = #tpu.dot_dimension_numbers<[1], [0], [0], [1], [0, 0, 1, 1], [], []>} : vector<1x32xbf16>, vector<32x256xbf16>, vector<1x256xf32> -> vector<1x256xf32>
      %360 = arith.addf %353, %359 : vector<1x256xf32>
      %c0_316 = arith.constant 0 : index
      %c39 = arith.constant 39 : index
      %c0_317 = arith.constant 0 : index
      %361 = vector.load %arg20[%c0_316, %c39, %c0_317] : memref<1x64x32xf32, #tpu.memory_space<vmem>>, vector<1x1x32xf32>
      %362 = vector.shape_cast %361 : vector<1x1x32xf32> to vector<1x32xf32>
      %363 = arith.truncf %362 : vector<1x32xf32> to vector<1x32xbf16>
      %c39_318 = arith.constant 39 : index
      %c0_319 = arith.constant 0 : index
      %c0_320 = arith.constant 0 : index
      %364 = vector.load %arg13[%c39_318, %c0_319, %c0_320] : memref<60x32x256xbf16, #tpu.memory_space<vmem>>, vector<1x32x256xbf16>
      %365 = vector.shape_cast %364 : vector<1x32x256xbf16> to vector<32x256xbf16>
      %cst_321 = arith.constant dense<0.000000e+00> : vector<1x256xf32>
      %366 = tpu.matmul %363, %365, %cst_321 {dimension_numbers = #tpu.dot_dimension_numbers<[1], [0], [0], [1], [0, 0, 1, 1], [], []>} : vector<1x32xbf16>, vector<32x256xbf16>, vector<1x256xf32> -> vector<1x256xf32>
      %367 = arith.addf %360, %366 : vector<1x256xf32>
      %c0_322 = arith.constant 0 : index
      %c40 = arith.constant 40 : index
      %c0_323 = arith.constant 0 : index
      %368 = vector.load %arg20[%c0_322, %c40, %c0_323] : memref<1x64x32xf32, #tpu.memory_space<vmem>>, vector<1x1x32xf32>
      %369 = vector.shape_cast %368 : vector<1x1x32xf32> to vector<1x32xf32>
      %370 = arith.truncf %369 : vector<1x32xf32> to vector<1x32xbf16>
      %c40_324 = arith.constant 40 : index
      %c0_325 = arith.constant 0 : index
      %c0_326 = arith.constant 0 : index
      %371 = vector.load %arg13[%c40_324, %c0_325, %c0_326] : memref<60x32x256xbf16, #tpu.memory_space<vmem>>, vector<1x32x256xbf16>
      %372 = vector.shape_cast %371 : vector<1x32x256xbf16> to vector<32x256xbf16>
      %cst_327 = arith.constant dense<0.000000e+00> : vector<1x256xf32>
      %373 = tpu.matmul %370, %372, %cst_327 {dimension_numbers = #tpu.dot_dimension_numbers<[1], [0], [0], [1], [0, 0, 1, 1], [], []>} : vector<1x32xbf16>, vector<32x256xbf16>, vector<1x256xf32> -> vector<1x256xf32>
      %374 = arith.addf %367, %373 : vector<1x256xf32>
      %c0_328 = arith.constant 0 : index
      %c41 = arith.constant 41 : index
      %c0_329 = arith.constant 0 : index
      %375 = vector.load %arg20[%c0_328, %c41, %c0_329] : memref<1x64x32xf32, #tpu.memory_space<vmem>>, vector<1x1x32xf32>
      %376 = vector.shape_cast %375 : vector<1x1x32xf32> to vector<1x32xf32>
      %377 = arith.truncf %376 : vector<1x32xf32> to vector<1x32xbf16>
      %c41_330 = arith.constant 41 : index
      %c0_331 = arith.constant 0 : index
      %c0_332 = arith.constant 0 : index
      %378 = vector.load %arg13[%c41_330, %c0_331, %c0_332] : memref<60x32x256xbf16, #tpu.memory_space<vmem>>, vector<1x32x256xbf16>
      %379 = vector.shape_cast %378 : vector<1x32x256xbf16> to vector<32x256xbf16>
      %cst_333 = arith.constant dense<0.000000e+00> : vector<1x256xf32>
      %380 = tpu.matmul %377, %379, %cst_333 {dimension_numbers = #tpu.dot_dimension_numbers<[1], [0], [0], [1], [0, 0, 1, 1], [], []>} : vector<1x32xbf16>, vector<32x256xbf16>, vector<1x256xf32> -> vector<1x256xf32>
      %381 = arith.addf %374, %380 : vector<1x256xf32>
      %c0_334 = arith.constant 0 : index
      %c42 = arith.constant 42 : index
      %c0_335 = arith.constant 0 : index
      %382 = vector.load %arg20[%c0_334, %c42, %c0_335] : memref<1x64x32xf32, #tpu.memory_space<vmem>>, vector<1x1x32xf32>
      %383 = vector.shape_cast %382 : vector<1x1x32xf32> to vector<1x32xf32>
      %384 = arith.truncf %383 : vector<1x32xf32> to vector<1x32xbf16>
      %c42_336 = arith.constant 42 : index
      %c0_337 = arith.constant 0 : index
      %c0_338 = arith.constant 0 : index
      %385 = vector.load %arg13[%c42_336, %c0_337, %c0_338] : memref<60x32x256xbf16, #tpu.memory_space<vmem>>, vector<1x32x256xbf16>
      %386 = vector.shape_cast %385 : vector<1x32x256xbf16> to vector<32x256xbf16>
      %cst_339 = arith.constant dense<0.000000e+00> : vector<1x256xf32>
      %387 = tpu.matmul %384, %386, %cst_339 {dimension_numbers = #tpu.dot_dimension_numbers<[1], [0], [0], [1], [0, 0, 1, 1], [], []>} : vector<1x32xbf16>, vector<32x256xbf16>, vector<1x256xf32> -> vector<1x256xf32>
      %388 = arith.addf %381, %387 : vector<1x256xf32>
      %c0_340 = arith.constant 0 : index
      %c43 = arith.constant 43 : index
      %c0_341 = arith.constant 0 : index
      %389 = vector.load %arg20[%c0_340, %c43, %c0_341] : memref<1x64x32xf32, #tpu.memory_space<vmem>>, vector<1x1x32xf32>
      %390 = vector.shape_cast %389 : vector<1x1x32xf32> to vector<1x32xf32>
      %391 = arith.truncf %390 : vector<1x32xf32> to vector<1x32xbf16>
      %c43_342 = arith.constant 43 : index
      %c0_343 = arith.constant 0 : index
      %c0_344 = arith.constant 0 : index
      %392 = vector.load %arg13[%c43_342, %c0_343, %c0_344] : memref<60x32x256xbf16, #tpu.memory_space<vmem>>, vector<1x32x256xbf16>
      %393 = vector.shape_cast %392 : vector<1x32x256xbf16> to vector<32x256xbf16>
      %cst_345 = arith.constant dense<0.000000e+00> : vector<1x256xf32>
      %394 = tpu.matmul %391, %393, %cst_345 {dimension_numbers = #tpu.dot_dimension_numbers<[1], [0], [0], [1], [0, 0, 1, 1], [], []>} : vector<1x32xbf16>, vector<32x256xbf16>, vector<1x256xf32> -> vector<1x256xf32>
      %395 = arith.addf %388, %394 : vector<1x256xf32>
      %c0_346 = arith.constant 0 : index
      %c44 = arith.constant 44 : index
      %c0_347 = arith.constant 0 : index
      %396 = vector.load %arg20[%c0_346, %c44, %c0_347] : memref<1x64x32xf32, #tpu.memory_space<vmem>>, vector<1x1x32xf32>
      %397 = vector.shape_cast %396 : vector<1x1x32xf32> to vector<1x32xf32>
      %398 = arith.truncf %397 : vector<1x32xf32> to vector<1x32xbf16>
      %c44_348 = arith.constant 44 : index
      %c0_349 = arith.constant 0 : index
      %c0_350 = arith.constant 0 : index
      %399 = vector.load %arg13[%c44_348, %c0_349, %c0_350] : memref<60x32x256xbf16, #tpu.memory_space<vmem>>, vector<1x32x256xbf16>
      %400 = vector.shape_cast %399 : vector<1x32x256xbf16> to vector<32x256xbf16>
      %cst_351 = arith.constant dense<0.000000e+00> : vector<1x256xf32>
      %401 = tpu.matmul %398, %400, %cst_351 {dimension_numbers = #tpu.dot_dimension_numbers<[1], [0], [0], [1], [0, 0, 1, 1], [], []>} : vector<1x32xbf16>, vector<32x256xbf16>, vector<1x256xf32> -> vector<1x256xf32>
      %402 = arith.addf %395, %401 : vector<1x256xf32>
      %c0_352 = arith.constant 0 : index
      %c45 = arith.constant 45 : index
      %c0_353 = arith.constant 0 : index
      %403 = vector.load %arg20[%c0_352, %c45, %c0_353] : memref<1x64x32xf32, #tpu.memory_space<vmem>>, vector<1x1x32xf32>
      %404 = vector.shape_cast %403 : vector<1x1x32xf32> to vector<1x32xf32>
      %405 = arith.truncf %404 : vector<1x32xf32> to vector<1x32xbf16>
      %c45_354 = arith.constant 45 : index
      %c0_355 = arith.constant 0 : index
      %c0_356 = arith.constant 0 : index
      %406 = vector.load %arg13[%c45_354, %c0_355, %c0_356] : memref<60x32x256xbf16, #tpu.memory_space<vmem>>, vector<1x32x256xbf16>
      %407 = vector.shape_cast %406 : vector<1x32x256xbf16> to vector<32x256xbf16>
      %cst_357 = arith.constant dense<0.000000e+00> : vector<1x256xf32>
      %408 = tpu.matmul %405, %407, %cst_357 {dimension_numbers = #tpu.dot_dimension_numbers<[1], [0], [0], [1], [0, 0, 1, 1], [], []>} : vector<1x32xbf16>, vector<32x256xbf16>, vector<1x256xf32> -> vector<1x256xf32>
      %409 = arith.addf %402, %408 : vector<1x256xf32>
      %c0_358 = arith.constant 0 : index
      %c46 = arith.constant 46 : index
      %c0_359 = arith.constant 0 : index
      %410 = vector.load %arg20[%c0_358, %c46, %c0_359] : memref<1x64x32xf32, #tpu.memory_space<vmem>>, vector<1x1x32xf32>
      %411 = vector.shape_cast %410 : vector<1x1x32xf32> to vector<1x32xf32>
      %412 = arith.truncf %411 : vector<1x32xf32> to vector<1x32xbf16>
      %c46_360 = arith.constant 46 : index
      %c0_361 = arith.constant 0 : index
      %c0_362 = arith.constant 0 : index
      %413 = vector.load %arg13[%c46_360, %c0_361, %c0_362] : memref<60x32x256xbf16, #tpu.memory_space<vmem>>, vector<1x32x256xbf16>
      %414 = vector.shape_cast %413 : vector<1x32x256xbf16> to vector<32x256xbf16>
      %cst_363 = arith.constant dense<0.000000e+00> : vector<1x256xf32>
      %415 = tpu.matmul %412, %414, %cst_363 {dimension_numbers = #tpu.dot_dimension_numbers<[1], [0], [0], [1], [0, 0, 1, 1], [], []>} : vector<1x32xbf16>, vector<32x256xbf16>, vector<1x256xf32> -> vector<1x256xf32>
      %416 = arith.addf %409, %415 : vector<1x256xf32>
      %c0_364 = arith.constant 0 : index
      %c47 = arith.constant 47 : index
      %c0_365 = arith.constant 0 : index
      %417 = vector.load %arg20[%c0_364, %c47, %c0_365] : memref<1x64x32xf32, #tpu.memory_space<vmem>>, vector<1x1x32xf32>
      %418 = vector.shape_cast %417 : vector<1x1x32xf32> to vector<1x32xf32>
      %419 = arith.truncf %418 : vector<1x32xf32> to vector<1x32xbf16>
      %c47_366 = arith.constant 47 : index
      %c0_367 = arith.constant 0 : index
      %c0_368 = arith.constant 0 : index
      %420 = vector.load %arg13[%c47_366, %c0_367, %c0_368] : memref<60x32x256xbf16, #tpu.memory_space<vmem>>, vector<1x32x256xbf16>
      %421 = vector.shape_cast %420 : vector<1x32x256xbf16> to vector<32x256xbf16>
      %cst_369 = arith.constant dense<0.000000e+00> : vector<1x256xf32>
      %422 = tpu.matmul %419, %421, %cst_369 {dimension_numbers = #tpu.dot_dimension_numbers<[1], [0], [0], [1], [0, 0, 1, 1], [], []>} : vector<1x32xbf16>, vector<32x256xbf16>, vector<1x256xf32> -> vector<1x256xf32>
      %423 = arith.addf %416, %422 : vector<1x256xf32>
      %c0_370 = arith.constant 0 : index
      %c48 = arith.constant 48 : index
      %c0_371 = arith.constant 0 : index
      %424 = vector.load %arg20[%c0_370, %c48, %c0_371] : memref<1x64x32xf32, #tpu.memory_space<vmem>>, vector<1x1x32xf32>
      %425 = vector.shape_cast %424 : vector<1x1x32xf32> to vector<1x32xf32>
      %426 = arith.truncf %425 : vector<1x32xf32> to vector<1x32xbf16>
      %c48_372 = arith.constant 48 : index
      %c0_373 = arith.constant 0 : index
      %c0_374 = arith.constant 0 : index
      %427 = vector.load %arg13[%c48_372, %c0_373, %c0_374] : memref<60x32x256xbf16, #tpu.memory_space<vmem>>, vector<1x32x256xbf16>
      %428 = vector.shape_cast %427 : vector<1x32x256xbf16> to vector<32x256xbf16>
      %cst_375 = arith.constant dense<0.000000e+00> : vector<1x256xf32>
      %429 = tpu.matmul %426, %428, %cst_375 {dimension_numbers = #tpu.dot_dimension_numbers<[1], [0], [0], [1], [0, 0, 1, 1], [], []>} : vector<1x32xbf16>, vector<32x256xbf16>, vector<1x256xf32> -> vector<1x256xf32>
      %430 = arith.addf %423, %429 : vector<1x256xf32>
      %c0_376 = arith.constant 0 : index
      %c49 = arith.constant 49 : index
      %c0_377 = arith.constant 0 : index
      %431 = vector.load %arg20[%c0_376, %c49, %c0_377] : memref<1x64x32xf32, #tpu.memory_space<vmem>>, vector<1x1x32xf32>
      %432 = vector.shape_cast %431 : vector<1x1x32xf32> to vector<1x32xf32>
      %433 = arith.truncf %432 : vector<1x32xf32> to vector<1x32xbf16>
      %c49_378 = arith.constant 49 : index
      %c0_379 = arith.constant 0 : index
      %c0_380 = arith.constant 0 : index
      %434 = vector.load %arg13[%c49_378, %c0_379, %c0_380] : memref<60x32x256xbf16, #tpu.memory_space<vmem>>, vector<1x32x256xbf16>
      %435 = vector.shape_cast %434 : vector<1x32x256xbf16> to vector<32x256xbf16>
      %cst_381 = arith.constant dense<0.000000e+00> : vector<1x256xf32>
      %436 = tpu.matmul %433, %435, %cst_381 {dimension_numbers = #tpu.dot_dimension_numbers<[1], [0], [0], [1], [0, 0, 1, 1], [], []>} : vector<1x32xbf16>, vector<32x256xbf16>, vector<1x256xf32> -> vector<1x256xf32>
      %437 = arith.addf %430, %436 : vector<1x256xf32>
      %c0_382 = arith.constant 0 : index
      %c50 = arith.constant 50 : index
      %c0_383 = arith.constant 0 : index
      %438 = vector.load %arg20[%c0_382, %c50, %c0_383] : memref<1x64x32xf32, #tpu.memory_space<vmem>>, vector<1x1x32xf32>
      %439 = vector.shape_cast %438 : vector<1x1x32xf32> to vector<1x32xf32>
      %440 = arith.truncf %439 : vector<1x32xf32> to vector<1x32xbf16>
      %c50_384 = arith.constant 50 : index
      %c0_385 = arith.constant 0 : index
      %c0_386 = arith.constant 0 : index
      %441 = vector.load %arg13[%c50_384, %c0_385, %c0_386] : memref<60x32x256xbf16, #tpu.memory_space<vmem>>, vector<1x32x256xbf16>
      %442 = vector.shape_cast %441 : vector<1x32x256xbf16> to vector<32x256xbf16>
      %cst_387 = arith.constant dense<0.000000e+00> : vector<1x256xf32>
      %443 = tpu.matmul %440, %442, %cst_387 {dimension_numbers = #tpu.dot_dimension_numbers<[1], [0], [0], [1], [0, 0, 1, 1], [], []>} : vector<1x32xbf16>, vector<32x256xbf16>, vector<1x256xf32> -> vector<1x256xf32>
      %444 = arith.addf %437, %443 : vector<1x256xf32>
      %c0_388 = arith.constant 0 : index
      %c51 = arith.constant 51 : index
      %c0_389 = arith.constant 0 : index
      %445 = vector.load %arg20[%c0_388, %c51, %c0_389] : memref<1x64x32xf32, #tpu.memory_space<vmem>>, vector<1x1x32xf32>
      %446 = vector.shape_cast %445 : vector<1x1x32xf32> to vector<1x32xf32>
      %447 = arith.truncf %446 : vector<1x32xf32> to vector<1x32xbf16>
      %c51_390 = arith.constant 51 : index
      %c0_391 = arith.constant 0 : index
      %c0_392 = arith.constant 0 : index
      %448 = vector.load %arg13[%c51_390, %c0_391, %c0_392] : memref<60x32x256xbf16, #tpu.memory_space<vmem>>, vector<1x32x256xbf16>
      %449 = vector.shape_cast %448 : vector<1x32x256xbf16> to vector<32x256xbf16>
      %cst_393 = arith.constant dense<0.000000e+00> : vector<1x256xf32>
      %450 = tpu.matmul %447, %449, %cst_393 {dimension_numbers = #tpu.dot_dimension_numbers<[1], [0], [0], [1], [0, 0, 1, 1], [], []>} : vector<1x32xbf16>, vector<32x256xbf16>, vector<1x256xf32> -> vector<1x256xf32>
      %451 = arith.addf %444, %450 : vector<1x256xf32>
      %c0_394 = arith.constant 0 : index
      %c52 = arith.constant 52 : index
      %c0_395 = arith.constant 0 : index
      %452 = vector.load %arg20[%c0_394, %c52, %c0_395] : memref<1x64x32xf32, #tpu.memory_space<vmem>>, vector<1x1x32xf32>
      %453 = vector.shape_cast %452 : vector<1x1x32xf32> to vector<1x32xf32>
      %454 = arith.truncf %453 : vector<1x32xf32> to vector<1x32xbf16>
      %c52_396 = arith.constant 52 : index
      %c0_397 = arith.constant 0 : index
      %c0_398 = arith.constant 0 : index
      %455 = vector.load %arg13[%c52_396, %c0_397, %c0_398] : memref<60x32x256xbf16, #tpu.memory_space<vmem>>, vector<1x32x256xbf16>
      %456 = vector.shape_cast %455 : vector<1x32x256xbf16> to vector<32x256xbf16>
      %cst_399 = arith.constant dense<0.000000e+00> : vector<1x256xf32>
      %457 = tpu.matmul %454, %456, %cst_399 {dimension_numbers = #tpu.dot_dimension_numbers<[1], [0], [0], [1], [0, 0, 1, 1], [], []>} : vector<1x32xbf16>, vector<32x256xbf16>, vector<1x256xf32> -> vector<1x256xf32>
      %458 = arith.addf %451, %457 : vector<1x256xf32>
      %c0_400 = arith.constant 0 : index
      %c53 = arith.constant 53 : index
      %c0_401 = arith.constant 0 : index
      %459 = vector.load %arg20[%c0_400, %c53, %c0_401] : memref<1x64x32xf32, #tpu.memory_space<vmem>>, vector<1x1x32xf32>
      %460 = vector.shape_cast %459 : vector<1x1x32xf32> to vector<1x32xf32>
      %461 = arith.truncf %460 : vector<1x32xf32> to vector<1x32xbf16>
      %c53_402 = arith.constant 53 : index
      %c0_403 = arith.constant 0 : index
      %c0_404 = arith.constant 0 : index
      %462 = vector.load %arg13[%c53_402, %c0_403, %c0_404] : memref<60x32x256xbf16, #tpu.memory_space<vmem>>, vector<1x32x256xbf16>
      %463 = vector.shape_cast %462 : vector<1x32x256xbf16> to vector<32x256xbf16>
      %cst_405 = arith.constant dense<0.000000e+00> : vector<1x256xf32>
      %464 = tpu.matmul %461, %463, %cst_405 {dimension_numbers = #tpu.dot_dimension_numbers<[1], [0], [0], [1], [0, 0, 1, 1], [], []>} : vector<1x32xbf16>, vector<32x256xbf16>, vector<1x256xf32> -> vector<1x256xf32>
      %465 = arith.addf %458, %464 : vector<1x256xf32>
      %c0_406 = arith.constant 0 : index
      %c54 = arith.constant 54 : index
      %c0_407 = arith.constant 0 : index
      %466 = vector.load %arg20[%c0_406, %c54, %c0_407] : memref<1x64x32xf32, #tpu.memory_space<vmem>>, vector<1x1x32xf32>
      %467 = vector.shape_cast %466 : vector<1x1x32xf32> to vector<1x32xf32>
      %468 = arith.truncf %467 : vector<1x32xf32> to vector<1x32xbf16>
      %c54_408 = arith.constant 54 : index
      %c0_409 = arith.constant 0 : index
      %c0_410 = arith.constant 0 : index
      %469 = vector.load %arg13[%c54_408, %c0_409, %c0_410] : memref<60x32x256xbf16, #tpu.memory_space<vmem>>, vector<1x32x256xbf16>
      %470 = vector.shape_cast %469 : vector<1x32x256xbf16> to vector<32x256xbf16>
      %cst_411 = arith.constant dense<0.000000e+00> : vector<1x256xf32>
      %471 = tpu.matmul %468, %470, %cst_411 {dimension_numbers = #tpu.dot_dimension_numbers<[1], [0], [0], [1], [0, 0, 1, 1], [], []>} : vector<1x32xbf16>, vector<32x256xbf16>, vector<1x256xf32> -> vector<1x256xf32>
      %472 = arith.addf %465, %471 : vector<1x256xf32>
      %c0_412 = arith.constant 0 : index
      %c55 = arith.constant 55 : index
      %c0_413 = arith.constant 0 : index
      %473 = vector.load %arg20[%c0_412, %c55, %c0_413] : memref<1x64x32xf32, #tpu.memory_space<vmem>>, vector<1x1x32xf32>
      %474 = vector.shape_cast %473 : vector<1x1x32xf32> to vector<1x32xf32>
      %475 = arith.truncf %474 : vector<1x32xf32> to vector<1x32xbf16>
      %c55_414 = arith.constant 55 : index
      %c0_415 = arith.constant 0 : index
      %c0_416 = arith.constant 0 : index
      %476 = vector.load %arg13[%c55_414, %c0_415, %c0_416] : memref<60x32x256xbf16, #tpu.memory_space<vmem>>, vector<1x32x256xbf16>
      %477 = vector.shape_cast %476 : vector<1x32x256xbf16> to vector<32x256xbf16>
      %cst_417 = arith.constant dense<0.000000e+00> : vector<1x256xf32>
      %478 = tpu.matmul %475, %477, %cst_417 {dimension_numbers = #tpu.dot_dimension_numbers<[1], [0], [0], [1], [0, 0, 1, 1], [], []>} : vector<1x32xbf16>, vector<32x256xbf16>, vector<1x256xf32> -> vector<1x256xf32>
      %479 = arith.addf %472, %478 : vector<1x256xf32>
      %c0_418 = arith.constant 0 : index
      %c56 = arith.constant 56 : index
      %c0_419 = arith.constant 0 : index
      %480 = vector.load %arg20[%c0_418, %c56, %c0_419] : memref<1x64x32xf32, #tpu.memory_space<vmem>>, vector<1x1x32xf32>
      %481 = vector.shape_cast %480 : vector<1x1x32xf32> to vector<1x32xf32>
      %482 = arith.truncf %481 : vector<1x32xf32> to vector<1x32xbf16>
      %c56_420 = arith.constant 56 : index
      %c0_421 = arith.constant 0 : index
      %c0_422 = arith.constant 0 : index
      %483 = vector.load %arg13[%c56_420, %c0_421, %c0_422] : memref<60x32x256xbf16, #tpu.memory_space<vmem>>, vector<1x32x256xbf16>
      %484 = vector.shape_cast %483 : vector<1x32x256xbf16> to vector<32x256xbf16>
      %cst_423 = arith.constant dense<0.000000e+00> : vector<1x256xf32>
      %485 = tpu.matmul %482, %484, %cst_423 {dimension_numbers = #tpu.dot_dimension_numbers<[1], [0], [0], [1], [0, 0, 1, 1], [], []>} : vector<1x32xbf16>, vector<32x256xbf16>, vector<1x256xf32> -> vector<1x256xf32>
      %486 = arith.addf %479, %485 : vector<1x256xf32>
      %c0_424 = arith.constant 0 : index
      %c57 = arith.constant 57 : index
      %c0_425 = arith.constant 0 : index
      %487 = vector.load %arg20[%c0_424, %c57, %c0_425] : memref<1x64x32xf32, #tpu.memory_space<vmem>>, vector<1x1x32xf32>
      %488 = vector.shape_cast %487 : vector<1x1x32xf32> to vector<1x32xf32>
      %489 = arith.truncf %488 : vector<1x32xf32> to vector<1x32xbf16>
      %c57_426 = arith.constant 57 : index
      %c0_427 = arith.constant 0 : index
      %c0_428 = arith.constant 0 : index
      %490 = vector.load %arg13[%c57_426, %c0_427, %c0_428] : memref<60x32x256xbf16, #tpu.memory_space<vmem>>, vector<1x32x256xbf16>
      %491 = vector.shape_cast %490 : vector<1x32x256xbf16> to vector<32x256xbf16>
      %cst_429 = arith.constant dense<0.000000e+00> : vector<1x256xf32>
      %492 = tpu.matmul %489, %491, %cst_429 {dimension_numbers = #tpu.dot_dimension_numbers<[1], [0], [0], [1], [0, 0, 1, 1], [], []>} : vector<1x32xbf16>, vector<32x256xbf16>, vector<1x256xf32> -> vector<1x256xf32>
      %493 = arith.addf %486, %492 : vector<1x256xf32>
      %c0_430 = arith.constant 0 : index
      %c58 = arith.constant 58 : index
      %c0_431 = arith.constant 0 : index
      %494 = vector.load %arg20[%c0_430, %c58, %c0_431] : memref<1x64x32xf32, #tpu.memory_space<vmem>>, vector<1x1x32xf32>
      %495 = vector.shape_cast %494 : vector<1x1x32xf32> to vector<1x32xf32>
      %496 = arith.truncf %495 : vector<1x32xf32> to vector<1x32xbf16>
      %c58_432 = arith.constant 58 : index
      %c0_433 = arith.constant 0 : index
      %c0_434 = arith.constant 0 : index
      %497 = vector.load %arg13[%c58_432, %c0_433, %c0_434] : memref<60x32x256xbf16, #tpu.memory_space<vmem>>, vector<1x32x256xbf16>
      %498 = vector.shape_cast %497 : vector<1x32x256xbf16> to vector<32x256xbf16>
      %cst_435 = arith.constant dense<0.000000e+00> : vector<1x256xf32>
      %499 = tpu.matmul %496, %498, %cst_435 {dimension_numbers = #tpu.dot_dimension_numbers<[1], [0], [0], [1], [0, 0, 1, 1], [], []>} : vector<1x32xbf16>, vector<32x256xbf16>, vector<1x256xf32> -> vector<1x256xf32>
      %500 = arith.addf %493, %499 : vector<1x256xf32>
      %c0_436 = arith.constant 0 : index
      %c59 = arith.constant 59 : index
      %c0_437 = arith.constant 0 : index
      %501 = vector.load %arg20[%c0_436, %c59, %c0_437] : memref<1x64x32xf32, #tpu.memory_space<vmem>>, vector<1x1x32xf32>
      %502 = vector.shape_cast %501 : vector<1x1x32xf32> to vector<1x32xf32>
      %503 = arith.truncf %502 : vector<1x32xf32> to vector<1x32xbf16>
      %c59_438 = arith.constant 59 : index
      %c0_439 = arith.constant 0 : index
      %c0_440 = arith.constant 0 : index
      %504 = vector.load %arg13[%c59_438, %c0_439, %c0_440] : memref<60x32x256xbf16, #tpu.memory_space<vmem>>, vector<1x32x256xbf16>
      %505 = vector.shape_cast %504 : vector<1x32x256xbf16> to vector<32x256xbf16>
      %cst_441 = arith.constant dense<0.000000e+00> : vector<1x256xf32>
      %506 = tpu.matmul %503, %505, %cst_441 {dimension_numbers = #tpu.dot_dimension_numbers<[1], [0], [0], [1], [0, 0, 1, 1], [], []>} : vector<1x32xbf16>, vector<32x256xbf16>, vector<1x256xf32> -> vector<1x256xf32>
      %507 = arith.addf %500, %506 : vector<1x256xf32>
      %c0_442 = arith.constant 0 : index
      %c0_443 = arith.constant 0 : index
      %508 = vector.load %arg14[%c0_442, %c0_443] : memref<1x256xf32, #tpu.memory_space<vmem>>, vector<1x256xf32>
      %509 = arith.addf %507, %508 : vector<1x256xf32>
      %cst_444 = arith.constant 0.000000e+00 : f32
      %510 = vector.broadcast %cst_444 : f32 to vector<1x256xf32>
      %511 = arith.maximumf %509, %510 : vector<1x256xf32>
      %512 = arith.truncf %511 : vector<1x256xf32> to vector<1x256xbf16>
      %c0_445 = arith.constant 0 : index
      %c0_446 = arith.constant 0 : index
      %513 = vector.load %arg15[%c0_445, %c0_446] : memref<256x128xbf16, #tpu.memory_space<vmem>>, vector<256x128xbf16>
      %cst_447 = arith.constant dense<0.000000e+00> : vector<1x128xf32>
      %514 = tpu.matmul %512, %513, %cst_447 {dimension_numbers = #tpu.dot_dimension_numbers<[1], [0], [0], [1], [0, 0, 1, 1], [], []>} : vector<1x256xbf16>, vector<256x128xbf16>, vector<1x128xf32> -> vector<1x128xf32>
      %c0_448 = arith.constant 0 : index
      %c0_449 = arith.constant 0 : index
      %515 = vector.load %arg16[%c0_448, %c0_449] : memref<1x128xf32, #tpu.memory_space<vmem>>, vector<1x128xf32>
      %516 = arith.addf %514, %515 : vector<1x128xf32>
      %cst_450 = arith.constant 0.000000e+00 : f32
      %517 = vector.broadcast %cst_450 : f32 to vector<1x128xf32>
      %518 = arith.maximumf %516, %517 : vector<1x128xf32>
      %519 = arith.truncf %518 : vector<1x128xf32> to vector<1x128xbf16>
      %c0_451 = arith.constant 0 : index
      %c0_452 = arith.constant 0 : index
      %520 = vector.load %arg17[%c0_451, %c0_452] : memref<128x128xbf16, #tpu.memory_space<vmem>>, vector<128x128xbf16>
      %cst_453 = arith.constant dense<0.000000e+00> : vector<1x128xf32>
      %521 = tpu.matmul %519, %520, %cst_453 {dimension_numbers = #tpu.dot_dimension_numbers<[1], [0], [0], [1], [0, 0, 1, 1], [], []>} : vector<1x128xbf16>, vector<128x128xbf16>, vector<1x128xf32> -> vector<1x128xf32>
      %c0_454 = arith.constant 0 : index
      %c0_455 = arith.constant 0 : index
      %522 = vector.load %arg18[%c0_454, %c0_455] : memref<1x128xf32, #tpu.memory_space<vmem>>, vector<1x128xf32>
      %523 = arith.addf %521, %522 : vector<1x128xf32>
      %c0_456 = arith.constant 0 : index
      %c0_457 = arith.constant 0 : index
      %c0_458 = arith.constant 0 : index
      %524 = vector.load %arg19[%c0_456, %c0_457, %c0_458] : memref<1x1x128xf32, #tpu.memory_space<vmem>>, vector<1x1x128xf32>
      %525 = vector.shape_cast %524 : vector<1x1x128xf32> to vector<1x128xf32>
      %526 = vector.shape_cast %523 : vector<1x128xf32> to vector<1x1x128xf32>
      tpu.vector_store %arg19[%c0_456, %c0_457, %c0_458], %526 {strides = array<i32>} : memref<1x1x128xf32, #tpu.memory_space<vmem>>, vector<1x1x128xf32>,
    } else {
    }
    return
  }
  func.func @transform_0(%arg0: i32, %arg1: i32) -> (i32, i32, i32) {
    %c1_i32 = arith.constant 1 : i32
    %0 = arith.muli %arg0, %c1_i32 : i32
    %1 = arith.addi %0, %arg1 : i32
    %c0_i32 = arith.constant 0 : i32
    %c0_i32_0 = arith.constant 0 : i32
    %c0_i32_1 = arith.constant 0 : i32
    return %1, %c0_i32, %c0_i32_0 : i32, i32, i32
  }
  func.func @transform_1(%arg0: i32, %arg1: i32) -> (i32, i32) {
    %c0_i32 = arith.constant 0 : i32
    %c0_i32_0 = arith.constant 0 : i32
    %c0_i32_1 = arith.constant 0 : i32
    return %c0_i32, %c0_i32_0 : i32, i32
  }
  func.func @transform_2(%arg0: i32, %arg1: i32) -> (i32, i32) {
    %c0_i32 = arith.constant 0 : i32
    %c0_i32_0 = arith.constant 0 : i32
    %c0_i32_1 = arith.constant 0 : i32
    return %c0_i32, %c0_i32_0 : i32, i32
  }
  func.func @transform_3(%arg0: i32, %arg1: i32) -> (i32, i32) {
    %c0_i32 = arith.constant 0 : i32
    %c0_i32_0 = arith.constant 0 : i32
    %c0_i32_1 = arith.constant 0 : i32
    return %c0_i32, %c0_i32_0 : i32, i32
  }
  func.func @transform_4(%arg0: i32, %arg1: i32) -> (i32, i32) {
    %c0_i32 = arith.constant 0 : i32
    %c0_i32_0 = arith.constant 0 : i32
    %c0_i32_1 = arith.constant 0 : i32
    return %c0_i32, %c0_i32_0 : i32, i32
  }
  func.func @transform_5(%arg0: i32, %arg1: i32) -> (i32, i32) {
    %c0_i32 = arith.constant 0 : i32
    %c0_i32_0 = arith.constant 0 : i32
    %c0_i32_1 = arith.constant 0 : i32
    return %c0_i32, %c0_i32_0 : i32, i32
  }
  func.func @transform_6(%arg0: i32, %arg1: i32) -> (i32, i32) {
    %c0_i32 = arith.constant 0 : i32
    %c0_i32_0 = arith.constant 0 : i32
    %c0_i32_1 = arith.constant 0 : i32
    return %c0_i32, %c0_i32_0 : i32, i32
  }
  func.func @transform_7(%arg0: i32, %arg1: i32) -> (i32, i32) {
    %c0_i32 = arith.constant 0 : i32
    %c0_i32_0 = arith.constant 0 : i32
    %c0_i32_1 = arith.constant 0 : i32
    return %c0_i32, %c0_i32_0 : i32, i32
  }
  func.func @transform_8(%arg0: i32, %arg1: i32) -> (i32, i32) {
    %c0_i32 = arith.constant 0 : i32
    %c0_i32_0 = arith.constant 0 : i32
    %c0_i32_1 = arith.constant 0 : i32
    return %c0_i32, %c0_i32_0 : i32, i32
  }
  func.func @transform_9(%arg0: i32, %arg1: i32) -> (i32, i32) {
    %c0_i32 = arith.constant 0 : i32
    %c0_i32_0 = arith.constant 0 : i32
    %c0_i32_1 = arith.constant 0 : i32
    return %c0_i32, %c0_i32_0 : i32, i32
  }
  func.func @transform_10(%arg0: i32, %arg1: i32) -> (i32, i32) {
    %c0_i32 = arith.constant 0 : i32
    %c0_i32_0 = arith.constant 0 : i32
    %c0_i32_1 = arith.constant 0 : i32
    return %c0_i32, %c0_i32_0 : i32, i32
  }
  func.func @transform_11(%arg0: i32, %arg1: i32) -> (i32, i32, i32) {
    %c0_i32 = arith.constant 0 : i32
    %c0_i32_0 = arith.constant 0 : i32
    %c0_i32_1 = arith.constant 0 : i32
    %c0_i32_2 = arith.constant 0 : i32
    return %c0_i32, %c0_i32_0, %c0_i32_1 : i32, i32, i32
  }
  func.func @transform_12(%arg0: i32, %arg1: i32) -> (i32, i32) {
    %c0_i32 = arith.constant 0 : i32
    %c0_i32_0 = arith.constant 0 : i32
    %c0_i32_1 = arith.constant 0 : i32
    return %c0_i32, %c0_i32_0 : i32, i32
  }
  func.func @transform_13(%arg0: i32, %arg1: i32) -> (i32, i32) {
    %c0_i32 = arith.constant 0 : i32
    %c0_i32_0 = arith.constant 0 : i32
    %c0_i32_1 = arith.constant 0 : i32
    return %c0_i32, %c0_i32_0 : i32, i32
  }
  func.func @transform_14(%arg0: i32, %arg1: i32) -> (i32, i32) {
    %c0_i32 = arith.constant 0 : i32
    %c0_i32_0 = arith.constant 0 : i32
    %c0_i32_1 = arith.constant 0 : i32
    return %c0_i32, %c0_i32_0 : i32, i32
  }
  func.func @transform_15(%arg0: i32, %arg1: i32) -> (i32, i32) {
    %c0_i32 = arith.constant 0 : i32
    %c0_i32_0 = arith.constant 0 : i32
    %c0_i32_1 = arith.constant 0 : i32
    return %c0_i32, %c0_i32_0 : i32, i32
  }
  func.func @transform_16(%arg0: i32, %arg1: i32) -> (i32, i32) {
    %c0_i32 = arith.constant 0 : i32
    %c0_i32_0 = arith.constant 0 : i32
    %c0_i32_1 = arith.constant 0 : i32
    return %c0_i32, %c0_i32_0 : i32, i32
  }
  func.func @transform_17(%arg0: i32, %arg1: i32) -> (i32, i32, i32) {
    %c0_i32 = arith.constant 0 : i32
    %c0_i32_0 = arith.constant 0 : i32
    %c0_i32_1 = arith.constant 0 : i32
    return %arg0, %c0_i32, %c0_i32_0 : i32, i32, i32
  }
}

</mosaic_0001>

<bundles_post_ra>
// kernel: long_filter_cnn_forward.1
= control target key start
LH: loop header
LB: loop body
LE: loop exit
PB: predicated region body
PF: predicated region fallthrough
CT: control target
= control target key end

     0   :  { %s15058_s0 = inlined_call_operand.vmem [shape: bf16[2,254,80], index: 0, kind: input, shape index: {}]   ;;  %s15059_s1 = inlined_call_operand.vmem [shape: bf16[240,64], index: 1, kind: input, shape index: {}]   ;;  %s15060_s2 = inlined_call_operand.vmem [shape: f32[1,64], index: 2, kind: input, shape index: {}]   ;;  %s15061_s3 = inlined_call_operand.vmem [shape: bf16[192,64], index: 3, kind: input, shape index: {}]   ;;  %s15062_s4 = inlined_call_operand.vmem [shape: f32[1,64], index: 4, kind: input, shape index: {}]   ;;  %s15063_s5 = inlined_call_operand.vmem [shape: bf16[192,32], index: 5, kind: input, shape index: {}]   ;;  %s15064_s6 = inlined_call_operand.vmem [shape: f32[1,32], index: 6, kind: input, shape index: {}]   ;;  %s15065_s7 = inlined_call_operand.vmem [shape: bf16[96,32], index: 7, kind: input, shape index: {}]   ;;  %s15066_s8 = inlined_call_operand.vmem [shape: f32[1,32], index: 8, kind: input, shape index: {}]   ;;  %s15067_s9 = inlined_call_operand.vmem [shape: bf16[96,32], index: 9, kind: input, shape index: {}]   ;;  %s15068_s10 = inlined_call_operand.vmem [shape: f32[1,32], index: 10, kind: input, shape index: {}]   ;;  %s15069_s11 = inlined_call_operand.hbm [shape: bf16[60,32,256], index: 11, kind: input, shape index: {}]   ;;  %s15070_s12 = inlined_call_operand.vmem [shape: f32[1,256], index: 12, kind: input, shape index: {}]   ;;  %s15071_s13 = inlined_call_operand.vmem [shape: bf16[256,128], index: 13, kind: input, shape index: {}]   ;;  %s15072_s14 = inlined_call_operand.vmem [shape: f32[1,128], index: 14, kind: input, shape index: {}]   ;;  %s15073_s15 = inlined_call_operand.vmem [shape: bf16[128,128], index: 15, kind: input, shape index: {}]   ;;  %s15074_s16 = inlined_call_operand.vmem [shape: f32[1,128], index: 16, kind: input, shape index: {}]   ;;  %s15075_s17 = inlined_call_operand.hbm [shape: f32[2,1,128], index: 17, kind: output, shape index: {}]  }
   0x1   :  { %15085 = sst [smem:[#allocation15_spill]] %s15058_s0 }
   0x2   :  { %15086 = sst [smem:[#allocation16_spill]] %s15059_s1 }
   0x3   :  { %15087 = sst [smem:[#allocation17_spill]] %s15060_s2 }
   0x4   :  { %15088 = sst [smem:[#allocation18_spill]] %s15061_s3 }
   0x5   :  { %22 = vsyncpa [#allocation6], 0 }
   0x6   :  { %23 = vsyncpa [#allocation7], 0 }
   0x7   :  { %25 = vsyncpa [#allocation7 + $0x1], 0  ;;  %s12437_s24 = smov 0   ;;  %s12439_s25 = smov 0  }
   0x8   :  { %s12441_s26 = smov 0   ;;  %s12443_s27 = smov 0  }
   0x9   :  { %s12445_s28 = smov 0   ;;  %s12447_s29 = smov 0  }
   0xa LB: > { %15089 = sst [smem:[#allocation11_spill]] %s12315_s24  ;;  %s10716_s0 = sadd.s32 4294967295, %s12335_s29   ;;  %s12335_s29 = sphi %s12447_s29, %s31_s29   ;;  %s12331_s28 = sphi %s12445_s28, %s15112_s28   ;;  %s12327_s27 = sphi %s12443_s27, %s15111_s27   ;;  %s12323_s26 = sphi %s12441_s26, %s15115_s26   ;;  %s12319_s25 = sphi %s12439_s25, %s15114_s25   ;;  %s12315_s24 = sphi %s12437_s24, %s15113_s24  }
   0xb   : > { %15090 = sst [smem:[#allocation12_spill]] %s12331_s28  ;;  %s10717_s30 = sadd.s32 4294967294, %s12335_s29  }
   0xc   : > { %s43_s18 = sadd.s32 1, %s12331_s28  ;;  %s414_s19 = sadd.s32 1, %s12323_s26 }
   0xd   : > { %p45_p0 = scmp.ge.s32.totalorder %s43_s18, 2  ;;  %p424_p1 = scmp.ne.s32.totalorder %s12323_s26, %s12319_s25 }
   0xe   : > { %p425_p2 = scmp.eq.s32.totalorder %s10716_s0, 1  ;;  %p430_p3 = scmp.ne.s32.totalorder %s12319_s25, %s12315_s24 }
   0xf   : > { %s15117_s18 = smov (%p45_p0, %s43_s18), 0  ;;  %p431_p5 = scmp.eq.s32.totalorder %s10717_s30, 1 }
  0x10   : > { %15091 = sst [smem:[#allocation13_spill]] %s15117_s18  ;;  %p12477_p4 = por %p425_p2, %p424_p1 }
  0x11   : > { %s411_s20 = ssub.s32 %s12331_s28, %s15117_s18  ;;  %p10718_p6 = scmp.ge.s32.totalorder %s12335_s29, 1 }
  0x12   : > { %p412_p7 = scmp.eq.s32.totalorder %s411_s20, 0  ;;  %p12484_p8 = por %p431_p5, %p430_p3 }
  0x13   : > { %p438_p9 = scmp.lt.s32.totalorder %s12335_s29, 3  ;;  %p12496_p11 = scmp.eq.s32.totalorder %s10716_s0, 0 }
  0x14   : > { %s12490_s22 = scalar_select %p412_p7, %s12323_s26, %s414_s19  }
  0x15   : > { %p12492_p10 = pnand %p10718_p6, %p438_p9  ;;  %s12337_s30 = smov [#allocation5]  }
  0x16   : > { %15094 = sst [smem:[#allocation14_spill]] %s12490_s22  ;;  %s480_s20 = sshll.u32 %s12337_s30, 4  ;;  %s481_s20 = int_to_ptr.vmem [resolvable:$true] %s480_s20 }
  0x17   : > { %p11623_p12 = pneg %p12492_p10  ;;  %s12240_s19 = scalar_lea.vmem %s481_s20, 30720 }
  0x18   : > { %p12241_p1 = scmp.ne.s32.totalorder %s481_s20, %s12240_s19  ;;  %p12248_p5 = scmp.lt.s32.totalorder %s481_s20, %s481_s20 }
  0x19   : > { %p11624_p13 = pnand %p12496_p11, %p11623_p12  ;;  %p12249_p6 = scmp.lt.s32.totalorder %s12240_s19, %s12240_s19 }
  0x1b   : > { %p12231_p0 = pneg %p11624_p13  ;;  %p12250_p7 = por %p12249_p6, %p12248_p5 }
  0x1d   : > { %p12243_p2 = pnand %p12241_p1, %p12231_p0 }
  0x1f   : > { %p12244_p3 = pneg %p12243_p2 }
  0x21   : > { %p12251_p9 = pnand %p12250_p7, %p12244_p3 }
  0x23   : > { %12254 = shalt.err (!%p12251_p9)
}
  0x24   : > { %s12338_s0 = smov 128   ;;  %s12339_s18 = smov 8  }
  0x25   : > { %11626 = dma.hbm_to_vmem [thread:$0]  (!%p11624_p13), %s15069_s11, 30720, %s481_s20, [#allocation6], %s12338_s0, %s12338_s0, %s12339_s18  }
  0x26   : > { %521 = sbr.rel (%p12492_p10) target bundleno = 2708 (0xa94), region = 88 }
  0x2b   : > { %12306 = dma.done.wait (%p12496_p11), [#allocation6], 30720  }
  0x2c   : > { %12308 = vsyncadd (%p12496_p11), [#allocation6], 4294936576  ;;  %p574_p12 = scmp.lt.s32.totalorder %s12327_s27, 1  ;;  %v12340_v0 = vmov 0   ;;  %s15097_s23 = sld [smem:[#allocation15_spill]]  ;;  %vm1200_vm0 = vcmask 1042432  }
  0x2d   : > { %1780 = vmatprep.subr.bf16.mxu0 %v12340_v0  ;;  %3071 = vmatprep.subr.bf16.mxu1 %v12340_v0  ;;  %vm1201_vm1 = vcmask 1046532   ;;  %vm613_vm2 = vcmask 650240   ;;  %vm647_vm3 = vsmask.f32 3328  ;;  %vm648_vm4 = vsmask.f32 7440 }
  0x2e   : > { %s575_s30 = scalar_select %p574_p12, %s12327_s27, 1  ;;  %vm12527_vm5 = vmor %vm1200_vm0, %vm1201_vm1  ;;  %vm1130_vm7 = vcmask 1044096   ;;  %vm1131_vm8 = vcmask 261124   ;;  %vm645_vm9 = vcmask 648192   ;;  %vm1065_vm11 = vcmask 654336  }
  0x2f   : > { %s15100_s0 = sld [smem:[#allocation16_spill]]  ;;  %vm12575_vm6 = vmor %vm647_vm3, %vm648_vm4  ;;  %s12342_s22 = smov 80   ;;  %vm1394_vm12 = vcmask 912640   ;;  %vm1731_vm13 = vcmask 916480   ;;  %vm1164_vm14 = vcmask 1042048   ;;  %vm1165_vm15 = vcmask 259076  }
  0x30   : > { %s11385_s28 = sshll.u32 %s575_s30, 7  ;;  %s15080_s30 = smov 32   ;;  %vm13305_vm10 = vmor %vm1131_vm8, %vm1130_vm7  ;;  %vm1426_vm1 = vcmask 910592   ;;  %vm2550_vm3 = vcmask 1043968   ;;  %vm2133_vm4 = vcmask 516096   ;;  %vm3022_vm7 = vcmask 523264  }
  0x31   : > { %vm1166_vm0 = vmor %vm1165_vm15, %vm1164_vm14  ;;  %s15105_s3 = sld [smem:[#allocation18_spill]]  ;;  %s15082_s19 = smov 64   ;;  %vm2582_vm8 = vcmask 1040896   ;;  %vm5140_vm14 = vcmask 785408   ;;  %vm4914_vm15 = vcmask 516352  }
  0x32   : > { %s12520_s20 = scalar_lea.vmem %s15097_s23, %s11385_s28  ;;  %s15106_s2 = sld [smem:[#allocation17_spill]] }
  0x33   : > { %v581_v1 = vld [vmem:[%s12520_s20] sm:$0xf]  ;;  %v582_v2 = vld [vmem:[%s12520_s20 + $0x4] sm:$0xf]  ;;  %v12525_v3 = vld [vmem:[%s12520_s20 + $0x8] sm:$0xf] }
  0x34   : > { %v651_v4 = vshrl.u32 %v581_v1, 16  ;;  %v654_v5 = vshll.u32 %v581_v1, 16  ;;  %v660_v6 = vshll.u32 %v582_v2, 16  ;;  %v10725_v8 = vrot.slane %v581_v1, 9  ;;  %v12532_v9 = vld [vmem:[%s12520_s20 + $0xc] sm:$0xf] }
  0x35   : > { %614 = vst.msk [vmem:[#allocation3] sm:$0xf] %vm613_vm2, %v581_v1  ;;  %615 = vst.msk [vmem:[#allocation3 + $0x8] sm:$0xf] %vm613_vm2, %v582_v2  ;;  %v1205_v10 = vrot.slane %v582_v2, 5  ;;  %v664_v11 = vshrl.u32 %v582_v2, 16 }
  0x36   : > { %616 = vst.msk [vmem:[#allocation3 + $0x10] sm:$0xf] %vm613_vm2, %v12525_v3  ;;  %v670_v12 = vshll.u32 %v12525_v3, 16  ;;  %v1208_v13 = vrot.slane %v12525_v3, 5  ;;  %v12541_v14 = vld [vmem:[%s12520_s20 + $0x10] sm:$0xf] }
  0x37   : > { %617 = vst.msk [vmem:[#allocation3 + $0x18] sm:$0xf] %vm613_vm2, %v12532_v9  ;;  %v653_v15 = vrot.slane %v651_v4, 4  ;;  %v656_v16 = vrot.slane %v654_v5, 5  ;;  %v662_v17 = vrot.slane %v660_v6, 5  ;;  %v680_v18 = vshll.u32 %v12532_v9, 16 }
  0x38   : > { %v12547_v19 = vld [vmem:[%s12520_s20 + $0x14] sm:$0xf]  ;;  %618 = vst.msk [vmem:[#allocation3 + $0x20] sm:$0xf] %vm613_vm2, %v12541_v14  ;;  %v1206_v20 = vsel %vm12527_vm5, %v10725_v8, %v1205_v10  ;;  %v666_v21 = vrot.slane %v664_v11, 4  ;;  %v12553_v22 = vrot.slane %v670_v12, 5 }
  0x39   : > { %v1207_v23 = vrot.slane %v1205_v10, 4  ;;  %v12556_v24 = vld [vmem:[%s12520_s20 + $0x18] sm:$0xf]  ;;  %619 = vst.msk [vmem:[#allocation3 + $0x28] sm:$0xf] %vm613_vm2, %v12547_v19  ;;  %v657_v26 = vor.u32 %v656_v16, %v653_v15  ;;  %1298 = vrot.lane.b32.xlu1 %v1206_v20, %s15080_s30  ;;  %v12564_v27 = vrot.slane %v680_v18, 5 }
  0x3a   : > { %v11691_v25 = vld [vmem:[%s15100_s0 + $0x38] sm:$0xff]   ;;  %v684_v28 = vshrl.u32 %v12532_v9, 16  ;;  %v690_v29 = vshll.u32 %v12541_v14, 16  ;;  %620 = vst.msk [vmem:[#allocation3 + $0x30] sm:$0xf] %vm613_vm2, %v12556_v24  ;;  %v667_v32 = vor.u32 %v666_v21, %v662_v17  ;;  %v674_v34 = vshrl.u32 %v12525_v3, 16 }
  0x3b   : > { %v12569_v30 = vld [vmem:[%s12520_s20 + $0x1c] sm:$0xf]  ;;  %v1209_v33 = vsel %vm12527_vm5, %v1207_v23, %v1208_v13  ;;  %v1211_v35 = vrot.slane %v12532_v9, 5  ;;  %v12586_v36 = vld [vmem:[%s12520_s20 + $0x20] sm:$0xf]  ;;  %1781 = vmatpush1.bf16.msra.mxu0 %v11691_v25  ;;  %v658_v38 = vrot.slane %v657_v26, 4 }
  0x3c   : > { %v12589_v37 = vld [vmem:[%s12520_s20 + $0x24] sm:$0xf]  ;;  %621 = vst.msk [vmem:[#allocation3 + $0x38] sm:$0xf] %vm613_vm2, %v12569_v30  ;;  %v686_v39 = vrot.slane %v684_v28, 4  ;;  %v12593_v40 = vrot.slane %v690_v29, 5  ;;  %1782 = vmatprep.subr.bf16.mxu0 %v12340_v0 }
  0x3d   : > { %v12596_v41 = vld [vmem:[%s12520_s20 + $0x28] sm:$0xf]  ;;  %v11692_v42 = vld [vmem:[%s15100_s0 + $0x30] sm:$0xff]   ;;  %622 = vst.msk [vmem:[#allocation3 + $0x40] sm:$0xf] %vm613_vm2, %v12586_v36  ;;  %v668_v43 = vrot.slane %v667_v32, 4  ;;  %v663_v48 = vsel %vm12575_vm6, %v658_v38, %v662_v17  ;;  %1300 = vrot.lane.b32.xlu1 %v1209_v33, %s15080_s30 }
  0x3e   : > { %623 = vst.msk [vmem:[#allocation3 + $0x48] sm:$0xf] %vm613_vm2, %v12589_v37  ;;  %v676_v44 = vrot.slane %v674_v34, 4  ;;  %v1213_v45 = vrot.slane %v1211_v35, 4  ;;  %v1214_v46 = vrot.slane %v12541_v14, 5  ;;  %v687_v49 = vor.u32 %v686_v39, %v12564_v27  ;;  %969 = vrot.lane.b32.xlu0 %v663_v48, %s12342_s22 }
  0x3f   : > { %v12610_v47 = vld [vmem:[%s12520_s20 + $0x2c] sm:$0xf]  ;;  %624 = vst.msk [vmem:[#allocation3 + $0x50] sm:$0xf] %vm613_vm2, %v12596_v41  ;;  %v700_v50 = vshll.u32 %v12547_v19, 16  ;;  %v704_v51 = vshrl.u32 %v12547_v19, 16  ;;  %v673_v54 = vsel %vm12575_vm6, %v668_v43, %v12553_v22  ;;  %1783 = vmatpush1.bf16.msra.mxu0 %v11692_v42 }
  0x40   : > { %v12621_v52 = vld [vmem:[%s12520_s20 + $0x30] sm:$0xf]  ;;  %v12624_v53 = vld [vmem:[%s12520_s20 + $0x34] sm:$0xf]  ;;  %625 = vst.msk [vmem:[#allocation3 + $0x58] sm:$0xf] %vm613_vm2, %v12610_v47  ;;  %v677_v55 = vor.u32 %v676_v44, %v12553_v22  ;;  %1784 = vmatprep.subr.bf16.mxu0 %v12340_v0  ;;  %v1215_v18 = vsel %vm12527_vm5, %v1213_v45, %v1214_v46 }
  0x41   : > { %v12634_v56 = vld [vmem:[%s12520_s20 + $0x38] sm:$0xf]  ;;  %v12637_v57 = vld [vmem:[%s12520_s20 + $0x3c] sm:$0xf]  ;;  %v12640_v58 = vld [vmem:[%s12520_s20 + $0x40] sm:$0xf] }
  0x42   : > { %626 = vst.msk [vmem:[#allocation3 + $0x60] sm:$0xf] %vm613_vm2, %v12621_v52  ;;  %627 = vst.msk [vmem:[#allocation3 + $0x68] sm:$0xf] %vm613_vm2, %v12624_v53  ;;  %v688_v59 = vrot.slane %v687_v49, 4  ;;  %v12646_v60 = vrot.slane %v700_v50, 5  ;;  %971 = vrot.lane.b32.xlu0 %v673_v54, %s12342_s22 }
  0x43   : > { %v706_v61 = vrot.slane %v704_v51, 4  ;;  %v710_v62 = vshll.u32 %v12556_v24, 16  ;;  %v12650_v63 = vld [vmem:[%s12520_s20 + $0x44] sm:$0xf]  ;;  %628 = vst.msk [vmem:[#allocation3 + $0x70] sm:$0xf] %vm613_vm2, %v12634_v56 }
  0x44   : > { %629 = vst.msk [vmem:[#allocation3 + $0x78] sm:$0xf] %vm613_vm2, %v12637_v57  ;;  %630 = vst.msk [vmem:[#allocation3 + $0x80] sm:$0xf] %vm613_vm2, %v12640_v58  ;;  %v678_v1 = vrot.slane %v677_v55, 4  ;;  %v694_v2 = vshrl.u32 %v12541_v14, 16  ;;  %v693_v5 = vsel %vm12575_vm6, %v688_v59, %v12593_v40 }
  0x45   : > { %v12660_v4 = vld [vmem:[%s12520_s20 + $0x48] sm:$0xf]  ;;  %631 = vst.msk [vmem:[#allocation3 + $0x88] sm:$0xf] %vm613_vm2, %v12650_v63  ;;  %v1210_v6 = vrot.slane %v1208_v13, 4  ;;  %v707_v8 = vor.u32 %v706_v61, %v12646_v60  ;;  %v1217_v10 = vrot.slane %v12547_v19, 5  ;;  %975 = vrot.lane.b32.xlu1 %v693_v5, %s12342_s22 }
  0x46   : > { %v12673_v11 = vld [vmem:[%s12520_s20 + $0x4c] sm:$0xf]  ;;  %v12676_v12 = vld [vmem:[%s12520_s20 + $0x50] sm:$0xf]  ;;  %632 = vst.msk [vmem:[#allocation3 + $0x90] sm:$0xf] %vm613_vm2, %v12660_v4  ;;  %v683_v17 = vsel %vm12575_vm6, %v678_v1, %v12564_v27 }
  0x47   : > { %v712_v15 = vrot.slane %v710_v62, 5  ;;  %v696_v16 = vrot.slane %v694_v2, 4  ;;  %v720_v3 = vshll.u32 %v12569_v30, 16  ;;  %v11693_v13 = vld [vmem:[%s15100_s0 + $0x28] sm:$0xff]   ;;  %633 = vst.msk [vmem:[#allocation3 + $0x98] sm:$0xf] %vm613_vm2, %v12673_v11  ;;  %v1212_v27 = vsel %vm12527_vm5, %v1210_v6, %v1211_v35  ;;  %973 = vrot.lane.b32.xlu0 %v683_v17, %s12342_s22 }
  0x48   : > { %634 = vst.msk [vmem:[#allocation3 + $0xa0] sm:$0xf] %vm613_vm2, %v12676_v12  ;;  %v708_v20 = vrot.slane %v707_v8, 4  ;;  %v724_v21 = vshrl.u32 %v12569_v30, 16  ;;  %v11694_v22 = vld [vmem:[%s15100_s0 + $0x20] sm:$0xff]   ;;  %v714_v26 = vshrl.u32 %v12556_v24, 16  ;;  %1785 = vmatpush1.bf16.msra.mxu0 %v11693_v13 }
  0x49   : > { %v697_v23 = vor.u32 %v696_v16, %v12593_v40  ;;  %v12702_v25 = vrot.slane %v720_v3, 5  ;;  %v1220_v28 = vrot.slane %v12556_v24, 5  ;;  %v12711_v32 = vld [vmem:[%s12520_s20 + $0x54] sm:$0xf]  ;;  %1786 = vmatprep.subr.bf16.mxu0 %v12340_v0  ;;  %1304 = vrot.lane.b32.xlu1 %v1215_v18, %s15080_s30  ;;  %v1219_v9 = vrot.slane %v1217_v10, 4  ;;  %v11695_v44 = vld [vmem:[%s15100_s0 + $0x18] sm:$0xff]  }
  0x4a   : > { %v726_v29 = vrot.slane %v724_v21, 4  ;;  %v713_v33 = vsel %vm12575_vm6, %v708_v20, %v712_v15  ;;  %v730_v34 = vshll.u32 %v12586_v36, 16  ;;  %v716_v35 = vrot.slane %v714_v26, 4  ;;  %v12722_v38 = vld [vmem:[%s12520_s20 + $0x58] sm:$0xf] }
  0x4b   : > { %635 = vst.msk [vmem:[#allocation3 + $0xa8] sm:$0xf] %vm613_vm2, %v12711_v32  ;;  %v698_v24 = vrot.slane %v697_v23, 4  ;;  %v740_v40 = vshll.u32 %v12589_v37, 16  ;;  %v744_v42 = vshrl.u32 %v12589_v37, 16  ;;  %v1223_v43 = vrot.slane %v12569_v30, 5  ;;  %1302 = vrot.lane.b32.xlu0 %v1212_v27, %s15080_s30 }
  0x4c   : > { %v727_v39 = vor.u32 %v726_v29, %v12702_v25  ;;  %636 = vst.msk [vmem:[#allocation3 + $0xb0] sm:$0xf] %vm613_vm2, %v12722_v38  ;;  %1787 = vmatpush1.bf16.msra.mxu0 %v11694_v22  ;;  %v1216_v45 = vrot.slane %v1214_v46, 4  ;;  %v717_v48 = vor.u32 %v716_v35, %v712_v15  ;;  %v732_v51 = vrot.slane %v730_v34, 5  ;;  %v12751_v1 = vld [vmem:[%s12520_s20 + $0x5c] sm:$0xf] }
  0x4d   : > { %v12737_v49 = vrot.slane %v740_v40, 5  ;;  %v746_v50 = vrot.slane %v744_v42, 4  ;;  %1788 = vmatprep.subr.bf16.mxu0 %v12340_v0  ;;  %979 = vrot.lane.b32.xlu1 %v713_v33, %s12342_s22  ;;  %v1226_v54 = vrot.slane %v12586_v36, 5  ;;  %v750_v55 = vshll.u32 %v12596_v41, 16  ;;  %v12757_v8 = vld [vmem:[%s12520_s20 + $0x60] sm:$0xf] }
  0x4e   : > { %v734_v14 = vshrl.u32 %v12586_v36, 16  ;;  %v703_v46 = vsel %vm12575_vm6, %v698_v24, %v12646_v60  ;;  %v1221_v59 = vsel %vm12527_vm5, %v1219_v9, %v1220_v28  ;;  %v728_v61 = vrot.slane %v727_v39, 4  ;;  %v11696_v36 = vld [vmem:[%s15100_s0 + $0x10] sm:$0xff]   ;;  %637 = vst.msk [vmem:[#allocation3 + $0xb8] sm:$0xf] %vm613_vm2, %v12751_v1 }
  0x4f   : > { %v1222_v62 = vrot.slane %v1220_v28, 4  ;;  %v1225_v2 = vrot.slane %v1223_v43, 4  ;;  %v760_v6 = vshll.u32 %v12610_v47, 16  ;;  %v718_v60 = vrot.slane %v717_v48, 4  ;;  %638 = vst.msk [vmem:[#allocation3 + $0xc0] sm:$0xf] %vm613_vm2, %v12757_v8  ;;  %977 = vrot.lane.b32.xlu0 %v703_v46, %s12342_s22 }
  0x50   : > { %v736_v5 = vrot.slane %v734_v14, 4  ;;  %1789 = vmatpush1.bf16.msra.mxu0 %v11695_v44  ;;  %v747_v15 = vor.u32 %v746_v50, %v12737_v49  ;;  %v1229_v16 = vrot.slane %v12589_v37, 5  ;;  %v764_v3 = vshrl.u32 %v12610_v47, 16  ;;  %v12791_v29 = vld [vmem:[%s12520_s20 + $0x64] sm:$0xf] }
  0x51   : > { %1790 = vmatprep.subr.bf16.mxu0 %v12340_v0  ;;  %1308 = vrot.lane.b32.xlu1 %v1221_v59, %s15080_s30  ;;  %v1218_v13 = vsel %vm12527_vm5, %v1216_v45, %v1217_v10  ;;  %v12776_v17 = vrot.slane %v750_v55, 5  ;;  %v754_v18 = vshrl.u32 %v12596_v41, 16  ;;  %v733_v20 = vsel %vm12575_vm6, %v728_v61, %v732_v51  ;;  %v11697_v10 = vld [vmem:[%s15100_s0 + $0x8] sm:$0xff]   ;;  %639 = vst.msk [vmem:[#allocation3 + $0xc8] sm:$0xf] %vm613_vm2, %v12791_v29 }
  0x52   : > { %v12781_v21 = vrot.slane %v760_v6, 5  ;;  %v766_v22 = vrot.slane %v764_v3, 4  ;;  %v770_v23 = vshll.u32 %v12621_v52, 16  ;;  %v737_v26 = vor.u32 %v736_v5, %v732_v51  ;;  %v12839_v5 = vld [vmem:[%s12520_s20 + $0x70] sm:$0xf] }
  0x53   : > { %v1232_v27 = vrot.slane %v12596_v41, 5  ;;  %v12785_v19 = vrot.slane %v1226_v54, 4  ;;  %v756_v28 = vrot.slane %v754_v18, 4  ;;  %v748_v33 = vrot.slane %v747_v15, 4  ;;  %v12799_v41 = vld [vmem:[%s12520_s20 + $0x68] sm:$0xf]  ;;  %1306 = vrot.lane.b32.xlu0 %v1218_v13, %s15080_s30 }
  0x54   : > { %1791 = vmatpush1.bf16.msra.mxu0 %v11696_v36  ;;  %v1231_v9 = vrot.slane %v1229_v16, 4  ;;  %v780_v34 = vshll.u32 %v12624_v53, 16  ;;  %v784_v35 = vshrl.u32 %v12624_v53, 16  ;;  %v723_v24 = vsel %vm12575_vm6, %v718_v60, %v12702_v25  ;;  %640 = vst.msk [vmem:[#allocation3 + $0xd0] sm:$0xf] %vm613_vm2, %v12799_v41  ;;  %v11698_v25 = vld [vmem:[%s15100_s0] sm:$0xff]  }
  0x55   : > { %1792 = vmatprep.subr.bf16.mxu0 %v12340_v0  ;;  %983 = vrot.lane.b32.xlu1 %v733_v20, %s12342_s22  ;;  %v1227_v39 = vsel %vm12527_vm5, %v1225_v2, %v1226_v54  ;;  %v1235_v40 = vrot.slane %v12610_v47, 5  ;;  %v767_v42 = vor.u32 %v766_v22, %v12781_v21  ;;  %v12814_v44 = vrot.slane %v770_v23, 5  ;;  %v12836_v2 = vld [vmem:[%s12520_s20 + $0x6c] sm:$0xf]  ;;  %v11699_v36 = vld [vmem:[%s15100_s0 + $0x70] sm:$0xff]  }
  0x56   : > { %v757_v45 = vor.u32 %v756_v28, %v12776_v17  ;;  %v790_v48 = vshll.u32 %v12634_v56, 16  ;;  %v738_v50 = vrot.slane %v737_v26, 4  ;;  %v12821_v51 = vrot.slane %v780_v34, 5  ;;  %641 = vst.msk [vmem:[#allocation3 + $0xd8] sm:$0xf] %vm613_vm2, %v12836_v2 }
  0x57   : > { %v786_v54 = vrot.slane %v784_v35, 4  ;;  %v774_v55 = vshrl.u32 %v12621_v52, 16  ;;  %v1224_v14 = vsel %vm12527_vm5, %v1222_v62, %v1223_v43  ;;  %v753_v46 = vsel %vm12575_vm6, %v748_v33, %v12776_v17  ;;  %981 = vrot.lane.b32.xlu0 %v723_v24, %s12342_s22  ;;  %642 = vst.msk [vmem:[#allocation3 + $0xe0] sm:$0xf] %vm613_vm2, %v12839_v5  ;;  %v11700_v35 = vld [vmem:[%s15100_s0 + $0x68] sm:$0xff]  }
  0x58   : > { %1793 = vmatpush1.bf16.msra.mxu0 %v11697_v10  ;;  %v1238_v59 = vrot.slane %v12621_v52, 5  ;;  %v12832_v61 = vrot.slane %v1232_v27, 4  ;;  %v12845_v30 = vrot.slane %v1235_v40, 4  ;;  %v1241_v62 = vrot.slane %v12624_v53, 5  ;;  %v12872_v10 = vld [vmem:[%s12520_s20 + $0x74] sm:$0xf] }
  0x59   : > { %1794 = vmatprep.subr.bf16.mxu0 %v12340_v0  ;;  %1312 = vrot.lane.b32.xlu1 %v1227_v39, %s15080_s30  ;;  %v776_v43 = vrot.slane %v774_v55, 4  ;;  %v800_v6 = vshll.u32 %v12637_v57, 16  ;;  %v768_v60 = vrot.slane %v767_v42, 4  ;;  %v12856_v15 = vrot.slane %v757_v45, 4  ;;  %v12884_v24 = vld [vmem:[%s12520_s20 + $0x78] sm:$0xf] }
  0x5a   : > { %v12858_v3 = vrot.slane %v790_v48, 5  ;;  %v804_v13 = vshrl.u32 %v12637_v57, 16  ;;  %v787_v17 = vor.u32 %v786_v54, %v12821_v51  ;;  %v794_v20 = vshrl.u32 %v12634_v56, 16  ;;  %643 = vst.msk [vmem:[#allocation3 + $0xe8] sm:$0xf] %vm613_vm2, %v12872_v10 }
  0x5b   : > { %v12862_v18 = vrot.slane %v800_v6, 5  ;;  %v1233_v22 = vsel %vm12527_vm5, %v1231_v9, %v1232_v27  ;;  %v1244_v23 = vrot.slane %v12634_v56, 5  ;;  %v1240_v26 = vrot.slane %v1238_v59, 4  ;;  %1310 = vrot.lane.b32.xlu0 %v1224_v14, %s15080_s30  ;;  %644 = vst.msk [vmem:[#allocation3 + $0xf0] sm:$0xf] %vm613_vm2, %v12884_v24 }
  0x5c   : > { %1795 = vmatpush1.bf16.msra.mxu0 %v11698_v25  ;;  %v806_v28 = vrot.slane %v804_v13, 4  ;;  %v777_v33 = vor.u32 %v776_v43, %v12814_v44  ;;  %v1243_v34 = vrot.slane %v1241_v62, 4  ;;  %v810_v27 = vshll.u32 %v12640_v58, 16  ;;  %v11701_v13 = vld [vmem:[%s15100_s0 + $0x60] sm:$0xff]  }
  0x5d   : > { %1798 = vmatprep.subr.bf16.mxu0 %v12340_v0  ;;  %987 = vrot.lane.b32.xlu1 %v753_v46, %s12342_s22  ;;  %v796_v9 = vrot.slane %v794_v20, 4  ;;  %v743_v39 = vsel %vm12575_vm6, %v738_v50, %v12737_v49  ;;  %v1247_v42 = vrot.slane %v12637_v57, 5  ;;  %v820_v45 = vshll.u32 %v12650_v63, 16 }
  0x5e   : > { %v824_v48 = vshrl.u32 %v12650_v63, 16  ;;  %v12896_v25 = vrot.slane %v787_v17, 4  ;;  %v807_v54 = vor.u32 %v806_v28, %v12862_v18  ;;  %v830_v49 = vshll.u32 %v12660_v4, 16 }
  0x5f   : > { %v797_v55 = vor.u32 %v796_v9, %v12858_v3  ;;  %v12900_v14 = vrot.slane %v820_v45, 5  ;;  %985 = vrot.lane.b32.xlu0 %v743_v39, %s12342_s22  ;;  %v12906_v50 = vrot.slane %v777_v33, 4  ;;  %v12908_v43 = vrot.slane %v810_v27, 5 }
  0x60   : > { %1799 = vmatpush2.bf16.msra.mxu0 %v11699_v36  ;;  %v826_v46 = vrot.slane %v824_v48, 4  ;;  %v1250_v6 = vrot.slane %v12640_v58, 5  ;;  %v814_v36 = vshrl.u32 %v12640_v58, 16  ;;  %v1230_v17 = vsel %vm12527_vm5, %v12785_v19, %v1229_v16 }
  0x61   : > { %1800 = vmatprep.subr.bf16.mxu0 %v12340_v0  ;;  %1316 = vrot.lane.b32.xlu1 %v1233_v22, %s15080_s30  ;;  %v773_v20 = vsel %vm12575_vm6, %v768_v60, %v12814_v44  ;;  %v1249_v22 = vrot.slane %v1247_v42, 4  ;;  %v1246_v58 = vrot.slane %v1244_v23, 4  ;;  %v12927_v28 = vrot.slane %v807_v54, 4 }
  0x62   : > { %v827_v33 = vor.u32 %v826_v46, %v12900_v14  ;;  %v1253_v37 = vrot.slane %v12650_v63, 5  ;;  %v840_v27 = vshll.u32 %v12673_v11, 16  ;;  %v1236_v16 = vsel %vm12527_vm5, %v12832_v61, %v1235_v40 }
  0x63   : > { %v12937_v19 = vrot.slane %v797_v55, 4  ;;  %v12939_v44 = vrot.slane %v830_v49, 5  ;;  %v844_v60 = vshrl.u32 %v12673_v11, 16  ;;  %1314 = vrot.lane.b32.xlu0 %v1230_v17, %s15080_s30  ;;  %v763_v47 = vsel %vm12575_vm6, %v12856_v15, %v12781_v21 }
  0x64   : > { %1801 = vmatpush2.bf16.msra.mxu0 %v11700_v35  ;;  %v1239_v40 = vsel %vm12527_vm5, %v12845_v30, %v1238_v59  ;;  %v816_v61 = vrot.slane %v814_v36, 4  ;;  %v834_v9 = vshrl.u32 %v12660_v4, 16  ;;  %v11702_v35 = vld [vmem:[%s15100_s0 + $0x58] sm:$0xff]   ;;  %v12962_v39 = vsel %vm12527_vm5, %v1240_v26, %v1241_v62 }
  0x65   : > { %1802 = vmatprep.subr.bf16.mxu0 %v12340_v0  ;;  %991 = vrot.lane.b32.xlu1 %v773_v20, %s12342_s22  ;;  %v1256_v21 = vrot.slane %v12660_v4, 5  ;;  %v12965_v52 = vrot.slane %v840_v27, 5  ;;  %v846_v15 = vrot.slane %v844_v60, 4  ;;  %v12967_v45 = vrot.slane %v827_v33, 4 }
  0x66   : > { %v12971_v59 = vrot.slane %v1253_v37, 4  ;;  %v1252_v30 = vrot.slane %v1250_v6, 4  ;;  %v836_v48 = vrot.slane %v834_v9, 4  ;;  %v1245_v53 = vsel %vm12527_vm5, %v1243_v34, %v1244_v23 }
  0x67   : > { %v850_v62 = vshll.u32 %v12676_v12, 16  ;;  %v860_v26 = vshll.u32 %v12711_v32, 16  ;;  %v864_v54 = vshrl.u32 %v12711_v32, 16  ;;  %989 = vrot.lane.b32.xlu0 %v763_v47, %s12342_s22  ;;  %v793_v56 = vsel %vm12575_vm6, %v12896_v25, %v12858_v3 }
  0x68   : > { %1803 = vmatpush2.bf16.msra.mxu0 %v11701_v13  ;;  %v783_v23 = vsel %vm12575_vm6, %v12906_v50, %v12821_v51  ;;  %v817_v34 = vor.u32 %v816_v61, %v12908_v43  ;;  %v1259_v55 = vrot.slane %v12673_v11, 5  ;;  %v847_v46 = vor.u32 %v846_v15, %v12965_v52  ;;  %v11703_v51 = vld [vmem:[%s15100_s0 + $0x50] sm:$0xff]  }
  0x69   : > { %1804 = vmatprep.subr.bf16.mxu0 %v12340_v0  ;;  %1320 = vrot.lane.b32.xlu1 %v1239_v40, %s15080_s30  ;;  %v1262_v49 = vrot.slane %v12676_v12, 5  ;;  %v12995_v36 = vrot.slane %v860_v26, 5  ;;  %v866_v13 = vrot.slane %v864_v54, 4  ;;  %v837_v17 = vor.u32 %v836_v48, %v12939_v44 }
  0x6a   : > { %v870_v3 = vshll.u32 %v12722_v38, 16  ;;  %v854_v25 = vshrl.u32 %v12676_v12, 16  ;;  %v1265_v20 = vrot.slane %v12711_v32, 5  ;;  %v13006_v50 = vsel %vm12527_vm5, %v1249_v22, %v1250_v6 }
  0x6b   : > { %v13012_v33 = vsel %vm12527_vm5, %v1246_v58, %v1247_v42  ;;  %v1268_v27 = vrot.slane %v12722_v38, 5  ;;  %v1264_v32 = vrot.slane %v1262_v49, 4  ;;  %1318 = vrot.lane.b32.xlu0 %v1236_v16, %s15080_s30  ;;  %v13020_v60 = vrot.slane %v817_v34, 4  ;;  %v11704_v42 = vld [vmem:[%s15100_s0 + $0x48] sm:$0xff]  }
  0x6c   : > { %1805 = vmatpush2.bf16.msra.mxu0 %v11702_v35  ;;  %v13022_v6 = vrot.slane %v850_v62, 5  ;;  %v867_v57 = vor.u32 %v866_v13, %v12995_v36  ;;  %v1267_v22 = vrot.slane %v1265_v20, 4  ;;  %v13028_v58 = vrot.slane %v847_v46, 4 }
  0x6d   : > { %1806 = vmatprep.subr.bf16.mxu0 %v12340_v0  ;;  %995 = vrot.lane.b32.xlu1 %v793_v56, %s12342_s22  ;;  %v13032_v47 = vrot.slane %v1259_v55, 4  ;;  %v13036_v16 = vrot.slane %v1256_v21, 4  ;;  %v13040_v40 = vsel %vm12527_vm5, %v1264_v32, %v1265_v20  ;;  %v813_v61 = vsel %vm12575_vm6, %v12927_v28, %v12908_v43 }
  0x6e   : > { %v13046_v9 = vrot.slane %v837_v17, 4  ;;  %v13048_v35 = vrot.slane %v870_v3, 5  ;;  %v13052_v15 = vsel %vm12527_vm5, %v1267_v22, %v1268_v27  ;;  %v803_v48 = vsel %vm12575_vm6, %v12937_v19, %v12862_v18  ;;  %v11705_v18 = vld [vmem:[%s15100_s0 + $0x40] sm:$0xff]   ;;  %s11382_s0 = sshll.u32 %s12327_s27, 4  ;;  %s12346_s27 = smov [#allocation8]  }
  0x6f   : > { %v13058_v62 = vrot.slane %v854_v25, 4  ;;  %v880_v26 = vshll.u32 %v12751_v1, 16  ;;  %v1271_v43 = vrot.slane %v12751_v1, 5  ;;  %993 = vrot.lane.b32.xlu0 %v783_v23, %s12342_s22  ;;  %v13065_v28 = vrot.slane %v867_v57, 4  ;;  %s15012_s24 = scalar_lea.hbm %s15075_s17, %s11382_s0 }
  0x70   : > { %1807 = vmatpush2.bf16.msra.mxu0 %v11703_v51  ;;  %v890_v54 = vshll.u32 %v12757_v8, 16  ;;  %v1274_v56 = vrot.slane %v12757_v8, 5  ;;  %v1270_v34 = vrot.slane %v1268_v27, 4  ;;  %v13076_v19 = vsel %vm12527_vm5, %v1252_v30, %v1253_v37 }
  0x71   : > { %1808 = vmatprep.subr.bf16.mxu0 %v12340_v0  ;;  %1324 = vrot.lane.b32.xlu1 %v1245_v53, %s15080_s30  ;;  %v1273_v23 = vrot.slane %v1271_v43, 4  ;;  %v900_v53 = vshll.u32 %v12791_v29, 16  ;;  %v904_v46 = vshrl.u32 %v12791_v29, 16  ;;  %v833_v13 = vsel %vm12575_vm6, %v12967_v45, %v12939_v44 }
  0x72   : > { %v13089_v63 = vsel %vm12527_vm5, %v12971_v59, %v1256_v21  ;;  %v13093_v37 = vsel %vm12527_vm5, %v1270_v34, %v1271_v43  ;;  %v910_v30 = vshll.u32 %v12799_v41, 16  ;;  %v884_v17 = vshrl.u32 %v12751_v1, 16 }
  0x73   : > { %v13099_v3 = vsel %vm12527_vm5, %v1273_v23, %v1274_v56  ;;  %v13101_v44 = vrot.slane %v900_v53, 5  ;;  %v906_v4 = vrot.slane %v904_v46, 4  ;;  %1322 = vrot.lane.b32.xlu0 %v12962_v39, %s15080_s30  ;;  %v13107_v21 = vrot.slane %v890_v54, 5 }
  0x74   : > { %1809 = vmatpush2.bf16.msra.mxu0 %v11704_v42  ;;  %v13109_v45 = vrot.slane %v910_v30, 5  ;;  %v894_v59 = vshrl.u32 %v12757_v8, 16  ;;  %v1277_v25 = vrot.slane %v12791_v29, 5  ;;  %v823_v20 = vsel %vm12575_vm6, %v13020_v60, %v12900_v14 }
  0x75   : > { %1810 = vmatprep.subr.bf16.mxu0 %v12340_v0  ;;  %999 = vrot.lane.b32.xlu1 %v813_v61, %s12342_s22  ;;  %v907_v51 = vor.u32 %v906_v4, %v13101_v44  ;;  %v1280_v27 = vrot.slane %v12799_v41, 5  ;;  %v1276_v39 = vrot.slane %v1274_v56, 4  ;;  %v853_v32 = vsel %vm12575_vm6, %v13028_v58, %v13022_v6 }
  0x76   : > { %v896_v57 = vrot.slane %v894_v59, 4  ;;  %v1279_v22 = vrot.slane %v1277_v25, 4  ;;  %v920_v8 = vshll.u32 %v12836_v2, 16  ;;  %v924_v60 = vshrl.u32 %v12836_v2, 16 }
  0x77   : > { %v13124_v29 = vrot.slane %v907_v51, 4  ;;  %v13128_v14 = vsel %vm12527_vm5, %v1276_v39, %v1277_v25  ;;  %v930_v42 = vshll.u32 %v12839_v5, 16  ;;  %997 = vrot.lane.b32.xlu0 %v803_v48, %s12342_s22  ;;  %v914_v56 = vshrl.u32 %v12799_v41, 16 }
  0x78   : > { %1811 = vmatpush2.bf16.msra.mxu0 %v11705_v18  ;;  %v897_v61 = vor.u32 %v896_v57, %v13107_v21  ;;  %v13138_v43 = vsel %vm12527_vm5, %v1279_v22, %v1280_v27  ;;  %v13140_v54 = vrot.slane %v920_v8, 5  ;;  %v926_v18 = vrot.slane %v924_v60, 4 }
  0x79   : > { %1328 = vrot.lane.b32.xlu1 %v13006_v50, %s15080_s30  ;;  %v913_v34 = vsel %vm12575_vm6, %v13124_v29, %v13109_v45  ;;  %v13147_v48 = vrot.slane %v930_v42, 5  ;;  %v1283_v50 = vrot.slane %v12836_v2, 5  ;;  %v916_v53 = vrot.slane %v914_v56, 4  ;;  %v13184_v56 = vld [vmem:[%s12520_s20 + $0x7c] sm:$0x7]  ;;  %s15108_s20 = smov 32  }
  0x7a   : > { %v13150_v23 = vrot.slane %v897_v61, 4  ;;  %v1286_v46 = vrot.slane %v12839_v5, 5  ;;  %v1282_v30 = vrot.slane %v1280_v27, 4  ;;  %v927_v4 = vor.u32 %v926_v18, %v13140_v54  ;;  %646 = vst.msk [vmem:[#allocation3 + $0xf8] sm:$0x3] %vm645_vm9, %v13184_v56 }
  0x7b   : > { %v1285_v59 = vrot.slane %v1283_v50, 4  ;;  %v940_v41 = vshll.u32 %v12872_v10, 16  ;;  %v944_v25 = vshrl.u32 %v12872_v10, 16  ;;  %1326 = vrot.lane.b32.xlu0 %v13012_v33, %s15080_s30  ;;  %v917_v51 = vor.u32 %v916_v53, %v13109_v45 }
  0x7c   : > { %v903_v2 = vsel %vm12575_vm6, %v13150_v23, %v13101_v44  ;;  %v13166_v27 = vsel %vm12527_vm5, %v1282_v30, %v1283_v50  ;;  %v950_v39 = vshll.u32 %v12884_v24, 16  ;;  %v13169_v57 = vrot.slane %v927_v4, 4 }
  0x7d   : > { %1003 = vrot.lane.b32.xlu1 %v833_v13, %s12342_s22  ;;  %v13173_v33 = vsel %vm12527_vm5, %v1285_v59, %v1286_v46  ;;  %v13175_v13 = vrot.slane %v940_v41, 5  ;;  %v946_v22 = vrot.slane %v944_v25, 4  ;;  %v13177_v8 = vrot.slane %v917_v51, 4 }
  0x7e   : > { %v13179_v60 = vrot.slane %v950_v39, 5  ;;  %v934_v42 = vshrl.u32 %v12839_v5, 16  ;;  %v1289_v61 = vrot.slane %v12872_v10, 5  ;;  %v933_v18 = vsel %vm12575_vm6, %v13169_v57, %v13147_v48 }
  0x7f   : > { %v947_v50 = vor.u32 %v946_v22, %v13175_v13  ;;  %v1292_v53 = vrot.slane %v12884_v24, 5  ;;  %v1288_v30 = vrot.slane %v1286_v46, 4  ;;  %1001 = vrot.lane.b32.xlu0 %v823_v20, %s12342_s22  ;;  %v857_v5 = vor.u32 %v13058_v62, %v13022_v6 }
  0x80   : > { %v923_v10 = vsel %vm12575_vm6, %v13177_v8, %v13140_v54  ;;  %v936_v4 = vrot.slane %v934_v42, 4  ;;  %v1291_v59 = vrot.slane %v1289_v61, 4  ;;  %v882_v41 = vrot.slane %v880_v26, 5 }
  0x81   : > { %1332 = vrot.lane.b32.xlu1 %v13089_v63, %s15080_s30  ;;  %v948_v25 = vrot.slane %v947_v50, 4  ;;  %v13205_v20 = vsel %vm12527_vm5, %v1288_v30, %v1289_v61  ;;  %v954_v63 = vshrl.u32 %v12884_v24, 16  ;;  %v874_v46 = vshrl.u32 %v12722_v38, 16 }
  0x82   : > { %v937_v62 = vor.u32 %v936_v4, %v13147_v48  ;;  %v1293_v51 = vsel %vm12527_vm5, %v1291_v59, %v1292_v53  ;;  %v1295_v54 = vrot.slane %v13184_v56, 5  ;;  %v960_v39 = vshll.u32 %v13184_v56, 16 }
  0x83   : > { %v953_v26 = vsel %vm12575_vm6, %v948_v25, %v13179_v60  ;;  %v956_v57 = vrot.slane %v954_v63, 4  ;;  %v1294_v22 = vrot.slane %v1292_v53, 4  ;;  %1330 = vrot.lane.b32.xlu0 %v13076_v19, %s15080_s30  ;;  %v858_v38 = vrot.slane %v857_v5, 4 }
  0x84   : > { %v886_v24 = vrot.slane %v884_v17, 4  ;;  %v938_v48 = vrot.slane %v937_v62, 4  ;;  %v843_v8 = vsel %vm12575_vm6, %v13046_v9, %v12965_v52  ;;  %v1263_v19 = vsel %vm12527_vm5, %v13032_v47, %v1262_v49 }
  0x85   : > { %1007 = vrot.lane.b32.xlu1 %v853_v32, %s12342_s22  ;;  %v957_v42 = vor.u32 %v956_v57, %v13179_v60  ;;  %v13241_v1 = vsel %vm12527_vm5, %v1294_v22, %v1295_v54  ;;  %v962_v58 = vrot.slane %v960_v39, 5  ;;  %v876_v49 = vrot.slane %v874_v46, 4 }
  0x86   : > { %v943_v6 = vsel %vm12575_vm6, %v938_v48, %v13175_v13  ;;  %v887_v12 = vor.u32 %v886_v24, %v882_v41  ;;  %v1260_v47 = vsel %vm12527_vm5, %v13036_v16, %v1259_v55  ;;  %v873_v9 = vsel %vm12575_vm6, %v13065_v28, %v13048_v35 }
  0x87   : > { %v958_v52 = vrot.slane %v957_v42, 4  ;;  %1005 = vrot.lane.b32.xlu0 %v843_v8, %s12342_s22  ;;  %v863_v11 = vsel %vm12575_vm6, %v858_v38, %v12995_v36  ;;  %v877_v13 = vor.u32 %v876_v49, %v13048_v35  ;;  %v1297_v29 = vrot.slane %v1295_v54, 4 }
  0x88   : > { %v888_v32 = vrot.slane %v887_v12, 4  ;;  %vm2101_vm2 = vcmask 519168   ;;  %vm4498_vm9 = vcmask 261120  }
  0x89   : > { %1336 = vrot.lane.b32.xlu1 %v1263_v19, %s15080_s30  ;;  %v963_v17 = vsel %vm12575_vm6, %v958_v52, %v962_v58  ;;  %v878_v16 = vrot.slane %v877_v13, 4 }
  0x8a   : > { %v893_v55 = vsel %vm12575_vm6, %v888_v32, %v13107_v21 }
  0x8b   : > { %1334 = vrot.lane.b32.xlu0 %v1260_v47, %s15080_s30  ;;  %v883_v36 = vsel %vm12575_vm6, %v878_v16, %v882_v41 }
  0x8d   : > { %1011 = vrot.lane.b32.xlu1 %v873_v9, %s12342_s22 }
  0x8f   : > { %1009 = vrot.lane.b32.xlu0 %v863_v11, %s12342_s22 }
  0x91   : > { %1340 = vrot.lane.b32.xlu1 %v13052_v15, %s15080_s30 }
  0x93   : > { %1338 = vrot.lane.b32.xlu0 %v13040_v40, %s15080_s30  ;;  %v964_v40 = vshrl.u32 %v13184_v56, 16 }
  0x95   : > { %1015 = vrot.lane.b32.xlu1 %v893_v55, %s12342_s22  ;;  %v966_v35 = vrot.slane %v964_v40, 4 }
  0x97   : > { %1013 = vrot.lane.b32.xlu0 %v883_v36, %s12342_s22  ;;  %v967_v15 = vor.u32 %v966_v35, %v962_v58 }
  0x99   : > { %1344 = vrot.lane.b32.xlu1 %v13099_v3, %s15080_s30  ;;  %v968_v3 = vrot.slane %v967_v15, 4 }
  0x9b   : > { %1342 = vrot.lane.b32.xlu0 %v13093_v37, %s15080_s30  ;;  %v11725_v37 = vld [vmem:[%s15105_s3 + $0x30] sm:$0xff]  }
  0x9d   : > { %1019 = vrot.lane.b32.xlu1 %v913_v34, %s12342_s22 }
  0x9f   : > { %1017 = vrot.lane.b32.xlu0 %v903_v2, %s12342_s22 }
  0xa1   : > { %1348 = vrot.lane.b32.xlu1 %v13138_v43, %s15080_s30 }
  0xa3   : > { %1346 = vrot.lane.b32.xlu0 %v13128_v14, %s15080_s30 }
  0xa5   : > { %1023 = vrot.lane.b32.xlu1 %v933_v18, %s12342_s22 }
  0xa7   : > { %1021 = vrot.lane.b32.xlu0 %v923_v10, %s12342_s22 }
  0xa9   : > { %1352 = vrot.lane.b32.xlu1 %v13173_v33, %s15080_s30 }
  0xab   : > { %1350 = vrot.lane.b32.xlu0 %v13166_v27, %s15080_s30  ;;  %v1299_v28 = vpop.permute.xlu1 %1298 }
  0xad   : > { %1027 = vrot.lane.b32.xlu1 %v953_v26, %s12342_s22 }
  0xaf   : > { %1025 = vrot.lane.b32.xlu0 %v943_v6, %s12342_s22  ;;  %v1301_v44 = vpop.permute.xlu1 %1300 }
  0xb0   : > { %v970_v21 = vpop.permute.xlu0 %969 }
  0xb1   : > { %1356 = vrot.lane.b32.xlu1 %v1293_v51, %s15080_s30  ;;  %v1033_v45 = vrot.slane %v970_v21, 4 }
  0xb3   : > { %1354 = vrot.lane.b32.xlu0 %v13205_v20, %s15080_s30  ;;  %v1066_v14 = vsel %vm1065_vm11, %v1033_v45, %v970_v21 }
  0xb4   : > { %1133 = vst.msk [vmem:[#allocation3] sm:$0xff] %vm13305_vm10, %v1066_v14  ;;  %v972_v43 = vpop.permute.xlu0 %971 }
  0xb5   : > { %1031 = vrot.lane.b32.xlu1 %v968_v3, %s12342_s22  ;;  %1395 = vst.msk [vmem:[#allocation3 + $0x4] sm:$0xf] %vm1394_vm12, %v1299_v28  ;;  %v1034_v23 = vrot.slane %v972_v43, 4 }
  0xb7   : > { %v976_v34 = vpop.permute.xlu1 %975  ;;  %1029 = vrot.lane.b32.xlu0 %v963_v17, %s12342_s22  ;;  %v1067_v27 = vsel %vm1065_vm11, %v1034_v23, %v972_v43 }
  0xb8   : > { %v1036_v2 = vrot.slane %v976_v34, 4  ;;  %1134 = vst.msk [vmem:[#allocation3 + $0x8] sm:$0xff] %vm13305_vm10, %v1067_v27 }
  0xb9   : > { %1360 = vrot.lane.b32.xlu1 %v1297_v29, %s15080_s30  ;;  %v974_v60 = vpop.permute.xlu0 %973  ;;  %1396 = vst.msk [vmem:[#allocation3 + $0xc] sm:$0xf] %vm1394_vm12, %v1301_v44 }
  0xba   : > { %v1069_v33 = vsel %vm1065_vm11, %v1036_v2, %v976_v34  ;;  %v1035_v56 = vrot.slane %v974_v60, 4 }
  0xbb   : > { %1136 = vst.msk [vmem:[#allocation3 + $0x18] sm:$0xff] %vm13305_vm10, %v1069_v33  ;;  %v1305_v61 = vpop.permute.xlu1 %1304  ;;  %1358 = vrot.lane.b32.xlu0 %v13241_v1, %s15080_s30 }
  0xbc   : > { %1398 = vst.msk [vmem:[#allocation3 + $0x1c] sm:$0xf] %vm1394_vm12, %v1305_v61  ;;  %v1068_v18 = vsel %vm1065_vm11, %v1035_v56, %v974_v60  ;;  %v1428_v5 = vld [vmem:[#allocation3] sm:$0xff] }
  0xbd   : > { %1135 = vst.msk [vmem:[#allocation3 + $0x10] sm:$0xff] %vm13305_vm10, %v1068_v18  ;;  %v1303_v50 = vpop.permute.xlu0 %1302 }
  0xbe   : > { %1397 = vst.msk [vmem:[#allocation3 + $0x14] sm:$0xf] %vm1394_vm12, %v1303_v50 }
  0xbf   : > { %v980_v53 = vpop.permute.xlu1 %979 }
  0xc0   : > { %v1038_v30 = vrot.slane %v980_v53, 4  ;;  %v1429_v4 = vld [vmem:[#allocation3 + $0x8] sm:$0xff] }
  0xc1   : > { %v978_v41 = vpop.permute.xlu0 %977  ;;  %v10728_v63 = vcombine.high %v1428_v5, %v1429_v4  ;;  %v10727_v46 = vcombine.low %v1428_v5, %v1429_v4 }
  0xc2   : > { %v1071_v10 = vsel %vm1065_vm11, %v1038_v30, %v980_v53  ;;  %v1037_v20 = vrot.slane %v978_v41, 4 }
  0xc3   : > { %v1431_v59 = vld [vmem:[#allocation3 + $0x18] sm:$0xff]  ;;  %1138 = vst.msk [vmem:[#allocation3 + $0x28] sm:$0xff] %vm13305_vm10, %v1071_v10  ;;  %v1309_v25 = vpop.permute.xlu1 %1308  ;;  %10774 = vmatprep.mubr.msk.bf16.mxu0 %vm1731_vm13, %v10728_v63 }
  0xc4   : > { %1400 = vst.msk [vmem:[#allocation3 + $0x2c] sm:$0xf] %vm1394_vm12, %v1309_v25  ;;  %v1070_v62 = vsel %vm1065_vm11, %v1037_v20, %v978_v41  ;;  %1813 = vmatmul.mubr.bf16.vlgmr.msra.gmra.mxu0 %v10727_v46 }
  0xc5   : > { %v1430_v51 = vld [vmem:[#allocation3 + $0x10] sm:$0xff]  ;;  %1137 = vst.msk [vmem:[#allocation3 + $0x20] sm:$0xff] %vm13305_vm10, %v1070_v62  ;;  %v1307_v54 = vpop.permute.xlu0 %1306 }
  0xc6   : > { %1399 = vst.msk [vmem:[#allocation3 + $0x24] sm:$0xf] %vm1394_vm12, %v1307_v54  ;;  %v10730_v39 = vcombine.high %v1430_v51, %v1431_v59  ;;  %v10729_v19 = vcombine.low %v1430_v51, %v1431_v59 }
  0xc7   : > { %v984_v26 = vpop.permute.xlu1 %983 }
  0xc8   : > { %v1040_v57 = vrot.slane %v984_v26, 4  ;;  %10775 = vmatprep.mubr.msk.bf16.mxu0 %vm1731_vm13, %v10730_v39 }
  0xc9   : > { %v982_v24 = vpop.permute.xlu0 %981 }
  0xca   : > { %v1073_v22 = vsel %vm1065_vm11, %v1040_v57, %v984_v26  ;;  %v1039_v8 = vrot.slane %v982_v24, 4 }
  0xcb   : > { %v1433_v38 = vld [vmem:[#allocation3 + $0x28] sm:$0xff]  ;;  %1140 = vst.msk [vmem:[#allocation3 + $0x38] sm:$0xff] %vm13305_vm10, %v1073_v22  ;;  %v1313_v48 = vpop.permute.xlu1 %1312 }
  0xcc   : > { %1402 = vst.msk [vmem:[#allocation3 + $0x3c] sm:$0xf] %vm1394_vm12, %v1313_v48  ;;  %v1072_v42 = vsel %vm1065_vm11, %v1039_v8, %v982_v24  ;;  %1821 = vmatmul.mubr.bf16.gmra.mxu0 %v10729_v19 }
  0xcd   : > { %v1432_v1 = vld [vmem:[#allocation3 + $0x20] sm:$0xff]  ;;  %1139 = vst.msk [vmem:[#allocation3 + $0x30] sm:$0xff] %vm13305_vm10, %v1072_v42  ;;  %v1311_v6 = vpop.permute.xlu0 %1310 }
  0xce   : > { %1401 = vst.msk [vmem:[#allocation3 + $0x34] sm:$0xf] %vm1394_vm12, %v1311_v6  ;;  %v10732_v52 = vcombine.high %v1432_v1, %v1433_v38  ;;  %v10731_v11 = vcombine.low %v1432_v1, %v1433_v38 }
  0xcf   : > { %v988_v58 = vpop.permute.xlu1 %987 }
  0xd0   : > { %v1042_v12 = vrot.slane %v988_v58, 4  ;;  %10776 = vmatprep.mubr.msk.bf16.mxu0 %vm1731_vm13, %v10732_v52 }
  0xd1   : > { %v986_v9 = vpop.permute.xlu0 %985 }
  0xd2   : > { %v1075_v49 = vsel %vm1065_vm11, %v1042_v12, %v988_v58  ;;  %v1041_v32 = vrot.slane %v986_v9, 4 }
  0xd3   : > { %v1435_v47 = vld [vmem:[#allocation3 + $0x38] sm:$0xff]  ;;  %1142 = vst.msk [vmem:[#allocation3 + $0x48] sm:$0xff] %vm13305_vm10, %v1075_v49  ;;  %v1317_v17 = vpop.permute.xlu1 %1316 }
  0xd4   : > { %1404 = vst.msk [vmem:[#allocation3 + $0x4c] sm:$0xf] %vm1394_vm12, %v1317_v17  ;;  %v1074_v13 = vsel %vm1065_vm11, %v1041_v32, %v986_v9  ;;  %1829 = vmatmul.mubr.bf16.gmra.mxu0 %v10731_v11 }
  0xd5   : > { %v1434_v55 = vld [vmem:[#allocation3 + $0x30] sm:$0xff]  ;;  %1141 = vst.msk [vmem:[#allocation3 + $0x40] sm:$0xff] %vm13305_vm10, %v1074_v13  ;;  %v1315_v16 = vpop.permute.xlu0 %1314 }
  0xd6   : > { %1403 = vst.msk [vmem:[#allocation3 + $0x44] sm:$0xf] %vm1394_vm12, %v1315_v16  ;;  %v10734_v40 = vcombine.high %v1434_v55, %v1435_v47  ;;  %v10733_v45 = vcombine.low %v1434_v55, %v1435_v47 }
  0xd7   : > { %v992_v36 = vpop.permute.xlu1 %991 }
  0xd8   : > { %v1044_v35 = vrot.slane %v992_v36, 4  ;;  %10777 = vmatprep.mubr.msk.bf16.mxu0 %vm1731_vm13, %v10734_v40 }
  0xd9   : > { %v990_v28 = vpop.permute.xlu0 %989 }
  0xda   : > { %v1077_v15 = vsel %vm1065_vm11, %v1044_v35, %v992_v36  ;;  %v1043_v21 = vrot.slane %v990_v28, 4 }
  0xdb   : > { %1144 = vst.msk [vmem:[#allocation3 + $0x58] sm:$0xff] %vm13305_vm10, %v1077_v15  ;;  %v1321_v3 = vpop.permute.xlu1 %1320  ;;  %v1437_v44 = vld [vmem:[#allocation3 + $0x48] sm:$0xff] }
  0xdc   : > { %1406 = vst.msk [vmem:[#allocation3 + $0x5c] sm:$0xf] %vm1394_vm12, %v1321_v3  ;;  %v1076_v29 = vsel %vm1065_vm11, %v1043_v21, %v990_v28  ;;  %1837 = vmatmul.mubr.bf16.gmra.mxu0 %v10733_v45 }
  0xdd   : > { %v1436_v14 = vld [vmem:[#allocation3 + $0x40] sm:$0xff]  ;;  %1143 = vst.msk [vmem:[#allocation3 + $0x50] sm:$0xff] %vm13305_vm10, %v1076_v29  ;;  %v1319_v43 = vpop.permute.xlu0 %1318 }
  0xde   : > { %1405 = vst.msk [vmem:[#allocation3 + $0x54] sm:$0xf] %vm1394_vm12, %v1319_v43  ;;  %v10736_v23 = vcombine.high %v1436_v14, %v1437_v44  ;;  %v10735_v18 = vcombine.low %v1436_v14, %v1437_v44 }
  0xdf   : > { %v996_v34 = vpop.permute.xlu1 %995 }
  0xe0   : > { %v1046_v2 = vrot.slane %v996_v34, 4  ;;  %10778 = vmatprep.mubr.msk.bf16.mxu0 %vm1731_vm13, %v10736_v23 }
  0xe1   : > { %v994_v33 = vpop.permute.xlu0 %993 }
  0xe2   : > { %v1079_v27 = vsel %vm1065_vm11, %v1046_v2, %v996_v34  ;;  %v1045_v56 = vrot.slane %v994_v33, 4 }
  0xe3   : > { %1146 = vst.msk [vmem:[#allocation3 + $0x68] sm:$0xff] %vm13305_vm10, %v1079_v27  ;;  %v1325_v60 = vpop.permute.xlu1 %1324  ;;  %v1439_v61 = vld [vmem:[#allocation3 + $0x58] sm:$0xff] }
  0xe4   : > { %1408 = vst.msk [vmem:[#allocation3 + $0x6c] sm:$0xf] %vm1394_vm12, %v1325_v60  ;;  %v1078_v50 = vsel %vm1065_vm11, %v1045_v56, %v994_v33  ;;  %1845 = vmatmul.mubr.bf16.gmra.mxu0 %v10735_v18 }
  0xe5   : > { %v1438_v53 = vld [vmem:[#allocation3 + $0x50] sm:$0xff]  ;;  %1145 = vst.msk [vmem:[#allocation3 + $0x60] sm:$0xff] %vm13305_vm10, %v1078_v50  ;;  %v1323_v30 = vpop.permute.xlu0 %1322 }
  0xe6   : > { %1407 = vst.msk [vmem:[#allocation3 + $0x64] sm:$0xf] %vm1394_vm12, %v1323_v30  ;;  %v10738_v10 = vcombine.high %v1438_v53, %v1439_v61  ;;  %v10737_v46 = vcombine.low %v1438_v53, %v1439_v61 }
  0xe7   : > { %v1000_v5 = vpop.permute.xlu1 %999 }
  0xe8   : > { %v1048_v4 = vrot.slane %v1000_v5, 4  ;;  %10779 = vmatprep.mubr.msk.bf16.mxu0 %vm1731_vm13, %v10738_v10 }
  0xe9   : > { %v998_v41 = vpop.permute.xlu0 %997 }
  0xea   : > { %v1081_v59 = vsel %vm1065_vm11, %v1048_v4, %v1000_v5  ;;  %v1047_v63 = vrot.slane %v998_v41, 4 }
  0xeb   : > { %1148 = vst.msk [vmem:[#allocation3 + $0x78] sm:$0xff] %vm13305_vm10, %v1081_v59  ;;  %v1329_v25 = vpop.permute.xlu1 %1328  ;;  %v1441_v20 = vld [vmem:[#allocation3 + $0x68] sm:$0xff] }
  0xec   : > { %1410 = vst.msk [vmem:[#allocation3 + $0x7c] sm:$0xf] %vm1394_vm12, %v1329_v25  ;;  %v1080_v62 = vsel %vm1065_vm11, %v1047_v63, %v998_v41  ;;  %1853 = vmatmul.mubr.bf16.gmra.mxu0 %v10737_v46 }
  0xed   : > { %v1440_v51 = vld [vmem:[#allocation3 + $0x60] sm:$0xff]  ;;  %1147 = vst.msk [vmem:[#allocation3 + $0x70] sm:$0xff] %vm13305_vm10, %v1080_v62  ;;  %v1327_v54 = vpop.permute.xlu0 %1326 }
  0xee   : > { %1409 = vst.msk [vmem:[#allocation3 + $0x74] sm:$0xf] %vm1394_vm12, %v1327_v54  ;;  %v10740_v39 = vcombine.high %v1440_v51, %v1441_v20  ;;  %v10739_v19 = vcombine.low %v1440_v51, %v1441_v20 }
  0xef   : > { %v1004_v26 = vpop.permute.xlu1 %1003 }
  0xf0   : > { %v1050_v57 = vrot.slane %v1004_v26, 4  ;;  %10780 = vmatprep.mubr.msk.bf16.mxu0 %vm1731_vm13, %v10740_v39 }
  0xf1   : > { %v1002_v38 = vpop.permute.xlu0 %1001 }
  0xf2   : > { %v1083_v22 = vsel %vm1065_vm11, %v1050_v57, %v1004_v26  ;;  %v1049_v48 = vrot.slane %v1002_v38, 4 }
  0xf3   : > { %1150 = vst.msk [vmem:[#allocation3 + $0x88] sm:$0xff] %vm13305_vm10, %v1083_v22  ;;  %v1333_v24 = vpop.permute.xlu1 %1332  ;;  %v1443_v8 = vld [vmem:[#allocation3 + $0x78] sm:$0xff] }
  0xf4   : > { %1412 = vst.msk [vmem:[#allocation3 + $0x8c] sm:$0xf] %vm1394_vm12, %v1333_v24  ;;  %v1082_v42 = vsel %vm1065_vm11, %v1049_v48, %v1002_v38  ;;  %1861 = vmatmul.mubr.bf16.gmra.mxu0 %v10739_v19 }
  0xf5   : > { %v1442_v1 = vld [vmem:[#allocation3 + $0x70] sm:$0xff]  ;;  %1149 = vst.msk [vmem:[#allocation3 + $0x80] sm:$0xff] %vm13305_vm10, %v1082_v42  ;;  %v1331_v6 = vpop.permute.xlu0 %1330 }
  0xf6   : > { %1411 = vst.msk [vmem:[#allocation3 + $0x84] sm:$0xf] %vm1394_vm12, %v1331_v6  ;;  %v10742_v52 = vcombine.high %v1442_v1, %v1443_v8  ;;  %v10741_v32 = vcombine.low %v1442_v1, %v1443_v8 }
  0xf7   : > { %v1008_v58 = vpop.permute.xlu1 %1007 }
  0xf8   : > { %v1052_v12 = vrot.slane %v1008_v58, 4  ;;  %10781 = vmatprep.mubr.msk.bf16.mxu0 %vm1731_vm13, %v10742_v52 }
  0xf9   : > { %v1006_v47 = vpop.permute.xlu0 %1005 }
  0xfa   : > { %v1085_v49 = vsel %vm1065_vm11, %v1052_v12, %v1008_v58  ;;  %v1051_v17 = vrot.slane %v1006_v47, 4 }
  0xfb   : > { %1152 = vst.msk [vmem:[#allocation3 + $0x98] sm:$0xff] %vm13305_vm10, %v1085_v49  ;;  %v1337_v9 = vpop.permute.xlu1 %1336  ;;  %v1445_v35 = vld [vmem:[#allocation3 + $0x88] sm:$0xff] }
  0xfc   : > { %1414 = vst.msk [vmem:[#allocation3 + $0x9c] sm:$0xf] %vm1394_vm12, %v1337_v9  ;;  %v1084_v11 = vsel %vm1065_vm11, %v1051_v17, %v1006_v47  ;;  %1869 = vmatmul.mubr.bf16.gmra.mxu0 %v10741_v32 }
  0xfd   : > { %1151 = vst.msk [vmem:[#allocation3 + $0x90] sm:$0xff] %vm13305_vm10, %v1084_v11  ;;  %v1335_v13 = vpop.permute.xlu0 %1334  ;;  %v11706_v55 = vld [vmem:[#allocation3 + $0x84] ss:$8 sps:$4 sm:$0xff]  }
  0xfe   : > { %1413 = vst.msk [vmem:[#allocation3 + $0x94] sm:$0xf] %vm1394_vm12, %v1335_v13  ;;  %10782 = vmatprep.mubr.msk.bf16.mxu0 %vm1731_vm13, %v11706_v55  ;;  %v1444_v40 = vld [vmem:[#allocation3 + $0x80] sm:$0xff] }
  0xff   : > { %v1012_v16 = vpop.permute.xlu1 %1011  ;;  %v10743_v21 = vcombine.low %v1444_v40, %v1445_v35 }
 0x100   : > { %v1054_v36 = vrot.slane %v1012_v16, 4 }
 0x101   : > { %v1010_v28 = vpop.permute.xlu0 %1009 }
 0x102   : > { %v1087_v15 = vsel %vm1065_vm11, %v1054_v36, %v1012_v16  ;;  %v1053_v44 = vrot.slane %v1010_v28, 4 }
 0x103   : > { %1154 = vst.msk [vmem:[#allocation3 + $0xa8] sm:$0xff] %vm13305_vm10, %v1087_v15  ;;  %v1341_v3 = vpop.permute.xlu1 %1340  ;;  %v1447_v2 = vld [vmem:[#allocation3 + $0x98] sm:$0xff] }
 0x104   : > { %1416 = vst.msk [vmem:[#allocation3 + $0xac] sm:$0xf] %vm1394_vm12, %v1341_v3  ;;  %v1086_v45 = vsel %vm1065_vm11, %v1053_v44, %v1010_v28  ;;  %1877 = vmatmul.mubr.bf16.gmra.mxu0 %v10743_v21 }
 0x105   : > { %1153 = vst.msk [vmem:[#allocation3 + $0xa0] sm:$0xff] %vm13305_vm10, %v1086_v45  ;;  %v1339_v29 = vpop.permute.xlu0 %1338  ;;  %v11708_v14 = vld [vmem:[#allocation3 + $0x94] ss:$8 sps:$4 sm:$0xff]  }
 0x106   : > { %1415 = vst.msk [vmem:[#allocation3 + $0xa4] sm:$0xf] %vm1394_vm12, %v1339_v29  ;;  %10783 = vmatprep.mubr.msk.bf16.mxu0 %vm1731_vm13, %v11708_v14  ;;  %v1446_v23 = vld [vmem:[#allocation3 + $0x90] sm:$0xff] }
 0x107   : > { %v1016_v43 = vpop.permute.xlu1 %1015  ;;  %v10745_v56 = vcombine.low %v1446_v23, %v1447_v2  ;;  %v11724_v2 = vld [vmem:[%s15105_s3 + $0x38] sm:$0xff]  }
 0x108   : > { %v1056_v34 = vrot.slane %v1016_v43, 4  ;;  %3072 = vmatpush1.bf16.msra.mxu1 %v11724_v2 }
 0x109   : > { %v1014_v33 = vpop.permute.xlu0 %1013  ;;  %3073 = vmatprep.subr.bf16.mxu1 %v12340_v0 }
 0x10a   : > { %v1089_v27 = vsel %vm1065_vm11, %v1056_v34, %v1016_v43  ;;  %v1055_v61 = vrot.slane %v1014_v33, 4 }
 0x10b   : > { %1156 = vst.msk [vmem:[#allocation3 + $0xb8] sm:$0xff] %vm13305_vm10, %v1089_v27  ;;  %v1345_v60 = vpop.permute.xlu1 %1344  ;;  %v1449_v4 = vld [vmem:[#allocation3 + $0xa8] sm:$0xff] }
 0x10c   : > { %1418 = vst.msk [vmem:[#allocation3 + $0xbc] sm:$0xf] %vm1394_vm12, %v1345_v60  ;;  %v1088_v18 = vsel %vm1065_vm11, %v1055_v61, %v1014_v33  ;;  %1885 = vmatmul.mubr.bf16.gmra.mxu0 %v10745_v56  ;;  %3074 = vmatpush1.bf16.msra.mxu1 %v11725_v37  ;;  %v11726_v27 = vld [vmem:[%s15105_s3 + $0x28] sm:$0xff]   ;;  %v11727_v33 = vld [vmem:[%s15105_s3 + $0x20] sm:$0xff]   ;;  %v11728_v60 = vld [vmem:[%s15105_s3 + $0x18] sm:$0xff]  }
 0x10d   : > { %1155 = vst.msk [vmem:[#allocation3 + $0xb0] sm:$0xff] %vm13305_vm10, %v1088_v18  ;;  %v1343_v50 = vpop.permute.xlu0 %1342  ;;  %v11710_v53 = vld [vmem:[#allocation3 + $0xa4] ss:$8 sps:$4 sm:$0xff]   ;;  %3075 = vmatprep.subr.bf16.mxu1 %v12340_v0  ;;  %v11729_v61 = vld [vmem:[%s15105_s3 + $0x10] sm:$0xff]  }
 0x10e   : > { %1417 = vst.msk [vmem:[#allocation3 + $0xb4] sm:$0xf] %vm1394_vm12, %v1343_v50  ;;  %10784 = vmatprep.mubr.msk.bf16.mxu0 %vm1731_vm13, %v11710_v53  ;;  %v1448_v10 = vld [vmem:[#allocation3 + $0xa0] sm:$0xff]  ;;  %v11730_v56 = vld [vmem:[%s15105_s3 + $0x8] sm:$0xff]  }
 0x10f   : > { %v1020_v30 = vpop.permute.xlu1 %1019  ;;  %v10747_v63 = vcombine.low %v1448_v10, %v1449_v4  ;;  %v11731_v18 = vld [vmem:[%s15105_s3] sm:$0xff]  }
 0x110   : > { %v1058_v5 = vrot.slane %v1020_v30, 4  ;;  %3076 = vmatpush1.bf16.msra.mxu1 %v11726_v27  ;;  %v13496_v50 = vld [vmem:[%s15106_s2] ss:$0 sm:$0xff] }
 0x111   : > { %v1018_v41 = vpop.permute.xlu0 %1017  ;;  %3077 = vmatprep.subr.bf16.mxu1 %v12340_v0 }
 0x112   : > { %v1091_v59 = vsel %vm1065_vm11, %v1058_v5, %v1020_v30  ;;  %v1057_v20 = vrot.slane %v1018_v41, 4  ;;  %v11732_v5 = vld [vmem:[%s15105_s3 + $0x58] sm:$0xff]  }
 0x113   : > { %1158 = vst.msk [vmem:[#allocation3 + $0xc8] sm:$0xff] %vm13305_vm10, %v1091_v59  ;;  %v1349_v25 = vpop.permute.xlu1 %1348  ;;  %v1451_v39 = vld [vmem:[#allocation3 + $0xb8] sm:$0xff] }
 0x114   : > { %1420 = vst.msk [vmem:[#allocation3 + $0xcc] sm:$0xf] %vm1394_vm12, %v1349_v25  ;;  %v1090_v46 = vsel %vm1065_vm11, %v1057_v20, %v1018_v41  ;;  %1893 = vmatmul.mubr.bf16.gmra.mxu0 %v10747_v63  ;;  %3078 = vmatpush1.bf16.msra.mxu1 %v11727_v33  ;;  %v11733_v20 = vld [vmem:[%s15105_s3 + $0x50] sm:$0xff]  }
 0x115   : > { %1157 = vst.msk [vmem:[#allocation3 + $0xc0] sm:$0xff] %vm13305_vm10, %v1090_v46  ;;  %v1347_v62 = vpop.permute.xlu0 %1346  ;;  %v11712_v51 = vld [vmem:[#allocation3 + $0xb4] ss:$8 sps:$4 sm:$0xff]   ;;  %3079 = vmatprep.subr.bf16.mxu1 %v12340_v0 }
 0x116   : > { %1419 = vst.msk [vmem:[#allocation3 + $0xc4] sm:$0xf] %vm1394_vm12, %v1347_v62  ;;  %v1450_v26 = vld [vmem:[#allocation3 + $0xb0] sm:$0xff]  ;;  %10785 = vmatprep.mubr.msk.bf16.mxu0 %vm1731_vm13, %v11712_v51 }
 0x117   : > { %v1024_v54 = vpop.permute.xlu1 %1023  ;;  %v10749_v24 = vcombine.low %v1450_v26, %v1451_v39 }
 0x118   : > { %v1060_v57 = vrot.slane %v1024_v54, 4  ;;  %3080 = vmatpush1.bf16.msra.mxu1 %v11728_v60 }
 0x119   : > { %v1022_v38 = vpop.permute.xlu0 %1021  ;;  %3081 = vmatprep.subr.bf16.mxu1 %v12340_v0 }
 0x11a   : > { %v1093_v22 = vsel %vm1065_vm11, %v1060_v57, %v1024_v54  ;;  %v1059_v8 = vrot.slane %v1022_v38, 4 }
 0x11b   : > { %1160 = vst.msk [vmem:[#allocation3 + $0xd8] sm:$0xff] %vm13305_vm10, %v1093_v22  ;;  %v1353_v48 = vpop.permute.xlu1 %1352  ;;  %v1453_v52 = vld [vmem:[#allocation3 + $0xc8] sm:$0xff] }
 0x11c   : > { %1422 = vst.msk [vmem:[#allocation3 + $0xdc] sm:$0xf] %vm1394_vm12, %v1353_v48  ;;  %v1092_v19 = vsel %vm1065_vm11, %v1059_v8, %v1022_v38  ;;  %1901 = vmatmul.mubr.bf16.gmra.mxu0 %v10749_v24  ;;  %3082 = vmatpush1.bf16.msra.mxu1 %v11729_v61  ;;  %v11734_v38 = vld [vmem:[%s15105_s3 + $0x48] sm:$0xff]  }
 0x11d   : > { %1159 = vst.msk [vmem:[#allocation3 + $0xd0] sm:$0xff] %vm13305_vm10, %v1092_v19  ;;  %v1351_v42 = vpop.permute.xlu0 %1350  ;;  %v11714_v1 = vld [vmem:[#allocation3 + $0xc4] ss:$8 sps:$4 sm:$0xff]   ;;  %3083 = vmatprep.subr.bf16.mxu1 %v12340_v0 }
 0x11e   : > { %1421 = vst.msk [vmem:[#allocation3 + $0xd4] sm:$0xf] %vm1394_vm12, %v1351_v42  ;;  %v1452_v58 = vld [vmem:[#allocation3 + $0xc0] sm:$0xff]  ;;  %10786 = vmatprep.mubr.msk.bf16.mxu0 %vm1731_vm13, %v11714_v1 }
 0x11f   : > { %v1028_v6 = vpop.permute.xlu1 %1027  ;;  %v10751_v9 = vcombine.low %v1452_v58, %v1453_v52 }
 0x120   : > { %v1062_v12 = vrot.slane %v1028_v6, 4  ;;  %3084 = vmatpush1.bf16.msra.mxu1 %v11730_v56 }
 0x121   : > { %v1026_v47 = vpop.permute.xlu0 %1025  ;;  %3085 = vmatprep.subr.bf16.mxu1 %v12340_v0 }
 0x122   : > { %v1095_v49 = vsel %vm1065_vm11, %v1062_v12, %v1028_v6  ;;  %v1061_v32 = vrot.slane %v1026_v47, 4 }
 0x123   : > { %1162 = vst.msk [vmem:[#allocation3 + $0xe8] sm:$0xff] %vm13305_vm10, %v1095_v49  ;;  %v1357_v17 = vpop.permute.xlu1 %1356  ;;  %v1455_v40 = vld [vmem:[#allocation3 + $0xd8] sm:$0xff] }
 0x124   : > { %1424 = vst.msk [vmem:[#allocation3 + $0xec] sm:$0xf] %vm1394_vm12, %v1357_v17  ;;  %v1094_v11 = vsel %vm1065_vm11, %v1061_v32, %v1026_v47  ;;  %1909 = vmatmul.mubr.bf16.gmra.mxu0 %v10751_v9  ;;  %3086 = vmatpush1.bf16.msra.mxu1 %v11731_v18  ;;  %v11735_v47 = vld [vmem:[%s15105_s3 + $0x40] sm:$0xff]  }
 0x125   : > { %1161 = vst.msk [vmem:[#allocation3 + $0xe0] sm:$0xff] %vm13305_vm10, %v1094_v11  ;;  %v1355_v13 = vpop.permute.xlu0 %1354  ;;  %v11716_v55 = vld [vmem:[#allocation3 + $0xd4] ss:$8 sps:$4 sm:$0xff]   ;;  %3095 = vmatprep.subr.bf16.mxu1 %v12340_v0 }
 0x126   : > { %1423 = vst.msk [vmem:[#allocation3 + $0xe4] sm:$0xf] %vm1394_vm12, %v1355_v13  ;;  %v1454_v36 = vld [vmem:[#allocation3 + $0xd0] sm:$0xff]  ;;  %10787 = vmatprep.mubr.msk.bf16.mxu0 %vm1731_vm13, %v11716_v55 }
 0x127   : > { %v1032_v16 = vpop.permute.xlu1 %1031  ;;  %v10753_v3 = vcombine.low %v1454_v36, %v1455_v40 }
 0x128   : > { %v1064_v35 = vrot.slane %v1032_v16, 4  ;;  %3096 = vmatpush2.bf16.msra.mxu1 %v11732_v5 }
 0x129   : > { %v1030_v28 = vpop.permute.xlu0 %1029  ;;  %3097 = vmatprep.subr.bf16.mxu1 %v12340_v0 }
 0x12a   : > { %v1097_v15 = vsel %vm1065_vm11, %v1064_v35, %v1032_v16  ;;  %v1063_v21 = vrot.slane %v1030_v28, 4 }
 0x12b   : > { %1167 = vst.msk [vmem:[#allocation3 + $0xf8] sm:$0x33] %vm1166_vm0, %v1097_v15  ;;  %v1361_v44 = vpop.permute.xlu1 %1360  ;;  %vm5027_vm0 = vcmask 778752  }
 0x12c   : > { %1427 = vst.msk [vmem:[#allocation3 + $0xfc] sm:$0x3] %vm1426_vm1, %v1361_v44  ;;  %v1096_v45 = vsel %vm1065_vm11, %v1063_v21, %v1030_v28  ;;  %1917 = vmatmul.mubr.bf16.gmra.mxu0 %v10753_v3  ;;  %v11720_v43 = vld [vmem:[#allocation3 + $0xe0] ss:$8 sps:$4 sm:$0xff]   ;;  %3098 = vmatpush2.bf16.msra.mxu1 %v11733_v20  ;;  %vm4689_vm11 = vcmask 253952  }
 0x12d   : > { %1163 = vst.msk [vmem:[#allocation3 + $0xf0] sm:$0xff] %vm13305_vm10, %v1096_v45  ;;  %v1359_v29 = vpop.permute.xlu0 %1358  ;;  %v11718_v14 = vld [vmem:[#allocation3 + $0xe4] ss:$8 sps:$4 sm:$0xff]   ;;  %3099 = vmatprep.subr.bf16.mxu1 %v12340_v0  ;;  %vm4673_vm10 = vcmask 257024  }
 0x12e   : > { %1425 = vst.msk [vmem:[#allocation3 + $0xf4] sm:$0xf] %vm1394_vm12, %v1359_v29  ;;  %10788 = vmatprep.mubr.msk.bf16.mxu0 %vm1731_vm13, %v11718_v14  ;;  %vm4898_vm12 = vcmask 519424  }
 0x130   : > { %3100 = vmatpush2.bf16.msra.mxu1 %v11734_v38 }
 0x131   : > { %3101 = vmatprep.subr.bf16.mxu1 %v12340_v0 }
 0x134   : > { %1925 = vmatmul.mubr.bf16.gmra.mxu0 %v11720_v43  ;;  %v11723_v23 = vld [vmem:[#allocation3 + $0xf0] ss:$8 sps:$4 sm:$0x3f]   ;;  %3102 = vmatpush2.bf16.msra.mxu1 %v11735_v47 }
 0x135   : > { %v11721_v34 = vld [vmem:[#allocation3 + $0xf4] ss:$8 sps:$4 sm:$0x3f]   ;;  %4307 = vmatprep.subr.bf16.mxu1 %v12340_v0 }
 0x136   : > { %10789 = vmatprep.mubr.msk.bf16.mxu0 %vm1731_vm13, %v11721_v34  ;;  %vm5011_vm13 = vcmask 781824  }
 0x13c   : > { %1933 = vmatmul.mubr.bf16.gmra.mxu0 %v11723_v23 }
 0x184   : > { %v1814_v53 = vpop.f32.mrf.mxu0 }
 0x185   : > { %v1815_v30 = vadd.f32 %v13496_v50, %v1814_v53 }
 0x186   : > { %v1816_v10 = vpop.f32.mrf.mxu0 }
 0x187   : > { %v1941_v4 = vmax.f32 %v1815_v30, 0.0 }
 0x188   : > { %v1817_v59 = vpop.f32.mrf.mxu0 }
 0x189   : > { %v11386_v41 = vpack.c.bf16 %v1941_v4, %v1941_v4  ;;  %v1818_v25 = vadd.f32 %v13496_v50, %v1817_v59 }
 0x18a   : > { %v1819_v63 = vpop.f32.mrf.mxu0 }
 0x18b   : > { %v1942_v46 = vmax.f32 %v1818_v25, 0.0  ;;  %2102 = vst.msk [vmem:[#allocation3] sm:$0xf] %vm2101_vm2, %v11386_v41  ;;  %v2136_v62 = vshrl.u32 %v11386_v41, 16  ;;  %v2139_v51 = vshll.u32 %v11386_v41, 16  ;;  %v10822_v24 = vrot.slane %v11386_v41, 9 }
 0x18c   : > { %v1822_v54 = vpop.f32.mrf.mxu0 }
 0x18d   : > { %v11387_v26 = vpack.c.bf16 %v1942_v46, %v1942_v46  ;;  %v1823_v39 = vadd.f32 %v13496_v50, %v1822_v54  ;;  %v2138_v57 = vrot.slane %v2136_v62, 4  ;;  %v2141_v22 = vrot.slane %v2139_v51, 5 }
 0x18e   : > { %v1824_v48 = vpop.f32.mrf.mxu0 }
 0x18f   : > { %v2586_v8 = vrot.slane %v11387_v26, 5  ;;  %2103 = vst.msk [vmem:[#allocation3 + $0x8] sm:$0xf] %vm2101_vm2, %v11387_v26  ;;  %v1943_v19 = vmax.f32 %v1823_v39, 0.0  ;;  %v2142_v42 = vor.u32 %v2141_v22, %v2138_v57  ;;  %v2145_v1 = vshll.u32 %v11387_v26, 16 }
 0x190   : > { %v1825_v6 = vpop.f32.mrf.mxu0  ;;  %v2149_v58 = vshrl.u32 %v11387_v26, 16 }
 0x191   : > { %v2587_v52 = vsel %vm12527_vm5, %v10822_v24, %v2586_v8  ;;  %v11388_v12 = vpack.c.bf16 %v1943_v19, %v1943_v19  ;;  %v1826_v49 = vadd.f32 %v13496_v50, %v1825_v6  ;;  %v2588_v9 = vrot.slane %v2586_v8, 4 }
 0x192   : > { %2711 = vst.msk [vmem:[#allocation3 + $0x4] sm:$0xf] %vm2101_vm2, %v2587_v52  ;;  %v1827_v17 = vpop.f32.mrf.mxu0  ;;  %v2143_v32 = vrot.slane %v2142_v42, 4  ;;  %v2147_v11 = vrot.slane %v2145_v1, 5  ;;  %v2151_v13 = vrot.slane %v2149_v58, 4 }
 0x193   : > { %v2589_v55 = vrot.slane %v11388_v12, 5  ;;  %2104 = vst.msk [vmem:[#allocation3 + $0x10] sm:$0xf] %vm2101_vm2, %v11388_v12  ;;  %v1944_v16 = vmax.f32 %v1826_v49, 0.0  ;;  %v2155_v36 = vshll.u32 %v11388_v12, 16  ;;  %v2159_v40 = vshrl.u32 %v11388_v12, 16 }
 0x194   : > { %v1830_v35 = vpop.f32.mrf.mxu0  ;;  %v2148_v15 = vsel %vm12575_vm6, %v2143_v32, %v2147_v11  ;;  %v2152_v28 = vor.u32 %v2151_v13, %v2147_v11 }
 0x195   : > { %v2590_v3 = vsel %vm12527_vm5, %v2588_v9, %v2589_v55  ;;  %v11389_v44 = vpack.c.bf16 %v1944_v16, %v1944_v16  ;;  %v1831_v21 = vadd.f32 %v13496_v50, %v1830_v35  ;;  %2454 = vrot.lane.b32.xlu0 %v2148_v15, %s15082_s19  ;;  %v2591_v45 = vrot.slane %v2589_v55, 4 }
 0x196   : > { %2712 = vst.msk [vmem:[#allocation3 + $0xc] sm:$0xf] %vm2101_vm2, %v2590_v3  ;;  %v1832_v29 = vpop.f32.mrf.mxu0  ;;  %v2153_v14 = vrot.slane %v2152_v28, 4  ;;  %v2157_v43 = vrot.slane %v2155_v36, 5  ;;  %v2161_v34 = vrot.slane %v2159_v40, 4 }
 0x197   : > { %v2592_v23 = vrot.slane %v11389_v44, 5  ;;  %2105 = vst.msk [vmem:[#allocation3 + $0x18] sm:$0xf] %vm2101_vm2, %v11389_v44  ;;  %v1945_v2 = vmax.f32 %v1831_v21, 0.0  ;;  %v2165_v37 = vshll.u32 %v11389_v44, 16  ;;  %v2169_v27 = vshrl.u32 %v11389_v44, 16 }
 0x198   : > { %v1833_v33 = vpop.f32.mrf.mxu0  ;;  %v2158_v60 = vsel %vm12575_vm6, %v2153_v14, %v2157_v43  ;;  %v2162_v61 = vor.u32 %v2161_v34, %v2157_v43 }
 0x199   : > { %v2593_v56 = vsel %vm12527_vm5, %v2591_v45, %v2592_v23  ;;  %v11390_v18 = vpack.c.bf16 %v1945_v2, %v1945_v2  ;;  %v1834_v53 = vadd.f32 %v13496_v50, %v1833_v33  ;;  %2456 = vrot.lane.b32.xlu1 %v2158_v60, %s15082_s19  ;;  %v2594_v30 = vrot.slane %v2592_v23, 4 }
 0x19a   : > { %2713 = vst.msk [vmem:[#allocation3 + $0x14] sm:$0xf] %vm2101_vm2, %v2593_v56  ;;  %v1835_v5 = vpop.f32.mrf.mxu0  ;;  %v2163_v10 = vrot.slane %v2162_v61, 4  ;;  %v2167_v4 = vrot.slane %v2165_v37, 5  ;;  %v2171_v59 = vrot.slane %v2169_v27, 4 }
 0x19b   : > { %v2595_v41 = vrot.slane %v11390_v18, 5  ;;  %2106 = vst.msk [vmem:[#allocation3 + $0x20] sm:$0xf] %vm2101_vm2, %v11390_v18  ;;  %v1946_v25 = vmax.f32 %v1834_v53, 0.0  ;;  %v2175_v20 = vshll.u32 %v11390_v18, 16  ;;  %v2179_v63 = vshrl.u32 %v11390_v18, 16 }
 0x19c   : > { %v1838_v46 = vpop.f32.mrf.mxu0  ;;  %v2168_v62 = vsel %vm12575_vm6, %v2163_v10, %v2167_v4  ;;  %v2172_v51 = vor.u32 %v2171_v59, %v2167_v4 }
 0x19d   : > { %v2596_v54 = vsel %vm12527_vm5, %v2594_v30, %v2595_v41  ;;  %v11391_v26 = vpack.c.bf16 %v1946_v25, %v1946_v25  ;;  %v1839_v39 = vadd.f32 %v13496_v50, %v1838_v46  ;;  %2458 = vrot.lane.b32.xlu0 %v2168_v62, %s15082_s19  ;;  %v2597_v57 = vrot.slane %v2595_v41, 4 }
 0x19e   : > { %2714 = vst.msk [vmem:[#allocation3 + $0x1c] sm:$0xf] %vm2101_vm2, %v2596_v54  ;;  %v1840_v22 = vpop.f32.mrf.mxu0  ;;  %v2173_v38 = vrot.slane %v2172_v51, 4  ;;  %v2177_v24 = vrot.slane %v2175_v20, 5  ;;  %v2181_v48 = vrot.slane %v2179_v63, 4 }
 0x19f   : > { %v2598_v8 = vrot.slane %v11391_v26, 5  ;;  %2107 = vst.msk [vmem:[#allocation3 + $0x28] sm:$0xf] %vm2101_vm2, %v11391_v26  ;;  %v1947_v19 = vmax.f32 %v1839_v39, 0.0  ;;  %v2185_v42 = vshll.u32 %v11391_v26, 16  ;;  %v2189_v1 = vshrl.u32 %v11391_v26, 16 }
 0x1a0   : > { %v1841_v6 = vpop.f32.mrf.mxu0  ;;  %v2178_v58 = vsel %vm12575_vm6, %v2173_v38, %v2177_v24  ;;  %v2182_v52 = vor.u32 %v2181_v48, %v2177_v24 }
 0x1a1   : > { %v2599_v12 = vsel %vm12527_vm5, %v2597_v57, %v2598_v8  ;;  %v11392_v49 = vpack.c.bf16 %v1947_v19, %v1947_v19  ;;  %v1842_v47 = vadd.f32 %v13496_v50, %v1841_v6  ;;  %2460 = vrot.lane.b32.xlu1 %v2178_v58, %s15082_s19  ;;  %v2600_v9 = vrot.slane %v2598_v8, 4 }
 0x1a2   : > { %2715 = vst.msk [vmem:[#allocation3 + $0x24] sm:$0xf] %vm2101_vm2, %v2599_v12  ;;  %v1843_v17 = vpop.f32.mrf.mxu0  ;;  %v2183_v32 = vrot.slane %v2182_v52, 4  ;;  %v2187_v11 = vrot.slane %v2185_v42, 5  ;;  %v2191_v13 = vrot.slane %v2189_v1, 4 }
 0x1a3   : > { %v2601_v55 = vrot.slane %v11392_v49, 5  ;;  %2108 = vst.msk [vmem:[#allocation3 + $0x30] sm:$0xf] %vm2101_vm2, %v11392_v49  ;;  %v1948_v16 = vmax.f32 %v1842_v47, 0.0  ;;  %v2195_v36 = vshll.u32 %v11392_v49, 16  ;;  %v2199_v40 = vshrl.u32 %v11392_v49, 16 }
 0x1a4   : > { %v1846_v35 = vpop.f32.mrf.mxu0  ;;  %v2188_v15 = vsel %vm12575_vm6, %v2183_v32, %v2187_v11  ;;  %v2192_v28 = vor.u32 %v2191_v13, %v2187_v11 }
 0x1a5   : > { %v2602_v3 = vsel %vm12527_vm5, %v2600_v9, %v2601_v55  ;;  %v11393_v44 = vpack.c.bf16 %v1948_v16, %v1948_v16  ;;  %v1847_v21 = vadd.f32 %v13496_v50, %v1846_v35  ;;  %2462 = vrot.lane.b32.xlu0 %v2188_v15, %s15082_s19  ;;  %v2603_v45 = vrot.slane %v2601_v55, 4 }
 0x1a6   : > { %2716 = vst.msk [vmem:[#allocation3 + $0x2c] sm:$0xf] %vm2101_vm2, %v2602_v3  ;;  %v1848_v29 = vpop.f32.mrf.mxu0  ;;  %v2193_v14 = vrot.slane %v2192_v28, 4  ;;  %v2197_v43 = vrot.slane %v2195_v36, 5  ;;  %v2201_v34 = vrot.slane %v2199_v40, 4 }
 0x1a7   : > { %v2604_v23 = vrot.slane %v11393_v44, 5  ;;  %2109 = vst.msk [vmem:[#allocation3 + $0x38] sm:$0xf] %vm2101_vm2, %v11393_v44  ;;  %v1949_v2 = vmax.f32 %v1847_v21, 0.0  ;;  %v2205_v37 = vshll.u32 %v11393_v44, 16  ;;  %v2209_v27 = vshrl.u32 %v11393_v44, 16 }
 0x1a8   : > { %v1849_v33 = vpop.f32.mrf.mxu0  ;;  %v2198_v60 = vsel %vm12575_vm6, %v2193_v14, %v2197_v43  ;;  %v2202_v61 = vor.u32 %v2201_v34, %v2197_v43 }
 0x1a9   : > { %v2605_v56 = vsel %vm12527_vm5, %v2603_v45, %v2604_v23  ;;  %v11394_v18 = vpack.c.bf16 %v1949_v2, %v1949_v2  ;;  %v1850_v53 = vadd.f32 %v13496_v50, %v1849_v33  ;;  %2464 = vrot.lane.b32.xlu1 %v2198_v60, %s15082_s19  ;;  %v2606_v30 = vrot.slane %v2604_v23, 4 }
 0x1aa   : > { %2717 = vst.msk [vmem:[#allocation3 + $0x34] sm:$0xf] %vm2101_vm2, %v2605_v56  ;;  %v1851_v5 = vpop.f32.mrf.mxu0  ;;  %v2203_v10 = vrot.slane %v2202_v61, 4  ;;  %v2207_v4 = vrot.slane %v2205_v37, 5  ;;  %v2211_v59 = vrot.slane %v2209_v27, 4 }
 0x1ab   : > { %v2607_v41 = vrot.slane %v11394_v18, 5  ;;  %2110 = vst.msk [vmem:[#allocation3 + $0x40] sm:$0xf] %vm2101_vm2, %v11394_v18  ;;  %v1950_v25 = vmax.f32 %v1850_v53, 0.0  ;;  %v2215_v20 = vshll.u32 %v11394_v18, 16  ;;  %v2219_v63 = vshrl.u32 %v11394_v18, 16 }
 0x1ac   : > { %v1854_v46 = vpop.f32.mrf.mxu0  ;;  %v2208_v62 = vsel %vm12575_vm6, %v2203_v10, %v2207_v4  ;;  %v2212_v51 = vor.u32 %v2211_v59, %v2207_v4 }
 0x1ad   : > { %v2608_v54 = vsel %vm12527_vm5, %v2606_v30, %v2607_v41  ;;  %v11395_v26 = vpack.c.bf16 %v1950_v25, %v1950_v25  ;;  %v1855_v39 = vadd.f32 %v13496_v50, %v1854_v46  ;;  %2466 = vrot.lane.b32.xlu0 %v2208_v62, %s15082_s19  ;;  %v2609_v57 = vrot.slane %v2607_v41, 4 }
 0x1ae   : > { %2718 = vst.msk [vmem:[#allocation3 + $0x3c] sm:$0xf] %vm2101_vm2, %v2608_v54  ;;  %v1856_v22 = vpop.f32.mrf.mxu0  ;;  %v2213_v38 = vrot.slane %v2212_v51, 4  ;;  %v2217_v24 = vrot.slane %v2215_v20, 5  ;;  %v2221_v48 = vrot.slane %v2219_v63, 4 }
 0x1af   : > { %v2610_v8 = vrot.slane %v11395_v26, 5  ;;  %2111 = vst.msk [vmem:[#allocation3 + $0x48] sm:$0xf] %vm2101_vm2, %v11395_v26  ;;  %v1951_v19 = vmax.f32 %v1855_v39, 0.0  ;;  %v2225_v42 = vshll.u32 %v11395_v26, 16  ;;  %v2229_v1 = vshrl.u32 %v11395_v26, 16 }
 0x1b0   : > { %v1857_v6 = vpop.f32.mrf.mxu0  ;;  %v2218_v58 = vsel %vm12575_vm6, %v2213_v38, %v2217_v24  ;;  %v2222_v52 = vor.u32 %v2221_v48, %v2217_v24 }
 0x1b1   : > { %v2611_v12 = vsel %vm12527_vm5, %v2609_v57, %v2610_v8  ;;  %v11396_v49 = vpack.c.bf16 %v1951_v19, %v1951_v19  ;;  %v1858_v47 = vadd.f32 %v13496_v50, %v1857_v6  ;;  %2468 = vrot.lane.b32.xlu1 %v2218_v58, %s15082_s19  ;;  %v2612_v9 = vrot.slane %v2610_v8, 4 }
 0x1b2   : > { %2719 = vst.msk [vmem:[#allocation3 + $0x44] sm:$0xf] %vm2101_vm2, %v2611_v12  ;;  %v1859_v17 = vpop.f32.mrf.mxu0  ;;  %v2223_v32 = vrot.slane %v2222_v52, 4  ;;  %v2227_v11 = vrot.slane %v2225_v42, 5  ;;  %v2231_v13 = vrot.slane %v2229_v1, 4 }
 0x1b3   : > { %v2613_v55 = vrot.slane %v11396_v49, 5  ;;  %2112 = vst.msk [vmem:[#allocation3 + $0x50] sm:$0xf] %vm2101_vm2, %v11396_v49  ;;  %v1952_v16 = vmax.f32 %v1858_v47, 0.0  ;;  %v2235_v36 = vshll.u32 %v11396_v49, 16  ;;  %v2239_v40 = vshrl.u32 %v11396_v49, 16 }
 0x1b4   : > { %v1862_v35 = vpop.f32.mrf.mxu0  ;;  %v2228_v15 = vsel %vm12575_vm6, %v2223_v32, %v2227_v11  ;;  %v2232_v28 = vor.u32 %v2231_v13, %v2227_v11 }
 0x1b5   : > { %v2614_v3 = vsel %vm12527_vm5, %v2612_v9, %v2613_v55  ;;  %v11397_v44 = vpack.c.bf16 %v1952_v16, %v1952_v16  ;;  %v1863_v21 = vadd.f32 %v13496_v50, %v1862_v35  ;;  %2470 = vrot.lane.b32.xlu0 %v2228_v15, %s15082_s19  ;;  %v2615_v45 = vrot.slane %v2613_v55, 4 }
 0x1b6   : > { %2720 = vst.msk [vmem:[#allocation3 + $0x4c] sm:$0xf] %vm2101_vm2, %v2614_v3  ;;  %v1864_v29 = vpop.f32.mrf.mxu0  ;;  %v2233_v14 = vrot.slane %v2232_v28, 4  ;;  %v2237_v43 = vrot.slane %v2235_v36, 5  ;;  %v2241_v34 = vrot.slane %v2239_v40, 4 }
 0x1b7   : > { %v2616_v23 = vrot.slane %v11397_v44, 5  ;;  %2113 = vst.msk [vmem:[#allocation3 + $0x58] sm:$0xf] %vm2101_vm2, %v11397_v44  ;;  %v1953_v2 = vmax.f32 %v1863_v21, 0.0  ;;  %v2245_v37 = vshll.u32 %v11397_v44, 16  ;;  %v2249_v27 = vshrl.u32 %v11397_v44, 16 }
 0x1b8   : > { %v1865_v33 = vpop.f32.mrf.mxu0  ;;  %v2238_v60 = vsel %vm12575_vm6, %v2233_v14, %v2237_v43  ;;  %v2242_v61 = vor.u32 %v2241_v34, %v2237_v43 }
 0x1b9   : > { %v2617_v56 = vsel %vm12527_vm5, %v2615_v45, %v2616_v23  ;;  %v11398_v18 = vpack.c.bf16 %v1953_v2, %v1953_v2  ;;  %v1866_v53 = vadd.f32 %v13496_v50, %v1865_v33  ;;  %2472 = vrot.lane.b32.xlu1 %v2238_v60, %s15082_s19  ;;  %v2618_v30 = vrot.slane %v2616_v23, 4 }
 0x1ba   : > { %2721 = vst.msk [vmem:[#allocation3 + $0x54] sm:$0xf] %vm2101_vm2, %v2617_v56  ;;  %v1867_v5 = vpop.f32.mrf.mxu0  ;;  %v2243_v10 = vrot.slane %v2242_v61, 4  ;;  %v2247_v4 = vrot.slane %v2245_v37, 5  ;;  %v2251_v59 = vrot.slane %v2249_v27, 4 }
 0x1bb   : > { %v2619_v41 = vrot.slane %v11398_v18, 5  ;;  %2114 = vst.msk [vmem:[#allocation3 + $0x60] sm:$0xf] %vm2101_vm2, %v11398_v18  ;;  %v1954_v25 = vmax.f32 %v1866_v53, 0.0  ;;  %v2255_v20 = vshll.u32 %v11398_v18, 16  ;;  %v2259_v63 = vshrl.u32 %v11398_v18, 16 }
 0x1bc   : > { %v1870_v46 = vpop.f32.mrf.mxu0  ;;  %v2248_v62 = vsel %vm12575_vm6, %v2243_v10, %v2247_v4  ;;  %v2252_v51 = vor.u32 %v2251_v59, %v2247_v4 }
 0x1bd   : > { %v2620_v54 = vsel %vm12527_vm5, %v2618_v30, %v2619_v41  ;;  %v11399_v26 = vpack.c.bf16 %v1954_v25, %v1954_v25  ;;  %v1871_v39 = vadd.f32 %v13496_v50, %v1870_v46  ;;  %2474 = vrot.lane.b32.xlu0 %v2248_v62, %s15082_s19  ;;  %v2621_v57 = vrot.slane %v2619_v41, 4 }
 0x1be   : > { %2722 = vst.msk [vmem:[#allocation3 + $0x5c] sm:$0xf] %vm2101_vm2, %v2620_v54  ;;  %v1872_v22 = vpop.f32.mrf.mxu0  ;;  %v2253_v38 = vrot.slane %v2252_v51, 4  ;;  %v2257_v24 = vrot.slane %v2255_v20, 5  ;;  %v2261_v48 = vrot.slane %v2259_v63, 4 }
 0x1bf   : > { %v2622_v8 = vrot.slane %v11399_v26, 5  ;;  %2115 = vst.msk [vmem:[#allocation3 + $0x68] sm:$0xf] %vm2101_vm2, %v11399_v26  ;;  %v1955_v19 = vmax.f32 %v1871_v39, 0.0  ;;  %v2265_v42 = vshll.u32 %v11399_v26, 16  ;;  %v2269_v1 = vshrl.u32 %v11399_v26, 16 }
 0x1c0   : > { %v1873_v6 = vpop.f32.mrf.mxu0  ;;  %v2258_v58 = vsel %vm12575_vm6, %v2253_v38, %v2257_v24  ;;  %v2262_v52 = vor.u32 %v2261_v48, %v2257_v24 }
 0x1c1   : > { %v2623_v12 = vsel %vm12527_vm5, %v2621_v57, %v2622_v8  ;;  %v11400_v49 = vpack.c.bf16 %v1955_v19, %v1955_v19  ;;  %v1874_v47 = vadd.f32 %v13496_v50, %v1873_v6  ;;  %2476 = vrot.lane.b32.xlu1 %v2258_v58, %s15082_s19  ;;  %v2624_v9 = vrot.slane %v2622_v8, 4 }
 0x1c2   : > { %2723 = vst.msk [vmem:[#allocation3 + $0x64] sm:$0xf] %vm2101_vm2, %v2623_v12  ;;  %v1875_v17 = vpop.f32.mrf.mxu0  ;;  %v2263_v32 = vrot.slane %v2262_v52, 4  ;;  %v2267_v11 = vrot.slane %v2265_v42, 5  ;;  %v2271_v13 = vrot.slane %v2269_v1, 4 }
 0x1c3   : > { %v2625_v55 = vrot.slane %v11400_v49, 5  ;;  %2116 = vst.msk [vmem:[#allocation3 + $0x70] sm:$0xf] %vm2101_vm2, %v11400_v49  ;;  %v1956_v16 = vmax.f32 %v1874_v47, 0.0  ;;  %v2275_v36 = vshll.u32 %v11400_v49, 16  ;;  %v2279_v40 = vshrl.u32 %v11400_v49, 16 }
 0x1c4   : > { %v1878_v35 = vpop.f32.mrf.mxu0  ;;  %v2268_v15 = vsel %vm12575_vm6, %v2263_v32, %v2267_v11  ;;  %v2272_v28 = vor.u32 %v2271_v13, %v2267_v11 }
 0x1c5   : > { %v2626_v3 = vsel %vm12527_vm5, %v2624_v9, %v2625_v55  ;;  %v11401_v44 = vpack.c.bf16 %v1956_v16, %v1956_v16  ;;  %v1879_v21 = vadd.f32 %v13496_v50, %v1878_v35  ;;  %2478 = vrot.lane.b32.xlu0 %v2268_v15, %s15082_s19  ;;  %v2627_v45 = vrot.slane %v2625_v55, 4 }
 0x1c6   : > { %2724 = vst.msk [vmem:[#allocation3 + $0x6c] sm:$0xf] %vm2101_vm2, %v2626_v3  ;;  %v1880_v29 = vpop.f32.mrf.mxu0  ;;  %v2273_v14 = vrot.slane %v2272_v28, 4  ;;  %v2277_v43 = vrot.slane %v2275_v36, 5  ;;  %v2281_v34 = vrot.slane %v2279_v40, 4 }
 0x1c7   : > { %v2628_v23 = vrot.slane %v11401_v44, 5  ;;  %2117 = vst.msk [vmem:[#allocation3 + $0x78] sm:$0xf] %vm2101_vm2, %v11401_v44  ;;  %v1957_v2 = vmax.f32 %v1879_v21, 0.0  ;;  %v2285_v37 = vshll.u32 %v11401_v44, 16  ;;  %v2289_v27 = vshrl.u32 %v11401_v44, 16 }
 0x1c8   : > { %v1881_v33 = vpop.f32.mrf.mxu0  ;;  %v2278_v60 = vsel %vm12575_vm6, %v2273_v14, %v2277_v43  ;;  %v2282_v61 = vor.u32 %v2281_v34, %v2277_v43 }
 0x1c9   : > { %v2629_v56 = vsel %vm12527_vm5, %v2627_v45, %v2628_v23  ;;  %v11402_v18 = vpack.c.bf16 %v1957_v2, %v1957_v2  ;;  %v1882_v53 = vadd.f32 %v13496_v50, %v1881_v33  ;;  %2480 = vrot.lane.b32.xlu1 %v2278_v60, %s15082_s19  ;;  %v2630_v30 = vrot.slane %v2628_v23, 4 }
 0x1ca   : > { %2725 = vst.msk [vmem:[#allocation3 + $0x74] sm:$0xf] %vm2101_vm2, %v2629_v56  ;;  %v1883_v5 = vpop.f32.mrf.mxu0  ;;  %v2283_v10 = vrot.slane %v2282_v61, 4  ;;  %v2287_v4 = vrot.slane %v2285_v37, 5  ;;  %v2291_v59 = vrot.slane %v2289_v27, 4 }
 0x1cb   : > { %v2631_v41 = vrot.slane %v11402_v18, 5  ;;  %2118 = vst.msk [vmem:[#allocation3 + $0x80] sm:$0xf] %vm2101_vm2, %v11402_v18  ;;  %v1958_v25 = vmax.f32 %v1882_v53, 0.0  ;;  %v2295_v20 = vshll.u32 %v11402_v18, 16  ;;  %v2299_v63 = vshrl.u32 %v11402_v18, 16 }
 0x1cc   : > { %v1886_v46 = vpop.f32.mrf.mxu0  ;;  %v2288_v62 = vsel %vm12575_vm6, %v2283_v10, %v2287_v4  ;;  %v2292_v51 = vor.u32 %v2291_v59, %v2287_v4 }
 0x1cd   : > { %v2632_v54 = vsel %vm12527_vm5, %v2630_v30, %v2631_v41  ;;  %v11403_v26 = vpack.c.bf16 %v1958_v25, %v1958_v25  ;;  %v1887_v39 = vadd.f32 %v13496_v50, %v1886_v46  ;;  %2482 = vrot.lane.b32.xlu0 %v2288_v62, %s15082_s19  ;;  %v2633_v57 = vrot.slane %v2631_v41, 4 }
 0x1ce   : > { %2726 = vst.msk [vmem:[#allocation3 + $0x7c] sm:$0xf] %vm2101_vm2, %v2632_v54  ;;  %v1888_v22 = vpop.f32.mrf.mxu0  ;;  %v2293_v38 = vrot.slane %v2292_v51, 4  ;;  %v2297_v24 = vrot.slane %v2295_v20, 5  ;;  %v2301_v48 = vrot.slane %v2299_v63, 4 }
 0x1cf   : > { %v2634_v8 = vrot.slane %v11403_v26, 5  ;;  %2119 = vst.msk [vmem:[#allocation3 + $0x88] sm:$0xf] %vm2101_vm2, %v11403_v26  ;;  %v1959_v19 = vmax.f32 %v1887_v39, 0.0  ;;  %v2305_v42 = vshll.u32 %v11403_v26, 16  ;;  %v2309_v1 = vshrl.u32 %v11403_v26, 16 }
 0x1d0   : > { %v1889_v6 = vpop.f32.mrf.mxu0  ;;  %v2298_v58 = vsel %vm12575_vm6, %v2293_v38, %v2297_v24  ;;  %v2302_v52 = vor.u32 %v2301_v48, %v2297_v24 }
 0x1d1   : > { %v2635_v12 = vsel %vm12527_vm5, %v2633_v57, %v2634_v8  ;;  %v11404_v49 = vpack.c.bf16 %v1959_v19, %v1959_v19  ;;  %v1890_v47 = vadd.f32 %v13496_v50, %v1889_v6  ;;  %2484 = vrot.lane.b32.xlu1 %v2298_v58, %s15082_s19  ;;  %v2636_v9 = vrot.slane %v2634_v8, 4 }
 0x1d2   : > { %2727 = vst.msk [vmem:[#allocation3 + $0x84] sm:$0xf] %vm2101_vm2, %v2635_v12  ;;  %v1891_v17 = vpop.f32.mrf.mxu0  ;;  %v2303_v32 = vrot.slane %v2302_v52, 4  ;;  %v2307_v11 = vrot.slane %v2305_v42, 5  ;;  %v2311_v13 = vrot.slane %v2309_v1, 4 }
 0x1d3   : > { %v2637_v55 = vrot.slane %v11404_v49, 5  ;;  %2120 = vst.msk [vmem:[#allocation3 + $0x90] sm:$0xf] %vm2101_vm2, %v11404_v49  ;;  %v1960_v16 = vmax.f32 %v1890_v47, 0.0  ;;  %v2315_v36 = vshll.u32 %v11404_v49, 16  ;;  %v2319_v40 = vshrl.u32 %v11404_v49, 16 }
 0x1d4   : > { %v1894_v35 = vpop.f32.mrf.mxu0  ;;  %v2308_v15 = vsel %vm12575_vm6, %v2303_v32, %v2307_v11  ;;  %v2312_v28 = vor.u32 %v2311_v13, %v2307_v11 }
 0x1d5   : > { %v2638_v3 = vsel %vm12527_vm5, %v2636_v9, %v2637_v55  ;;  %v11405_v44 = vpack.c.bf16 %v1960_v16, %v1960_v16  ;;  %v1895_v21 = vadd.f32 %v13496_v50, %v1894_v35  ;;  %2486 = vrot.lane.b32.xlu0 %v2308_v15, %s15082_s19  ;;  %v2639_v45 = vrot.slane %v2637_v55, 4 }
 0x1d6   : > { %2728 = vst.msk [vmem:[#allocation3 + $0x8c] sm:$0xf] %vm2101_vm2, %v2638_v3  ;;  %v1896_v29 = vpop.f32.mrf.mxu0  ;;  %v2313_v14 = vrot.slane %v2312_v28, 4  ;;  %v2317_v43 = vrot.slane %v2315_v36, 5  ;;  %v2321_v34 = vrot.slane %v2319_v40, 4 }
 0x1d7   : > { %v2640_v23 = vrot.slane %v11405_v44, 5  ;;  %2121 = vst.msk [vmem:[#allocation3 + $0x98] sm:$0xf] %vm2101_vm2, %v11405_v44  ;;  %v1961_v2 = vmax.f32 %v1895_v21, 0.0  ;;  %v2325_v37 = vshll.u32 %v11405_v44, 16  ;;  %v2329_v27 = vshrl.u32 %v11405_v44, 16 }
 0x1d8   : > { %v1897_v33 = vpop.f32.mrf.mxu0  ;;  %v2318_v60 = vsel %vm12575_vm6, %v2313_v14, %v2317_v43  ;;  %v2322_v61 = vor.u32 %v2321_v34, %v2317_v43 }
 0x1d9   : > { %v2641_v56 = vsel %vm12527_vm5, %v2639_v45, %v2640_v23  ;;  %v11406_v18 = vpack.c.bf16 %v1961_v2, %v1961_v2  ;;  %v1898_v53 = vadd.f32 %v13496_v50, %v1897_v33  ;;  %2488 = vrot.lane.b32.xlu1 %v2318_v60, %s15082_s19  ;;  %v2642_v30 = vrot.slane %v2640_v23, 4 }
 0x1da   : > { %2729 = vst.msk [vmem:[#allocation3 + $0x94] sm:$0xf] %vm2101_vm2, %v2641_v56  ;;  %v1899_v5 = vpop.f32.mrf.mxu0  ;;  %v2323_v10 = vrot.slane %v2322_v61, 4  ;;  %v2327_v4 = vrot.slane %v2325_v37, 5  ;;  %v2331_v59 = vrot.slane %v2329_v27, 4 }
 0x1db   : > { %v2643_v41 = vrot.slane %v11406_v18, 5  ;;  %2122 = vst.msk [vmem:[#allocation3 + $0xa0] sm:$0xf] %vm2101_vm2, %v11406_v18  ;;  %v1962_v25 = vmax.f32 %v1898_v53, 0.0  ;;  %v2335_v20 = vshll.u32 %v11406_v18, 16  ;;  %v2339_v63 = vshrl.u32 %v11406_v18, 16 }
 0x1dc   : > { %v1902_v46 = vpop.f32.mrf.mxu0  ;;  %v2328_v62 = vsel %vm12575_vm6, %v2323_v10, %v2327_v4  ;;  %v2332_v51 = vor.u32 %v2331_v59, %v2327_v4 }
 0x1dd   : > { %v2644_v54 = vsel %vm12527_vm5, %v2642_v30, %v2643_v41  ;;  %v11407_v26 = vpack.c.bf16 %v1962_v25, %v1962_v25  ;;  %v1903_v39 = vadd.f32 %v13496_v50, %v1902_v46  ;;  %2490 = vrot.lane.b32.xlu0 %v2328_v62, %s15082_s19  ;;  %v2645_v57 = vrot.slane %v2643_v41, 4 }
 0x1de   : > { %2730 = vst.msk [vmem:[#allocation3 + $0x9c] sm:$0xf] %vm2101_vm2, %v2644_v54  ;;  %v1904_v22 = vpop.f32.mrf.mxu0  ;;  %v2333_v38 = vrot.slane %v2332_v51, 4  ;;  %v2337_v24 = vrot.slane %v2335_v20, 5  ;;  %v2341_v48 = vrot.slane %v2339_v63, 4 }
 0x1df   : > { %v2646_v8 = vrot.slane %v11407_v26, 5  ;;  %2123 = vst.msk [vmem:[#allocation3 + $0xa8] sm:$0xf] %vm2101_vm2, %v11407_v26  ;;  %v1963_v19 = vmax.f32 %v1903_v39, 0.0  ;;  %v2345_v42 = vshll.u32 %v11407_v26, 16  ;;  %v2349_v1 = vshrl.u32 %v11407_v26, 16 }
 0x1e0   : > { %v1905_v6 = vpop.f32.mrf.mxu0  ;;  %v2338_v58 = vsel %vm12575_vm6, %v2333_v38, %v2337_v24  ;;  %v2342_v52 = vor.u32 %v2341_v48, %v2337_v24 }
 0x1e1   : > { %v2647_v12 = vsel %vm12527_vm5, %v2645_v57, %v2646_v8  ;;  %v11408_v49 = vpack.c.bf16 %v1963_v19, %v1963_v19  ;;  %v1906_v47 = vadd.f32 %v13496_v50, %v1905_v6  ;;  %2492 = vrot.lane.b32.xlu1 %v2338_v58, %s15082_s19  ;;  %v2648_v9 = vrot.slane %v2646_v8, 4 }
 0x1e2   : > { %2731 = vst.msk [vmem:[#allocation3 + $0xa4] sm:$0xf] %vm2101_vm2, %v2647_v12  ;;  %v1907_v17 = vpop.f32.mrf.mxu0  ;;  %v2343_v32 = vrot.slane %v2342_v52, 4  ;;  %v2347_v11 = vrot.slane %v2345_v42, 5  ;;  %v2351_v13 = vrot.slane %v2349_v1, 4 }
 0x1e3   : > { %v2649_v55 = vrot.slane %v11408_v49, 5  ;;  %2124 = vst.msk [vmem:[#allocation3 + $0xb0] sm:$0xf] %vm2101_vm2, %v11408_v49  ;;  %v1964_v16 = vmax.f32 %v1906_v47, 0.0  ;;  %v2355_v36 = vshll.u32 %v11408_v49, 16  ;;  %v2359_v40 = vshrl.u32 %v11408_v49, 16 }
 0x1e4   : > { %v1910_v35 = vpop.f32.mrf.mxu0  ;;  %v2348_v15 = vsel %vm12575_vm6, %v2343_v32, %v2347_v11  ;;  %v2352_v28 = vor.u32 %v2351_v13, %v2347_v11 }
 0x1e5   : > { %v2650_v3 = vsel %vm12527_vm5, %v2648_v9, %v2649_v55  ;;  %v2651_v44 = vrot.slane %v2649_v55, 4  ;;  %v11409_v21 = vpack.c.bf16 %v1964_v16, %v1964_v16  ;;  %v1911_v45 = vadd.f32 %v13496_v50, %v1910_v35  ;;  %2494 = vrot.lane.b32.xlu0 %v2348_v15, %s15082_s19 }
 0x1e6   : > { %2732 = vst.msk [vmem:[#allocation3 + $0xac] sm:$0xf] %vm2101_vm2, %v2650_v3  ;;  %v1912_v29 = vpop.f32.mrf.mxu0  ;;  %v2353_v14 = vrot.slane %v2352_v28, 4  ;;  %v2357_v43 = vrot.slane %v2355_v36, 5  ;;  %v2361_v34 = vrot.slane %v2359_v40, 4 }
 0x1e7   : > { %v2652_v23 = vrot.slane %v11409_v21, 5  ;;  %2125 = vst.msk [vmem:[#allocation3 + $0xb8] sm:$0xf] %vm2101_vm2, %v11409_v21  ;;  %v1965_v2 = vmax.f32 %v1911_v45, 0.0  ;;  %v2365_v37 = vshll.u32 %v11409_v21, 16  ;;  %v2369_v27 = vshrl.u32 %v11409_v21, 16 }
 0x1e8   : > { %v1913_v33 = vpop.f32.mrf.mxu0  ;;  %v2358_v60 = vsel %vm12575_vm6, %v2353_v14, %v2357_v43  ;;  %v2362_v61 = vor.u32 %v2361_v34, %v2357_v43 }
 0x1e9   : > { %v2653_v56 = vsel %vm12527_vm5, %v2651_v44, %v2652_v23  ;;  %v2654_v18 = vrot.slane %v2652_v23, 4  ;;  %v11410_v53 = vpack.c.bf16 %v1965_v2, %v1965_v2  ;;  %v1914_v30 = vadd.f32 %v13496_v50, %v1913_v33  ;;  %2496 = vrot.lane.b32.xlu1 %v2358_v60, %s15082_s19 }
 0x1ea   : > { %2733 = vst.msk [vmem:[#allocation3 + $0xb4] sm:$0xf] %vm2101_vm2, %v2653_v56  ;;  %v1915_v5 = vpop.f32.mrf.mxu0  ;;  %v2363_v10 = vrot.slane %v2362_v61, 4  ;;  %v2367_v4 = vrot.slane %v2365_v37, 5  ;;  %v2371_v59 = vrot.slane %v2369_v27, 4 }
 0x1eb   : > { %v2655_v41 = vrot.slane %v11410_v53, 5  ;;  %2126 = vst.msk [vmem:[#allocation3 + $0xc0] sm:$0xf] %vm2101_vm2, %v11410_v53  ;;  %v1966_v25 = vmax.f32 %v1914_v30, 0.0  ;;  %v2375_v20 = vshll.u32 %v11410_v53, 16  ;;  %v2379_v63 = vshrl.u32 %v11410_v53, 16 }
 0x1ec   : > { %v1918_v46 = vpop.f32.mrf.mxu0  ;;  %v2368_v62 = vsel %vm12575_vm6, %v2363_v10, %v2367_v4  ;;  %v2372_v51 = vor.u32 %v2371_v59, %v2367_v4  ;;  %v12227_v53 = vld [vmem:[%s15106_s2] ss:$0 sm:$0xff]  ;;  %s12259_s2 = sshll.u32 %s12346_s27, 4  ;;  %s12260_s2 = int_to_ptr.vmem [resolvable:$false] %s12259_s2 }
 0x1ed   : > { %v2656_v54 = vsel %vm12527_vm5, %v2654_v18, %v2655_v41  ;;  %v2657_v26 = vrot.slane %v2655_v41, 4  ;;  %v11411_v39 = vpack.c.bf16 %v1966_v25, %v1966_v25  ;;  %v1919_v57 = vadd.f32 %v13496_v50, %v1918_v46  ;;  %2498 = vrot.lane.b32.xlu0 %v2368_v62, %s15082_s19  ;;  %s12261_s23 = scalar_lea.vmem %s12260_s2, 32 }
 0x1ee   : > { %2734 = vst.msk [vmem:[#allocation3 + $0xbc] sm:$0xf] %vm2101_vm2, %v2656_v54  ;;  %v1920_v22 = vpop.f32.mrf.mxu0  ;;  %v2373_v38 = vrot.slane %v2372_v51, 4  ;;  %v2377_v24 = vrot.slane %v2375_v20, 5  ;;  %v2381_v48 = vrot.slane %v2379_v63, 4 }
 0x1ef   : > { %v2658_v8 = vrot.slane %v11411_v39, 5  ;;  %2127 = vst.msk [vmem:[#allocation3 + $0xc8] sm:$0xf] %vm2101_vm2, %v11411_v39  ;;  %v1967_v19 = vmax.f32 %v1919_v57, 0.0  ;;  %v2385_v42 = vshll.u32 %v11411_v39, 16  ;;  %v2389_v1 = vshrl.u32 %v11411_v39, 16 }
 0x1f0   : > { %v1921_v6 = vpop.f32.mrf.mxu0  ;;  %v2378_v58 = vsel %vm12575_vm6, %v2373_v38, %v2377_v24  ;;  %v2382_v52 = vor.u32 %v2381_v48, %v2377_v24 }
 0x1f1   : > { %v2659_v12 = vsel %vm12527_vm5, %v2657_v26, %v2658_v8  ;;  %v2660_v49 = vrot.slane %v2658_v8, 4  ;;  %v11412_v47 = vpack.c.bf16 %v1967_v19, %v1967_v19  ;;  %v1922_v9 = vadd.f32 %v13496_v50, %v1921_v6  ;;  %2500 = vrot.lane.b32.xlu1 %v2378_v58, %s15082_s19 }
 0x1f2   : > { %2735 = vst.msk [vmem:[#allocation3 + $0xc4] sm:$0xf] %vm2101_vm2, %v2659_v12  ;;  %v1923_v17 = vpop.f32.mrf.mxu0  ;;  %v2383_v32 = vrot.slane %v2382_v52, 4  ;;  %v2387_v11 = vrot.slane %v2385_v42, 5  ;;  %v2391_v13 = vrot.slane %v2389_v1, 4 }
 0x1f3   : > { %v2661_v55 = vrot.slane %v11412_v47, 5  ;;  %2128 = vst.msk [vmem:[#allocation3 + $0xd0] sm:$0xf] %vm2101_vm2, %v11412_v47  ;;  %v1968_v16 = vmax.f32 %v1922_v9, 0.0  ;;  %v2395_v36 = vshll.u32 %v11412_v47, 16  ;;  %v2399_v40 = vshrl.u32 %v11412_v47, 16 }
 0x1f4   : > { %v1926_v35 = vpop.f32.mrf.mxu0  ;;  %v2388_v15 = vsel %vm12575_vm6, %v2383_v32, %v2387_v11  ;;  %v2392_v28 = vor.u32 %v2391_v13, %v2387_v11 }
 0x1f5   : > { %v2662_v3 = vsel %vm12527_vm5, %v2660_v49, %v2661_v55  ;;  %v2663_v44 = vrot.slane %v2661_v55, 4  ;;  %v11413_v21 = vpack.c.bf16 %v1968_v16, %v1968_v16  ;;  %v1927_v45 = vadd.f32 %v13496_v50, %v1926_v35  ;;  %2502 = vrot.lane.b32.xlu0 %v2388_v15, %s15082_s19 }
 0x1f6   : > { %2736 = vst.msk [vmem:[#allocation3 + $0xcc] sm:$0xf] %vm2101_vm2, %v2662_v3  ;;  %v1928_v29 = vpop.f32.mrf.mxu0  ;;  %v2393_v14 = vrot.slane %v2392_v28, 4  ;;  %v2397_v43 = vrot.slane %v2395_v36, 5  ;;  %v2401_v34 = vrot.slane %v2399_v40, 4 }
 0x1f7   : > { %v2664_v23 = vrot.slane %v11413_v21, 5  ;;  %2129 = vst.msk [vmem:[#allocation3 + $0xd8] sm:$0xf] %vm2101_vm2, %v11413_v21  ;;  %v1969_v2 = vmax.f32 %v1927_v45, 0.0  ;;  %v2405_v37 = vshll.u32 %v11413_v21, 16  ;;  %v2409_v27 = vshrl.u32 %v11413_v21, 16 }
 0x1f8   : > { %v1929_v33 = vpop.f32.mrf.mxu0  ;;  %v2398_v60 = vsel %vm12575_vm6, %v2393_v14, %v2397_v43  ;;  %v2402_v61 = vor.u32 %v2401_v34, %v2397_v43 }
 0x1f9   : > { %v2665_v50 = vsel %vm12527_vm5, %v2663_v44, %v2664_v23  ;;  %v2666_v56 = vrot.slane %v2664_v23, 4  ;;  %v11414_v18 = vpack.c.bf16 %v1969_v2, %v1969_v2  ;;  %v1930_v30 = vadd.f32 %v12227_v53, %v1929_v33  ;;  %2504 = vrot.lane.b32.xlu1 %v2398_v60, %s15082_s19 }
 0x1fa   : > { %2737 = vst.msk [vmem:[#allocation3 + $0xd4] sm:$0xf] %vm2101_vm2, %v2665_v50  ;;  %v1931_v5 = vpop.f32.mrf.mxu0  ;;  %v2403_v10 = vrot.slane %v2402_v61, 4  ;;  %v2407_v4 = vrot.slane %v2405_v37, 5  ;;  %v2411_v59 = vrot.slane %v2409_v27, 4 }
 0x1fb   : > { %v2667_v41 = vrot.slane %v11414_v18, 5  ;;  %2130 = vst.msk [vmem:[#allocation3 + $0xe0] sm:$0xf] %vm2101_vm2, %v11414_v18  ;;  %v1970_v25 = vmax.f32 %v1930_v30, 0.0  ;;  %v2415_v20 = vshll.u32 %v11414_v18, 16  ;;  %v2419_v63 = vshrl.u32 %v11414_v18, 16 }
 0x1fc   : > { %v1934_v46 = vpop.f32.mrf.mxu0  ;;  %v2408_v62 = vsel %vm12575_vm6, %v2403_v10, %v2407_v4  ;;  %v2412_v51 = vor.u32 %v2411_v59, %v2407_v4 }
 0x1fd   : > { %v2668_v54 = vsel %vm12527_vm5, %v2666_v56, %v2667_v41  ;;  %v2669_v26 = vrot.slane %v2667_v41, 4  ;;  %v11415_v39 = vpack.c.bf16 %v1970_v25, %v1970_v25  ;;  %v1935_v57 = vadd.f32 %v12227_v53, %v1934_v46  ;;  %2506 = vrot.lane.b32.xlu0 %v2408_v62, %s15082_s19  ;;  %v11736_v41 = vld [vmem:[#allocation3 + $0x4] ss:$8 sps:$4 sm:$0xff]  }
 0x1fe   : > { %2738 = vst.msk [vmem:[#allocation3 + $0xdc] sm:$0xf] %vm2101_vm2, %v2668_v54  ;;  %v1936_v22 = vpop.f32.mrf.mxu0  ;;  %v2413_v38 = vrot.slane %v2412_v51, 4  ;;  %v2417_v24 = vrot.slane %v2415_v20, 5  ;;  %v2421_v48 = vrot.slane %v2419_v63, 4  ;;  %10868 = vmatprep.mubr.msk.bf16.mxu1 %vm3022_vm7, %v11736_v41 }
 0x1ff   : > { %v2670_v8 = vrot.slane %v11415_v39, 5  ;;  %2131 = vst.msk [vmem:[#allocation3 + $0xe8] sm:$0xf] %vm2101_vm2, %v11415_v39  ;;  %v1971_v19 = vmax.f32 %v1935_v57, 0.0  ;;  %v2425_v42 = vshll.u32 %v11415_v39, 16  ;;  %v2429_v1 = vshrl.u32 %v11415_v39, 16 }
 0x200   : > { %v1937_v6 = vpop.f32.mrf.mxu0  ;;  %v2418_v58 = vsel %vm12575_vm6, %v2413_v38, %v2417_v24  ;;  %v2422_v52 = vor.u32 %v2421_v48, %v2417_v24  ;;  %v11738_v51 = vld [vmem:[#allocation3 + $0x14] ss:$8 sps:$4 sm:$0xff]   ;;  %v11740_v38 = vld [vmem:[#allocation3 + $0x24] ss:$8 sps:$4 sm:$0xff]  }
 0x201   : > { %v2671_v12 = vsel %vm12527_vm5, %v2669_v26, %v2670_v8  ;;  %v2672_v49 = vrot.slane %v2670_v8, 4  ;;  %v11416_v47 = vpack.c.bf16 %v1971_v19, %v1971_v19  ;;  %v1938_v9 = vadd.f32 %v12227_v53, %v1937_v6  ;;  %2508 = vrot.lane.b32.xlu1 %v2418_v58, %s15082_s19 }
 0x202   : > { %2739 = vst.msk [vmem:[#allocation3 + $0xe4] sm:$0xf] %vm2101_vm2, %v2671_v12  ;;  %v2423_v17 = vrot.slane %v2422_v52, 4  ;;  %v2427_v32 = vrot.slane %v2425_v42, 5  ;;  %v2431_v11 = vrot.slane %v2429_v1, 4  ;;  %v1939_v13 = vpop.f32.mrf.mxu0 }
 0x203   : > { %v2673_v55 = vrot.slane %v11416_v47, 5  ;;  %2132 = vst.msk [vmem:[#allocation3 + $0xf0] sm:$0xf] %vm2101_vm2, %v11416_v47  ;;  %v1972_v16 = vmax.f32 %v1938_v9, 0.0  ;;  %v2435_v36 = vshll.u32 %v11416_v47, 16  ;;  %v2439_v40 = vshrl.u32 %v11416_v47, 16 }
 0x204   : > { %v2428_v35 = vsel %vm12575_vm6, %v2423_v17, %v2427_v32  ;;  %v2432_v15 = vor.u32 %v2431_v11, %v2427_v32  ;;  %v11742_v1 = vld [vmem:[#allocation3 + $0x34] ss:$8 sps:$4 sm:$0xff]   ;;  %v11744_v47 = vld [vmem:[#allocation3 + $0x44] ss:$8 sps:$4 sm:$0xff]  }
 0x205   : > { %v2674_v28 = vsel %vm12527_vm5, %v2672_v49, %v2673_v55  ;;  %v2675_v3 = vrot.slane %v2673_v55, 4  ;;  %v11417_v44 = vpack.c.bf16 %v1972_v16, %v1972_v16  ;;  %2510 = vrot.lane.b32.xlu0 %v2428_v35, %s15082_s19  ;;  %v2437_v21 = vrot.slane %v2435_v36, 5  ;;  %v11746_v55 = vld [vmem:[#allocation3 + $0x54] ss:$8 sps:$4 sm:$0xff]  }
 0x206   : > { %2740 = vst.msk [vmem:[#allocation3 + $0xec] sm:$0xf] %vm2101_vm2, %v2674_v28  ;;  %v2433_v45 = vrot.slane %v2432_v15, 4  ;;  %v2441_v29 = vrot.slane %v2439_v40, 4  ;;  %v11748_v28 = vld [vmem:[#allocation3 + $0x64] ss:$8 sps:$4 sm:$0xff]  }
 0x207   : > { %v2676_v14 = vrot.slane %v11417_v44, 5  ;;  %v2455_v43 = vpop.permute.xlu0 %2454  ;;  %v2445_v34 = vshll.u32 %v11417_v44, 16  ;;  %v2449_v23 = vshrl.u32 %v11417_v44, 16  ;;  %2134 = vst.msk [vmem:[#allocation3 + $0xf8] sm:$0x1] %vm2133_vm4, %v11417_v44 }
 0x208   : > { %2551 = vst.msk [vmem:[#allocation3] sm:$0xf] %vm2550_vm3, %v2455_v43  ;;  %v2438_v2 = vsel %vm12575_vm6, %v2433_v45, %v2437_v21  ;;  %v2442_v37 = vor.u32 %v2441_v29, %v2437_v21 }
 0x209   : > { %v2677_v27 = vsel %vm12527_vm5, %v2675_v3, %v2676_v14  ;;  %v2678_v33 = vrot.slane %v2676_v14, 4  ;;  %2512 = vrot.lane.b32.xlu1 %v2438_v2, %s15082_s19  ;;  %v2447_v60 = vrot.slane %v2445_v34, 5  ;;  %v2451_v61 = vrot.slane %v2449_v23, 4  ;;  %v11750_v14 = vld [vmem:[#allocation3 + $0x74] ss:$8 sps:$4 sm:$0xff]  }
 0x20a   : > { %2741 = vst.msk [vmem:[#allocation3 + $0xf4] sm:$0xf] %vm2101_vm2, %v2677_v27  ;;  %v2443_v50 = vrot.slane %v2442_v37, 4  ;;  %v11752_v27 = vld [vmem:[#allocation3 + $0x84] ss:$8 sps:$4 sm:$0xff]  }
 0x20b   : > { %v2457_v56 = vpop.permute.xlu1 %2456  ;;  %v2452_v18 = vor.u32 %v2451_v61, %v2447_v60  ;;  %2742 = vst.msk [vmem:[#allocation3 + $0xfc] sm:$0x1] %vm2133_vm4, %v2678_v33 }
 0x20c   : > { %2552 = vst.msk [vmem:[#allocation3 + $0x8] sm:$0xf] %vm2550_vm3, %v2457_v56  ;;  %v2448_v53 = vsel %vm12575_vm6, %v2443_v50, %v2447_v60 }
 0x20d   : > { %2514 = vrot.lane.b32.xlu0 %v2448_v53, %s15082_s19  ;;  %v2453_v30 = vrot.slane %v2452_v18, 4  ;;  %v11754_v18 = vld [vmem:[#allocation3 + $0x94] ss:$8 sps:$4 sm:$0xff]  }
 0x20f   : > { %v2459_v5 = vpop.permute.xlu0 %2458  ;;  %2516 = vrot.lane.b32.xlu1 %v2453_v30, %s15082_s19  ;;  %v2743_v4 = vld [vmem:[#allocation3] sm:$0xff]  ;;  %s15107_s19 = smov 64  }
 0x210   : > { %2553 = vst.msk [vmem:[#allocation3 + $0x10] sm:$0xf] %vm2550_vm3, %v2459_v5 }
 0x213   : > { %v2461_v10 = vpop.permute.xlu1 %2460  ;;  %v2744_v59 = vld [vmem:[#allocation3 + $0x8] sm:$0xff] }
 0x214   : > { %2554 = vst.msk [vmem:[#allocation3 + $0x18] sm:$0xf] %vm2550_vm3, %v2461_v10  ;;  %v10824_v25 = vcombine.low %v2743_v4, %v2744_v59  ;;  %v11756_v59 = vld [vmem:[#allocation3 + $0xa4] ss:$8 sps:$4 sm:$0xff]  }
 0x216   : > { %3104 = vmatmul.mubr.bf16.vlgmr.msra.gmra.mxu1 %v10824_v25 }
 0x217   : > { %v2463_v20 = vpop.permute.xlu0 %2462  ;;  %v2745_v46 = vld [vmem:[#allocation3 + $0x10] sm:$0xff]  ;;  %10869 = vmatprep.mubr.msk.bf16.mxu1 %vm3022_vm7, %v11738_v51 }
 0x218   : > { %2555 = vst.msk [vmem:[#allocation3 + $0x20] sm:$0xf] %vm2550_vm3, %v2463_v20 }
 0x21b   : > { %v2465_v63 = vpop.permute.xlu1 %2464  ;;  %v2746_v62 = vld [vmem:[#allocation3 + $0x18] sm:$0xff] }
 0x21c   : > { %2556 = vst.msk [vmem:[#allocation3 + $0x28] sm:$0xf] %vm2550_vm3, %v2465_v63  ;;  %v10826_v54 = vcombine.low %v2745_v46, %v2746_v62  ;;  %v11758_v62 = vld [vmem:[#allocation3 + $0xb4] ss:$8 sps:$4 sm:$0xff]  }
 0x21e   : > { %3112 = vmatmul.mubr.bf16.gmra.mxu1 %v10826_v54  ;;  %v11770_v54 = vld [vmem:[%s15063_s5 + $0x38] sm:$0xff]  }
 0x21f   : > { %v2467_v26 = vpop.permute.xlu0 %2466  ;;  %v2747_v57 = vld [vmem:[#allocation3 + $0x20] sm:$0xff]  ;;  %10870 = vmatprep.mubr.msk.bf16.mxu1 %vm3022_vm7, %v11740_v38  ;;  %4308 = vmatpush1.bf16.msra.mxu1 %v11770_v54 }
 0x220   : > { %2557 = vst.msk [vmem:[#allocation3 + $0x30] sm:$0xf] %vm2550_vm3, %v2467_v26  ;;  %4309 = vmatprep.subr.bf16.mxu1 %v12340_v0  ;;  %v11760_v38 = vld [vmem:[#allocation3 + $0xc4] ss:$8 sps:$4 sm:$0xff]  }
 0x223   : > { %v2469_v39 = vpop.permute.xlu1 %2468  ;;  %v2748_v22 = vld [vmem:[#allocation3 + $0x28] sm:$0xff] }
 0x224   : > { %2558 = vst.msk [vmem:[#allocation3 + $0x38] sm:$0xf] %vm2550_vm3, %v2469_v39  ;;  %v10828_v24 = vcombine.low %v2747_v57, %v2748_v22 }
 0x226   : > { %3120 = vmatmul.mubr.bf16.gmra.mxu1 %v10828_v24 }
 0x227   : > { %v2471_v48 = vpop.permute.xlu0 %2470  ;;  %v2749_v19 = vld [vmem:[#allocation3 + $0x30] sm:$0xff]  ;;  %10871 = vmatprep.mubr.msk.bf16.mxu1 %vm3022_vm7, %v11742_v1 }
 0x228   : > { %2559 = vst.msk [vmem:[#allocation3 + $0x40] sm:$0xf] %vm2550_vm3, %v2471_v48  ;;  %v11771_v48 = vld [vmem:[%s15063_s5 + $0x30] sm:$0xff]  }
 0x229   : > { %4310 = vmatpush1.bf16.msra.mxu1 %v11771_v48 }
 0x22a   : > { %4311 = vmatprep.subr.bf16.mxu1 %v12340_v0 }
 0x22b   : > { %v2473_v8 = vpop.permute.xlu1 %2472  ;;  %v2750_v42 = vld [vmem:[#allocation3 + $0x38] sm:$0xff] }
 0x22c   : > { %2560 = vst.msk [vmem:[#allocation3 + $0x48] sm:$0xf] %vm2550_vm3, %v2473_v8  ;;  %v10830_v6 = vcombine.low %v2749_v19, %v2750_v42 }
 0x22e   : > { %3128 = vmatmul.mubr.bf16.gmra.mxu1 %v10830_v6  ;;  %v11762_v6 = vld [vmem:[#allocation3 + $0xd4] ss:$8 sps:$4 sm:$0xff]  }
 0x22f   : > { %v2475_v58 = vpop.permute.xlu0 %2474  ;;  %v2751_v12 = vld [vmem:[#allocation3 + $0x40] sm:$0xff]  ;;  %10872 = vmatprep.mubr.msk.bf16.mxu1 %vm3022_vm7, %v11744_v47 }
 0x230   : > { %2561 = vst.msk [vmem:[#allocation3 + $0x50] sm:$0xf] %vm2550_vm3, %v2475_v58  ;;  %v11764_v47 = vld [vmem:[#allocation3 + $0xe4] ss:$8 sps:$4 sm:$0xff]  }
 0x233   : > { %v2477_v52 = vpop.permute.xlu1 %2476  ;;  %v2752_v49 = vld [vmem:[#allocation3 + $0x48] sm:$0xff] }
 0x234   : > { %2562 = vst.msk [vmem:[#allocation3 + $0x58] sm:$0xf] %vm2550_vm3, %v2477_v52  ;;  %v10832_v9 = vcombine.low %v2751_v12, %v2752_v49  ;;  %v11772_v49 = vld [vmem:[%s15063_s5 + $0x28] sm:$0xff]  }
 0x235   : > { %4312 = vmatpush1.bf16.msra.mxu1 %v11772_v49 }
 0x236   : > { %3136 = vmatmul.mubr.bf16.gmra.mxu1 %v10832_v9  ;;  %4313 = vmatprep.subr.bf16.mxu1 %v12340_v0 }
 0x237   : > { %v2479_v17 = vpop.permute.xlu0 %2478  ;;  %v2753_v11 = vld [vmem:[#allocation3 + $0x50] sm:$0xff]  ;;  %10873 = vmatprep.mubr.msk.bf16.mxu1 %vm3022_vm7, %v11746_v55 }
 0x238   : > { %2563 = vst.msk [vmem:[#allocation3 + $0x60] sm:$0xf] %vm2550_vm3, %v2479_v17  ;;  %v11767_v17 = vld [vmem:[#allocation3 + $0xf4] ss:$8 sps:$4 sm:$0x1f]  }
 0x239   : > { %v11775_v55 = vld [vmem:[%s15063_s5 + $0x10] sm:$0xff]  }
 0x23b   : > { %v2481_v32 = vpop.permute.xlu1 %2480  ;;  %v2754_v13 = vld [vmem:[#allocation3 + $0x58] sm:$0xff] }
 0x23c   : > { %2564 = vst.msk [vmem:[#allocation3 + $0x68] sm:$0xf] %vm2550_vm3, %v2481_v32  ;;  %v10834_v16 = vcombine.low %v2753_v11, %v2754_v13  ;;  %v11773_v11 = vld [vmem:[%s15063_s5 + $0x20] sm:$0xff]   ;;  %v11774_v13 = vld [vmem:[%s15063_s5 + $0x18] sm:$0xff]  }
 0x23d   : > { %4314 = vmatpush1.bf16.msra.mxu1 %v11773_v11 }
 0x23e   : > { %3144 = vmatmul.mubr.bf16.gmra.mxu1 %v10834_v16  ;;  %4315 = vmatprep.subr.bf16.mxu1 %v12340_v0  ;;  %v11776_v16 = vld [vmem:[%s15063_s5 + $0x8] sm:$0xff]  }
 0x23f   : > { %v2483_v36 = vpop.permute.xlu0 %2482  ;;  %v2755_v35 = vld [vmem:[#allocation3 + $0x60] sm:$0xff]  ;;  %10874 = vmatprep.mubr.msk.bf16.mxu1 %vm3022_vm7, %v11748_v28 }
 0x240   : > { %2565 = vst.msk [vmem:[#allocation3 + $0x70] sm:$0xf] %vm2550_vm3, %v2483_v36  ;;  %v11777_v36 = vld [vmem:[%s15063_s5] sm:$0xff]  }
 0x241   : > { %4316 = vmatpush1.bf16.msra.mxu1 %v11774_v13 }
 0x242   : > { %4317 = vmatprep.subr.bf16.mxu1 %v12340_v0 }
 0x243   : > { %v2485_v40 = vpop.permute.xlu1 %2484  ;;  %v2756_v15 = vld [vmem:[#allocation3 + $0x68] sm:$0xff] }
 0x244   : > { %2566 = vst.msk [vmem:[#allocation3 + $0x78] sm:$0xf] %vm2550_vm3, %v2485_v40  ;;  %v10836_v3 = vcombine.low %v2755_v35, %v2756_v15  ;;  %v11778_v40 = vld [vmem:[%s15063_s5 + $0x58] sm:$0xff]   ;;  %v11779_v35 = vld [vmem:[%s15063_s5 + $0x50] sm:$0xff]   ;;  %v13857_v15 = vld [vmem:[%s15062_s4] ss:$0 sm:$0xff] }
 0x245   : > { %4318 = vmatpush1.bf16.msra.mxu1 %v11775_v55 }
 0x246   : > { %3152 = vmatmul.mubr.bf16.gmra.mxu1 %v10836_v3  ;;  %4319 = vmatprep.subr.bf16.mxu1 %v12340_v0  ;;  %v11780_v3 = vld [vmem:[%s15063_s5 + $0x48] sm:$0xff]  }
 0x247   : > { %v2487_v44 = vpop.permute.xlu0 %2486  ;;  %v2757_v45 = vld [vmem:[#allocation3 + $0x70] sm:$0xff]  ;;  %10875 = vmatprep.mubr.msk.bf16.mxu1 %vm3022_vm7, %v11750_v14 }
 0x248   : > { %2567 = vst.msk [vmem:[#allocation3 + $0x80] sm:$0xf] %vm2550_vm3, %v2487_v44 }
 0x249   : > { %4320 = vmatpush1.bf16.msra.mxu1 %v11776_v16 }
 0x24a   : > { %4321 = vmatprep.subr.bf16.mxu1 %v12340_v0 }
 0x24b   : > { %v2489_v21 = vpop.permute.xlu1 %2488  ;;  %v2758_v29 = vld [vmem:[#allocation3 + $0x78] sm:$0xff] }
 0x24c   : > { %2568 = vst.msk [vmem:[#allocation3 + $0x88] sm:$0xf] %vm2550_vm3, %v2489_v21  ;;  %v10838_v43 = vcombine.low %v2757_v45, %v2758_v29 }
 0x24d   : > { %4322 = vmatpush1.bf16.msra.mxu1 %v11777_v36 }
 0x24e   : > { %3160 = vmatmul.mubr.bf16.gmra.mxu1 %v10838_v43  ;;  %4331 = vmatprep.subr.bf16.mxu1 %v12340_v0 }
 0x24f   : > { %v2491_v34 = vpop.permute.xlu0 %2490  ;;  %v2759_v2 = vld [vmem:[#allocation3 + $0x80] sm:$0xff]  ;;  %10876 = vmatprep.mubr.msk.bf16.mxu1 %vm3022_vm7, %v11752_v27 }
 0x250   : > { %2569 = vst.msk [vmem:[#allocation3 + $0x90] sm:$0xf] %vm2550_vm3, %v2491_v34 }
 0x251   : > { %4332 = vmatpush2.bf16.msra.mxu1 %v11778_v40 }
 0x252   : > { %4333 = vmatprep.subr.bf16.mxu1 %v12340_v0 }
 0x253   : > { %v2493_v23 = vpop.permute.xlu1 %2492  ;;  %v2760_v37 = vld [vmem:[#allocation3 + $0x88] sm:$0xff] }
 0x254   : > { %2570 = vst.msk [vmem:[#allocation3 + $0x98] sm:$0xf] %vm2550_vm3, %v2493_v23  ;;  %v10840_v33 = vcombine.low %v2759_v2, %v2760_v37  ;;  %v11781_v2 = vld [vmem:[%s15063_s5 + $0x40] sm:$0xff]  }
 0x255   : > { %4334 = vmatpush2.bf16.msra.mxu1 %v11779_v35 }
 0x256   : > { %3168 = vmatmul.mubr.bf16.gmra.mxu1 %v10840_v33  ;;  %4335 = vmatprep.subr.bf16.mxu1 %v12340_v0 }
 0x257   : > { %v2495_v60 = vpop.permute.xlu0 %2494  ;;  %v2761_v50 = vld [vmem:[#allocation3 + $0x90] sm:$0xff]  ;;  %10877 = vmatprep.mubr.msk.bf16.mxu1 %vm3022_vm7, %v11754_v18 }
 0x258   : > { %2571 = vst.msk [vmem:[#allocation3 + $0xa0] sm:$0xf] %vm2550_vm3, %v2495_v60 }
 0x259   : > { %4336 = vmatpush2.bf16.msra.mxu1 %v11780_v3 }
 0x25a   : > { %4337 = vmatprep.subr.bf16.mxu1 %v12340_v0 }
 0x25b   : > { %v2497_v61 = vpop.permute.xlu1 %2496  ;;  %v2762_v56 = vld [vmem:[#allocation3 + $0x98] sm:$0xff] }
 0x25c   : > { %2572 = vst.msk [vmem:[#allocation3 + $0xa8] sm:$0xf] %vm2550_vm3, %v2497_v61  ;;  %v10842_v53 = vcombine.low %v2761_v50, %v2762_v56 }
 0x25d   : > { %4338 = vmatpush2.bf16.msra.mxu1 %v11781_v2 }
 0x25e   : > { %3176 = vmatmul.mubr.bf16.gmra.mxu1 %v10842_v53 }
 0x25f   : > { %v2499_v30 = vpop.permute.xlu0 %2498  ;;  %v2763_v10 = vld [vmem:[#allocation3 + $0xa0] sm:$0xff]  ;;  %10878 = vmatprep.mubr.msk.bf16.mxu1 %vm3022_vm7, %v11756_v59 }
 0x260   : > { %2573 = vst.msk [vmem:[#allocation3 + $0xb0] sm:$0xf] %vm2550_vm3, %v2499_v30 }
 0x263   : > { %v2501_v5 = vpop.permute.xlu1 %2500  ;;  %v2764_v4 = vld [vmem:[#allocation3 + $0xa8] sm:$0xff] }
 0x264   : > { %2574 = vst.msk [vmem:[#allocation3 + $0xb8] sm:$0xf] %vm2550_vm3, %v2501_v5  ;;  %v10844_v41 = vcombine.low %v2763_v10, %v2764_v4 }
 0x266   : > { %3184 = vmatmul.mubr.bf16.gmra.mxu1 %v10844_v41 }
 0x267   : > { %v2503_v25 = vpop.permute.xlu0 %2502  ;;  %v2765_v63 = vld [vmem:[#allocation3 + $0xb0] sm:$0xff]  ;;  %10879 = vmatprep.mubr.msk.bf16.mxu1 %vm3022_vm7, %v11758_v62 }
 0x268   : > { %2575 = vst.msk [vmem:[#allocation3 + $0xc0] sm:$0xf] %vm2550_vm3, %v2503_v25 }
 0x26b   : > { %v2505_v20 = vpop.permute.xlu1 %2504  ;;  %v2766_v46 = vld [vmem:[#allocation3 + $0xb8] sm:$0xff] }
 0x26c   : > { %2576 = vst.msk [vmem:[#allocation3 + $0xc8] sm:$0xf] %vm2550_vm3, %v2505_v20  ;;  %v10846_v51 = vcombine.low %v2765_v63, %v2766_v46 }
 0x26e   : > { %3192 = vmatmul.mubr.bf16.gmra.mxu1 %v10846_v51 }
 0x26f   : > { %v2507_v26 = vpop.permute.xlu0 %2506  ;;  %v2767_v57 = vld [vmem:[#allocation3 + $0xc0] sm:$0xff]  ;;  %10880 = vmatprep.mubr.msk.bf16.mxu1 %vm3022_vm7, %v11760_v38 }
 0x270   : > { %2577 = vst.msk [vmem:[#allocation3 + $0xd0] sm:$0xf] %vm2550_vm3, %v2507_v26 }
 0x273   : > { %v2509_v39 = vpop.permute.xlu1 %2508  ;;  %v2768_v22 = vld [vmem:[#allocation3 + $0xc8] sm:$0xff] }
 0x274   : > { %2578 = vst.msk [vmem:[#allocation3 + $0xd8] sm:$0xf] %vm2550_vm3, %v2509_v39  ;;  %v10848_v24 = vcombine.low %v2767_v57, %v2768_v22 }
 0x276   : > { %3200 = vmatmul.mubr.bf16.gmra.mxu1 %v10848_v24 }
 0x277   : > { %v2511_v8 = vpop.permute.xlu0 %2510  ;;  %v2769_v42 = vld [vmem:[#allocation3 + $0xd0] sm:$0xff]  ;;  %10881 = vmatprep.mubr.msk.bf16.mxu1 %vm3022_vm7, %v11762_v6 }
 0x278   : > { %2579 = vst.msk [vmem:[#allocation3 + $0xe0] sm:$0xf] %vm2550_vm3, %v2511_v8 }
 0x27b   : > { %v2513_v19 = vpop.permute.xlu1 %2512  ;;  %v2770_v1 = vld [vmem:[#allocation3 + $0xd8] sm:$0xff] }
 0x27c   : > { %2580 = vst.msk [vmem:[#allocation3 + $0xe8] sm:$0xf] %vm2550_vm3, %v2513_v19  ;;  %v10850_v58 = vcombine.low %v2769_v42, %v2770_v1 }
 0x27e   : > { %3208 = vmatmul.mubr.bf16.gmra.mxu1 %v10850_v58 }
 0x27f   : > { %v2515_v52 = vpop.permute.xlu0 %2514  ;;  %10882 = vmatprep.mubr.msk.bf16.mxu1 %vm3022_vm7, %v11764_v47 }
 0x280   : > { %2581 = vst.msk [vmem:[#allocation3 + $0xf0] sm:$0xf] %vm2550_vm3, %v2515_v52 }
 0x281   : > { %v2517_v12 = vpop.permute.xlu1 %2516 }
 0x282   : > { %2583 = vst.msk [vmem:[#allocation3 + $0xf8] sm:$0x1] %vm2582_vm8, %v2517_v12 }
 0x283   : > { %v11766_v9 = vld [vmem:[#allocation3 + $0xe0] ss:$8 sps:$4 sm:$0xff]  }
 0x286   : > { %3216 = vmatmul.mubr.bf16.gmra.mxu1 %v11766_v9 }
 0x287   : > { %10883 = vmatprep.mubr.msk.bf16.mxu1 %vm3022_vm7, %v11767_v17 }
 0x289   : > { %v11769_v32 = vld [vmem:[#allocation3 + $0xf0] ss:$8 sps:$4 sm:$0x1f]  }
 0x28e   : > { %3224 = vmatmul.mubr.bf16.gmra.mxu1 %v11769_v32 }
 0x2d6   : > { %v3105_v28 = vpop.f32.mrf.mxu1 }
 0x2d7   : > { %v3106_v44 = vadd.f32 %v13857_v15, %v3105_v28 }
 0x2d8   : > { %v3107_v21 = vpop.f32.mrf.mxu1 }
 0x2d9   : > { %v11418_v45 = vpack.c.bf16 %v3106_v44, %v3106_v44 }
 0x2da   : > { %v3108_v29 = vpop.f32.mrf.mxu1 }
 0x2db   : > { %v3391_v14 = vshrl.u32 %v11418_v45, 16  ;;  %v3394_v43 = vshll.u32 %v11418_v45, 16  ;;  %3357 = vst.msk [vmem:[#allocation3] sm:$0xf] %vm2101_vm2, %v11418_v45  ;;  %v3109_v34 = vadd.f32 %v13857_v15, %v3108_v29  ;;  %v10916_v60 = vrot.slane %v11418_v45, 9 }
 0x2dc   : > { %v3110_v23 = vpop.f32.mrf.mxu1 }
 0x2dd   : > { %v11419_v37 = vpack.c.bf16 %v3109_v34, %v3109_v34  ;;  %v3393_v27 = vrot.slane %v3391_v14, 4  ;;  %v3396_v33 = vrot.slane %v3394_v43, 5 }
 0x2de   : > { %v3113_v61 = vpop.f32.mrf.mxu1 }
 0x2df   : > { %v3404_v50 = vshrl.u32 %v11419_v37, 16  ;;  %v3830_v56 = vrot.slane %v11419_v37, 5  ;;  %3358 = vst.msk [vmem:[#allocation3 + $0x8] sm:$0xf] %vm2101_vm2, %v11419_v37  ;;  %v3114_v18 = vadd.f32 %v13857_v15, %v3113_v61  ;;  %v3397_v53 = vor.u32 %v3396_v33, %v3393_v27 }
 0x2e0   : > { %v3115_v30 = vpop.f32.mrf.mxu1  ;;  %v3400_v5 = vshll.u32 %v11419_v37, 16 }
 0x2e1   : > { %v3831_v10 = vsel %vm12527_vm5, %v10916_v60, %v3830_v56  ;;  %v11420_v4 = vpack.c.bf16 %v3114_v18, %v3114_v18  ;;  %v3398_v59 = vrot.slane %v3397_v53, 4  ;;  %v3832_v41 = vrot.slane %v3830_v56, 4 }
 0x2e2   : > { %3953 = vst.msk [vmem:[#allocation3 + $0x4] sm:$0xf] %vm2101_vm2, %v3831_v10  ;;  %v3116_v25 = vpop.f32.mrf.mxu1  ;;  %v3402_v20 = vrot.slane %v3400_v5, 5  ;;  %v3406_v63 = vrot.slane %v3404_v50, 4 }
 0x2e3   : > { %v3414_v46 = vshrl.u32 %v11420_v4, 16  ;;  %v3833_v62 = vrot.slane %v11420_v4, 5  ;;  %3359 = vst.msk [vmem:[#allocation3 + $0x10] sm:$0xf] %vm2101_vm2, %v11420_v4  ;;  %v3117_v51 = vadd.f32 %v13857_v15, %v3116_v25  ;;  %v3410_v54 = vshll.u32 %v11420_v4, 16 }
 0x2e4   : > { %v3118_v26 = vpop.f32.mrf.mxu1  ;;  %v3403_v39 = vsel %vm12575_vm6, %v3398_v59, %v3402_v20  ;;  %v3407_v57 = vor.u32 %v3406_v63, %v3402_v20 }
 0x2e5   : > { %v3416_v22 = vrot.slane %v3414_v46, 4  ;;  %v3834_v38 = vsel %vm12527_vm5, %v3832_v41, %v3833_v62  ;;  %v11421_v24 = vpack.c.bf16 %v3117_v51, %v3117_v51  ;;  %3704 = vrot.lane.b32.xlu0 %v3403_v39, %s15107_s19  ;;  %v3835_v48 = vrot.slane %v3833_v62, 4 }
 0x2e6   : > { %3954 = vst.msk [vmem:[#allocation3 + $0xc] sm:$0xf] %vm2101_vm2, %v3834_v38  ;;  %v3121_v8 = vpop.f32.mrf.mxu1  ;;  %v3408_v19 = vrot.slane %v3407_v57, 4  ;;  %v3412_v42 = vrot.slane %v3410_v54, 5 }
 0x2e7   : > { %v3424_v1 = vshrl.u32 %v11421_v24, 16  ;;  %v3836_v6 = vrot.slane %v11421_v24, 5  ;;  %3360 = vst.msk [vmem:[#allocation3 + $0x18] sm:$0xf] %vm2101_vm2, %v11421_v24  ;;  %v3122_v58 = vadd.f32 %v13857_v15, %v3121_v8  ;;  %v3420_v52 = vshll.u32 %v11421_v24, 16 }
 0x2e8   : > { %v3123_v12 = vpop.f32.mrf.mxu1  ;;  %v3413_v49 = vsel %vm12575_vm6, %v3408_v19, %v3412_v42  ;;  %v3417_v47 = vor.u32 %v3416_v22, %v3412_v42 }
 0x2e9   : > { %v3426_v9 = vrot.slane %v3424_v1, 4  ;;  %v3837_v17 = vsel %vm12527_vm5, %v3835_v48, %v3836_v6  ;;  %v11422_v32 = vpack.c.bf16 %v3122_v58, %v3122_v58  ;;  %3706 = vrot.lane.b32.xlu1 %v3413_v49, %s15107_s19  ;;  %v3838_v11 = vrot.slane %v3836_v6, 4 }
 0x2ea   : > { %3955 = vst.msk [vmem:[#allocation3 + $0x14] sm:$0xf] %vm2101_vm2, %v3837_v17  ;;  %v3124_v13 = vpop.f32.mrf.mxu1  ;;  %v3418_v55 = vrot.slane %v3417_v47, 4  ;;  %v3422_v16 = vrot.slane %v3420_v52, 5 }
 0x2eb   : > { %v3434_v36 = vshrl.u32 %v11422_v32, 16  ;;  %v3839_v40 = vrot.slane %v11422_v32, 5  ;;  %3361 = vst.msk [vmem:[#allocation3 + $0x20] sm:$0xf] %vm2101_vm2, %v11422_v32  ;;  %v3125_v35 = vadd.f32 %v13857_v15, %v3124_v13  ;;  %v3430_v28 = vshll.u32 %v11422_v32, 16 }
 0x2ec   : > { %v3126_v3 = vpop.f32.mrf.mxu1  ;;  %v3423_v44 = vsel %vm12575_vm6, %v3418_v55, %v3422_v16  ;;  %v3427_v21 = vor.u32 %v3426_v9, %v3422_v16 }
 0x2ed   : > { %v3436_v45 = vrot.slane %v3434_v36, 4  ;;  %v3840_v29 = vsel %vm12527_vm5, %v3838_v11, %v3839_v40  ;;  %v11423_v14 = vpack.c.bf16 %v3125_v35, %v3125_v35  ;;  %3708 = vrot.lane.b32.xlu0 %v3423_v44, %s15107_s19  ;;  %v3841_v43 = vrot.slane %v3839_v40, 4 }
 0x2ee   : > { %3956 = vst.msk [vmem:[#allocation3 + $0x1c] sm:$0xf] %vm2101_vm2, %v3840_v29  ;;  %v3129_v34 = vpop.f32.mrf.mxu1  ;;  %v3428_v23 = vrot.slane %v3427_v21, 4  ;;  %v3432_v2 = vrot.slane %v3430_v28, 5 }
 0x2ef   : > { %v3444_v37 = vshrl.u32 %v11423_v14, 16  ;;  %v3842_v27 = vrot.slane %v11423_v14, 5  ;;  %3362 = vst.msk [vmem:[#allocation3 + $0x28] sm:$0xf] %vm2101_vm2, %v11423_v14  ;;  %v3130_v33 = vadd.f32 %v13857_v15, %v3129_v34  ;;  %v3440_v60 = vshll.u32 %v11423_v14, 16 }
 0x2f0   : > { %v3131_v61 = vpop.f32.mrf.mxu1  ;;  %v3433_v50 = vsel %vm12575_vm6, %v3428_v23, %v3432_v2  ;;  %v3437_v56 = vor.u32 %v3436_v45, %v3432_v2 }
 0x2f1   : > { %v3446_v18 = vrot.slane %v3444_v37, 4  ;;  %v3843_v53 = vsel %vm12527_vm5, %v3841_v43, %v3842_v27  ;;  %v11424_v30 = vpack.c.bf16 %v3130_v33, %v3130_v33  ;;  %3710 = vrot.lane.b32.xlu1 %v3433_v50, %s15107_s19  ;;  %v3844_v5 = vrot.slane %v3842_v27, 4 }
 0x2f2   : > { %3957 = vst.msk [vmem:[#allocation3 + $0x24] sm:$0xf] %vm2101_vm2, %v3843_v53  ;;  %v3132_v10 = vpop.f32.mrf.mxu1  ;;  %v3438_v4 = vrot.slane %v3437_v56, 4  ;;  %v3442_v59 = vrot.slane %v3440_v60, 5 }
 0x2f3   : > { %v3454_v41 = vshrl.u32 %v11424_v30, 16  ;;  %v3845_v25 = vrot.slane %v11424_v30, 5  ;;  %3363 = vst.msk [vmem:[#allocation3 + $0x30] sm:$0xf] %vm2101_vm2, %v11424_v30  ;;  %v3133_v20 = vadd.f32 %v13857_v15, %v3132_v10  ;;  %v3450_v63 = vshll.u32 %v11424_v30, 16 }
 0x2f4   : > { %v3134_v46 = vpop.f32.mrf.mxu1  ;;  %v3443_v62 = vsel %vm12575_vm6, %v3438_v4, %v3442_v59  ;;  %v3447_v51 = vor.u32 %v3446_v18, %v3442_v59 }
 0x2f5   : > { %v3456_v54 = vrot.slane %v3454_v41, 4  ;;  %v3846_v26 = vsel %vm12527_vm5, %v3844_v5, %v3845_v25  ;;  %v11425_v39 = vpack.c.bf16 %v3133_v20, %v3133_v20  ;;  %3712 = vrot.lane.b32.xlu0 %v3443_v62, %s15107_s19  ;;  %v3847_v57 = vrot.slane %v3845_v25, 4 }
 0x2f6   : > { %3958 = vst.msk [vmem:[#allocation3 + $0x2c] sm:$0xf] %vm2101_vm2, %v3846_v26  ;;  %v3137_v22 = vpop.f32.mrf.mxu1  ;;  %v3448_v38 = vrot.slane %v3447_v51, 4  ;;  %v3452_v24 = vrot.slane %v3450_v63, 5 }
 0x2f7   : > { %v3464_v48 = vshrl.u32 %v11425_v39, 16  ;;  %v3848_v8 = vrot.slane %v11425_v39, 5  ;;  %3364 = vst.msk [vmem:[#allocation3 + $0x38] sm:$0xf] %vm2101_vm2, %v11425_v39  ;;  %v3138_v19 = vadd.f32 %v13857_v15, %v3137_v22  ;;  %v3460_v42 = vshll.u32 %v11425_v39, 16 }
 0x2f8   : > { %v3139_v1 = vpop.f32.mrf.mxu1  ;;  %v3453_v6 = vsel %vm12575_vm6, %v3448_v38, %v3452_v24  ;;  %v3457_v58 = vor.u32 %v3456_v54, %v3452_v24 }
 0x2f9   : > { %v3466_v52 = vrot.slane %v3464_v48, 4  ;;  %v3849_v12 = vsel %vm12527_vm5, %v3847_v57, %v3848_v8  ;;  %v11426_v49 = vpack.c.bf16 %v3138_v19, %v3138_v19  ;;  %3714 = vrot.lane.b32.xlu1 %v3453_v6, %s15107_s19  ;;  %v3850_v47 = vrot.slane %v3848_v8, 4 }
 0x2fa   : > { %3959 = vst.msk [vmem:[#allocation3 + $0x34] sm:$0xf] %vm2101_vm2, %v3849_v12  ;;  %v3140_v9 = vpop.f32.mrf.mxu1  ;;  %v3458_v17 = vrot.slane %v3457_v58, 4  ;;  %v3462_v32 = vrot.slane %v3460_v42, 5 }
 0x2fb   : > { %v3474_v11 = vshrl.u32 %v11426_v49, 16  ;;  %v3851_v13 = vrot.slane %v11426_v49, 5  ;;  %3365 = vst.msk [vmem:[#allocation3 + $0x40] sm:$0xf] %vm2101_vm2, %v11426_v49  ;;  %v3141_v55 = vadd.f32 %v13857_v15, %v3140_v9  ;;  %v3470_v16 = vshll.u32 %v11426_v49, 16 }
 0x2fc   : > { %v3142_v36 = vpop.f32.mrf.mxu1  ;;  %v3463_v40 = vsel %vm12575_vm6, %v3458_v17, %v3462_v32  ;;  %v3467_v35 = vor.u32 %v3466_v52, %v3462_v32 }
 0x2fd   : > { %v3476_v28 = vrot.slane %v3474_v11, 4  ;;  %v3852_v3 = vsel %vm12527_vm5, %v3850_v47, %v3851_v13  ;;  %v11427_v44 = vpack.c.bf16 %v3141_v55, %v3141_v55  ;;  %3716 = vrot.lane.b32.xlu0 %v3463_v40, %s15107_s19  ;;  %v3853_v21 = vrot.slane %v3851_v13, 4 }
 0x2fe   : > { %3960 = vst.msk [vmem:[#allocation3 + $0x3c] sm:$0xf] %vm2101_vm2, %v3852_v3  ;;  %v3145_v45 = vpop.f32.mrf.mxu1  ;;  %v3468_v29 = vrot.slane %v3467_v35, 4  ;;  %v3472_v14 = vrot.slane %v3470_v16, 5 }
 0x2ff   : > { %v3484_v43 = vshrl.u32 %v11427_v44, 16  ;;  %v3854_v34 = vrot.slane %v11427_v44, 5  ;;  %3366 = vst.msk [vmem:[#allocation3 + $0x48] sm:$0xf] %vm2101_vm2, %v11427_v44  ;;  %v3146_v23 = vadd.f32 %v13857_v15, %v3145_v45  ;;  %v3480_v2 = vshll.u32 %v11427_v44, 16 }
 0x300   : > { %v3147_v37 = vpop.f32.mrf.mxu1  ;;  %v3473_v27 = vsel %vm12575_vm6, %v3468_v29, %v3472_v14  ;;  %v3477_v33 = vor.u32 %v3476_v28, %v3472_v14 }
 0x301   : > { %v3486_v60 = vrot.slane %v3484_v43, 4  ;;  %v3855_v61 = vsel %vm12527_vm5, %v3853_v21, %v3854_v34  ;;  %v11428_v50 = vpack.c.bf16 %v3146_v23, %v3146_v23  ;;  %3718 = vrot.lane.b32.xlu1 %v3473_v27, %s15107_s19  ;;  %v3856_v56 = vrot.slane %v3854_v34, 4 }
 0x302   : > { %3961 = vst.msk [vmem:[#allocation3 + $0x44] sm:$0xf] %vm2101_vm2, %v3855_v61  ;;  %v3148_v18 = vpop.f32.mrf.mxu1  ;;  %v3478_v53 = vrot.slane %v3477_v33, 4  ;;  %v3482_v30 = vrot.slane %v3480_v2, 5 }
 0x303   : > { %v3494_v5 = vshrl.u32 %v11428_v50, 16  ;;  %v3857_v10 = vrot.slane %v11428_v50, 5  ;;  %3367 = vst.msk [vmem:[#allocation3 + $0x50] sm:$0xf] %vm2101_vm2, %v11428_v50  ;;  %v3149_v4 = vadd.f32 %v13857_v15, %v3148_v18  ;;  %v3490_v59 = vshll.u32 %v11428_v50, 16 }
 0x304   : > { %v3150_v41 = vpop.f32.mrf.mxu1  ;;  %v3483_v25 = vsel %vm12575_vm6, %v3478_v53, %v3482_v30  ;;  %v3487_v20 = vor.u32 %v3486_v60, %v3482_v30 }
 0x305   : > { %v3496_v63 = vrot.slane %v3494_v5, 4  ;;  %v3858_v46 = vsel %vm12527_vm5, %v3856_v56, %v3857_v10  ;;  %v11429_v62 = vpack.c.bf16 %v3149_v4, %v3149_v4  ;;  %3720 = vrot.lane.b32.xlu0 %v3483_v25, %s15107_s19  ;;  %v3859_v51 = vrot.slane %v3857_v10, 4 }
 0x306   : > { %3962 = vst.msk [vmem:[#allocation3 + $0x4c] sm:$0xf] %vm2101_vm2, %v3858_v46  ;;  %v3153_v54 = vpop.f32.mrf.mxu1  ;;  %v3488_v26 = vrot.slane %v3487_v20, 4  ;;  %v3492_v39 = vrot.slane %v3490_v59, 5 }
 0x307   : > { %v3504_v57 = vshrl.u32 %v11429_v62, 16  ;;  %v3860_v22 = vrot.slane %v11429_v62, 5  ;;  %3368 = vst.msk [vmem:[#allocation3 + $0x58] sm:$0xf] %vm2101_vm2, %v11429_v62  ;;  %v3154_v38 = vadd.f32 %v13857_v15, %v3153_v54  ;;  %v3500_v24 = vshll.u32 %v11429_v62, 16 }
 0x308   : > { %v3155_v48 = vpop.f32.mrf.mxu1  ;;  %v3493_v8 = vsel %vm12575_vm6, %v3488_v26, %v3492_v39  ;;  %v3497_v19 = vor.u32 %v3496_v63, %v3492_v39 }
 0x309   : > { %v3506_v42 = vrot.slane %v3504_v57, 4  ;;  %v3861_v1 = vsel %vm12527_vm5, %v3859_v51, %v3860_v22  ;;  %v11430_v6 = vpack.c.bf16 %v3154_v38, %v3154_v38  ;;  %3722 = vrot.lane.b32.xlu1 %v3493_v8, %s15107_s19  ;;  %v3862_v58 = vrot.slane %v3860_v22, 4 }
 0x30a   : > { %3963 = vst.msk [vmem:[#allocation3 + $0x54] sm:$0xf] %vm2101_vm2, %v3861_v1  ;;  %v3156_v52 = vpop.f32.mrf.mxu1  ;;  %v3498_v12 = vrot.slane %v3497_v19, 4  ;;  %v3502_v49 = vrot.slane %v3500_v24, 5 }
 0x30b   : > { %v3514_v47 = vshrl.u32 %v11430_v6, 16  ;;  %v3863_v9 = vrot.slane %v11430_v6, 5  ;;  %3369 = vst.msk [vmem:[#allocation3 + $0x60] sm:$0xf] %vm2101_vm2, %v11430_v6  ;;  %v3157_v17 = vadd.f32 %v13857_v15, %v3156_v52  ;;  %v3510_v32 = vshll.u32 %v11430_v6, 16 }
 0x30c   : > { %v3158_v11 = vpop.f32.mrf.mxu1  ;;  %v3503_v13 = vsel %vm12575_vm6, %v3498_v12, %v3502_v49  ;;  %v3507_v55 = vor.u32 %v3506_v42, %v3502_v49 }
 0x30d   : > { %v3516_v16 = vrot.slane %v3514_v47, 4  ;;  %v3864_v36 = vsel %vm12527_vm5, %v3862_v58, %v3863_v9  ;;  %v11431_v40 = vpack.c.bf16 %v3157_v17, %v3157_v17  ;;  %3724 = vrot.lane.b32.xlu0 %v3503_v13, %s15107_s19  ;;  %v3865_v35 = vrot.slane %v3863_v9, 4 }
 0x30e   : > { %3964 = vst.msk [vmem:[#allocation3 + $0x5c] sm:$0xf] %vm2101_vm2, %v3864_v36  ;;  %v3161_v28 = vpop.f32.mrf.mxu1  ;;  %v3508_v3 = vrot.slane %v3507_v55, 4  ;;  %v3512_v44 = vrot.slane %v3510_v32, 5 }
 0x30f   : > { %v3524_v21 = vshrl.u32 %v11431_v40, 16  ;;  %v3866_v45 = vrot.slane %v11431_v40, 5  ;;  %3370 = vst.msk [vmem:[#allocation3 + $0x68] sm:$0xf] %vm2101_vm2, %v11431_v40  ;;  %v3162_v29 = vadd.f32 %v13857_v15, %v3161_v28  ;;  %v3520_v14 = vshll.u32 %v11431_v40, 16 }
 0x310   : > { %v3163_v43 = vpop.f32.mrf.mxu1  ;;  %v3513_v34 = vsel %vm12575_vm6, %v3508_v3, %v3512_v44  ;;  %v3517_v23 = vor.u32 %v3516_v16, %v3512_v44 }
 0x311   : > { %v3526_v2 = vrot.slane %v3524_v21, 4  ;;  %v3867_v37 = vsel %vm12527_vm5, %v3865_v35, %v3866_v45  ;;  %v11432_v27 = vpack.c.bf16 %v3162_v29, %v3162_v29  ;;  %3726 = vrot.lane.b32.xlu1 %v3513_v34, %s15107_s19  ;;  %v3868_v33 = vrot.slane %v3866_v45, 4 }
 0x312   : > { %3965 = vst.msk [vmem:[#allocation3 + $0x64] sm:$0xf] %vm2101_vm2, %v3867_v37  ;;  %v3164_v60 = vpop.f32.mrf.mxu1  ;;  %v3518_v61 = vrot.slane %v3517_v23, 4  ;;  %v3522_v50 = vrot.slane %v3520_v14, 5 }
 0x313   : > { %v3534_v56 = vshrl.u32 %v11432_v27, 16  ;;  %v3869_v18 = vrot.slane %v11432_v27, 5  ;;  %3371 = vst.msk [vmem:[#allocation3 + $0x70] sm:$0xf] %vm2101_vm2, %v11432_v27  ;;  %v3165_v53 = vadd.f32 %v13857_v15, %v3164_v60  ;;  %v3530_v30 = vshll.u32 %v11432_v27, 16 }
 0x314   : > { %v3166_v5 = vpop.f32.mrf.mxu1  ;;  %v3523_v10 = vsel %vm12575_vm6, %v3518_v61, %v3522_v50  ;;  %v3527_v4 = vor.u32 %v3526_v2, %v3522_v50 }
 0x315   : > { %v3536_v59 = vrot.slane %v3534_v56, 4  ;;  %v3870_v41 = vsel %vm12527_vm5, %v3868_v33, %v3869_v18  ;;  %v11433_v25 = vpack.c.bf16 %v3165_v53, %v3165_v53  ;;  %3728 = vrot.lane.b32.xlu0 %v3523_v10, %s15107_s19  ;;  %v3871_v20 = vrot.slane %v3869_v18, 4 }
 0x316   : > { %3966 = vst.msk [vmem:[#allocation3 + $0x6c] sm:$0xf] %vm2101_vm2, %v3870_v41  ;;  %v3169_v63 = vpop.f32.mrf.mxu1  ;;  %v3528_v46 = vrot.slane %v3527_v4, 4  ;;  %v3532_v62 = vrot.slane %v3530_v30, 5 }
 0x317   : > { %v3544_v51 = vshrl.u32 %v11433_v25, 16  ;;  %v3872_v54 = vrot.slane %v11433_v25, 5  ;;  %3372 = vst.msk [vmem:[#allocation3 + $0x78] sm:$0xf] %vm2101_vm2, %v11433_v25  ;;  %v3170_v26 = vadd.f32 %v13857_v15, %v3169_v63  ;;  %v3540_v39 = vshll.u32 %v11433_v25, 16 }
 0x318   : > { %v3171_v57 = vpop.f32.mrf.mxu1  ;;  %v3533_v22 = vsel %vm12575_vm6, %v3528_v46, %v3532_v62  ;;  %v3537_v38 = vor.u32 %v3536_v59, %v3532_v62 }
 0x319   : > { %v3546_v24 = vrot.slane %v3544_v51, 4  ;;  %v3873_v48 = vsel %vm12527_vm5, %v3871_v20, %v3872_v54  ;;  %v11434_v8 = vpack.c.bf16 %v3170_v26, %v3170_v26  ;;  %3730 = vrot.lane.b32.xlu1 %v3533_v22, %s15107_s19  ;;  %v3874_v19 = vrot.slane %v3872_v54, 4 }
 0x31a   : > { %3967 = vst.msk [vmem:[#allocation3 + $0x74] sm:$0xf] %vm2101_vm2, %v3873_v48  ;;  %v3172_v42 = vpop.f32.mrf.mxu1  ;;  %v3538_v1 = vrot.slane %v3537_v38, 4  ;;  %v3542_v6 = vrot.slane %v3540_v39, 5 }
 0x31b   : > { %v3554_v58 = vshrl.u32 %v11434_v8, 16  ;;  %v3875_v52 = vrot.slane %v11434_v8, 5  ;;  %3373 = vst.msk [vmem:[#allocation3 + $0x80] sm:$0xf] %vm2101_vm2, %v11434_v8  ;;  %v3173_v12 = vadd.f32 %v13857_v15, %v3172_v42  ;;  %v3550_v49 = vshll.u32 %v11434_v8, 16 }
 0x31c   : > { %v3174_v47 = vpop.f32.mrf.mxu1  ;;  %v3543_v9 = vsel %vm12575_vm6, %v3538_v1, %v3542_v6  ;;  %v3547_v17 = vor.u32 %v3546_v24, %v3542_v6 }
 0x31d   : > { %v3556_v32 = vrot.slane %v3554_v58, 4  ;;  %v3876_v11 = vsel %vm12527_vm5, %v3874_v19, %v3875_v52  ;;  %v11435_v13 = vpack.c.bf16 %v3173_v12, %v3173_v12  ;;  %3732 = vrot.lane.b32.xlu0 %v3543_v9, %s15107_s19  ;;  %v3877_v55 = vrot.slane %v3875_v52, 4 }
 0x31e   : > { %3968 = vst.msk [vmem:[#allocation3 + $0x7c] sm:$0xf] %vm2101_vm2, %v3876_v11  ;;  %v3177_v16 = vpop.f32.mrf.mxu1  ;;  %v3548_v36 = vrot.slane %v3547_v17, 4  ;;  %v3552_v40 = vrot.slane %v3550_v49, 5 }
 0x31f   : > { %v3564_v35 = vshrl.u32 %v11435_v13, 16  ;;  %v3878_v28 = vrot.slane %v11435_v13, 5  ;;  %3374 = vst.msk [vmem:[#allocation3 + $0x88] sm:$0xf] %vm2101_vm2, %v11435_v13  ;;  %v3178_v3 = vadd.f32 %v13857_v15, %v3177_v16  ;;  %v3560_v44 = vshll.u32 %v11435_v13, 16 }
 0x320   : > { %v3179_v21 = vpop.f32.mrf.mxu1  ;;  %v3553_v45 = vsel %vm12575_vm6, %v3548_v36, %v3552_v40  ;;  %v3557_v29 = vor.u32 %v3556_v32, %v3552_v40 }
 0x321   : > { %v3566_v14 = vrot.slane %v3564_v35, 4  ;;  %v3879_v43 = vsel %vm12527_vm5, %v3877_v55, %v3878_v28  ;;  %v11436_v34 = vpack.c.bf16 %v3178_v3, %v3178_v3  ;;  %3734 = vrot.lane.b32.xlu1 %v3553_v45, %s15107_s19  ;;  %v3880_v23 = vrot.slane %v3878_v28, 4 }
 0x322   : > { %3969 = vst.msk [vmem:[#allocation3 + $0x84] sm:$0xf] %vm2101_vm2, %v3879_v43  ;;  %v3180_v2 = vpop.f32.mrf.mxu1  ;;  %v3558_v37 = vrot.slane %v3557_v29, 4  ;;  %v3562_v27 = vrot.slane %v3560_v44, 5 }
 0x323   : > { %v3574_v33 = vshrl.u32 %v11436_v34, 16  ;;  %v3881_v60 = vrot.slane %v11436_v34, 5  ;;  %3375 = vst.msk [vmem:[#allocation3 + $0x90] sm:$0xf] %vm2101_vm2, %v11436_v34  ;;  %v3181_v61 = vadd.f32 %v13857_v15, %v3180_v2  ;;  %v3570_v50 = vshll.u32 %v11436_v34, 16 }
 0x324   : > { %v3182_v56 = vpop.f32.mrf.mxu1  ;;  %v3563_v18 = vsel %vm12575_vm6, %v3558_v37, %v3562_v27  ;;  %v3567_v53 = vor.u32 %v3566_v14, %v3562_v27 }
 0x325   : > { %v3576_v30 = vrot.slane %v3574_v33, 4  ;;  %v3882_v5 = vsel %vm12527_vm5, %v3880_v23, %v3881_v60  ;;  %v11437_v10 = vpack.c.bf16 %v3181_v61, %v3181_v61  ;;  %3736 = vrot.lane.b32.xlu0 %v3563_v18, %s15107_s19  ;;  %v3883_v4 = vrot.slane %v3881_v60, 4 }
 0x326   : > { %3970 = vst.msk [vmem:[#allocation3 + $0x8c] sm:$0xf] %vm2101_vm2, %v3882_v5  ;;  %v3185_v59 = vpop.f32.mrf.mxu1  ;;  %v3568_v41 = vrot.slane %v3567_v53, 4  ;;  %v3572_v25 = vrot.slane %v3570_v50, 5 }
 0x327   : > { %v3584_v20 = vshrl.u32 %v11437_v10, 16  ;;  %v3884_v63 = vrot.slane %v11437_v10, 5  ;;  %3376 = vst.msk [vmem:[#allocation3 + $0x98] sm:$0xf] %vm2101_vm2, %v11437_v10  ;;  %v3186_v46 = vadd.f32 %v13857_v15, %v3185_v59  ;;  %v3580_v62 = vshll.u32 %v11437_v10, 16 }
 0x328   : > { %v3187_v51 = vpop.f32.mrf.mxu1  ;;  %v3573_v54 = vsel %vm12575_vm6, %v3568_v41, %v3572_v25  ;;  %v3577_v26 = vor.u32 %v3576_v30, %v3572_v25 }
 0x329   : > { %v3586_v39 = vrot.slane %v3584_v20, 4  ;;  %v3885_v57 = vsel %vm12527_vm5, %v3883_v4, %v3884_v63  ;;  %v11438_v22 = vpack.c.bf16 %v3186_v46, %v3186_v46  ;;  %3738 = vrot.lane.b32.xlu1 %v3573_v54, %s15107_s19  ;;  %v3886_v38 = vrot.slane %v3884_v63, 4 }
 0x32a   : > { %3971 = vst.msk [vmem:[#allocation3 + $0x94] sm:$0xf] %vm2101_vm2, %v3885_v57  ;;  %v3188_v24 = vpop.f32.mrf.mxu1  ;;  %v3578_v48 = vrot.slane %v3577_v26, 4  ;;  %v3582_v8 = vrot.slane %v3580_v62, 5 }
 0x32b   : > { %v3594_v19 = vshrl.u32 %v11438_v22, 16  ;;  %v3887_v42 = vrot.slane %v11438_v22, 5  ;;  %3377 = vst.msk [vmem:[#allocation3 + $0xa0] sm:$0xf] %vm2101_vm2, %v11438_v22  ;;  %v3189_v1 = vadd.f32 %v13857_v15, %v3188_v24  ;;  %v3590_v6 = vshll.u32 %v11438_v22, 16 }
 0x32c   : > { %v3190_v58 = vpop.f32.mrf.mxu1  ;;  %v3583_v52 = vsel %vm12575_vm6, %v3578_v48, %v3582_v8  ;;  %v3587_v12 = vor.u32 %v3586_v39, %v3582_v8 }
 0x32d   : > { %v3596_v49 = vrot.slane %v3594_v19, 4  ;;  %v3888_v47 = vsel %vm12527_vm5, %v3886_v38, %v3887_v42  ;;  %v11439_v9 = vpack.c.bf16 %v3189_v1, %v3189_v1  ;;  %3740 = vrot.lane.b32.xlu0 %v3583_v52, %s15107_s19  ;;  %v3889_v17 = vrot.slane %v3887_v42, 4 }
 0x32e   : > { %3972 = vst.msk [vmem:[#allocation3 + $0x9c] sm:$0xf] %vm2101_vm2, %v3888_v47  ;;  %v3193_v32 = vpop.f32.mrf.mxu1  ;;  %v3588_v11 = vrot.slane %v3587_v12, 4  ;;  %v3592_v13 = vrot.slane %v3590_v6, 5 }
 0x32f   : > { %v3604_v55 = vshrl.u32 %v11439_v9, 16  ;;  %v3890_v16 = vrot.slane %v11439_v9, 5  ;;  %3378 = vst.msk [vmem:[#allocation3 + $0xa8] sm:$0xf] %vm2101_vm2, %v11439_v9  ;;  %v3194_v36 = vadd.f32 %v13857_v15, %v3193_v32  ;;  %v3600_v40 = vshll.u32 %v11439_v9, 16 }
 0x330   : > { %v3195_v35 = vpop.f32.mrf.mxu1  ;;  %v3593_v28 = vsel %vm12575_vm6, %v3588_v11, %v3592_v13  ;;  %v3597_v3 = vor.u32 %v3596_v49, %v3592_v13 }
 0x331   : > { %v3606_v44 = vrot.slane %v3604_v55, 4  ;;  %v3891_v21 = vsel %vm12527_vm5, %v3889_v17, %v3890_v16  ;;  %v11440_v45 = vpack.c.bf16 %v3194_v36, %v3194_v36  ;;  %3742 = vrot.lane.b32.xlu1 %v3593_v28, %s15107_s19  ;;  %v3892_v29 = vrot.slane %v3890_v16, 4 }
 0x332   : > { %3973 = vst.msk [vmem:[#allocation3 + $0xa4] sm:$0xf] %vm2101_vm2, %v3891_v21  ;;  %v3196_v14 = vpop.f32.mrf.mxu1  ;;  %v3598_v43 = vrot.slane %v3597_v3, 4  ;;  %v3602_v34 = vrot.slane %v3600_v40, 5 }
 0x333   : > { %v3614_v23 = vshrl.u32 %v11440_v45, 16  ;;  %v3893_v2 = vrot.slane %v11440_v45, 5  ;;  %3379 = vst.msk [vmem:[#allocation3 + $0xb0] sm:$0xf] %vm2101_vm2, %v11440_v45  ;;  %v3197_v37 = vadd.f32 %v13857_v15, %v3196_v14  ;;  %v3610_v27 = vshll.u32 %v11440_v45, 16 }
 0x334   : > { %v3198_v33 = vpop.f32.mrf.mxu1  ;;  %v3603_v60 = vsel %vm12575_vm6, %v3598_v43, %v3602_v34  ;;  %v3607_v61 = vor.u32 %v3606_v44, %v3602_v34 }
 0x335   : > { %v3616_v50 = vrot.slane %v3614_v23, 4  ;;  %v3894_v56 = vsel %vm12527_vm5, %v3892_v29, %v3893_v2  ;;  %v11441_v18 = vpack.c.bf16 %v3197_v37, %v3197_v37  ;;  %3744 = vrot.lane.b32.xlu0 %v3603_v60, %s15107_s19  ;;  %v3895_v53 = vrot.slane %v3893_v2, 4 }
 0x336   : > { %3974 = vst.msk [vmem:[#allocation3 + $0xac] sm:$0xf] %vm2101_vm2, %v3894_v56  ;;  %v3201_v30 = vpop.f32.mrf.mxu1  ;;  %v3608_v5 = vrot.slane %v3607_v61, 4  ;;  %v3612_v10 = vrot.slane %v3610_v27, 5 }
 0x337   : > { %v3624_v4 = vshrl.u32 %v11441_v18, 16  ;;  %v3896_v59 = vrot.slane %v11441_v18, 5  ;;  %3380 = vst.msk [vmem:[#allocation3 + $0xb8] sm:$0xf] %vm2101_vm2, %v11441_v18  ;;  %v3202_v41 = vadd.f32 %v13857_v15, %v3201_v30  ;;  %v3620_v25 = vshll.u32 %v11441_v18, 16 }
 0x338   : > { %v3203_v20 = vpop.f32.mrf.mxu1  ;;  %v3613_v63 = vsel %vm12575_vm6, %v3608_v5, %v3612_v10  ;;  %v3617_v46 = vor.u32 %v3616_v50, %v3612_v10 }
 0x339   : > { %v3626_v62 = vrot.slane %v3624_v4, 4  ;;  %v3897_v51 = vsel %vm12527_vm5, %v3895_v53, %v3896_v59  ;;  %v11442_v54 = vpack.c.bf16 %v3202_v41, %v3202_v41  ;;  %3746 = vrot.lane.b32.xlu1 %v3613_v63, %s15107_s19  ;;  %v3898_v26 = vrot.slane %v3896_v59, 4 }
 0x33a   : > { %3975 = vst.msk [vmem:[#allocation3 + $0xb4] sm:$0xf] %vm2101_vm2, %v3897_v51  ;;  %v3204_v39 = vpop.f32.mrf.mxu1  ;;  %v3618_v57 = vrot.slane %v3617_v46, 4  ;;  %v3622_v22 = vrot.slane %v3620_v25, 5 }
 0x33b   : > { %v3634_v38 = vshrl.u32 %v11442_v54, 16  ;;  %v3899_v24 = vrot.slane %v11442_v54, 5  ;;  %3381 = vst.msk [vmem:[#allocation3 + $0xc0] sm:$0xf] %vm2101_vm2, %v11442_v54  ;;  %v3205_v48 = vadd.f32 %v13857_v15, %v3204_v39  ;;  %v3630_v8 = vshll.u32 %v11442_v54, 16 }
 0x33c   : > { %v3206_v19 = vpop.f32.mrf.mxu1  ;;  %v3623_v42 = vsel %vm12575_vm6, %v3618_v57, %v3622_v22  ;;  %v3627_v1 = vor.u32 %v3626_v62, %v3622_v22 }
 0x33d   : > { %v3636_v6 = vrot.slane %v3634_v38, 4  ;;  %v3900_v58 = vsel %vm12527_vm5, %v3898_v26, %v3899_v24  ;;  %v11443_v52 = vpack.c.bf16 %v3205_v48, %v3205_v48  ;;  %3748 = vrot.lane.b32.xlu0 %v3623_v42, %s15107_s19  ;;  %v3901_v12 = vrot.slane %v3899_v24, 4 }
 0x33e   : > { %3976 = vst.msk [vmem:[#allocation3 + $0xbc] sm:$0xf] %vm2101_vm2, %v3900_v58  ;;  %v3209_v49 = vpop.f32.mrf.mxu1  ;;  %v3628_v47 = vrot.slane %v3627_v1, 4  ;;  %v3632_v9 = vrot.slane %v3630_v8, 5 }
 0x33f   : > { %v3644_v17 = vshrl.u32 %v11443_v52, 16  ;;  %v3902_v32 = vrot.slane %v11443_v52, 5  ;;  %3382 = vst.msk [vmem:[#allocation3 + $0xc8] sm:$0xf] %vm2101_vm2, %v11443_v52  ;;  %v3210_v11 = vadd.f32 %v13857_v15, %v3209_v49  ;;  %v3640_v13 = vshll.u32 %v11443_v52, 16 }
 0x340   : > { %v3211_v55 = vpop.f32.mrf.mxu1  ;;  %v3633_v16 = vsel %vm12575_vm6, %v3628_v47, %v3632_v9  ;;  %v3637_v36 = vor.u32 %v3636_v6, %v3632_v9 }
 0x341   : > { %v3646_v40 = vrot.slane %v3644_v17, 4  ;;  %v3903_v35 = vsel %vm12527_vm5, %v3901_v12, %v3902_v32  ;;  %v11444_v28 = vpack.c.bf16 %v3210_v11, %v3210_v11  ;;  %3750 = vrot.lane.b32.xlu1 %v3633_v16, %s15107_s19  ;;  %v3904_v3 = vrot.slane %v3902_v32, 4 }
 0x342   : > { %3977 = vst.msk [vmem:[#allocation3 + $0xc4] sm:$0xf] %vm2101_vm2, %v3903_v35  ;;  %v3212_v44 = vpop.f32.mrf.mxu1  ;;  %v3638_v21 = vrot.slane %v3637_v36, 4  ;;  %v3642_v45 = vrot.slane %v3640_v13, 5 }
 0x343   : > { %v3654_v29 = vshrl.u32 %v11444_v28, 16  ;;  %v3905_v14 = vrot.slane %v11444_v28, 5  ;;  %3383 = vst.msk [vmem:[#allocation3 + $0xd0] sm:$0xf] %vm2101_vm2, %v11444_v28  ;;  %v3213_v43 = vadd.f32 %v13857_v15, %v3212_v44  ;;  %v3650_v34 = vshll.u32 %v11444_v28, 16 }
 0x344   : > { %v3214_v23 = vpop.f32.mrf.mxu1  ;;  %v3643_v2 = vsel %vm12575_vm6, %v3638_v21, %v3642_v45  ;;  %v3647_v37 = vor.u32 %v3646_v40, %v3642_v45  ;;  %v12228_v44 = vld [vmem:[%s15062_s4] ss:$0 sm:$0xff] }
 0x345   : > { %v3656_v27 = vrot.slane %v3654_v29, 4  ;;  %v3906_v33 = vsel %vm12527_vm5, %v3904_v3, %v3905_v14  ;;  %v11445_v60 = vpack.c.bf16 %v3213_v43, %v3213_v43  ;;  %3752 = vrot.lane.b32.xlu0 %v3643_v2, %s15107_s19  ;;  %v3907_v61 = vrot.slane %v3905_v14, 4 }
 0x346   : > { %3978 = vst.msk [vmem:[#allocation3 + $0xcc] sm:$0xf] %vm2101_vm2, %v3906_v33  ;;  %v3217_v50 = vpop.f32.mrf.mxu1  ;;  %v3648_v56 = vrot.slane %v3647_v37, 4  ;;  %v3652_v18 = vrot.slane %v3650_v34, 5 }
 0x347   : > { %v3664_v53 = vshrl.u32 %v11445_v60, 16  ;;  %v3908_v30 = vrot.slane %v11445_v60, 5  ;;  %3384 = vst.msk [vmem:[#allocation3 + $0xd8] sm:$0xf] %vm2101_vm2, %v11445_v60  ;;  %v3218_v5 = vadd.f32 %v13857_v15, %v3217_v50  ;;  %v3660_v10 = vshll.u32 %v11445_v60, 16 }
 0x348   : > { %v3219_v4 = vpop.f32.mrf.mxu1  ;;  %v3653_v59 = vsel %vm12575_vm6, %v3648_v56, %v3652_v18  ;;  %v3657_v41 = vor.u32 %v3656_v27, %v3652_v18 }
 0x349   : > { %v3666_v25 = vrot.slane %v3664_v53, 4  ;;  %v3909_v20 = vsel %vm12527_vm5, %v3907_v61, %v3908_v30  ;;  %v11446_v63 = vpack.c.bf16 %v3218_v5, %v3218_v5  ;;  %3754 = vrot.lane.b32.xlu1 %v3653_v59, %s15107_s19  ;;  %v3910_v46 = vrot.slane %v3908_v30, 4 }
 0x34a   : > { %3979 = vst.msk [vmem:[#allocation3 + $0xd4] sm:$0xf] %vm2101_vm2, %v3909_v20  ;;  %v3220_v62 = vpop.f32.mrf.mxu1  ;;  %v3658_v51 = vrot.slane %v3657_v41, 4  ;;  %v3662_v54 = vrot.slane %v3660_v10, 5 }
 0x34b   : > { %v3674_v26 = vshrl.u32 %v11446_v63, 16  ;;  %v3911_v39 = vrot.slane %v11446_v63, 5  ;;  %3385 = vst.msk [vmem:[#allocation3 + $0xe0] sm:$0xf] %vm2101_vm2, %v11446_v63  ;;  %v3221_v57 = vadd.f32 %v13857_v15, %v3220_v62  ;;  %v3670_v22 = vshll.u32 %v11446_v63, 16 }
 0x34c   : > { %v3222_v38 = vpop.f32.mrf.mxu1  ;;  %v3663_v24 = vsel %vm12575_vm6, %v3658_v51, %v3662_v54  ;;  %v3667_v48 = vor.u32 %v3666_v25, %v3662_v54  ;;  %v11782_v63 = vld [vmem:[#allocation3 + $0x4] ss:$8 sps:$4 sm:$0xff]  }
 0x34d   : > { %v3676_v8 = vrot.slane %v3674_v26, 4  ;;  %v3912_v19 = vsel %vm12527_vm5, %v3910_v46, %v3911_v39  ;;  %v11447_v42 = vpack.c.bf16 %v3221_v57, %v3221_v57  ;;  %3756 = vrot.lane.b32.xlu0 %v3663_v24, %s15107_s19  ;;  %v3913_v1 = vrot.slane %v3911_v39, 4  ;;  %10962 = vmatprep.mubr.msk.bf16.mxu1 %vm3022_vm7, %v11782_v63  ;;  %v11784_v39 = vld [vmem:[#allocation3 + $0x14] ss:$8 sps:$4 sm:$0xff]  }
 0x34e   : > { %3980 = vst.msk [vmem:[#allocation3 + $0xdc] sm:$0xf] %vm2101_vm2, %v3912_v19  ;;  %v3225_v6 = vpop.f32.mrf.mxu1  ;;  %v3668_v58 = vrot.slane %v3667_v48, 4  ;;  %v3672_v52 = vrot.slane %v3670_v22, 5 }
 0x34f   : > { %v3684_v12 = vshrl.u32 %v11447_v42, 16  ;;  %v3914_v49 = vrot.slane %v11447_v42, 5  ;;  %3386 = vst.msk [vmem:[#allocation3 + $0xe8] sm:$0xf] %vm2101_vm2, %v11447_v42  ;;  %v3226_v47 = vadd.f32 %v13857_v15, %v3225_v6  ;;  %v3680_v9 = vshll.u32 %v11447_v42, 16 }
 0x350   : > { %v3227_v17 = vpop.f32.mrf.mxu1  ;;  %v3673_v32 = vsel %vm12575_vm6, %v3668_v58, %v3672_v52  ;;  %v3677_v11 = vor.u32 %v3676_v8, %v3672_v52  ;;  %v11786_v8 = vld [vmem:[#allocation3 + $0x24] ss:$8 sps:$4 sm:$0xff]   ;;  %v11788_v52 = vld [vmem:[#allocation3 + $0x34] ss:$8 sps:$4 sm:$0xff]  }
 0x351   : > { %v3686_v13 = vrot.slane %v3684_v12, 4  ;;  %v3915_v55 = vsel %vm12527_vm5, %v3913_v1, %v3914_v49  ;;  %v11448_v16 = vpack.c.bf16 %v3226_v47, %v3226_v47  ;;  %3758 = vrot.lane.b32.xlu1 %v3673_v32, %s15107_s19  ;;  %v3916_v36 = vrot.slane %v3914_v49, 4  ;;  %v11790_v32 = vld [vmem:[#allocation3 + $0x44] ss:$8 sps:$4 sm:$0xff]  }
 0x352   : > { %3981 = vst.msk [vmem:[#allocation3 + $0xe4] sm:$0xf] %vm2101_vm2, %v3915_v55  ;;  %v3228_v40 = vpop.f32.mrf.mxu1  ;;  %v3678_v35 = vrot.slane %v3677_v11, 4  ;;  %v3682_v28 = vrot.slane %v3680_v9, 5 }
 0x353   : > { %v3694_v15 = vshrl.u32 %v11448_v16, 16  ;;  %v3917_v3 = vrot.slane %v11448_v16, 5  ;;  %3387 = vst.msk [vmem:[#allocation3 + $0xf0] sm:$0xf] %vm2101_vm2, %v11448_v16  ;;  %v3229_v21 = vadd.f32 %v12228_v44, %v3228_v40  ;;  %v3690_v45 = vshll.u32 %v11448_v16, 16 }
 0x354   : > { %v3230_v29 = vpop.f32.mrf.mxu1  ;;  %v3683_v14 = vsel %vm12575_vm6, %v3678_v35, %v3682_v28  ;;  %v3687_v43 = vor.u32 %v3686_v13, %v3682_v28  ;;  %v11792_v40 = vld [vmem:[#allocation3 + $0x54] ss:$8 sps:$4 sm:$0xff]  }
 0x355   : > { %v3696_v34 = vrot.slane %v3694_v15, 4  ;;  %v3918_v23 = vsel %vm12527_vm5, %v3916_v36, %v3917_v3  ;;  %v11449_v2 = vpack.c.bf16 %v3229_v21, %v3229_v21  ;;  %3760 = vrot.lane.b32.xlu0 %v3683_v14, %s15107_s19  ;;  %v3692_v27 = vrot.slane %v3690_v45, 5  ;;  %v11794_v21 = vld [vmem:[#allocation3 + $0x64] ss:$8 sps:$4 sm:$0xff]  }
 0x356   : > { %3982 = vst.msk [vmem:[#allocation3 + $0xec] sm:$0xf] %vm2101_vm2, %v3918_v23  ;;  %v3688_v37 = vrot.slane %v3687_v43, 4  ;;  %v3919_v33 = vrot.slane %v3917_v3, 4  ;;  %v11796_v23 = vld [vmem:[#allocation3 + $0x74] ss:$8 sps:$4 sm:$0xff]  }
 0x357   : > { %v3700_v60 = vshll.u32 %v11449_v2, 16  ;;  %v3920_v61 = vrot.slane %v11449_v2, 5  ;;  %v3705_v50 = vpop.permute.xlu0 %3704  ;;  %v3697_v18 = vor.u32 %v3696_v34, %v3692_v27 }
 0x358   : > { %3797 = vst.msk [vmem:[#allocation3] sm:$0xf] %vm2550_vm3, %v3705_v50  ;;  %v3693_v56 = vsel %vm12575_vm6, %v3688_v37, %v3692_v27 }
 0x359   : > { %v3702_v53 = vrot.slane %v3700_v60, 5  ;;  %v3921_v30 = vsel %vm12527_vm5, %v3919_v33, %v3920_v61  ;;  %3762 = vrot.lane.b32.xlu1 %v3693_v56, %s15107_s19  ;;  %v3698_v5 = vrot.slane %v3697_v18, 4  ;;  %v11798_v61 = vld [vmem:[#allocation3 + $0x84] ss:$8 sps:$4 sm:$0xff]  }
 0x35a   : > { %3983 = vst.msk [vmem:[#allocation3 + $0xf4] sm:$0xf] %vm2101_vm2, %v3921_v30 }
 0x35b   : > { %v3707_v10 = vpop.permute.xlu1 %3706  ;;  %v3703_v4 = vsel %vm12575_vm6, %v3698_v5, %v3702_v53  ;;  %v11800_v5 = vld [vmem:[#allocation3 + $0x94] ss:$8 sps:$4 sm:$0xff]  }
 0x35c   : > { %3798 = vst.msk [vmem:[#allocation3 + $0x8] sm:$0xf] %vm2550_vm3, %v3707_v10  ;;  %3764 = vrot.lane.b32.xlu0 %v3703_v4, %s15107_s19 }
 0x35f   : > { %v3709_v59 = vpop.permute.xlu0 %3708  ;;  %v3984_v25 = vld [vmem:[#allocation3] sm:$0xff] }
 0x360   : > { %3799 = vst.msk [vmem:[#allocation3 + $0x10] sm:$0xf] %vm2550_vm3, %v3709_v59 }
 0x363   : > { %v3711_v41 = vpop.permute.xlu1 %3710  ;;  %v3985_v20 = vld [vmem:[#allocation3 + $0x8] sm:$0xff] }
 0x364   : > { %3800 = vst.msk [vmem:[#allocation3 + $0x18] sm:$0xf] %vm2550_vm3, %v3711_v41  ;;  %v10918_v46 = vcombine.low %v3984_v25, %v3985_v20  ;;  %v11802_v20 = vld [vmem:[#allocation3 + $0xa4] ss:$8 sps:$4 sm:$0xff]  }
 0x366   : > { %4340 = vmatmul.mubr.bf16.vlgmr.msra.gmra.mxu1 %v10918_v46 }
 0x367   : > { %v3713_v62 = vpop.permute.xlu0 %3712  ;;  %v3986_v54 = vld [vmem:[#allocation3 + $0x10] sm:$0xff]  ;;  %10963 = vmatprep.mubr.msk.bf16.mxu1 %vm3022_vm7, %v11784_v39 }
 0x368   : > { %3801 = vst.msk [vmem:[#allocation3 + $0x20] sm:$0xf] %vm2550_vm3, %v3713_v62 }
 0x36b   : > { %v3715_v51 = vpop.permute.xlu1 %3714  ;;  %v3987_v26 = vld [vmem:[#allocation3 + $0x18] sm:$0xff] }
 0x36c   : > { %3802 = vst.msk [vmem:[#allocation3 + $0x28] sm:$0xf] %vm2550_vm3, %v3715_v51  ;;  %v10920_v57 = vcombine.low %v3986_v54, %v3987_v26  ;;  %v11804_v26 = vld [vmem:[#allocation3 + $0xb4] ss:$8 sps:$4 sm:$0xff]  }
 0x36e   : > { %4348 = vmatmul.mubr.bf16.gmra.mxu1 %v10920_v57 }
 0x36f   : > { %v3717_v22 = vpop.permute.xlu0 %3716  ;;  %v3988_v24 = vld [vmem:[#allocation3 + $0x20] sm:$0xff]  ;;  %10964 = vmatprep.mubr.msk.bf16.mxu1 %vm3022_vm7, %v11786_v8 }
 0x370   : > { %3803 = vst.msk [vmem:[#allocation3 + $0x30] sm:$0xf] %vm2550_vm3, %v3717_v22 }
 0x373   : > { %v3719_v38 = vpop.permute.xlu1 %3718  ;;  %v3989_v48 = vld [vmem:[#allocation3 + $0x28] sm:$0xff] }
 0x374   : > { %3804 = vst.msk [vmem:[#allocation3 + $0x38] sm:$0xf] %vm2550_vm3, %v3719_v38  ;;  %v10922_v19 = vcombine.low %v3988_v24, %v3989_v48  ;;  %v11806_v48 = vld [vmem:[#allocation3 + $0xc4] ss:$8 sps:$4 sm:$0xff]  }
 0x376   : > { %4356 = vmatmul.mubr.bf16.gmra.mxu1 %v10922_v19 }
 0x377   : > { %v3721_v42 = vpop.permute.xlu0 %3720  ;;  %v3990_v6 = vld [vmem:[#allocation3 + $0x30] sm:$0xff]  ;;  %10965 = vmatprep.mubr.msk.bf16.mxu1 %vm3022_vm7, %v11788_v52 }
 0x378   : > { %3805 = vst.msk [vmem:[#allocation3 + $0x40] sm:$0xf] %vm2550_vm3, %v3721_v42 }
 0x37b   : > { %v3723_v1 = vpop.permute.xlu1 %3722  ;;  %v3991_v58 = vld [vmem:[#allocation3 + $0x38] sm:$0xff] }
 0x37c   : > { %3806 = vst.msk [vmem:[#allocation3 + $0x48] sm:$0xf] %vm2550_vm3, %v3723_v1  ;;  %v10924_v12 = vcombine.low %v3990_v6, %v3991_v58  ;;  %v11808_v58 = vld [vmem:[#allocation3 + $0xd4] ss:$8 sps:$4 sm:$0xff]  }
 0x37e   : > { %4364 = vmatmul.mubr.bf16.gmra.mxu1 %v10924_v12 }
 0x37f   : > { %v3725_v49 = vpop.permute.xlu0 %3724  ;;  %v3992_v9 = vld [vmem:[#allocation3 + $0x40] sm:$0xff]  ;;  %10966 = vmatprep.mubr.msk.bf16.mxu1 %vm3022_vm7, %v11790_v32 }
 0x380   : > { %3807 = vst.msk [vmem:[#allocation3 + $0x50] sm:$0xf] %vm2550_vm3, %v3725_v49  ;;  %v11810_v49 = vld [vmem:[#allocation3 + $0xe4] ss:$8 sps:$4 sm:$0xff]  }
 0x383   : > { %v3727_v47 = vpop.permute.xlu1 %3726  ;;  %v3993_v17 = vld [vmem:[#allocation3 + $0x48] sm:$0xff] }
 0x384   : > { %3808 = vst.msk [vmem:[#allocation3 + $0x58] sm:$0xf] %vm2550_vm3, %v3727_v47  ;;  %v10926_v11 = vcombine.low %v3992_v9, %v3993_v17 }
 0x386   : > { %4372 = vmatmul.mubr.bf16.gmra.mxu1 %v10926_v11  ;;  %v11815_v11 = vld [vmem:[%s15065_s7 + $0x28] sm:$0xff]  }
 0x387   : > { %v3729_v13 = vpop.permute.xlu0 %3728  ;;  %v3994_v16 = vld [vmem:[#allocation3 + $0x50] sm:$0xff]  ;;  %10967 = vmatprep.mubr.msk.bf16.mxu1 %vm3022_vm7, %v11792_v40  ;;  %11541 = vmatprep.subr.bf16.mxu0 %v11815_v11 }
 0x388   : > { %3809 = vst.msk [vmem:[#allocation3 + $0x60] sm:$0xf] %vm2550_vm3, %v3729_v13  ;;  %11542 = vmatpush3.bf16.msra.mxu0 %v11815_v11  ;;  %v11816_v13 = vld [vmem:[%s15065_s7 + $0x20] sm:$0xff]  }
 0x389   : > { %11543 = vmatprep.subr.bf16.mxu0 %v11816_v13 }
 0x38b   : > { %v3731_v55 = vpop.permute.xlu1 %3730  ;;  %v3995_v36 = vld [vmem:[#allocation3 + $0x58] sm:$0xff] }
 0x38c   : > { %3810 = vst.msk [vmem:[#allocation3 + $0x68] sm:$0xf] %vm2550_vm3, %v3731_v55  ;;  %v10928_v35 = vcombine.low %v3994_v16, %v3995_v36  ;;  %11544 = vmatpush3.bf16.msra.mxu0 %v11816_v13  ;;  %v11817_v55 = vld [vmem:[%s15065_s7 + $0x18] sm:$0xff]   ;;  %v14177_v16 = vld [vmem:[%s15064_s6] ss:$0 sm:$0xff] }
 0x38d   : > { %11545 = vmatprep.subr.bf16.mxu0 %v11817_v55 }
 0x38e   : > { %4380 = vmatmul.mubr.bf16.gmra.mxu1 %v10928_v35 }
 0x38f   : > { %v3733_v28 = vpop.permute.xlu0 %3732  ;;  %v3996_v3 = vld [vmem:[#allocation3 + $0x60] sm:$0xff]  ;;  %10968 = vmatprep.mubr.msk.bf16.mxu1 %vm3022_vm7, %v11794_v21 }
 0x390   : > { %3811 = vst.msk [vmem:[#allocation3 + $0x70] sm:$0xf] %vm2550_vm3, %v3733_v28  ;;  %11546 = vmatpush3.bf16.msra.mxu0 %v11817_v55 }
 0x393   : > { %v3735_v15 = vpop.permute.xlu1 %3734  ;;  %v3997_v44 = vld [vmem:[#allocation3 + $0x68] sm:$0xff] }
 0x394   : > { %3812 = vst.msk [vmem:[#allocation3 + $0x78] sm:$0xf] %vm2550_vm3, %v3735_v15  ;;  %v10930_v45 = vcombine.low %v3996_v3, %v3997_v44 }
 0x396   : > { %4388 = vmatmul.mubr.bf16.gmra.mxu1 %v10930_v45 }
 0x397   : > { %v3737_v29 = vpop.permute.xlu0 %3736  ;;  %v3998_v43 = vld [vmem:[#allocation3 + $0x70] sm:$0xff]  ;;  %10969 = vmatprep.mubr.msk.bf16.mxu1 %vm3022_vm7, %v11796_v23 }
 0x398   : > { %3813 = vst.msk [vmem:[#allocation3 + $0x80] sm:$0xf] %vm2550_vm3, %v3737_v29  ;;  %v11818_v23 = vld [vmem:[%s15065_s7 + $0x10] sm:$0xff]  }
 0x399   : > { %11547 = vmatprep.subr.bf16.mxu0 %v11818_v23 }
 0x39a   : > { %11548 = vmatpush3.bf16.msra.mxu0 %v11818_v23 }
 0x39b   : > { %v3739_v14 = vpop.permute.xlu1 %3738  ;;  %v3999_v34 = vld [vmem:[#allocation3 + $0x78] sm:$0xff] }
 0x39c   : > { %3814 = vst.msk [vmem:[#allocation3 + $0x88] sm:$0xf] %vm2550_vm3, %v3739_v14  ;;  %v10932_v2 = vcombine.low %v3998_v43, %v3999_v34 }
 0x39e   : > { %4396 = vmatmul.mubr.bf16.gmra.mxu1 %v10932_v2 }
 0x39f   : > { %v3741_v37 = vpop.permute.xlu0 %3740  ;;  %v4000_v33 = vld [vmem:[#allocation3 + $0x80] sm:$0xff]  ;;  %10970 = vmatprep.mubr.msk.bf16.mxu1 %vm3022_vm7, %v11798_v61 }
 0x3a0   : > { %3815 = vst.msk [vmem:[#allocation3 + $0x90] sm:$0xf] %vm2550_vm3, %v3741_v37 }
 0x3a3   : > { %v3743_v27 = vpop.permute.xlu1 %3742  ;;  %v4001_v60 = vld [vmem:[#allocation3 + $0x88] sm:$0xff] }
 0x3a4   : > { %3816 = vst.msk [vmem:[#allocation3 + $0x98] sm:$0xf] %vm2550_vm3, %v3743_v27  ;;  %v10934_v50 = vcombine.low %v4000_v33, %v4001_v60 }
 0x3a6   : > { %4404 = vmatmul.mubr.bf16.gmra.mxu1 %v10934_v50 }
 0x3a7   : > { %v3745_v56 = vpop.permute.xlu0 %3744  ;;  %v4002_v53 = vld [vmem:[#allocation3 + $0x90] sm:$0xff]  ;;  %10971 = vmatprep.mubr.msk.bf16.mxu1 %vm3022_vm7, %v11800_v5 }
 0x3a8   : > { %3817 = vst.msk [vmem:[#allocation3 + $0xa0] sm:$0xf] %vm2550_vm3, %v3745_v56 }
 0x3ab   : > { %v3747_v18 = vpop.permute.xlu1 %3746  ;;  %v4003_v30 = vld [vmem:[#allocation3 + $0x98] sm:$0xff] }
 0x3ac   : > { %3818 = vst.msk [vmem:[#allocation3 + $0xa8] sm:$0xf] %vm2550_vm3, %v3747_v18  ;;  %v10936_v10 = vcombine.low %v4002_v53, %v4003_v30 }
 0x3ae   : > { %4412 = vmatmul.mubr.bf16.gmra.mxu1 %v10936_v10 }
 0x3af   : > { %v3749_v4 = vpop.permute.xlu0 %3748  ;;  %v4004_v41 = vld [vmem:[#allocation3 + $0xa0] sm:$0xff]  ;;  %10972 = vmatprep.mubr.msk.bf16.mxu1 %vm3022_vm7, %v11802_v20 }
 0x3b0   : > { %3819 = vst.msk [vmem:[#allocation3 + $0xb0] sm:$0xf] %vm2550_vm3, %v3749_v4 }
 0x3b3   : > { %v3751_v59 = vpop.permute.xlu1 %3750  ;;  %v4005_v25 = vld [vmem:[#allocation3 + $0xa8] sm:$0xff] }
 0x3b4   : > { %3820 = vst.msk [vmem:[#allocation3 + $0xb8] sm:$0xf] %vm2550_vm3, %v3751_v59  ;;  %v10938_v63 = vcombine.low %v4004_v41, %v4005_v25 }
 0x3b6   : > { %4420 = vmatmul.mubr.bf16.gmra.mxu1 %v10938_v63 }
 0x3b7   : > { %v3753_v46 = vpop.permute.xlu0 %3752  ;;  %v4006_v51 = vld [vmem:[#allocation3 + $0xb0] sm:$0xff]  ;;  %10973 = vmatprep.mubr.msk.bf16.mxu1 %vm3022_vm7, %v11804_v26 }
 0x3b8   : > { %3821 = vst.msk [vmem:[#allocation3 + $0xc0] sm:$0xf] %vm2550_vm3, %v3753_v46 }
 0x3bb   : > { %v3755_v62 = vpop.permute.xlu1 %3754  ;;  %v4007_v54 = vld [vmem:[#allocation3 + $0xb8] sm:$0xff] }
 0x3bc   : > { %3822 = vst.msk [vmem:[#allocation3 + $0xc8] sm:$0xf] %vm2550_vm3, %v3755_v62  ;;  %v10940_v39 = vcombine.low %v4006_v51, %v4007_v54 }
 0x3be   : > { %4428 = vmatmul.mubr.bf16.gmra.mxu1 %v10940_v39 }
 0x3bf   : > { %v3757_v57 = vpop.permute.xlu0 %3756  ;;  %v4008_v38 = vld [vmem:[#allocation3 + $0xc0] sm:$0xff]  ;;  %10974 = vmatprep.mubr.msk.bf16.mxu1 %vm3022_vm7, %v11806_v48 }
 0x3c0   : > { %3823 = vst.msk [vmem:[#allocation3 + $0xd0] sm:$0xf] %vm2550_vm3, %v3757_v57 }
 0x3c3   : > { %v3759_v22 = vpop.permute.xlu1 %3758  ;;  %v4009_v24 = vld [vmem:[#allocation3 + $0xc8] sm:$0xff] }
 0x3c4   : > { %3824 = vst.msk [vmem:[#allocation3 + $0xd8] sm:$0xf] %vm2550_vm3, %v3759_v22  ;;  %v10942_v8 = vcombine.low %v4008_v38, %v4009_v24 }
 0x3c6   : > { %4436 = vmatmul.mubr.bf16.gmra.mxu1 %v10942_v8 }
 0x3c7   : > { %v3761_v19 = vpop.permute.xlu0 %3760  ;;  %v4010_v1 = vld [vmem:[#allocation3 + $0xd0] sm:$0xff]  ;;  %10975 = vmatprep.mubr.msk.bf16.mxu1 %vm3022_vm7, %v11808_v58 }
 0x3c8   : > { %3825 = vst.msk [vmem:[#allocation3 + $0xe0] sm:$0xf] %vm2550_vm3, %v3761_v19 }
 0x3cb   : > { %v3763_v42 = vpop.permute.xlu1 %3762  ;;  %v4011_v6 = vld [vmem:[#allocation3 + $0xd8] sm:$0xff] }
 0x3cc   : > { %3826 = vst.msk [vmem:[#allocation3 + $0xe8] sm:$0xf] %vm2550_vm3, %v3763_v42  ;;  %v10944_v52 = vcombine.low %v4010_v1, %v4011_v6 }
 0x3ce   : > { %4444 = vmatmul.mubr.bf16.gmra.mxu1 %v10944_v52  ;;  %v3765_v12 = vpop.permute.xlu0 %3764 }
 0x3cf   : > { %3827 = vst.msk [vmem:[#allocation3 + $0xf0] sm:$0xf] %vm2550_vm3, %v3765_v12  ;;  %10976 = vmatprep.mubr.msk.bf16.mxu1 %vm3022_vm7, %v11810_v49 }
 0x3d3   : > { %v11812_v47 = vld [vmem:[#allocation3 + $0xe0] ss:$8 sps:$4 sm:$0xff]  }
 0x3d6   : > { %4452 = vmatmul.mubr.bf16.gmra.mxu1 %v11812_v47  ;;  %v4014_v9 = vld [vmem:[#allocation3 + $0xf0] sm:$0xff] }
 0x3d7   : > { %v10949_v17 = vcombine.high %v4014_v9, %v4014_v9  ;;  %v10948_v32 = vcombine.low %v4014_v9, %v4014_v9 }
 0x3d9   : > { %10977 = vmatprep.mubr.msk.bf16.mxu1 %vm3022_vm7, %v10949_v17 }
 0x3de   : > { %4460 = vmatmul.mubr.bf16.gmra.mxu1 %v10948_v32 }
 0x3df   : > { %6524 = vmatprep.mubr.bf16.mxu1 %v12340_v0 }
 0x426   : > { %v4341_v36 = vpop.f32.mrf.mxu1 }
 0x427   : > { %v4342_v40 = vadd.f32 %v14177_v16, %v4341_v36  ;;  %v11819_v36 = vld [vmem:[%s15065_s7 + $0x8] sm:$0xff]  }
 0x428   : > { %v4343_v35 = vpop.f32.mrf.mxu1  ;;  %11549 = vmatprep.subr.bf16.mxu0 %v11819_v36 }
 0x429   : > { %v4467_v28 = vmax.f32 %v4342_v40, 0.0  ;;  %11550 = vmatpush3.bf16.msra.mxu0 %v11819_v36 }
 0x42a   : > { %v4344_v15 = vpop.f32.mrf.mxu1 }
 0x42b   : > { %4499 = vst.msk [vmem:[#allocation4] sm:$0xff] %vm4498_vm9, %v4467_v28  ;;  %v4345_v3 = vadd.f32 %v14177_v16, %v4344_v15 }
 0x42c   : > { %v4346_v44 = vpop.f32.mrf.mxu1 }
 0x42d   : > { %v4468_v21 = vmax.f32 %v4345_v3, 0.0 }
 0x42e   : > { %v4349_v45 = vpop.f32.mrf.mxu1 }
 0x42f   : > { %4500 = vst.msk [vmem:[#allocation4 + $0x8] sm:$0xff] %vm4498_vm9, %v4468_v21  ;;  %v4350_v29 = vadd.f32 %v14177_v16, %v4349_v45 }
 0x430   : > { %v4351_v14 = vpop.f32.mrf.mxu1 }
 0x431   : > { %v4469_v43 = vmax.f32 %v4350_v29, 0.0 }
 0x432   : > { %v4352_v34 = vpop.f32.mrf.mxu1 }
 0x433   : > { %4501 = vst.msk [vmem:[#allocation4 + $0x10] sm:$0xff] %vm4498_vm9, %v4469_v43  ;;  %v4353_v2 = vadd.f32 %v14177_v16, %v4352_v34 }
 0x434   : > { %v4354_v37 = vpop.f32.mrf.mxu1 }
 0x435   : > { %v4470_v27 = vmax.f32 %v4353_v2, 0.0 }
 0x436   : > { %v4357_v33 = vpop.f32.mrf.mxu1  ;;  %v4530_v60 = vld [vmem:[#allocation4] ss:$2 sm:$0xff]  ;;  %v4562_v61 = vld [vmem:[#allocation4 + $0x1] ss:$2 sm:$0xff] }
 0x437   : > { %4502 = vst.msk [vmem:[#allocation4 + $0x18] sm:$0xff] %vm4498_vm9, %v4470_v27  ;;  %v4358_v50 = vadd.f32 %v14177_v16, %v4357_v33  ;;  %v4593_v56 = vmax.f32 %v4530_v60, %v4562_v61 }
 0x438   : > { %v4359_v18 = vpop.f32.mrf.mxu1 }
 0x439   : > { %v4471_v53 = vmax.f32 %v4358_v50, 0.0  ;;  %v11450_v30 = vpack.c.bf16 %v4593_v56, %v4593_v56 }
 0x43a   : > { %v4360_v5 = vpop.f32.mrf.mxu1 }
 0x43b   : > { %4503 = vst.msk [vmem:[#allocation4 + $0x20] sm:$0xff] %vm4498_vm9, %v4471_v53  ;;  %v4361_v10 = vadd.f32 %v14177_v16, %v4360_v5  ;;  %v4692_v4 = vshrl.u32 %v11450_v30, 16  ;;  %v4695_v59 = vshll.u32 %v11450_v30, 16  ;;  %v10994_v24 = vrot.slane %v11450_v30, 9 }
 0x43c   : > { %4674 = vst.msk [vmem:[#allocation3] sm:$0xf] %vm4673_vm10, %v11450_v30  ;;  %v4362_v41 = vpop.f32.mrf.mxu1 }
 0x43d   : > { %v4472_v25 = vmax.f32 %v4361_v10, 0.0  ;;  %v4694_v62 = vrot.slane %v4692_v4, 4  ;;  %v4697_v51 = vrot.slane %v4695_v59, 5 }
 0x43e   : > { %v4365_v20 = vpop.f32.mrf.mxu1  ;;  %v4532_v63 = vld [vmem:[#allocation4 + $0x10] ss:$2 sm:$0xff]  ;;  %v4564_v46 = vld [vmem:[#allocation4 + $0x11] ss:$2 sm:$0xff] }
 0x43f   : > { %4504 = vst.msk [vmem:[#allocation4 + $0x28] sm:$0xff] %vm4498_vm9, %v4472_v25  ;;  %v4366_v54 = vadd.f32 %v14177_v16, %v4365_v20  ;;  %v4594_v26 = vmax.f32 %v4532_v63, %v4564_v46  ;;  %v4698_v48 = vor.u32 %v4697_v51, %v4694_v62 }
 0x440   : > { %v4367_v39 = vpop.f32.mrf.mxu1 }
 0x441   : > { %v4473_v57 = vmax.f32 %v4366_v54, 0.0  ;;  %v11451_v22 = vpack.c.bf16 %v4594_v26, %v4594_v26  ;;  %v4699_v11 = vrot.slane %v4698_v48, 4 }
 0x442   : > { %v4368_v38 = vpop.f32.mrf.mxu1 }
 0x443   : > { %4505 = vst.msk [vmem:[#allocation4 + $0x30] sm:$0xff] %vm4498_vm9, %v4473_v57  ;;  %v4369_v8 = vadd.f32 %v14177_v16, %v4368_v38  ;;  %v4918_v19 = vrot.slane %v11451_v22, 5  ;;  %v4701_v42 = vshll.u32 %v11451_v22, 16  ;;  %v4705_v1 = vshrl.u32 %v11451_v22, 16 }
 0x444   : > { %4675 = vst.msk [vmem:[#allocation3 + $0x8] sm:$0xf] %vm4673_vm10, %v11451_v22  ;;  %v4370_v6 = vpop.f32.mrf.mxu1 }
 0x445   : > { %v4474_v58 = vmax.f32 %v4369_v8, 0.0  ;;  %v4919_v52 = vsel %vm12527_vm5, %v10994_v24, %v4918_v19  ;;  %v4703_v12 = vrot.slane %v4701_v42, 5  ;;  %v4707_v17 = vrot.slane %v4705_v1, 4 }
 0x446   : > { %v4373_v49 = vpop.f32.mrf.mxu1  ;;  %4963 = vrot.lane.b32.xlu1 %v4919_v52, %s15107_s19  ;;  %v4534_v47 = vld [vmem:[#allocation4 + $0x20] ss:$2 sm:$0xff]  ;;  %v4566_v9 = vld [vmem:[#allocation4 + $0x21] ss:$2 sm:$0xff]  ;;  %v4920_v3 = vrot.slane %v4918_v19, 4 }
 0x447   : > { %4506 = vst.msk [vmem:[#allocation4 + $0x38] sm:$0xff] %vm4498_vm9, %v4474_v58  ;;  %v4374_v32 = vadd.f32 %v14177_v16, %v4373_v49  ;;  %v4595_v13 = vmax.f32 %v4534_v47, %v4566_v9  ;;  %v4704_v35 = vsel %vm12575_vm6, %v4699_v11, %v4703_v12  ;;  %v4708_v44 = vor.u32 %v4707_v17, %v4703_v12  ;;  %v11821_v19 = vld [vmem:[%s15065_s7] sm:$0xff]  }
 0x448   : > { %v4375_v55 = vpop.f32.mrf.mxu1  ;;  %11551 = vmatprep.subr.bf16.mxu0 %v11821_v19 }
 0x449   : > { %v4475_v40 = vmax.f32 %v4374_v32, 0.0  ;;  %v11452_v28 = vpack.c.bf16 %v4595_v13, %v4595_v13  ;;  %v4709_v50 = vrot.slane %v4708_v44, 4  ;;  %11552 = vmatpush3.bf16.msra.mxu0 %v11821_v19 }
 0x44a   : > { %v4376_v15 = vpop.f32.mrf.mxu1  ;;  %4850 = vrot.lane.b32.xlu1 %v4704_v35, %s15108_s20 }
 0x44b   : > { %4507 = vst.msk [vmem:[#allocation4 + $0x40] sm:$0xff] %vm4498_vm9, %v4475_v40  ;;  %v4377_v21 = vadd.f32 %v14177_v16, %v4376_v15  ;;  %v4921_v45 = vrot.slane %v11452_v28, 5  ;;  %v4711_v29 = vshll.u32 %v11452_v28, 16  ;;  %v4715_v14 = vshrl.u32 %v11452_v28, 16 }
 0x44c   : > { %4676 = vst.msk [vmem:[#allocation3 + $0x10] sm:$0xf] %vm4673_vm10, %v11452_v28  ;;  %v4378_v43 = vpop.f32.mrf.mxu1 }
 0x44d   : > { %v4476_v34 = vmax.f32 %v4377_v21, 0.0  ;;  %v4922_v23 = vsel %vm12527_vm5, %v4920_v3, %v4921_v45  ;;  %v4713_v2 = vrot.slane %v4711_v29, 5  ;;  %v4717_v60 = vrot.slane %v4715_v14, 4 }
 0x44e   : > { %v4381_v37 = vpop.f32.mrf.mxu1  ;;  %4965 = vrot.lane.b32.xlu0 %v4922_v23, %s15107_s19  ;;  %v4536_v27 = vld [vmem:[#allocation4 + $0x30] ss:$2 sm:$0xff]  ;;  %v4568_v33 = vld [vmem:[#allocation4 + $0x31] ss:$2 sm:$0xff]  ;;  %v4923_v4 = vrot.slane %v4921_v45, 4 }
 0x44f   : > { %4508 = vst.msk [vmem:[#allocation4 + $0x48] sm:$0xff] %vm4498_vm9, %v4476_v34  ;;  %v4382_v61 = vadd.f32 %v14177_v16, %v4381_v37  ;;  %v4596_v56 = vmax.f32 %v4536_v27, %v4568_v33  ;;  %v4714_v30 = vsel %vm12575_vm6, %v4709_v50, %v4713_v2  ;;  %v4718_v59 = vor.u32 %v4717_v60, %v4713_v2 }
 0x450   : > { %v4383_v18 = vpop.f32.mrf.mxu1 }
 0x451   : > { %v4477_v53 = vmax.f32 %v4382_v61, 0.0  ;;  %v11453_v5 = vpack.c.bf16 %v4596_v56, %v4596_v56  ;;  %v4719_v24 = vrot.slane %v4718_v59, 4 }
 0x452   : > { %v4384_v10 = vpop.f32.mrf.mxu1  ;;  %4852 = vrot.lane.b32.xlu0 %v4714_v30, %s15108_s20 }
 0x453   : > { %4509 = vst.msk [vmem:[#allocation4 + $0x50] sm:$0xff] %vm4498_vm9, %v4477_v53  ;;  %v4385_v41 = vadd.f32 %v14177_v16, %v4384_v10  ;;  %v4924_v25 = vrot.slane %v11453_v5, 5  ;;  %v4721_v20 = vshll.u32 %v11453_v5, 16  ;;  %v4725_v63 = vshrl.u32 %v11453_v5, 16 }
 0x454   : > { %4677 = vst.msk [vmem:[#allocation3 + $0x18] sm:$0xf] %vm4673_vm10, %v11453_v5  ;;  %v4386_v46 = vpop.f32.mrf.mxu1 }
 0x455   : > { %v4478_v62 = vmax.f32 %v4385_v41, 0.0  ;;  %v4925_v51 = vsel %vm12527_vm5, %v4923_v4, %v4924_v25  ;;  %v4723_v54 = vrot.slane %v4721_v20, 5  ;;  %v4727_v22 = vrot.slane %v4725_v63, 4 }
 0x456   : > { %v4389_v26 = vpop.f32.mrf.mxu1  ;;  %4967 = vrot.lane.b32.xlu1 %v4925_v51, %s15107_s19  ;;  %v4538_v39 = vld [vmem:[#allocation4 + $0x40] ss:$2 sm:$0xff]  ;;  %v4570_v57 = vld [vmem:[#allocation4 + $0x41] ss:$2 sm:$0xff]  ;;  %v4926_v52 = vrot.slane %v4924_v25, 4 }
 0x457   : > { %4510 = vst.msk [vmem:[#allocation4 + $0x58] sm:$0xff] %vm4498_vm9, %v4478_v62  ;;  %v4390_v38 = vadd.f32 %v14177_v16, %v4389_v26  ;;  %v4597_v48 = vmax.f32 %v4538_v39, %v4570_v57  ;;  %v4724_v1 = vsel %vm12575_vm6, %v4719_v24, %v4723_v54  ;;  %v4728_v12 = vor.u32 %v4727_v22, %v4723_v54 }
 0x458   : > { %v4391_v8 = vpop.f32.mrf.mxu1 }
 0x459   : > { %v4479_v42 = vmax.f32 %v4390_v38, 0.0  ;;  %v11454_v6 = vpack.c.bf16 %v4597_v48, %v4597_v48  ;;  %v4729_v3 = vrot.slane %v4728_v12, 4 }
 0x45a   : > { %v4392_v58 = vpop.f32.mrf.mxu1  ;;  %4854 = vrot.lane.b32.xlu1 %v4724_v1, %s15108_s20 }
 0x45b   : > { %4511 = vst.msk [vmem:[#allocation4 + $0x60] sm:$0xff] %vm4498_vm9, %v4479_v42  ;;  %v4393_v49 = vadd.f32 %v14177_v16, %v4392_v58  ;;  %v4927_v47 = vrot.slane %v11454_v6, 5  ;;  %v4731_v9 = vshll.u32 %v11454_v6, 16  ;;  %v4735_v17 = vshrl.u32 %v11454_v6, 16 }
 0x45c   : > { %4678 = vst.msk [vmem:[#allocation3 + $0x20] sm:$0xf] %vm4673_vm10, %v11454_v6  ;;  %v4394_v32 = vpop.f32.mrf.mxu1 }
 0x45d   : > { %v4480_v11 = vmax.f32 %v4393_v49, 0.0  ;;  %v4928_v13 = vsel %vm12527_vm5, %v4926_v52, %v4927_v47  ;;  %v4733_v55 = vrot.slane %v4731_v9, 5  ;;  %v4737_v28 = vrot.slane %v4735_v17, 4 }
 0x45e   : > { %v4397_v36 = vpop.f32.mrf.mxu1  ;;  %4969 = vrot.lane.b32.xlu0 %v4928_v13, %s15107_s19  ;;  %v4540_v40 = vld [vmem:[#allocation4 + $0x50] ss:$2 sm:$0xff]  ;;  %v4572_v35 = vld [vmem:[#allocation4 + $0x51] ss:$2 sm:$0xff]  ;;  %v4929_v34 = vrot.slane %v4927_v47, 4 }
 0x45f   : > { %4512 = vst.msk [vmem:[#allocation4 + $0x68] sm:$0xff] %vm4498_vm9, %v4480_v11  ;;  %v4398_v15 = vadd.f32 %v14177_v16, %v4397_v36  ;;  %v4598_v44 = vmax.f32 %v4540_v40, %v4572_v35  ;;  %v4734_v29 = vsel %vm12575_vm6, %v4729_v3, %v4733_v55  ;;  %v4738_v23 = vor.u32 %v4737_v28, %v4733_v55 }
 0x460   : > { %v4399_v21 = vpop.f32.mrf.mxu1 }
 0x461   : > { %v4481_v45 = vmax.f32 %v4398_v15, 0.0  ;;  %v11455_v14 = vpack.c.bf16 %v4598_v44, %v4598_v44  ;;  %v4739_v4 = vrot.slane %v4738_v23, 4 }
 0x462   : > { %v4400_v43 = vpop.f32.mrf.mxu1  ;;  %4856 = vrot.lane.b32.xlu0 %v4734_v29, %s15108_s20 }
 0x463   : > { %4513 = vst.msk [vmem:[#allocation4 + $0x70] sm:$0xff] %vm4498_vm9, %v4481_v45  ;;  %v4401_v2 = vadd.f32 %v14177_v16, %v4400_v43  ;;  %v4930_v37 = vrot.slane %v11455_v14, 5  ;;  %v4741_v27 = vshll.u32 %v11455_v14, 16  ;;  %v4745_v33 = vshrl.u32 %v11455_v14, 16 }
 0x464   : > { %4679 = vst.msk [vmem:[#allocation3 + $0x28] sm:$0xf] %vm4673_vm10, %v11455_v14  ;;  %v4402_v60 = vpop.f32.mrf.mxu1 }
 0x465   : > { %v4482_v61 = vmax.f32 %v4401_v2, 0.0  ;;  %v4931_v50 = vsel %vm12527_vm5, %v4929_v34, %v4930_v37  ;;  %v4743_v56 = vrot.slane %v4741_v27, 5  ;;  %v4747_v5 = vrot.slane %v4745_v33, 4 }
 0x466   : > { %v4405_v18 = vpop.f32.mrf.mxu1  ;;  %4971 = vrot.lane.b32.xlu1 %v4931_v50, %s15107_s19  ;;  %v4542_v53 = vld [vmem:[#allocation4 + $0x60] ss:$2 sm:$0xff]  ;;  %v4574_v30 = vld [vmem:[#allocation4 + $0x61] ss:$2 sm:$0xff]  ;;  %v4932_v62 = vrot.slane %v4930_v37, 4 }
 0x467   : > { %4514 = vst.msk [vmem:[#allocation4 + $0x78] sm:$0xff] %vm4498_vm9, %v4482_v61  ;;  %v4406_v10 = vadd.f32 %v14177_v16, %v4405_v18  ;;  %v4599_v59 = vmax.f32 %v4542_v53, %v4574_v30  ;;  %v4744_v20 = vsel %vm12575_vm6, %v4739_v4, %v4743_v56  ;;  %v4748_v51 = vor.u32 %v4747_v5, %v4743_v56 }
 0x468   : > { %v4407_v41 = vpop.f32.mrf.mxu1 }
 0x469   : > { %v4483_v25 = vmax.f32 %v4406_v10, 0.0  ;;  %v11456_v63 = vpack.c.bf16 %v4599_v59, %v4599_v59  ;;  %v4749_v58 = vrot.slane %v4748_v51, 4 }
 0x46a   : > { %v4408_v46 = vpop.f32.mrf.mxu1  ;;  %4858 = vrot.lane.b32.xlu1 %v4744_v20, %s15108_s20 }
 0x46b   : > { %4515 = vst.msk [vmem:[#allocation4 + $0x80] sm:$0xff] %vm4498_vm9, %v4483_v25  ;;  %v4409_v54 = vadd.f32 %v14177_v16, %v4408_v46  ;;  %v4933_v26 = vrot.slane %v11456_v63, 5  ;;  %v4751_v39 = vshll.u32 %v11456_v63, 16  ;;  %v4755_v57 = vshrl.u32 %v11456_v63, 16 }
 0x46c   : > { %4680 = vst.msk [vmem:[#allocation3 + $0x30] sm:$0xf] %vm4673_vm10, %v11456_v63  ;;  %v4410_v22 = vpop.f32.mrf.mxu1 }
 0x46d   : > { %v4484_v38 = vmax.f32 %v4409_v54, 0.0  ;;  %v4934_v24 = vsel %vm12527_vm5, %v4932_v62, %v4933_v26  ;;  %v4753_v48 = vrot.slane %v4751_v39, 5  ;;  %v4757_v8 = vrot.slane %v4755_v57, 4 }
 0x46e   : > { %v4413_v19 = vpop.f32.mrf.mxu1  ;;  %4973 = vrot.lane.b32.xlu0 %v4934_v24, %s15107_s19  ;;  %v4544_v42 = vld [vmem:[#allocation4 + $0x70] ss:$2 sm:$0xff]  ;;  %v4576_v1 = vld [vmem:[#allocation4 + $0x71] ss:$2 sm:$0xff]  ;;  %v4935_v2 = vrot.slane %v4933_v26, 4 }
 0x46f   : > { %4516 = vst.msk [vmem:[#allocation4 + $0x88] sm:$0xff] %vm4498_vm9, %v4484_v38  ;;  %v4414_v6 = vadd.f32 %v14177_v16, %v4413_v19  ;;  %v4600_v52 = vmax.f32 %v4544_v42, %v4576_v1  ;;  %v4754_v47 = vsel %vm12575_vm6, %v4749_v58, %v4753_v48  ;;  %v4758_v17 = vor.u32 %v4757_v8, %v4753_v48 }
 0x470   : > { %v4415_v12 = vpop.f32.mrf.mxu1 }
 0x471   : > { %v4485_v49 = vmax.f32 %v4414_v6, 0.0  ;;  %v11457_v9 = vpack.c.bf16 %v4600_v52, %v4600_v52  ;;  %v4759_v35 = vrot.slane %v4758_v17, 4 }
 0x472   : > { %v4416_v32 = vpop.f32.mrf.mxu1  ;;  %4860 = vrot.lane.b32.xlu0 %v4754_v47, %s15108_s20 }
 0x473   : > { %4517 = vst.msk [vmem:[#allocation4 + $0x90] sm:$0xff] %vm4498_vm9, %v4485_v49  ;;  %v4417_v11 = vadd.f32 %v14177_v16, %v4416_v32  ;;  %v4761_v13 = vshll.u32 %v11457_v9, 16  ;;  %v4765_v55 = vshrl.u32 %v11457_v9, 16  ;;  %v4936_v14 = vrot.slane %v11457_v9, 5 }
 0x474   : > { %4681 = vst.msk [vmem:[#allocation3 + $0x38] sm:$0xf] %vm4673_vm10, %v11457_v9  ;;  %v4418_v36 = vpop.f32.mrf.mxu1 }
 0x475   : > { %v4486_v40 = vmax.f32 %v4417_v11, 0.0  ;;  %v4763_v28 = vrot.slane %v4761_v13, 5  ;;  %v4767_v15 = vrot.slane %v4765_v55, 4  ;;  %v4937_v61 = vsel %vm12527_vm5, %v4935_v2, %v4936_v14 }
 0x476   : > { %v4421_v3 = vpop.f32.mrf.mxu1  ;;  %v4546_v44 = vld [vmem:[#allocation4 + $0x80] ss:$2 sm:$0xff]  ;;  %v4578_v21 = vld [vmem:[#allocation4 + $0x81] ss:$2 sm:$0xff]  ;;  %v4938_v51 = vrot.slane %v4936_v14, 4 }
 0x477   : > { %4518 = vst.msk [vmem:[#allocation4 + $0x98] sm:$0xff] %vm4498_vm9, %v4486_v40  ;;  %v4422_v45 = vadd.f32 %v14177_v16, %v4421_v3  ;;  %v4764_v29 = vsel %vm12575_vm6, %v4759_v35, %v4763_v28  ;;  %v4601_v43 = vmax.f32 %v4546_v44, %v4578_v21  ;;  %v4768_v27 = vor.u32 %v4767_v15, %v4763_v28 }
 0x478   : > { %v4423_v34 = vpop.f32.mrf.mxu1  ;;  %4862 = vrot.lane.b32.xlu1 %v4764_v29, %s15108_s20 }
 0x479   : > { %v4487_v23 = vmax.f32 %v4422_v45, 0.0  ;;  %v11458_v37 = vpack.c.bf16 %v4601_v43, %v4601_v43  ;;  %v4769_v30 = vrot.slane %v4768_v27, 4 }
 0x47a   : > { %v4424_v33 = vpop.f32.mrf.mxu1 }
 0x47b   : > { %4519 = vst.msk [vmem:[#allocation4 + $0xa0] sm:$0xff] %vm4498_vm9, %v4487_v23  ;;  %v4425_v60 = vadd.f32 %v14177_v16, %v4424_v33  ;;  %v4771_v50 = vshll.u32 %v11458_v37, 16  ;;  %v4775_v56 = vshrl.u32 %v11458_v37, 16  ;;  %v4939_v4 = vrot.slane %v11458_v37, 5 }
 0x47c   : > { %4682 = vst.msk [vmem:[#allocation3 + $0x40] sm:$0xf] %vm4673_vm10, %v11458_v37  ;;  %v4426_v18 = vpop.f32.mrf.mxu1  ;;  %4975 = vrot.lane.b32.xlu1 %v4937_v61, %s15107_s19 }
 0x47d   : > { %v4488_v53 = vmax.f32 %v4425_v60, 0.0  ;;  %v4773_v5 = vrot.slane %v4771_v50, 5  ;;  %v4777_v25 = vrot.slane %v4775_v56, 4  ;;  %v4940_v57 = vsel %vm12527_vm5, %v4938_v51, %v4939_v4 }
 0x47e   : > { %v4429_v10 = vpop.f32.mrf.mxu1  ;;  %v4548_v59 = vld [vmem:[#allocation4 + $0x90] ss:$2 sm:$0xff]  ;;  %v4580_v41 = vld [vmem:[#allocation4 + $0x91] ss:$2 sm:$0xff]  ;;  %v4941_v22 = vrot.slane %v4939_v4, 4 }
 0x47f   : > { %4520 = vst.msk [vmem:[#allocation4 + $0xa8] sm:$0xff] %vm4498_vm9, %v4488_v53  ;;  %v4430_v20 = vadd.f32 %v14177_v16, %v4429_v10  ;;  %v4774_v63 = vsel %vm12575_vm6, %v4769_v30, %v4773_v5  ;;  %v4602_v46 = vmax.f32 %v4548_v59, %v4580_v41  ;;  %v4778_v38 = vor.u32 %v4777_v25, %v4773_v5 }
 0x480   : > { %v4431_v62 = vpop.f32.mrf.mxu1  ;;  %4864 = vrot.lane.b32.xlu0 %v4774_v63, %s15108_s20 }
 0x481   : > { %v4489_v54 = vmax.f32 %v4430_v20, 0.0  ;;  %v11459_v26 = vpack.c.bf16 %v4602_v46, %v4602_v46  ;;  %v4779_v17 = vrot.slane %v4778_v38, 4 }
 0x482   : > { %v4432_v39 = vpop.f32.mrf.mxu1 }
 0x483   : > { %4521 = vst.msk [vmem:[#allocation4 + $0xb0] sm:$0xff] %vm4498_vm9, %v4489_v54  ;;  %v4433_v24 = vadd.f32 %v14177_v16, %v4432_v39  ;;  %v4942_v48 = vrot.slane %v11459_v26, 5  ;;  %v4781_v8 = vshll.u32 %v11459_v26, 16  ;;  %v4785_v19 = vshrl.u32 %v11459_v26, 16 }
 0x484   : > { %4683 = vst.msk [vmem:[#allocation3 + $0x48] sm:$0xf] %vm4673_vm10, %v11459_v26  ;;  %v4434_v42 = vpop.f32.mrf.mxu1  ;;  %4977 = vrot.lane.b32.xlu0 %v4940_v57, %s15107_s19 }
 0x485   : > { %v4490_v1 = vmax.f32 %v4433_v24, 0.0  ;;  %v4943_v6 = vsel %vm12527_vm5, %v4941_v22, %v4942_v48  ;;  %v4783_v58 = vrot.slane %v4781_v8, 5  ;;  %v4787_v47 = vrot.slane %v4785_v19, 4 }
 0x486   : > { %v4437_v52 = vpop.f32.mrf.mxu1  ;;  %4979 = vrot.lane.b32.xlu1 %v4943_v6, %s15107_s19  ;;  %v4550_v12 = vld [vmem:[#allocation4 + $0xa0] ss:$2 sm:$0xff]  ;;  %v4582_v49 = vld [vmem:[#allocation4 + $0xa1] ss:$2 sm:$0xff]  ;;  %v4944_v35 = vrot.slane %v4942_v48, 4 }
 0x487   : > { %4522 = vst.msk [vmem:[#allocation4 + $0xb8] sm:$0xff] %vm4498_vm9, %v4490_v1  ;;  %v4438_v9 = vadd.f32 %v14177_v16, %v4437_v52  ;;  %v4603_v32 = vmax.f32 %v4550_v12, %v4582_v49  ;;  %v4784_v55 = vsel %vm12575_vm6, %v4779_v17, %v4783_v58  ;;  %v4788_v28 = vor.u32 %v4787_v47, %v4783_v58 }
 0x488   : > { %v4439_v11 = vpop.f32.mrf.mxu1 }
 0x489   : > { %v4491_v13 = vmax.f32 %v4438_v9, 0.0  ;;  %v11460_v36 = vpack.c.bf16 %v4603_v32, %v4603_v32  ;;  %v4789_v33 = vrot.slane %v4788_v28, 4 }
 0x48a   : > { %v4440_v40 = vpop.f32.mrf.mxu1  ;;  %4866 = vrot.lane.b32.xlu1 %v4784_v55, %s15108_s20 }
 0x48b   : > { %4523 = vst.msk [vmem:[#allocation4 + $0xc0] sm:$0xff] %vm4498_vm9, %v4491_v13  ;;  %v4441_v15 = vadd.f32 %v14177_v16, %v4440_v40  ;;  %v4945_v3 = vrot.slane %v11460_v36, 5  ;;  %v4791_v44 = vshll.u32 %v11460_v36, 16  ;;  %v4795_v21 = vshrl.u32 %v11460_v36, 16 }
 0x48c   : > { %4684 = vst.msk [vmem:[#allocation3 + $0x50] sm:$0xf] %vm4673_vm10, %v11460_v36  ;;  %v4442_v45 = vpop.f32.mrf.mxu1 }
 0x48d   : > { %v4492_v29 = vmax.f32 %v4441_v15, 0.0  ;;  %v4946_v14 = vsel %vm12527_vm5, %v4944_v35, %v4945_v3  ;;  %v4793_v43 = vrot.slane %v4791_v44, 5  ;;  %v4797_v34 = vrot.slane %v4795_v21, 4 }
 0x48e   : > { %v4445_v23 = vpop.f32.mrf.mxu1  ;;  %4981 = vrot.lane.b32.xlu0 %v4946_v14, %s15107_s19  ;;  %v4552_v2 = vld [vmem:[#allocation4 + $0xb0] ss:$2 sm:$0xff]  ;;  %v4584_v37 = vld [vmem:[#allocation4 + $0xb1] ss:$2 sm:$0xff]  ;;  %v4947_v24 = vrot.slane %v4945_v3, 4 }
 0x48f   : > { %4524 = vst.msk [vmem:[#allocation4 + $0xc8] sm:$0xff] %vm4498_vm9, %v4492_v29  ;;  %v4446_v27 = vadd.f32 %v14177_v16, %v4445_v23  ;;  %v4604_v60 = vmax.f32 %v4552_v2, %v4584_v37  ;;  %v4794_v56 = vsel %vm12575_vm6, %v4789_v33, %v4793_v43  ;;  %v4798_v53 = vor.u32 %v4797_v34, %v4793_v43 }
 0x490   : > { %v4447_v61 = vpop.f32.mrf.mxu1 }
 0x491   : > { %v4493_v50 = vmax.f32 %v4446_v27, 0.0  ;;  %v11461_v18 = vpack.c.bf16 %v4604_v60, %v4604_v60  ;;  %v4799_v25 = vrot.slane %v4798_v53, 4 }
 0x492   : > { %v4448_v30 = vpop.f32.mrf.mxu1  ;;  %4868 = vrot.lane.b32.xlu0 %v4794_v56, %s15108_s20 }
 0x493   : > { %4525 = vst.msk [vmem:[#allocation4 + $0xd0] sm:$0xff] %vm4498_vm9, %v4493_v50  ;;  %v4449_v5 = vadd.f32 %v14177_v16, %v4448_v30  ;;  %v4801_v10 = vshll.u32 %v11461_v18, 16  ;;  %v4805_v4 = vshrl.u32 %v11461_v18, 16  ;;  %v4948_v39 = vrot.slane %v11461_v18, 5 }
 0x494   : > { %4685 = vst.msk [vmem:[#allocation3 + $0x58] sm:$0xf] %vm4673_vm10, %v11461_v18  ;;  %v4450_v59 = vpop.f32.mrf.mxu1 }
 0x495   : > { %v4494_v41 = vmax.f32 %v4449_v5, 0.0  ;;  %v4803_v20 = vrot.slane %v4801_v10, 5  ;;  %v4807_v63 = vrot.slane %v4805_v4, 4  ;;  %v4949_v1 = vsel %vm12527_vm5, %v4947_v24, %v4948_v39 }
 0x496   : > { %v4453_v46 = vpop.f32.mrf.mxu1  ;;  %v4554_v62 = vld [vmem:[#allocation4 + $0xc0] ss:$2 sm:$0xff]  ;;  %v4586_v51 = vld [vmem:[#allocation4 + $0xc1] ss:$2 sm:$0xff]  ;;  %v4950_v28 = vrot.slane %v4948_v39, 4 }
 0x497   : > { %4526 = vst.msk [vmem:[#allocation4 + $0xd8] sm:$0xff] %vm4498_vm9, %v4494_v41  ;;  %v4454_v54 = vadd.f32 %v14177_v16, %v4453_v46  ;;  %v4804_v26 = vsel %vm12575_vm6, %v4799_v25, %v4803_v20  ;;  %v4605_v57 = vmax.f32 %v4554_v62, %v4586_v51  ;;  %v4808_v8 = vor.u32 %v4807_v63, %v4803_v20 }
 0x498   : > { %v4455_v22 = vpop.f32.mrf.mxu1  ;;  %4870 = vrot.lane.b32.xlu1 %v4804_v26, %s15108_s20 }
 0x499   : > { %v4495_v38 = vmax.f32 %v4454_v54, 0.0  ;;  %v11462_v48 = vpack.c.bf16 %v4605_v57, %v4605_v57  ;;  %v4809_v49 = vrot.slane %v4808_v8, 4 }
 0x49a   : > { %v4456_v19 = vpop.f32.mrf.mxu1 }
 0x49b   : > { %4527 = vst.msk [vmem:[#allocation4 + $0xe0] sm:$0xff] %vm4498_vm9, %v4495_v38  ;;  %v4457_v42 = vadd.f32 %v14177_v16, %v4456_v19  ;;  %v4811_v6 = vshll.u32 %v11462_v48, 16  ;;  %v4815_v58 = vshrl.u32 %v11462_v48, 16  ;;  %v4951_v17 = vrot.slane %v11462_v48, 5 }
 0x49c   : > { %4686 = vst.msk [vmem:[#allocation3 + $0x60] sm:$0xf] %vm4673_vm10, %v11462_v48  ;;  %v4458_v52 = vpop.f32.mrf.mxu1  ;;  %4983 = vrot.lane.b32.xlu1 %v4949_v1, %s15107_s19 }
 0x49d   : > { %v4496_v12 = vmax.f32 %v4457_v42, 0.0  ;;  %v4813_v47 = vrot.slane %v4811_v6, 5  ;;  %v4817_v40 = vrot.slane %v4815_v58, 4  ;;  %v4952_v21 = vsel %vm12527_vm5, %v4950_v28, %v4951_v17 }
 0x49e   : > { %v4461_v9 = vpop.f32.mrf.mxu1  ;;  %v4556_v32 = vld [vmem:[#allocation4 + $0xd0] ss:$2 sm:$0xff]  ;;  %v4588_v11 = vld [vmem:[#allocation4 + $0xd1] ss:$2 sm:$0xff]  ;;  %v4953_v45 = vrot.slane %v4951_v17, 4 }
 0x49f   : > { %4528 = vst.msk [vmem:[#allocation4 + $0xe8] sm:$0xff] %vm4498_vm9, %v4496_v12  ;;  %v4462_v13 = vadd.f32 %v14177_v16, %v4461_v9  ;;  %v4814_v55 = vsel %vm12575_vm6, %v4809_v49, %v4813_v47  ;;  %v4606_v36 = vmax.f32 %v4556_v32, %v4588_v11  ;;  %v4818_v16 = vor.u32 %v4817_v40, %v4813_v47 }
 0x4a0   : > { %v4463_v35 = vpop.f32.mrf.mxu1  ;;  %4872 = vrot.lane.b32.xlu0 %v4814_v55, %s15108_s20 }
 0x4a1   : > { %v4497_v15 = vmax.f32 %v4462_v13, 0.0  ;;  %v11463_v3 = vpack.c.bf16 %v4606_v36, %v4606_v36  ;;  %v4819_v60 = vrot.slane %v4818_v16, 4 }
 0x4a2   : > { %v4464_v44 = vpop.f32.mrf.mxu1 }
 0x4a3   : > { %4529 = vst.msk [vmem:[#allocation4 + $0xf0] sm:$0xff] %vm4498_vm9, %v4497_v15  ;;  %v4954_v29 = vrot.slane %v11463_v3, 5  ;;  %v4821_v14 = vshll.u32 %v11463_v3, 16  ;;  %v4825_v43 = vshrl.u32 %v11463_v3, 16 }
 0x4a4   : > { %4687 = vst.msk [vmem:[#allocation3 + $0x68] sm:$0xf] %vm4673_vm10, %v11463_v3  ;;  %v4465_v34 = vpop.f32.mrf.mxu1  ;;  %4985 = vrot.lane.b32.xlu0 %v4952_v21, %s15107_s19 }
 0x4a5   : > { %v4955_v23 = vsel %vm12527_vm5, %v4953_v45, %v4954_v29  ;;  %v4823_v2 = vrot.slane %v4821_v14, 5  ;;  %v4827_v33 = vrot.slane %v4825_v43, 4  ;;  %v4956_v18 = vrot.slane %v4954_v29, 4 }
 0x4a6   : > { %4987 = vrot.lane.b32.xlu1 %v4955_v23, %s15107_s19  ;;  %v4558_v37 = vld [vmem:[#allocation4 + $0xe0] ss:$2 sm:$0xff]  ;;  %v4590_v27 = vld [vmem:[#allocation4 + $0xe1] ss:$2 sm:$0xff] }
 0x4a7   : > { %v4607_v61 = vmax.f32 %v4558_v37, %v4590_v27  ;;  %v4824_v50 = vsel %vm12575_vm6, %v4819_v60, %v4823_v2  ;;  %v4828_v53 = vor.u32 %v4827_v33, %v4823_v2 }
 0x4a9   : > { %v11464_v56 = vpack.c.bf16 %v4607_v61, %v4607_v61  ;;  %v4829_v62 = vrot.slane %v4828_v53, 4 }
 0x4aa   : > { %4874 = vrot.lane.b32.xlu1 %v4824_v50, %s15108_s20  ;;  %v4560_v30 = vld [vmem:[#allocation4 + $0xf0] ss:$2 sm:$0xf]  ;;  %v4592_v5 = vld [vmem:[#allocation4 + $0xf1] ss:$2 sm:$0xf] }
 0x4ab   : > { %v4957_v10 = vrot.slane %v11464_v56, 5  ;;  %v4831_v4 = vshll.u32 %v11464_v56, 16  ;;  %v4608_v59 = vmax.f32 %v4560_v30, %v4592_v5  ;;  %v4835_v41 = vshrl.u32 %v11464_v56, 16  ;;  %4688 = vst.msk [vmem:[#allocation3 + $0x70] sm:$0xf] %vm4673_vm10, %v11464_v56 }
 0x4ad   : > { %v4958_v25 = vsel %vm12527_vm5, %v4956_v18, %v4957_v10  ;;  %v4833_v20 = vrot.slane %v4831_v4, 5  ;;  %v11465_v63 = vpack.c.bf16 %v4608_v59, %v4608_v59  ;;  %v4837_v46 = vrot.slane %v4835_v41, 4  ;;  %v14398_v59 = vld [vmem:[%s15066_s8] ss:$0 sm:$0xff] }
 0x4ae   : > { %4989 = vrot.lane.b32.xlu0 %v4958_v25, %s15107_s19  ;;  %v4959_v42 = vrot.slane %v4957_v10, 4 }
 0x4af   : > { %v4838_v51 = vor.u32 %v4837_v46, %v4833_v20  ;;  %v4841_v54 = vshll.u32 %v11465_v63, 16  ;;  %v4845_v26 = vshrl.u32 %v11465_v63, 16  ;;  %4690 = vst.msk [vmem:[#allocation3 + $0x78] sm:$0x1] %vm4689_vm11, %v11465_v63  ;;  %v4834_v39 = vsel %vm12575_vm6, %v4829_v62, %v4833_v20 }
 0x4b0   : > { %v4960_v8 = vrot.slane %v11465_v63, 5 }
 0x4b1   : > { %v4839_v57 = vrot.slane %v4838_v51, 4  ;;  %v4843_v22 = vrot.slane %v4841_v54, 5  ;;  %v4847_v38 = vrot.slane %v4845_v26, 4 }
 0x4b2   : > { %4876 = vrot.lane.b32.xlu0 %v4834_v39, %s15108_s20  ;;  %v4961_v1 = vsel %vm12527_vm5, %v4959_v42, %v4960_v8  ;;  %v4962_v58 = vrot.slane %v4960_v8, 4 }
 0x4b3   : > { %v4844_v24 = vsel %vm12575_vm6, %v4839_v57, %v4843_v22  ;;  %v4848_v48 = vor.u32 %v4847_v38, %v4843_v22 }
 0x4b4   : > { %4878 = vrot.lane.b32.xlu1 %v4844_v24, %s15108_s20 }
 0x4b5   : > { %v4849_v19 = vrot.slane %v4848_v48, 4 }
 0x4b7   : > { %4880 = vrot.lane.b32.xlu0 %v4849_v19, %s15108_s20 }
 0x4b8   : > { %v4964_v6 = vpop.permute.xlu1 %4963  ;;  %4991 = vrot.lane.b32.xlu1 %v4961_v1, %s15107_s19 }
 0x4bb   : > { %4993 = vrot.lane.b32.xlu0 %v4962_v58, %s15107_s19 }
 0x4bc   : > { %v4851_v52 = vpop.permute.xlu1 %4850 }
 0x4bd   : > { %4899 = vst.msk [vmem:[#allocation3] sm:$0xf] %vm4898_vm12, %v4851_v52 }
 0x4be   : > { %5012 = vst.msk [vmem:[#allocation3] sm:$0xf] %vm5011_vm13, %v4964_v6 }
 0x4c0   : > { %v4966_v12 = vpop.permute.xlu0 %4965 }
 0x4c4   : > { %v4853_v49 = vpop.permute.xlu0 %4852 }
 0x4c5   : > { %4900 = vst.msk [vmem:[#allocation3 + $0x8] sm:$0xf] %vm4898_vm12, %v4853_v49 }
 0x4c6   : > { %5013 = vst.msk [vmem:[#allocation3 + $0x8] sm:$0xf] %vm5011_vm13, %v4966_v12 }
 0x4c8   : > { %v4968_v47 = vpop.permute.xlu1 %4967 }
 0x4cc   : > { %v4855_v9 = vpop.permute.xlu1 %4854 }
 0x4cd   : > { %4901 = vst.msk [vmem:[#allocation3 + $0x10] sm:$0xf] %vm4898_vm12, %v4855_v9  ;;  %v11820_v17 = vld [vmem:[#allocation3] ss:$8 sps:$4 sm:$0xff]  }
 0x4ce   : > { %5014 = vst.msk [vmem:[#allocation3 + $0x10] sm:$0xf] %vm5011_vm13, %v4968_v47  ;;  %11553 = vmatprep.mubr.msk.bf16.mxu0 %vm5140_vm14, %v11820_v17 }
 0x4d0   : > { %v4970_v32 = vpop.permute.xlu0 %4969 }
 0x4d4   : > { %v4857_v11 = vpop.permute.xlu0 %4856 }
 0x4d5   : > { %4902 = vst.msk [vmem:[#allocation3 + $0x18] sm:$0xf] %vm4898_vm12, %v4857_v11 }
 0x4d6   : > { %5015 = vst.msk [vmem:[#allocation3 + $0x18] sm:$0xf] %vm5011_vm13, %v4970_v32 }
 0x4d8   : > { %v4972_v13 = vpop.permute.xlu1 %4971 }
 0x4dc   : > { %v4859_v55 = vpop.permute.xlu1 %4858 }
 0x4dd   : > { %4903 = vst.msk [vmem:[#allocation3 + $0x20] sm:$0xf] %vm4898_vm12, %v4859_v55  ;;  %v11822_v36 = vld [vmem:[#allocation3 + $0x10] ss:$8 sps:$4 sm:$0xff]  }
 0x4de   : > { %5016 = vst.msk [vmem:[#allocation3 + $0x20] sm:$0xf] %vm5011_vm13, %v4972_v13  ;;  %11554 = vmatmul.mubr.msk.bf16.vlgmr.msra.gmra.mxu0 %vm5140_vm14, %v11822_v36  ;;  %v11829_v36 = vld [vmem:[%s15067_s9 + $0x28] sm:$0xff]  }
 0x4df   : > { %11569 = vmatprep.subr.bf16.mxu0 %v11829_v36 }
 0x4e0   : > { %v4974_v40 = vpop.permute.xlu0 %4973  ;;  %11570 = vmatpush3.bf16.msra.mxu0 %v11829_v36 }
 0x4e4   : > { %v4861_v35 = vpop.permute.xlu0 %4860 }
 0x4e5   : > { %4904 = vst.msk [vmem:[#allocation3 + $0x28] sm:$0xf] %vm4898_vm12, %v4861_v35 }
 0x4e6   : > { %5017 = vst.msk [vmem:[#allocation3 + $0x28] sm:$0xf] %vm5011_vm13, %v4974_v40  ;;  %v11830_v40 = vld [vmem:[%s15067_s9 + $0x20] sm:$0xff]  }
 0x4e7   : > { %11571 = vmatprep.subr.bf16.mxu0 %v11830_v40 }
 0x4e8   : > { %11572 = vmatpush3.bf16.msra.mxu0 %v11830_v40 }
 0x4ea   : > { %v4863_v28 = vpop.permute.xlu1 %4862 }
 0x4eb   : > { %4905 = vst.msk [vmem:[#allocation3 + $0x30] sm:$0xf] %vm4898_vm12, %v4863_v28 }
 0x4ed   : > { %v11823_v15 = vld [vmem:[#allocation3 + $0x20] ss:$8 sps:$4 sm:$0xff]  }
 0x4ee   : > { %v4976_v3 = vpop.permute.xlu1 %4975  ;;  %11557 = vmatprep.mubr.msk.bf16.mxu0 %vm5140_vm14, %v11823_v15 }
 0x4ef   : > { %5018 = vst.msk [vmem:[#allocation3 + $0x30] sm:$0xf] %vm5011_vm13, %v4976_v3 }
 0x4f2   : > { %v4865_v44 = vpop.permute.xlu0 %4864 }
 0x4f3   : > { %4906 = vst.msk [vmem:[#allocation3 + $0x38] sm:$0xf] %vm4898_vm12, %v4865_v44 }
 0x4f6   : > { %v4978_v21 = vpop.permute.xlu0 %4977 }
 0x4f7   : > { %5019 = vst.msk [vmem:[#allocation3 + $0x38] sm:$0xf] %vm5011_vm13, %v4978_v21 }
 0x4f8   : > { %v4980_v45 = vpop.permute.xlu1 %4979 }
 0x4fc   : > { %v4867_v29 = vpop.permute.xlu1 %4866 }
 0x4fd   : > { %4907 = vst.msk [vmem:[#allocation3 + $0x40] sm:$0xf] %vm4898_vm12, %v4867_v29 }
 0x4fe   : > { %5020 = vst.msk [vmem:[#allocation3 + $0x40] sm:$0xf] %vm5011_vm13, %v4980_v45  ;;  %v11824_v16 = vld [vmem:[#allocation3 + $0x30] ss:$8 sps:$4 sm:$0xff]  }
 0x4ff   : > { %11558 = vmatmul.mubr.msk.bf16.gmra.mxu0 %vm5140_vm14, %v11824_v16 }
 0x500   : > { %v4982_v14 = vpop.permute.xlu0 %4981 }
 0x504   : > { %v4869_v43 = vpop.permute.xlu0 %4868 }
 0x505   : > { %4908 = vst.msk [vmem:[#allocation3 + $0x48] sm:$0xf] %vm4898_vm12, %v4869_v43 }
 0x506   : > { %5021 = vst.msk [vmem:[#allocation3 + $0x48] sm:$0xf] %vm5011_vm13, %v4982_v14  ;;  %v11832_v14 = vld [vmem:[%s15067_s9 + $0x18] sm:$0xff]  }
 0x507   : > { %11573 = vmatprep.subr.bf16.mxu0 %v11832_v14 }
 0x508   : > { %11574 = vmatpush3.bf16.msra.mxu0 %v11832_v14 }
 0x50a   : > { %v4871_v34 = vpop.permute.xlu1 %4870 }
 0x50b   : > { %4909 = vst.msk [vmem:[#allocation3 + $0x50] sm:$0xf] %vm4898_vm12, %v4871_v34 }
 0x50d   : > { %v11825_v23 = vld [vmem:[#allocation3 + $0x40] ss:$8 sps:$4 sm:$0xff]  }
 0x50e   : > { %v4984_v2 = vpop.permute.xlu1 %4983  ;;  %11561 = vmatprep.mubr.msk.bf16.mxu0 %vm5140_vm14, %v11825_v23  ;;  %v11833_v23 = vld [vmem:[%s15067_s9 + $0x10] sm:$0xff]  }
 0x50f   : > { %5022 = vst.msk [vmem:[#allocation3 + $0x50] sm:$0xf] %vm5011_vm13, %v4984_v2  ;;  %11575 = vmatprep.subr.bf16.mxu0 %v11833_v23 }
 0x510   : > { %11576 = vmatpush3.bf16.msra.mxu0 %v11833_v23 }
 0x512   : > { %v4873_v37 = vpop.permute.xlu0 %4872 }
 0x513   : > { %4910 = vst.msk [vmem:[#allocation3 + $0x58] sm:$0xf] %vm4898_vm12, %v4873_v37 }
 0x516   : > { %v4986_v27 = vpop.permute.xlu0 %4985 }
 0x517   : > { %5023 = vst.msk [vmem:[#allocation3 + $0x58] sm:$0xf] %vm5011_vm13, %v4986_v27 }
 0x518   : > { %v4988_v33 = vpop.permute.xlu1 %4987 }
 0x51c   : > { %v4875_v60 = vpop.permute.xlu1 %4874 }
 0x51d   : > { %4911 = vst.msk [vmem:[#allocation3 + $0x60] sm:$0xf] %vm4898_vm12, %v4875_v60 }
 0x51e   : > { %5024 = vst.msk [vmem:[#allocation3 + $0x60] sm:$0xf] %vm5011_vm13, %v4988_v33  ;;  %v11826_v61 = vld [vmem:[#allocation3 + $0x50] ss:$8 sps:$4 sm:$0xff]  }
 0x51f   : > { %11562 = vmatmul.mubr.msk.bf16.gmra.mxu0 %vm5140_vm14, %v11826_v61  ;;  %v11834_v61 = vld [vmem:[%s15067_s9 + $0x8] sm:$0xff]  }
 0x520   : > { %v4990_v50 = vpop.permute.xlu0 %4989  ;;  %11577 = vmatprep.subr.bf16.mxu0 %v11834_v61 }
 0x521   : > { %11578 = vmatpush3.bf16.msra.mxu0 %v11834_v61 }
 0x524   : > { %v4877_v56 = vpop.permute.xlu0 %4876 }
 0x525   : > { %4912 = vst.msk [vmem:[#allocation3 + $0x68] sm:$0xf] %vm4898_vm12, %v4877_v56 }
 0x526   : > { %5025 = vst.msk [vmem:[#allocation3 + $0x68] sm:$0xf] %vm5011_vm13, %v4990_v50  ;;  %v4879_v18 = vpop.permute.xlu1 %4878 }
 0x527   : > { %4913 = vst.msk [vmem:[#allocation3 + $0x70] sm:$0xf] %vm4898_vm12, %v4879_v18 }
 0x529   : > { %v4881_v53 = vpop.permute.xlu0 %4880 }
 0x52a   : > { %4915 = vst.msk [vmem:[#allocation3 + $0x78] sm:$0x1] %vm4914_vm15, %v4881_v53  ;;  %v4992_v30 = vpop.permute.xlu1 %4991 }
 0x52b   : > { %5026 = vst.msk [vmem:[#allocation3 + $0x70] sm:$0xf] %vm5011_vm13, %v4992_v30 }
 0x52d   : > { %v4994_v5 = vpop.permute.xlu0 %4993  ;;  %v11827_v10 = vld [vmem:[#allocation3 + $0x60] ss:$8 sps:$4 sm:$0xff]  }
 0x52e   : > { %5028 = vst.msk [vmem:[#allocation3 + $0x78] sm:$0x1] %vm5027_vm0, %v4994_v5  ;;  %11565 = vmatprep.mubr.msk.bf16.mxu0 %vm5140_vm14, %v11827_v10 }
 0x535   : > { %v11828_v4 = vld [vmem:[#allocation3 + $0x70] ss:$8 sps:$4 sm:$0x1f]  }
 0x536   : > { %11566 = vmatmul.mubr.msk.bf16.gmra.mxu0 %vm5140_vm14, %v11828_v4 }
 0x59e   : > { %v11555_v41 = vpop.f32.mrf.mxu0 }
 0x59f   : > { %v5208_v25 = vadd.f32 %v11555_v41, %v14398_v59 }
 0x5a0   : > { %v5199_v20 = vpop.f32.mrf.mxu0 }
 0x5a1   : > { %v11468_v63 = vpack.c.bf16 %v5208_v25, %v5208_v25  ;;  %v5200_v46 = vadd.f32 %v14398_v59, %v5199_v20 }
 0x5a2   : > { %v11556_v62 = vpop.f32.mrf.mxu0 }
 0x5a3   : > { %v5360_v51 = vshll.u32 %v11468_v63, 16  ;;  %v5364_v54 = vshrl.u32 %v11468_v63, 16  ;;  %5325 = vst.msk [vmem:[#allocation3 + $0x10] sm:$0xf] %vm4673_vm10, %v11468_v63  ;;  %v11466_v26 = vpack.c.bf16 %v5200_v46, %v5200_v46  ;;  %v5211_v39 = vadd.f32 %v11556_v62, %v14398_v59 }
 0x5a4   : > { %v5202_v57 = vpop.f32.mrf.mxu0  ;;  %v5559_v28 = vrot.slane %v11468_v63, 5 }
 0x5a5   : > { %v5362_v22 = vrot.slane %v5360_v51, 5  ;;  %v5366_v38 = vrot.slane %v5364_v54, 4  ;;  %v5341_v24 = vshrl.u32 %v11466_v26, 16  ;;  %v5344_v48 = vshll.u32 %v11466_v26, 16  ;;  %5323 = vst.msk [vmem:[#allocation3] sm:$0xf] %vm4673_vm10, %v11466_v26 }
 0x5a6   : > { %v14405_v8 = vpack.c.bf16 %v5211_v39, %v5211_v39  ;;  %v5203_v19 = vadd.f32 %v14398_v59, %v5202_v57  ;;  %v11034_v15 = vrot.slane %v11466_v26, 9  ;;  %v5561_v2 = vrot.slane %v5559_v28, 4  ;;  %v11835_v54 = vld [vmem:[%s15067_s9] sm:$0xff]  }
 0x5a7   : > { %v5367_v42 = vor.u32 %v5366_v38, %v5362_v22  ;;  %v5343_v1 = vrot.slane %v5341_v24, 4  ;;  %v5346_v6 = vrot.slane %v5344_v48, 5  ;;  %11579 = vmatprep.subr.bf16.mxu0 %v11835_v54 }
 0x5a8   : > { %5326 = vst.msk [vmem:[#allocation3 + $0x18] sm:$0xf] %vm4673_vm10, %v14405_v8  ;;  %v11467_v58 = vpack.c.bf16 %v5203_v19, %v5203_v19  ;;  %v5370_v52 = vshll.u32 %v14405_v8, 16  ;;  %v5562_v34 = vrot.slane %v14405_v8, 5  ;;  %v5374_v27 = vshrl.u32 %v14405_v8, 16  ;;  %11580 = vmatpush3.bf16.msra.mxu0 %v11835_v54 }
 0x5a9   : > { %v5368_v12 = vrot.slane %v5367_v42, 4  ;;  %v5347_v55 = vor.u32 %v5346_v6, %v5343_v1 }
 0x5aa   : > { %v5350_v49 = vshll.u32 %v11467_v58, 16  ;;  %v5354_v47 = vshrl.u32 %v11467_v58, 16  ;;  %5324 = vst.msk [vmem:[#allocation3 + $0x8] sm:$0xf] %vm4673_vm10, %v11467_v58  ;;  %v14412_v9 = vrot.slane %v5370_v52, 5  ;;  %v5556_v17 = vrot.slane %v11467_v58, 5 }
 0x5ab   : > { %v5348_v29 = vrot.slane %v5347_v55, 4  ;;  %v5563_v37 = vsel %vm12527_vm5, %v5561_v2, %v5562_v34  ;;  %v5376_v50 = vrot.slane %v5374_v27, 4 }
 0x5ac   : > { %v5373_v32 = vsel %vm12575_vm6, %v5368_v12, %v14412_v9  ;;  %v5352_v11 = vrot.slane %v5350_v49, 5  ;;  %v5356_v13 = vrot.slane %v5354_v47, 4  ;;  %v5558_v35 = vrot.slane %v5556_v17, 4 }
 0x5ad   : > { %5498 = vrot.lane.b32.xlu1 %v5373_v32, %s15108_s20  ;;  %v5557_v21 = vsel %vm12527_vm5, %v11034_v15, %v5556_v17  ;;  %v5377_v20 = vor.u32 %v5376_v50, %v14412_v9  ;;  %v5564_v9 = vrot.slane %v5562_v34, 4 }
 0x5ae   : > { %v5357_v3 = vor.u32 %v5356_v13, %v5352_v11  ;;  %v5560_v44 = vsel %vm12527_vm5, %v5558_v35, %v5559_v28  ;;  %v5353_v43 = vsel %vm12575_vm6, %v5348_v29, %v5352_v11 }
 0x5af   : > { %5602 = vrot.lane.b32.xlu0 %v5560_v44, %s15107_s19  ;;  %v5378_v48 = vrot.slane %v5377_v20, 4 }
 0x5b0   : > { %v5358_v45 = vrot.slane %v5357_v3, 4 }
 0x5b1   : > { %5600 = vrot.lane.b32.xlu1 %v5557_v21, %s15107_s19 }
 0x5b2   : > { %v5363_v16 = vsel %vm12575_vm6, %v5358_v45, %v5362_v22 }
 0x5b3   : > { %5496 = vrot.lane.b32.xlu0 %v5363_v16, %s15108_s20 }
 0x5b5   : > { %5494 = vrot.lane.b32.xlu1 %v5353_v43, %s15108_s20 }
 0x5b9   : > { %5604 = vrot.lane.b32.xlu1 %v5563_v37, %s15107_s19 }
 0x5bf   : > { %v11559_v33 = vpop.f32.mrf.mxu0 }
 0x5c0   : > { %v5224_v60 = vadd.f32 %v11559_v33, %v14398_v59 }
 0x5c1   : > { %v5215_v56 = vpop.f32.mrf.mxu0 }
 0x5c2   : > { %v11472_v18 = vpack.c.bf16 %v5224_v60, %v5224_v60  ;;  %v5216_v53 = vadd.f32 %v14398_v59, %v5215_v56 }
 0x5c3   : > { %v11560_v30 = vpop.f32.mrf.mxu0 }
 0x5c4   : > { %v5400_v5 = vshll.u32 %v11472_v18, 16  ;;  %v5404_v10 = vshrl.u32 %v11472_v18, 16  ;;  %5329 = vst.msk [vmem:[#allocation3 + $0x30] sm:$0xf] %vm4673_vm10, %v11472_v18  ;;  %v11470_v4 = vpack.c.bf16 %v5216_v53, %v5216_v53  ;;  %v5227_v41 = vadd.f32 %v11560_v30, %v14398_v59 }
 0x5c5   : > { %v5218_v25 = vpop.f32.mrf.mxu0  ;;  %v5571_v28 = vrot.slane %v11472_v18, 5 }
 0x5c6   : > { %v5402_v63 = vrot.slane %v5400_v5, 5  ;;  %v5406_v46 = vrot.slane %v5404_v10, 4  ;;  %v5384_v62 = vshrl.u32 %v11470_v4, 16  ;;  %5327 = vst.msk [vmem:[#allocation3 + $0x20] sm:$0xf] %vm4673_vm10, %v11470_v4  ;;  %v14456_v51 = vpack.c.bf16 %v5227_v41, %v5227_v41 }
 0x5c7   : > { %v5219_v26 = vadd.f32 %v14398_v59, %v5218_v25  ;;  %v5380_v39 = vshll.u32 %v11470_v4, 16  ;;  %v5565_v1 = vrot.slane %v11470_v4, 5  ;;  %v5573_v45 = vrot.slane %v5571_v28, 4 }
 0x5c8   : > { %v5386_v57 = vrot.slane %v5384_v62, 4  ;;  %5330 = vst.msk [vmem:[#allocation3 + $0x38] sm:$0xf] %vm4673_vm10, %v14456_v51  ;;  %v5407_v22 = vor.u32 %v5406_v46, %v5402_v63  ;;  %v5410_v38 = vshll.u32 %v14456_v51, 16  ;;  %v5574_v21 = vrot.slane %v14456_v51, 5 }
 0x5c9   : > { %v11471_v24 = vpack.c.bf16 %v5219_v26, %v5219_v26  ;;  %v5382_v8 = vrot.slane %v5380_v39, 5  ;;  %v5567_v32 = vrot.slane %v5565_v1, 4  ;;  %v5566_v13 = vsel %vm12527_vm5, %v5564_v9, %v5565_v1 }
 0x5ca   : > { %v5408_v19 = vrot.slane %v5407_v22, 4  ;;  %v5412_v42 = vrot.slane %v5410_v38, 5  ;;  %v5575_v16 = vsel %vm12527_vm5, %v5573_v45, %v5574_v21  ;;  %v5414_v14 = vshrl.u32 %v14456_v51, 16 }
 0x5cb   : > { %v5394_v6 = vshrl.u32 %v11471_v24, 16  ;;  %5328 = vst.msk [vmem:[#allocation3 + $0x28] sm:$0xf] %vm4673_vm10, %v11471_v24  ;;  %v5383_v58 = vsel %vm12575_vm6, %v5378_v48, %v5382_v8  ;;  %v5568_v52 = vrot.slane %v11471_v24, 5  ;;  %v5387_v49 = vor.u32 %v5386_v57, %v5382_v8 }
 0x5cc   : > { %5500 = vrot.lane.b32.xlu0 %v5383_v58, %s15108_s20  ;;  %v5413_v12 = vsel %vm12575_vm6, %v5408_v19, %v5412_v42  ;;  %v5390_v47 = vshll.u32 %v11471_v24, 16  ;;  %v5416_v23 = vrot.slane %v5414_v14, 4 }
 0x5cd   : > { %5506 = vrot.lane.b32.xlu1 %v5413_v12, %s15108_s20  ;;  %v5396_v17 = vrot.slane %v5394_v6, 4  ;;  %v5570_v55 = vrot.slane %v5568_v52, 4  ;;  %v5569_v36 = vsel %vm12527_vm5, %v5567_v32, %v5568_v52  ;;  %v5388_v40 = vrot.slane %v5387_v49, 4 }
 0x5ce   : > { %v5392_v11 = vrot.slane %v5390_v47, 5  ;;  %v5417_v53 = vor.u32 %v5416_v23, %v5412_v42  ;;  %v5576_v42 = vrot.slane %v5574_v21, 4 }
 0x5cf   : > { %v5572_v15 = vsel %vm12527_vm5, %v5570_v55, %v5571_v28 }
 0x5d0   : > { %5606 = vrot.lane.b32.xlu0 %v5566_v13, %s15107_s19  ;;  %v5397_v35 = vor.u32 %v5396_v17, %v5392_v11  ;;  %v5393_v44 = vsel %vm12575_vm6, %v5388_v40, %v5392_v11  ;;  %v5418_v51 = vrot.slane %v5417_v53, 4 }
 0x5d1   : > { %5608 = vrot.lane.b32.xlu1 %v5569_v36, %s15107_s19 }
 0x5d2   : > { %v5398_v3 = vrot.slane %v5397_v35, 4 }
 0x5d4   : > { %5610 = vrot.lane.b32.xlu0 %v5572_v15, %s15107_s19  ;;  %v5403_v29 = vsel %vm12575_vm6, %v5398_v3, %v5402_v63 }
 0x5d5   : > { %5502 = vrot.lane.b32.xlu1 %v5393_v44, %s15108_s20 }
 0x5d8   : > { %5504 = vrot.lane.b32.xlu0 %v5403_v29, %s15108_s20 }
 0x5d9   : > { %5612 = vrot.lane.b32.xlu1 %v5575_v16, %s15107_s19 }
 0x5df   : > { %v11563_v43 = vpop.f32.mrf.mxu0 }
 0x5e0   : > { %v5240_v34 = vadd.f32 %v11563_v43, %v14398_v59 }
 0x5e1   : > { %v5231_v2 = vpop.f32.mrf.mxu0 }
 0x5e2   : > { %v11476_v37 = vpack.c.bf16 %v5240_v34, %v5240_v34  ;;  %v5232_v27 = vadd.f32 %v14398_v59, %v5231_v2 }
 0x5e3   : > { %v11564_v33 = vpop.f32.mrf.mxu0 }
 0x5e4   : > { %v5440_v60 = vshll.u32 %v11476_v37, 16  ;;  %v5444_v61 = vshrl.u32 %v11476_v37, 16  ;;  %5333 = vst.msk [vmem:[#allocation3 + $0x50] sm:$0xf] %vm4673_vm10, %v11476_v37  ;;  %v11474_v50 = vpack.c.bf16 %v5232_v27, %v5232_v27  ;;  %v5243_v56 = vadd.f32 %v11564_v33, %v14398_v59 }
 0x5e5   : > { %v5234_v18 = vpop.f32.mrf.mxu0  ;;  %v5583_v17 = vrot.slane %v11476_v37, 5 }
 0x5e6   : > { %v5442_v30 = vrot.slane %v5440_v60, 5  ;;  %v5446_v5 = vrot.slane %v5444_v61, 4  ;;  %v5424_v10 = vshrl.u32 %v11474_v50, 16  ;;  %5331 = vst.msk [vmem:[#allocation3 + $0x40] sm:$0xf] %vm4673_vm10, %v11474_v50  ;;  %v14497_v4 = vpack.c.bf16 %v5243_v56, %v5243_v56 }
 0x5e7   : > { %v5235_v41 = vadd.f32 %v14398_v59, %v5234_v18  ;;  %v5420_v25 = vshll.u32 %v11474_v50, 16  ;;  %v5577_v57 = vrot.slane %v11474_v50, 5  ;;  %v5585_v35 = vrot.slane %v5583_v17, 4 }
 0x5e8   : > { %v5426_v20 = vrot.slane %v5424_v10, 4  ;;  %5334 = vst.msk [vmem:[#allocation3 + $0x58] sm:$0xf] %vm4673_vm10, %v14497_v4  ;;  %v5447_v63 = vor.u32 %v5446_v5, %v5442_v30  ;;  %v5450_v46 = vshll.u32 %v14497_v4, 16  ;;  %v5454_v13 = vshrl.u32 %v14497_v4, 16 }
 0x5e9   : > { %v11475_v62 = vpack.c.bf16 %v5235_v41, %v5235_v41  ;;  %v5422_v54 = vrot.slane %v5420_v25, 5  ;;  %v5579_v6 = vrot.slane %v5577_v57, 4  ;;  %v5578_v52 = vsel %vm12527_vm5, %v5576_v42, %v5577_v57 }
 0x5ea   : > { %v5448_v26 = vrot.slane %v5447_v63, 4  ;;  %v5452_v39 = vrot.slane %v5450_v46, 5  ;;  %v5586_v36 = vrot.slane %v14497_v4, 5  ;;  %v5456_v3 = vrot.slane %v5454_v13, 4 }
 0x5eb   : > { %v5434_v22 = vshrl.u32 %v11475_v62, 16  ;;  %5332 = vst.msk [vmem:[#allocation3 + $0x48] sm:$0xf] %vm4673_vm10, %v11475_v62  ;;  %v5423_v38 = vsel %vm12575_vm6, %v5418_v51, %v5422_v54  ;;  %v5580_v24 = vrot.slane %v11475_v62, 5  ;;  %v5427_v8 = vor.u32 %v5426_v20, %v5422_v54 }
 0x5ec   : > { %5508 = vrot.lane.b32.xlu0 %v5423_v38, %s15108_s20  ;;  %v5453_v48 = vsel %vm12575_vm6, %v5448_v26, %v5452_v39  ;;  %v5430_v19 = vshll.u32 %v11475_v62, 16  ;;  %v5587_v21 = vsel %vm12527_vm5, %v5585_v35, %v5586_v36  ;;  %v5457_v37 = vor.u32 %v5456_v3, %v5452_v39 }
 0x5ed   : > { %5514 = vrot.lane.b32.xlu1 %v5453_v48, %s15108_s20  ;;  %v5436_v1 = vrot.slane %v5434_v22, 4  ;;  %v5582_v12 = vrot.slane %v5580_v24, 4  ;;  %v5581_v49 = vsel %vm12527_vm5, %v5579_v6, %v5580_v24  ;;  %v5428_v47 = vrot.slane %v5427_v8, 4 }
 0x5ee   : > { %v5432_v58 = vrot.slane %v5430_v19, 5  ;;  %v5458_v10 = vrot.slane %v5457_v37, 4  ;;  %v5588_v26 = vrot.slane %v5586_v36, 4 }
 0x5ef   : > { %v5584_v32 = vsel %vm12527_vm5, %v5582_v12, %v5583_v17  ;;  %v11848_v17 = vld [vmem:[#allocation5 + $0x34] ss:$8 sps:$4 sm:$0xff]  }
 0x5f0   : > { %5614 = vrot.lane.b32.xlu0 %v5578_v52, %s15107_s19  ;;  %v5437_v9 = vor.u32 %v5436_v1, %v5432_v58  ;;  %v5433_v55 = vsel %vm12575_vm6, %v5428_v47, %v5432_v58  ;;  %v11845_v47 = vld [vmem:[#allocation5 + $0xf4] ss:$8 sps:$4 sm:$0xff]   ;;  %6004 = vmatprep.subr.bf16.mxu0 %v11848_v17 }
 0x5f1   : > { %5616 = vrot.lane.b32.xlu1 %v5581_v49, %s15107_s19  ;;  %v11843_v49 = vld [vmem:[#allocation5 + $0xf0] ss:$8 sps:$4 sm:$0xff]   ;;  %6504 = vmatprep.subr.bf16.mxu1 %v11845_v47 }
 0x5f2   : > { %v5438_v11 = vrot.slane %v5437_v9, 4  ;;  %6505 = vmatpush1.bf16.msra.mxu1 %v11843_v49 }
 0x5f4   : > { %5618 = vrot.lane.b32.xlu0 %v5584_v32, %s15107_s19  ;;  %v5443_v15 = vsel %vm12575_vm6, %v5438_v11, %v5442_v30 }
 0x5f5   : > { %5510 = vrot.lane.b32.xlu1 %v5433_v55, %s15108_s20 }
 0x5f6   : > { %v11567_v40 = vpop.f32.mrf.mxu0 }
 0x5f7   : > { %v5256_v28 = vadd.f32 %v11567_v40, %v14398_v59 }
 0x5f8   : > { %5512 = vrot.lane.b32.xlu0 %v5443_v15, %s15108_s20  ;;  %v5247_v44 = vpop.f32.mrf.mxu0 }
 0x5f9   : > { %v11480_v45 = vpack.c.bf16 %v5256_v28, %v5256_v28  ;;  %v5248_v29 = vadd.f32 %v14398_v59, %v5247_v44  ;;  %5620 = vrot.lane.b32.xlu1 %v5587_v21, %s15107_s19 }
 0x5fa   : > { %v11568_v16 = vpop.f32.mrf.mxu0 }
 0x5fb   : > { %v5480_v14 = vshll.u32 %v11480_v45, 16  ;;  %v5484_v43 = vshrl.u32 %v11480_v45, 16  ;;  %5337 = vst.msk [vmem:[#allocation3 + $0x70] sm:$0xf] %vm4673_vm10, %v11480_v45  ;;  %v11478_v34 = vpack.c.bf16 %v5248_v29, %v5248_v29  ;;  %v5259_v23 = vadd.f32 %v11568_v16, %v14398_v59 }
 0x5fc   : > { %v5250_v2 = vpop.f32.mrf.mxu0  ;;  %v5595_v42 = vrot.slane %v11480_v45, 5  ;;  %v11846_v45 = vld [vmem:[#allocation5 + $0x30] ss:$8 sps:$4 sm:$0xff]  }
 0x5fd   : > { %v5482_v27 = vrot.slane %v5480_v14, 5  ;;  %v5486_v33 = vrot.slane %v5484_v43, 4  ;;  %v5464_v60 = vshrl.u32 %v11478_v34, 16  ;;  %5335 = vst.msk [vmem:[#allocation3 + $0x60] sm:$0xf] %vm4673_vm10, %v11478_v34  ;;  %v11481_v61 = vpack.c.bf16 %v5259_v23, %v5259_v23 }
 0x5fe   : > { %v5251_v50 = vadd.f32 %v14398_v59, %v5250_v2  ;;  %v5460_v56 = vshll.u32 %v11478_v34, 16  ;;  %v5589_v20 = vrot.slane %v11478_v34, 5  ;;  %v5597_v9 = vrot.slane %v5595_v42, 4 }
 0x5ff   : > { %v5466_v18 = vrot.slane %v5464_v60, 4  ;;  %v5490_v53 = vshll.u32 %v11481_v61, 16  ;;  %v5487_v30 = vor.u32 %v5486_v33, %v5482_v27  ;;  %v5598_v52 = vrot.slane %v11481_v61, 5 }
 0x600   : > { %v11479_v5 = vpack.c.bf16 %v5251_v50, %v5251_v50  ;;  %v5462_v4 = vrot.slane %v5460_v56, 5  ;;  %v5590_v38 = vsel %vm12527_vm5, %v5588_v26, %v5589_v20  ;;  %v5591_v19 = vrot.slane %v5589_v20, 4  ;;  %v11857_v26 = vld [vmem:[#allocation5 + $0x14] ss:$8 sps:$4 sm:$0xff]  }
 0x601   : > { %v5492_v41 = vrot.slane %v5490_v53, 5  ;;  %v5488_v25 = vrot.slane %v5487_v30, 4  ;;  %v5599_v32 = vsel %vm12527_vm5, %v5597_v9, %v5598_v52 }
 0x602   : > { %v5474_v63 = vshrl.u32 %v11479_v5, 16  ;;  %5336 = vst.msk [vmem:[#allocation3 + $0x68] sm:$0xf] %vm4673_vm10, %v11479_v5  ;;  %v5463_v46 = vsel %vm12575_vm6, %v5458_v10, %v5462_v4  ;;  %v5467_v62 = vor.u32 %v5466_v18, %v5462_v4  ;;  %v5470_v51 = vshll.u32 %v11479_v5, 16 }
 0x603   : > { %5516 = vrot.lane.b32.xlu0 %v5463_v46, %s15108_s20  ;;  %v5493_v59 = vsel %vm12575_vm6, %v5488_v25, %v5492_v41  ;;  %v5592_v54 = vrot.slane %v11479_v5, 5 }
 0x604   : > { %5522 = vrot.lane.b32.xlu1 %v5493_v59, %s15108_s20  ;;  %v5468_v39 = vrot.slane %v5467_v62, 4  ;;  %v5472_v57 = vrot.slane %v5470_v51, 5  ;;  %v5476_v22 = vrot.slane %v5474_v63, 4  ;;  %v11849_v62 = vld [vmem:[#allocation5 + $0x20] ss:$8 sps:$4 sm:$0xff]  }
 0x605   : > { %v5594_v8 = vrot.slane %v5592_v54, 4  ;;  %v5593_v1 = vsel %vm12527_vm5, %v5591_v19, %v5592_v54  ;;  %v11851_v51 = vld [vmem:[#allocation5 + $0x24] ss:$8 sps:$4 sm:$0xff]   ;;  %v11852_v59 = vld [vmem:[#allocation5 + $0xe0] ss:$8 sps:$4 sm:$0xff]  }
 0x606   : > { %v5477_v24 = vor.u32 %v5476_v22, %v5472_v57  ;;  %v5473_v48 = vsel %vm12575_vm6, %v5468_v39, %v5472_v57  ;;  %v11854_v54 = vld [vmem:[#allocation5 + $0xe4] ss:$8 sps:$4 sm:$0xff]   ;;  %v11860_v39 = vld [vmem:[#allocation5 + $0x134] ss:$8 sps:$4 sm:$0xff]   ;;  %v14603_v57 = vld [vmem:[%s15068_s10] ss:$0 sm:$0xff] }
 0x607   : > { %5622 = vrot.lane.b32.xlu0 %v5590_v38, %s15107_s19  ;;  %v5596_v58 = vsel %vm12527_vm5, %v5594_v8, %v5595_v42  ;;  %6506 = vmatprep.subr.bf16.mxu1 %v11854_v54  ;;  %vm12345_vm5 = vmmov 0  }
 0x608   : > { %5518 = vrot.lane.b32.xlu1 %v5473_v48, %s15108_s20  ;;  %v5478_v6 = vrot.slane %v5477_v24, 4  ;;  %6507 = vmatpush1.bf16.msra.mxu1 %v11852_v59 }
 0x609   : > { %6650 = vmatprep.subr.bf16.mxu1 %v11860_v39  ;;  %v11890_v39 = vld [vmem:[#allocation5 + $0x1a4] ss:$8 sps:$4 sm:$0xff]  }
 0x60a   : > { %v5483_v12 = vsel %vm12575_vm6, %v5478_v6, %v5482_v27 }
 0x60b   : > { %5624 = vrot.lane.b32.xlu0 %v5593_v1, %s15107_s19 }
 0x60c   : > { %5626 = vrot.lane.b32.xlu1 %v5596_v58, %s15107_s19 }
 0x60f   : > { %5520 = vrot.lane.b32.xlu0 %v5483_v12, %s15108_s20 }
 0x613   : > { %5628 = vrot.lane.b32.xlu0 %v5599_v32, %s15107_s19  ;;  %s571_s19 = sand.u32 1, %s12319_s25  }
 0x614   : > { %s572_s30 = scalar_lea.vmem [#allocation8], %s571_s19  ;;  %s10627_s20 = scalar_lea.sflag [#allocation7], %s571_s19 }
 0x615   : > { %s10639_s18 = sshll.u32 %s572_s30, 4  ;;  %s15014_s18 = int_to_ptr.vmem [resolvable:$true] %s10639_s18 }
 0x616   : > { %s12255_s28 = scalar_lea.vmem %s15014_s18, 16  ;;  %p12262_p0 = scmp.lt.s32.totalorder %s15014_s18, %s12260_s2 }
 0x617   : > { %p12256_p10 = scmp.ne.s32.totalorder %s15014_s18, %s12255_s28  ;;  %p12263_p1 = scmp.lt.s32.totalorder %s12261_s23, %s12255_s28 }
 0x619   : > { %p12257_p11 = pnand %p12256_p10, %p12477_p4  ;;  %p12264_p2 = por %p12263_p1, %p12262_p0 }
 0x61b   : > { %p12258_p13 = pneg %p12257_p11 }
 0x61d   : > { %p12265_p3 = pnand %p12264_p2, %p12258_p13 }
 0x61f   : > { %v5499_v11 = vpop.permute.xlu1 %5498 }
 0x620   : > { %5541 = vst.msk [vmem:[#allocation3 + $0x10] sm:$0xf] %vm4898_vm12, %v5499_v11 }
 0x621   : > { %v5603_v13 = vpop.permute.xlu0 %5602 }
 0x623   : > { %v5601_v31 = vpop.permute.xlu1 %5600 }
 0x625   : > { %v5497_v55 = vpop.permute.xlu0 %5496 }
 0x626   : > { %5540 = vst.msk [vmem:[#allocation3 + $0x8] sm:$0xf] %vm4898_vm12, %v5497_v55 }
 0x627   : > { %v5495_v36 = vpop.permute.xlu1 %5494  ;;  %5646 = vst.msk [vmem:[#allocation3 + $0x8] sm:$0xf] %vm5011_vm13, %v5603_v13  ;;  %v11855_v13 = vld [vmem:[#allocation5 + $0x10] ss:$8 sps:$4 sm:$0xff]  }
 0x628   : > { %5539 = vst.msk [vmem:[#allocation3] sm:$0xf] %vm4898_vm12, %v5495_v36  ;;  %v11858_v36 = vld [vmem:[#allocation5 + $0x130] ss:$8 sps:$4 sm:$0xff]  }
 0x629   : > { %5645 = vst.msk [vmem:[#allocation3] sm:$0xf] %vm5011_vm13, %v5601_v31 }
 0x62b   : > { %v5605_v7 = vpop.permute.xlu1 %5604 }
 0x62c   : > { %5647 = vst.msk [vmem:[#allocation3 + $0x10] sm:$0xf] %vm5011_vm13, %v5605_v7 }
 0x630   : > { %v11831_v40 = vld [vmem:[#allocation3] ss:$8 sps:$4 sm:$0xff]  }
 0x631   : > { %11581 = vmatprep.mubr.msk.bf16.mxu0 %vm5140_vm14, %v11831_v40 }
 0x63e   : > { %v5501_v35 = vpop.permute.xlu0 %5500 }
 0x63f   : > { %5542 = vst.msk [vmem:[#allocation3 + $0x18] sm:$0xf] %vm4898_vm12, %v5501_v35  ;;  %v5507_v28 = vpop.permute.xlu1 %5506  ;;  %v11863_v35 = vld [vmem:[#allocation5 + $0x4] ss:$8 sps:$4 sm:$0xff]  }
 0x640   : > { %5545 = vst.msk [vmem:[#allocation3 + $0x30] sm:$0xf] %vm4898_vm12, %v5507_v28  ;;  %v11866_v28 = vld [vmem:[#allocation5 + $0x124] ss:$8 sps:$4 sm:$0xff]  }
 0x642   : > { %v5607_v15 = vpop.permute.xlu0 %5606 }
 0x643   : > { %5648 = vst.msk [vmem:[#allocation3 + $0x18] sm:$0xf] %vm5011_vm13, %v5607_v15  ;;  %v5609_v3 = vpop.permute.xlu1 %5608 }
 0x646   : > { %v5611_v44 = vpop.permute.xlu0 %5610 }
 0x647   : > { %v5503_v21 = vpop.permute.xlu1 %5502 }
 0x648   : > { %5543 = vst.msk [vmem:[#allocation3 + $0x20] sm:$0xf] %vm4898_vm12, %v5503_v21 }
 0x649   : > { %5649 = vst.msk [vmem:[#allocation3 + $0x20] sm:$0xf] %vm5011_vm13, %v5609_v3  ;;  %v11861_v3 = vld [vmem:[#allocation5] ss:$8 sps:$4 sm:$0xff]  }
 0x64a   : > { %v5505_v29 = vpop.permute.xlu0 %5504  ;;  %v11836_v16 = vld [vmem:[#allocation3 + $0x10] ss:$8 sps:$4 sm:$0xff]  }
 0x64b   : > { %5544 = vst.msk [vmem:[#allocation3 + $0x28] sm:$0xf] %vm4898_vm12, %v5505_v29  ;;  %v5613_v14 = vpop.permute.xlu1 %5612  ;;  %11582 = vmatmul.mubr.msk.bf16.vlgmr.msra.gmra.mxu0 %vm5140_vm14, %v11836_v16  ;;  %v11872_v29 = vld [vmem:[#allocation5 + $0x174] ss:$8 sps:$4 sm:$0xff]  }
 0x64c   : > { %5650 = vst.msk [vmem:[#allocation3 + $0x28] sm:$0xf] %vm5011_vm13, %v5611_v44  ;;  %5651 = vst.msk [vmem:[#allocation3 + $0x30] sm:$0xf] %vm5011_vm13, %v5613_v14  ;;  %6005 = vmatpush1.bf16.msra.mxu0 %v11846_v45  ;;  %v11864_v44 = vld [vmem:[#allocation5 + $0x120] ss:$8 sps:$4 sm:$0xff]  }
 0x64d   : > { %6006 = vmatprep.subr.bf16.mxu0 %v11851_v51  ;;  %v11869_v45 = vld [vmem:[#allocation5 + $0x54] ss:$8 sps:$4 sm:$0xff]   ;;  %v11882_v51 = vld [vmem:[#allocation5 + $0x1b0] ss:$8 sps:$4 sm:$0xff]  }
 0x650   : > { %6007 = vmatpush1.bf16.msra.mxu0 %v11849_v62  ;;  %v11879_v62 = vld [vmem:[#allocation5 + $0x70] ss:$8 sps:$4 sm:$0xff]  }
 0x651   : > { %6068 = vmatprep.subr.bf16.mxu0 %v11857_v26  ;;  %v11887_v26 = vld [vmem:[#allocation5 + $0x64] ss:$8 sps:$4 sm:$0xff]  }
 0x653   : > { %v11837_v43 = vld [vmem:[#allocation3 + $0x20] ss:$8 sps:$4 sm:$0xff]  }
 0x654   : > { %11585 = vmatprep.mubr.msk.bf16.mxu0 %vm5140_vm14, %v11837_v43 }
 0x65e   : > { %v5509_v34 = vpop.permute.xlu0 %5508 }
 0x65f   : > { %5546 = vst.msk [vmem:[#allocation3 + $0x38] sm:$0xf] %vm4898_vm12, %v5509_v34  ;;  %v5515_v23 = vpop.permute.xlu1 %5514 }
 0x660   : > { %5549 = vst.msk [vmem:[#allocation3 + $0x50] sm:$0xf] %vm4898_vm12, %v5515_v23 }
 0x662   : > { %v5615_v2 = vpop.permute.xlu0 %5614 }
 0x663   : > { %5652 = vst.msk [vmem:[#allocation3 + $0x38] sm:$0xf] %vm5011_vm13, %v5615_v2  ;;  %v5617_v37 = vpop.permute.xlu1 %5616 }
 0x666   : > { %v5619_v27 = vpop.permute.xlu0 %5618 }
 0x667   : > { %v5511_v33 = vpop.permute.xlu1 %5510 }
 0x668   : > { %5547 = vst.msk [vmem:[#allocation3 + $0x40] sm:$0xf] %vm4898_vm12, %v5511_v33 }
 0x669   : > { %5653 = vst.msk [vmem:[#allocation3 + $0x40] sm:$0xf] %vm5011_vm13, %v5617_v37  ;;  %v11867_v37 = vld [vmem:[#allocation5 + $0x50] ss:$8 sps:$4 sm:$0xff]  }
 0x66a   : > { %v5513_v60 = vpop.permute.xlu0 %5512  ;;  %v11838_v61 = vld [vmem:[#allocation3 + $0x30] ss:$8 sps:$4 sm:$0xff]  }
 0x66b   : > { %5548 = vst.msk [vmem:[#allocation3 + $0x48] sm:$0xf] %vm4898_vm12, %v5513_v60  ;;  %v5621_v50 = vpop.permute.xlu1 %5620  ;;  %11586 = vmatmul.mubr.msk.bf16.gmra.mxu0 %vm5140_vm14, %v11838_v61 }
 0x66c   : > { %5654 = vst.msk [vmem:[#allocation3 + $0x48] sm:$0xf] %vm5011_vm13, %v5619_v27  ;;  %5655 = vst.msk [vmem:[#allocation3 + $0x50] sm:$0xf] %vm5011_vm13, %v5621_v50  ;;  %v11870_v27 = vld [vmem:[#allocation5 + $0x170] ss:$8 sps:$4 sm:$0xff]  }
 0x673   : > { %v11839_v56 = vld [vmem:[#allocation3 + $0x40] ss:$8 sps:$4 sm:$0xff]  }
 0x674   : > { %11589 = vmatprep.mubr.msk.bf16.mxu0 %vm5140_vm14, %v11839_v56  ;;  %v11875_v56 = vld [vmem:[#allocation5 + $0x44] ss:$8 sps:$4 sm:$0xff]  }
 0x675   : > { %v5517_v18 = vpop.permute.xlu0 %5516 }
 0x676   : > { %5550 = vst.msk [vmem:[#allocation3 + $0x58] sm:$0xf] %vm4898_vm12, %v5517_v18  ;;  %v5523_v53 = vpop.permute.xlu1 %5522  ;;  %v11878_v18 = vld [vmem:[#allocation5 + $0x164] ss:$8 sps:$4 sm:$0xff]  }
 0x677   : > { %5553 = vst.msk [vmem:[#allocation3 + $0x70] sm:$0xf] %vm4898_vm12, %v5523_v53 }
 0x679   : > { %v5623_v30 = vpop.permute.xlu0 %5622 }
 0x67a   : > { %5656 = vst.msk [vmem:[#allocation3 + $0x58] sm:$0xf] %vm5011_vm13, %v5623_v30  ;;  %v5519_v5 = vpop.permute.xlu1 %5518 }
 0x67b   : > { %5551 = vst.msk [vmem:[#allocation3 + $0x60] sm:$0xf] %vm4898_vm12, %v5519_v5 }
 0x67d   : > { %v5625_v10 = vpop.permute.xlu0 %5624 }
 0x67e   : > { %5657 = vst.msk [vmem:[#allocation3 + $0x60] sm:$0xf] %vm5011_vm13, %v5625_v10  ;;  %v5627_v25 = vpop.permute.xlu1 %5626  ;;  %v11873_v10 = vld [vmem:[#allocation5 + $0x40] ss:$8 sps:$4 sm:$0xff]  }
 0x681   : > { %v5521_v4 = vpop.permute.xlu0 %5520  ;;  %v11840_v41 = vld [vmem:[#allocation3 + $0x50] ss:$8 sps:$4 sm:$0xff]  }
 0x682   : > { %5552 = vst.msk [vmem:[#allocation3 + $0x68] sm:$0xf] %vm4898_vm12, %v5521_v4  ;;  %11590 = vmatmul.mubr.msk.bf16.gmra.mxu0 %vm5140_vm14, %v11840_v41  ;;  %v11876_v4 = vld [vmem:[#allocation5 + $0x160] ss:$8 sps:$4 sm:$0xff]  }
 0x683   : > { %5658 = vst.msk [vmem:[#allocation3 + $0x68] sm:$0xf] %vm5011_vm13, %v5627_v25  ;;  %v11881_v25 = vld [vmem:[#allocation5 + $0x74] ss:$8 sps:$4 sm:$0xff]  }
 0x685   : > { %v5629_v20 = vpop.permute.xlu0 %5628 }
 0x686   : > { %5659 = vst.msk [vmem:[#allocation3 + $0x70] sm:$0xf] %vm5011_vm13, %v5629_v20  ;;  %v11884_v20 = vld [vmem:[#allocation5 + $0x1b4] ss:$8 sps:$4 sm:$0xff]  }
 0x68a   : > { %v11841_v63 = vld [vmem:[#allocation3 + $0x60] ss:$8 sps:$4 sm:$0xff]  }
 0x68b   : > { %11593 = vmatprep.mubr.msk.bf16.mxu0 %vm5140_vm14, %v11841_v63 }
 0x68d   : > { %v11842_v46 = vld [vmem:[#allocation3 + $0x70] ss:$0 sps:$4 sm:$0xff]  }
 0x68e   : > { %11594 = vmatmul.mubr.msk.bf16.gmra.mxu0 %vm5140_vm14, %v11842_v46 }
 0x68f   : > { %6024 = vmatprep.mubr.bf16.mxu0 %v12340_v0 }
 0x70b   : > { %v11583_v22 = vpop.f32.mrf.mxu0 }
 0x70c   : > { %v5835_v38 = vadd.f32 %v11583_v22, %v14603_v57  ;;  %v11885_v22 = vld [vmem:[#allocation5 + $0x60] ss:$8 sps:$4 sm:$0xff]  }
 0x70d   : > { %v5826_v24 = vpop.f32.mrf.mxu0 }
 0x70e   : > { %v5890_v48 = vmax.f32 %v5835_v38, 0.0  ;;  %v5827_v8 = vadd.f32 %v14603_v57, %v5826_v24 }
 0x70f   : > { %v11584_v19 = vpop.f32.mrf.mxu0 }
 0x710   : > { %5905 = vst.msk [vmem:[#allocation4 + $0x10] sm:$0xff] %vm4498_vm9, %v5890_v48  ;;  %v5888_v42 = vmax.f32 %v5827_v8, 0.0  ;;  %v5838_v1 = vadd.f32 %v11584_v19, %v14603_v57  ;;  %v11888_v48 = vld [vmem:[#allocation5 + $0x1a0] ss:$8 sps:$4 sm:$0xff]   ;;  %v11893_v19 = vld [vmem:[#allocation5 + $0x94] ss:$8 sps:$4 sm:$0xff]  }
 0x711   : > { %v5829_v6 = vpop.f32.mrf.mxu0 }
 0x712   : > { %5903 = vst.msk [vmem:[#allocation4] sm:$0xff] %vm4498_vm9, %v5888_v42  ;;  %v5891_v58 = vmax.f32 %v5838_v1, 0.0  ;;  %v5830_v52 = vadd.f32 %v14603_v57, %v5829_v6  ;;  %v11896_v1 = vld [vmem:[#allocation5 + $0x1f4] ss:$8 sps:$4 sm:$0xff]  }
 0x714   : > { %5906 = vst.msk [vmem:[#allocation4 + $0x18] sm:$0xff] %vm4498_vm9, %v5891_v58  ;;  %v5889_v12 = vmax.f32 %v5830_v52, 0.0 }
 0x716   : > { %5904 = vst.msk [vmem:[#allocation4 + $0x8] sm:$0xff] %vm4498_vm9, %v5889_v12 }
 0x71b   : > { %v5919_v49 = vld [vmem:[#allocation4 + $0x10] ss:$2 sm:$0xff]  ;;  %v5927_v47 = vld [vmem:[#allocation4 + $0x11] ss:$2 sm:$0xff] }
 0x71c   : > { %v5935_v9 = vmax.f32 %v5919_v49, %v5927_v47  ;;  %v11891_v49 = vld [vmem:[#allocation5 + $0x90] ss:$8 sps:$4 sm:$0xff]  }
 0x71d   : > { %v5918_v17 = vld [vmem:[#allocation4] ss:$2 sm:$0xff]  ;;  %v5926_v32 = vld [vmem:[#allocation4 + $0x1] ss:$2 sm:$0xff] }
 0x71e   : > { %5945 = vst.msk [vmem:[#allocation2 + $0x8] sm:$0xff] %vm4498_vm9, %v5935_v9  ;;  %v5934_v11 = vmax.f32 %v5918_v17, %v5926_v32  ;;  %v11894_v47 = vld [vmem:[#allocation5 + $0x1f0] ss:$8 sps:$4 sm:$0xff]   ;;  %v11899_v32 = vld [vmem:[#allocation5 + $0x84] ss:$8 sps:$4 sm:$0xff]  }
 0x720   : > { %5944 = vst.msk [vmem:[#allocation2] sm:$0xff] %vm4498_vm9, %v5934_v11  ;;  %v11902_v11 = vld [vmem:[#allocation5 + $0x1e4] ss:$8 sps:$4 sm:$0xff]  }
 0x725   : > { %v6608_v43 = vld [vmem:[#allocation2 + $0x9] sm:$0x1]  ;;  %v6754_v46 = vld [vmem:[#allocation2 + $0xb] sm:$0x1]  ;;  %v6900_v42 = vld [vmem:[#allocation2 + $0xd] sm:$0x1] }
 0x726   : > { %v6609_v50 = vpack.c.bf16 %v6608_v43, %v6608_v43  ;;  %v6755_v54 = vpack.c.bf16 %v6754_v46, %v6754_v46  ;;  %v6901_v17 = vpack.c.bf16 %v6900_v42, %v6900_v42  ;;  %v11923_v46 = vld [vmem:[#allocation5 + $0xc4] ss:$8 sps:$4 sm:$0xff]  }
 0x727   : > { %v5962_v31 = vld [vmem:[#allocation2 + $0x1] sm:$0x1]  ;;  %v6462_v55 = vld [vmem:[#allocation2 + $0x7] sm:$0x1]  ;;  %v5956_v14 = vld [vmem:[#allocation2] sm:$0x1] }
 0x728   : > { %v5963_v7 = vpack.c.bf16 %v5962_v31, %v5962_v31  ;;  %v6463_v40 = vpack.c.bf16 %v6462_v55, %v6462_v55  ;;  %v5957_v61 = vpack.c.bf16 %v5956_v14, %v5956_v14  ;;  %v6097_v63 = vld [vmem:[#allocation2 + $0x2] sm:$0x1]  ;;  %v6170_v52 = vld [vmem:[#allocation2 + $0x3] sm:$0x1]  ;;  %v11906_v14 = vld [vmem:[#allocation5 + $0x230] ss:$8 sps:$4 sm:$0xff]  }
 0x729   : > { %v6098_v59 = vpack.c.bf16 %v6097_v63, %v6097_v63  ;;  %v6171_v9 = vpack.c.bf16 %v6170_v52, %v6170_v52  ;;  %v11897_v55 = vld [vmem:[#allocation5 + $0x80] ss:$8 sps:$4 sm:$0xff]  }
 0x72a   : > { %11062 = vmatmul.mubr.msk.bf16.vlgmr.msra.gmra.mxu0 %vm4498_vm9, %v5963_v7  ;;  %11097 = vmatmul.mubr.msk.bf16.vlgmr.msra.gmra.mxu1 %vm4498_vm9, %v6463_v40  ;;  %v11905_v40 = vld [vmem:[#allocation5 + $0xb4] ss:$8 sps:$4 sm:$0xff]  }
 0x72b   : > { %6069 = vmatpush1.bf16.msra.mxu0 %v11855_v13  ;;  %v11587_v15 = vpop.f32.mrf.mxu0  ;;  %6651 = vmatpush1.bf16.msra.mxu1 %v11858_v36  ;;  %v11900_v36 = vld [vmem:[#allocation5 + $0x1e0] ss:$8 sps:$4 sm:$0xff]  }
 0x72c   : > { %v5851_v21 = vadd.f32 %v11587_v15, %v14603_v57  ;;  %6070 = vmatprep.subr.bf16.mxu0 %v11863_v35  ;;  %6652 = vmatprep.subr.bf16.mxu1 %v11866_v28  ;;  %v11908_v35 = vld [vmem:[#allocation5 + $0x234] ss:$8 sps:$4 sm:$0xff]  }
 0x72d   : > { %v5842_v16 = vpop.f32.mrf.mxu0  ;;  %6088 = vmatprep.mubr.bf16.mxu0 %v12340_v0  ;;  %6670 = vmatprep.mubr.bf16.mxu1 %v12340_v0 }
 0x72e   : > { %v5894_v34 = vmax.f32 %v5851_v21, 0.0  ;;  %v5843_v23 = vadd.f32 %v14603_v57, %v5842_v16  ;;  %v11903_v16 = vld [vmem:[#allocation5 + $0xb0] ss:$8 sps:$4 sm:$0xff]  }
 0x72f   : > { %6071 = vmatpush1.bf16.msra.mxu0 %v11861_v3  ;;  %v11588_v2 = vpop.f32.mrf.mxu0  ;;  %6653 = vmatpush1.bf16.msra.mxu1 %v11864_v44  ;;  %v6243_v3 = vld [vmem:[#allocation2 + $0x4] sm:$0x1]  ;;  %v7046_v44 = vld [vmem:[#allocation2 + $0xf] sm:$0x1] }
 0x730   : > { %5909 = vst.msk [vmem:[#allocation4 + $0x30] sm:$0xff] %vm4498_vm9, %v5894_v34  ;;  %v5892_v33 = vmax.f32 %v5843_v23, 0.0  ;;  %v5854_v60 = vadd.f32 %v11588_v2, %v14603_v57  ;;  %6139 = vmatprep.subr.bf16.mxu0 %v11869_v45  ;;  %6796 = vmatprep.subr.bf16.mxu1 %v11872_v29  ;;  %v6244_v34 = vpack.c.bf16 %v6243_v3, %v6243_v3  ;;  %v11911_v2 = vld [vmem:[#allocation5 + $0xa4] ss:$8 sps:$4 sm:$0xff]  }
 0x731   : > { %v5845_v53 = vpop.f32.mrf.mxu0  ;;  %v7047_v23 = vpack.c.bf16 %v7046_v44, %v7046_v44  ;;  %v11939_v44 = vld [vmem:[#allocation5 + $0x150] ss:$8 sps:$4 sm:$0xff]  }
 0x732   : > { %5907 = vst.msk [vmem:[#allocation4 + $0x20] sm:$0xff] %vm4498_vm9, %v5892_v33  ;;  %v5895_v30 = vmax.f32 %v5854_v60, 0.0  ;;  %v5846_v5 = vadd.f32 %v14603_v57, %v5845_v53  ;;  %11067 = vmatmul.mubr.msk.bf16.vlgmr.msra.gmra.mxu0 %vm4498_vm9, %v5957_v61  ;;  %11107 = vmatmul.mubr.msk.bf16.vlgmr.msra.gmra.mxu1 %vm4498_vm9, %v6609_v50  ;;  %v11909_v61 = vld [vmem:[#allocation5 + $0xa0] ss:$8 sps:$4 sm:$0xff]   ;;  %v6316_v53 = vld [vmem:[#allocation2 + $0x5] sm:$0x1] }
 0x733   : > { %6140 = vmatpush1.bf16.msra.mxu0 %v11867_v37  ;;  %6797 = vmatpush1.bf16.msra.mxu1 %v11870_v27  ;;  %v11914_v37 = vld [vmem:[#allocation5 + $0x224] ss:$8 sps:$4 sm:$0xff]   ;;  %v11912_v50 = vld [vmem:[#allocation5 + $0x220] ss:$8 sps:$4 sm:$0xff]  }
 0x734   : > { %5910 = vst.msk [vmem:[#allocation4 + $0x38] sm:$0xff] %vm4498_vm9, %v5895_v30  ;;  %v5893_v41 = vmax.f32 %v5846_v5, 0.0  ;;  %6141 = vmatprep.subr.bf16.mxu0 %v11875_v56  ;;  %6798 = vmatprep.subr.bf16.mxu1 %v11878_v18  ;;  %v11917_v56 = vld [vmem:[#allocation5 + $0xd4] ss:$8 sps:$4 sm:$0xff]  }
 0x735   : > { %6159 = vmatprep.mubr.bf16.mxu0 %v12340_v0  ;;  %6816 = vmatprep.mubr.bf16.mxu1 %v12340_v0  ;;  %v11920_v18 = vld [vmem:[#allocation5 + $0x274] ss:$8 sps:$4 sm:$0xff]  }
 0x736   : > { %5908 = vst.msk [vmem:[#allocation4 + $0x28] sm:$0xff] %vm4498_vm9, %v5893_v41  ;;  %v11918_v41 = vld [vmem:[#allocation5 + $0x270] ss:$8 sps:$4 sm:$0xff]  }
 0x737   : > { %6142 = vmatpush1.bf16.msra.mxu0 %v11873_v10  ;;  %6799 = vmatpush1.bf16.msra.mxu1 %v11876_v4  ;;  %v11915_v4 = vld [vmem:[#allocation5 + $0xd0] ss:$8 sps:$4 sm:$0xff]  }
 0x738   : > { %6212 = vmatprep.subr.bf16.mxu0 %v11881_v25  ;;  %6942 = vmatprep.subr.bf16.mxu1 %v11884_v20  ;;  %v6317_v20 = vpack.c.bf16 %v6316_v53, %v6316_v53 }
 0x73a   : > { %11072 = vmatmul.mubr.msk.bf16.vlgmr.msra.gmra.mxu0 %vm4498_vm9, %v6098_v59  ;;  %11117 = vmatmul.mubr.msk.bf16.vlgmr.msra.gmra.mxu1 %vm4498_vm9, %v6755_v54 }
 0x73b   : > { %v5921_v38 = vld [vmem:[#allocation4 + $0x30] ss:$2 sm:$0xff]  ;;  %v5929_v24 = vld [vmem:[#allocation4 + $0x31] ss:$2 sm:$0xff]  ;;  %6213 = vmatpush1.bf16.msra.mxu0 %v11879_v62  ;;  %6943 = vmatpush1.bf16.msra.mxu1 %v11882_v51 }
 0x73c   : > { %v5937_v8 = vmax.f32 %v5921_v38, %v5929_v24  ;;  %6214 = vmatprep.subr.bf16.mxu0 %v11887_v26  ;;  %6944 = vmatprep.subr.bf16.mxu1 %v11890_v39  ;;  %v11926_v62 = vld [vmem:[#allocation5 + $0x264] ss:$8 sps:$4 sm:$0xff]  }
 0x73d   : > { %v5920_v6 = vld [vmem:[#allocation4 + $0x20] ss:$2 sm:$0xff]  ;;  %v5928_v58 = vld [vmem:[#allocation4 + $0x21] ss:$2 sm:$0xff]  ;;  %6232 = vmatprep.mubr.bf16.mxu0 %v12340_v0  ;;  %6962 = vmatprep.mubr.bf16.mxu1 %v12340_v0 }
 0x73e   : > { %5947 = vst.msk [vmem:[#allocation2 + $0x18] sm:$0xff] %vm4498_vm9, %v5937_v8  ;;  %v5936_v12 = vmax.f32 %v5920_v6, %v5928_v58  ;;  %v11929_v8 = vld [vmem:[#allocation5 + $0x114] ss:$8 sps:$4 sm:$0xff]  }
 0x73f   : > { %6215 = vmatpush1.bf16.msra.mxu0 %v11885_v22  ;;  %6945 = vmatpush1.bf16.msra.mxu1 %v11888_v48  ;;  %v11921_v22 = vld [vmem:[#allocation5 + $0xc0] ss:$8 sps:$4 sm:$0xff]   ;;  %v11932_v6 = vld [vmem:[#allocation5 + $0x2b4] ss:$8 sps:$4 sm:$0xff]  }
 0x740   : > { %5946 = vst.msk [vmem:[#allocation2 + $0x10] sm:$0xff] %vm4498_vm9, %v5936_v12  ;;  %6285 = vmatprep.subr.bf16.mxu0 %v11893_v19  ;;  %7088 = vmatprep.subr.bf16.mxu1 %v11896_v1  ;;  %v11924_v48 = vld [vmem:[#allocation5 + $0x260] ss:$8 sps:$4 sm:$0xff]   ;;  %v6389_v12 = vld [vmem:[#allocation2 + $0x6] sm:$0x1] }
 0x742   : > { %v11591_v13 = vpop.f32.mrf.mxu0  ;;  %11077 = vmatmul.mubr.msk.bf16.vlgmr.msra.gmra.mxu0 %vm4498_vm9, %v6171_v9  ;;  %11127 = vmatmul.mubr.msk.bf16.vlgmr.msra.gmra.mxu1 %vm4498_vm9, %v6901_v17  ;;  %v11927_v9 = vld [vmem:[#allocation5 + $0x110] ss:$8 sps:$4 sm:$0xff]  }
 0x743   : > { %v5867_v31 = vadd.f32 %v11591_v13, %v14603_v57  ;;  %6286 = vmatpush1.bf16.msra.mxu0 %v11891_v49  ;;  %7089 = vmatpush1.bf16.msra.mxu1 %v11894_v47  ;;  %v11930_v17 = vld [vmem:[#allocation5 + $0x2b0] ss:$8 sps:$4 sm:$0xff]   ;;  %v11935_v13 = vld [vmem:[#allocation5 + $0x104] ss:$8 sps:$4 sm:$0xff]  }
 0x744   : > { %v5858_v7 = vpop.f32.mrf.mxu0  ;;  %6287 = vmatprep.subr.bf16.mxu0 %v11899_v32  ;;  %7090 = vmatprep.subr.bf16.mxu1 %v11902_v11  ;;  %v6390_v32 = vpack.c.bf16 %v6389_v12, %v6389_v12  ;;  %v11981_v12 = vld [vmem:[#allocation5 + $0x200] ss:$8 sps:$4 sm:$0xff]  }
 0x745   : > { %v5898_v28 = vmax.f32 %v5867_v31, 0.0  ;;  %v5859_v15 = vadd.f32 %v14603_v57, %v5858_v7  ;;  %6305 = vmatprep.mubr.bf16.mxu0 %v12340_v0  ;;  %7108 = vmatprep.mubr.bf16.mxu1 %v12340_v0  ;;  %v11938_v31 = vld [vmem:[#allocation5 + $0x2a4] ss:$8 sps:$4 sm:$0xff]   ;;  %v11933_v7 = vld [vmem:[#allocation5 + $0x100] ss:$8 sps:$4 sm:$0xff]  }
 0x746   : > { %v11592_v21 = vpop.f32.mrf.mxu0 }
 0x747   : > { %5913 = vst.msk [vmem:[#allocation4 + $0x50] sm:$0xff] %vm4498_vm9, %v5898_v28  ;;  %v5896_v45 = vmax.f32 %v5859_v15, 0.0  ;;  %v5870_v29 = vadd.f32 %v11592_v21, %v14603_v57  ;;  %6288 = vmatpush1.bf16.msra.mxu0 %v11897_v55  ;;  %7091 = vmatpush1.bf16.msra.mxu1 %v11900_v36  ;;  %v7192_v30 = vld [vmem:[#allocation2 + $0x11] sm:$0x1]  ;;  %v7338_v49 = vld [vmem:[#allocation2 + $0x13] sm:$0x1] }
 0x748   : > { %v5861_v43 = vpop.f32.mrf.mxu0  ;;  %6358 = vmatprep.subr.bf16.mxu0 %v11905_v40  ;;  %7234 = vmatprep.subr.bf16.mxu1 %v11908_v35  ;;  %v7193_v63 = vpack.c.bf16 %v7192_v30, %v7192_v30  ;;  %v7339_v11 = vpack.c.bf16 %v7338_v49, %v7338_v49  ;;  %v11936_v40 = vld [vmem:[#allocation5 + $0x2a0] ss:$8 sps:$4 sm:$0xff]   ;;  %v11941_v35 = vld [vmem:[#allocation5 + $0x154] ss:$8 sps:$4 sm:$0xff]   ;;  %v6535_v15 = vld [vmem:[#allocation2 + $0x8] sm:$0x1] }
 0x749   : > { %5911 = vst.msk [vmem:[#allocation4 + $0x40] sm:$0xff] %vm4498_vm9, %v5896_v45  ;;  %v5899_v27 = vmax.f32 %v5870_v29, 0.0  ;;  %v5862_v33 = vadd.f32 %v14603_v57, %v5861_v43  ;;  %v11944_v28 = vld [vmem:[#allocation5 + $0x2f4] ss:$8 sps:$4 sm:$0xff]   ;;  %v11942_v21 = vld [vmem:[#allocation5 + $0x2f0] ss:$8 sps:$4 sm:$0xff]  }
 0x74a   : > { %11082 = vmatmul.mubr.msk.bf16.vlgmr.msra.gmra.mxu0 %vm4498_vm9, %v6244_v34  ;;  %11137 = vmatmul.mubr.msk.bf16.vlgmr.msra.gmra.mxu1 %vm4498_vm9, %v7047_v23  ;;  %v7484_v3 = vld [vmem:[#allocation2 + $0x15] sm:$0x1]  ;;  %v11947_v45 = vld [vmem:[#allocation5 + $0x144] ss:$8 sps:$4 sm:$0xff]   ;;  %v11984_v49 = vld [vmem:[#allocation5 + $0x3a0] ss:$8 sps:$4 sm:$0xff]  }
 0x74b   : > { %5914 = vst.msk [vmem:[#allocation4 + $0x58] sm:$0xff] %vm4498_vm9, %v5899_v27  ;;  %v5897_v60 = vmax.f32 %v5862_v33, 0.0  ;;  %6359 = vmatpush1.bf16.msra.mxu0 %v11903_v16  ;;  %7235 = vmatpush1.bf16.msra.mxu1 %v11906_v14  ;;  %v6536_v14 = vpack.c.bf16 %v6535_v15, %v6535_v15  ;;  %v7485_v43 = vpack.c.bf16 %v7484_v3, %v7484_v3  ;;  %v11950_v34 = vld [vmem:[#allocation5 + $0x2e4] ss:$8 sps:$4 sm:$0xff]   ;;  %v11953_v27 = vld [vmem:[#allocation5 + $0x194] ss:$8 sps:$4 sm:$0xff]  }
 0x74c   : > { %6360 = vmatprep.subr.bf16.mxu0 %v11911_v2  ;;  %7236 = vmatprep.subr.bf16.mxu1 %v11914_v37  ;;  %v11945_v2 = vld [vmem:[#allocation5 + $0x140] ss:$8 sps:$4 sm:$0xff]   ;;  %v11956_v33 = vld [vmem:[#allocation5 + $0x334] ss:$8 sps:$4 sm:$0xff]   ;;  %v11959_v30 = vld [vmem:[#allocation5 + $0x184] ss:$8 sps:$4 sm:$0xff]  }
 0x74d   : > { %5912 = vst.msk [vmem:[#allocation4 + $0x48] sm:$0xff] %vm4498_vm9, %v5897_v60  ;;  %6378 = vmatprep.mubr.bf16.mxu0 %v12340_v0  ;;  %7254 = vmatprep.mubr.bf16.mxu1 %v12340_v0  ;;  %v11948_v37 = vld [vmem:[#allocation5 + $0x2e0] ss:$8 sps:$4 sm:$0xff]   ;;  %v6681_v60 = vld [vmem:[#allocation2 + $0xa] sm:$0x1] }
 0x74e   : > { %v11595_v5 = vpop.f32.mrf.mxu0  ;;  %v7265_v15 = vld [vmem:[#allocation2 + $0x12] sm:$0x1]  ;;  %v8214_v3 = vld [vmem:[#allocation2 + $0x1f] sm:$0x1] }
 0x74f   : > { %v5883_v10 = vadd.f32 %v11595_v5, %v14603_v57  ;;  %6361 = vmatpush1.bf16.msra.mxu0 %v11909_v61  ;;  %7237 = vmatpush1.bf16.msra.mxu1 %v11912_v50  ;;  %v7630_v61 = vld [vmem:[#allocation2 + $0x17] sm:$0x1]  ;;  %v11951_v50 = vld [vmem:[#allocation5 + $0x190] ss:$8 sps:$4 sm:$0xff]   ;;  %v11962_v5 = vld [vmem:[#allocation5 + $0x324] ss:$8 sps:$4 sm:$0xff]  }
 0x750   : > { %v5874_v25 = vpop.f32.mrf.mxu0  ;;  %6431 = vmatprep.subr.bf16.mxu0 %v11917_v56  ;;  %7380 = vmatprep.subr.bf16.mxu1 %v11920_v18  ;;  %v11954_v56 = vld [vmem:[#allocation5 + $0x330] ss:$8 sps:$4 sm:$0xff]   ;;  %v6682_v18 = vpack.c.bf16 %v6681_v60, %v6681_v60  ;;  %v7631_v53 = vpack.c.bf16 %v7630_v61, %v7630_v61 }
 0x751   : > { %v5902_v51 = vmax.f32 %v5883_v10, 0.0  ;;  %v5875_v59 = vadd.f32 %v14603_v57, %v5874_v25  ;;  %v11957_v10 = vld [vmem:[#allocation5 + $0x180] ss:$8 sps:$4 sm:$0xff]   ;;  %v11968_v25 = vld [vmem:[#allocation5 + $0x374] ss:$8 sps:$4 sm:$0xff]  }
 0x752   : > { %v5923_v54 = vld [vmem:[#allocation4 + $0x50] ss:$2 sm:$0xff]  ;;  %v5931_v26 = vld [vmem:[#allocation4 + $0x51] ss:$2 sm:$0xff]  ;;  %v11596_v39 = vpop.f32.mrf.mxu0  ;;  %11087 = vmatmul.mubr.msk.bf16.vlgmr.msra.gmra.mxu0 %vm4498_vm9, %v6317_v20  ;;  %11147 = vmatmul.mubr.msk.bf16.vlgmr.msra.gmra.mxu1 %vm4498_vm9, %v7193_v63  ;;  %v6827_v20 = vld [vmem:[#allocation2 + $0xc] sm:$0x1] }
 0x753   : > { %v5939_v38 = vmax.f32 %v5923_v54, %v5931_v26  ;;  %5917 = vst.msk [vmem:[#allocation4 + $0x70] sm:$0xff] %vm4498_vm9, %v5902_v51  ;;  %v5900_v24 = vmax.f32 %v5875_v59, 0.0  ;;  %6432 = vmatpush1.bf16.msra.mxu0 %v11915_v4  ;;  %7381 = vmatpush1.bf16.msra.mxu1 %v11918_v41  ;;  %v11960_v4 = vld [vmem:[#allocation5 + $0x320] ss:$8 sps:$4 sm:$0xff]   ;;  %v11965_v41 = vld [vmem:[#allocation5 + $0x1d4] ss:$8 sps:$4 sm:$0xff]   ;;  %v6828_v51 = vpack.c.bf16 %v6827_v20, %v6827_v20 }
 0x754   : > { %v5922_v19 = vld [vmem:[#allocation4 + $0x40] ss:$2 sm:$0xff]  ;;  %v5930_v42 = vld [vmem:[#allocation4 + $0x41] ss:$2 sm:$0xff]  ;;  %v5877_v1 = vpop.f32.mrf.mxu0  ;;  %6433 = vmatprep.subr.bf16.mxu0 %v11923_v46  ;;  %7382 = vmatprep.subr.bf16.mxu1 %v11926_v62  ;;  %v7776_v63 = vld [vmem:[#allocation2 + $0x19] sm:$0x1] }
 0x755   : > { %5949 = vst.msk [vmem:[#allocation2 + $0x28] sm:$0xff] %vm4498_vm9, %v5939_v38  ;;  %v5938_v58 = vmax.f32 %v5922_v19, %v5930_v42  ;;  %5915 = vst.msk [vmem:[#allocation4 + $0x60] sm:$0xff] %vm4498_vm9, %v5900_v24  ;;  %v5878_v52 = vadd.f32 %v14603_v57, %v5877_v1  ;;  %6451 = vmatprep.mubr.bf16.mxu0 %v12340_v0  ;;  %7400 = vmatprep.mubr.bf16.mxu1 %v12340_v0  ;;  %v11963_v46 = vld [vmem:[#allocation5 + $0x1d0] ss:$8 sps:$4 sm:$0xff]   ;;  %v11971_v54 = vld [vmem:[#allocation5 + $0x1c4] ss:$8 sps:$4 sm:$0xff]  }
 0x756   : > { %v11966_v62 = vld [vmem:[#allocation5 + $0x370] ss:$8 sps:$4 sm:$0xff]   ;;  %v7777_v59 = vpack.c.bf16 %v7776_v63, %v7776_v63  ;;  %v11974_v26 = vld [vmem:[#allocation5 + $0x364] ss:$8 sps:$4 sm:$0xff]   ;;  %v11969_v39 = vld [vmem:[#allocation5 + $0x1c0] ss:$8 sps:$4 sm:$0xff]  }
 0x757   : > { %5948 = vst.msk [vmem:[#allocation2 + $0x20] sm:$0xff] %vm4498_vm9, %v5938_v58  ;;  %v5901_v47 = vmax.f32 %v5878_v52, 0.0  ;;  %6434 = vmatpush1.bf16.msra.mxu0 %v11921_v22  ;;  %7383 = vmatpush1.bf16.msra.mxu1 %v11924_v48  ;;  %v11972_v22 = vld [vmem:[#allocation5 + $0x360] ss:$8 sps:$4 sm:$0xff]   ;;  %v11977_v38 = vld [vmem:[#allocation5 + $0x214] ss:$8 sps:$4 sm:$0xff]  }
 0x758   : > { %6577 = vmatprep.subr.bf16.mxu0 %v11929_v8  ;;  %7526 = vmatprep.subr.bf16.mxu1 %v11932_v6  ;;  %v11980_v24 = vld [vmem:[#allocation5 + $0x3b4] ss:$8 sps:$4 sm:$0xff]   ;;  %v7922_v8 = vld [vmem:[#allocation2 + $0x1b] sm:$0x1]  ;;  %v11975_v19 = vld [vmem:[#allocation5 + $0x210] ss:$8 sps:$4 sm:$0xff]  }
 0x759   : > { %5916 = vst.msk [vmem:[#allocation4 + $0x68] sm:$0xff] %vm4498_vm9, %v5901_v47  ;;  %v6973_v48 = vld [vmem:[#allocation2 + $0xe] sm:$0x1]  ;;  %v11978_v42 = vld [vmem:[#allocation5 + $0x3b0] ss:$8 sps:$4 sm:$0xff]   ;;  %v7923_v6 = vpack.c.bf16 %v7922_v8, %v7922_v8 }
 0x75a   : > { %v5925_v57 = vld [vmem:[#allocation4 + $0x70] ss:$2 sm:$0xf]  ;;  %v5933_v55 = vld [vmem:[#allocation4 + $0x71] ss:$2 sm:$0xf]  ;;  %11092 = vmatmul.mubr.msk.bf16.vlgmr.msra.gmra.mxu0 %vm4498_vm9, %v6390_v32  ;;  %11157 = vmatmul.mubr.msk.bf16.vlgmr.msra.gmra.mxu1 %vm4498_vm9, %v7339_v11  ;;  %v6974_v1 = vpack.c.bf16 %v6973_v48, %v6973_v48 }
 0x75b   : > { %v5941_v36 = vmax.f32 %v5925_v57, %v5933_v55  ;;  %6578 = vmatpush1.bf16.msra.mxu0 %v11927_v9  ;;  %7527 = vmatpush1.bf16.msra.mxu1 %v11930_v17  ;;  %v11983_v58 = vld [vmem:[#allocation5 + $0x204] ss:$8 sps:$4 sm:$0xff]   ;;  %v11989_v47 = vld [vmem:[#allocation5 + $0x254] ss:$8 sps:$4 sm:$0xff]   ;;  %v7119_v17 = vld [vmem:[#allocation2 + $0x10] sm:$0x1] }
 0x75c   : > { %6579 = vmatprep.subr.bf16.mxu0 %v11935_v13  ;;  %7528 = vmatprep.subr.bf16.mxu1 %v11938_v31  ;;  %v11986_v52 = vld [vmem:[#allocation5 + $0x3a4] ss:$8 sps:$4 sm:$0xff]   ;;  %v11992_v9 = vld [vmem:[#allocation5 + $0x3f4] ss:$8 sps:$4 sm:$0xff]   ;;  %v11987_v11 = vld [vmem:[#allocation5 + $0x250] ss:$8 sps:$4 sm:$0xff]   ;;  %v7120_v31 = vpack.c.bf16 %v7119_v17, %v7119_v17 }
 0x75d   : > { %5951 = vst.msk [vmem:[#allocation2 + $0x38] sm:$0xf] %vm4673_vm10, %v5941_v36  ;;  %6597 = vmatprep.mubr.bf16.mxu0 %v12340_v0  ;;  %7546 = vmatprep.mubr.bf16.mxu1 %v12340_v0  ;;  %v8068_v32 = vld [vmem:[#allocation2 + $0x1d] sm:$0x1]  ;;  %v11990_v13 = vld [vmem:[#allocation5 + $0x3f0] ss:$8 sps:$4 sm:$0xff]  }
 0x75e   : > { %v8069_v57 = vpack.c.bf16 %v8068_v32, %v8068_v32  ;;  %v11995_v55 = vld [vmem:[#allocation5 + $0x244] ss:$8 sps:$4 sm:$0xff]   ;;  %v12014_v60 = vld [vmem:[#allocation5 + $0x470] ss:$8 sps:$4 sm:$0xff]  }
 0x75f   : > { %6580 = vmatpush1.bf16.msra.mxu0 %v11933_v7  ;;  %7529 = vmatpush1.bf16.msra.mxu1 %v11936_v40  ;;  %v11998_v36 = vld [vmem:[#allocation5 + $0x3e4] ss:$8 sps:$4 sm:$0xff]   ;;  %v11993_v7 = vld [vmem:[#allocation5 + $0x240] ss:$8 sps:$4 sm:$0xff]   ;;  %v12026_v20 = vld [vmem:[#allocation5 + $0x4b0] ss:$8 sps:$4 sm:$0xff]  }
 0x760   : > { %v5924_v29 = vld [vmem:[#allocation4 + $0x60] ss:$2 sm:$0xff]  ;;  %v5932_v16 = vld [vmem:[#allocation4 + $0x61] ss:$2 sm:$0xff]  ;;  %6723 = vmatprep.subr.bf16.mxu0 %v11941_v35  ;;  %7672 = vmatprep.subr.bf16.mxu1 %v11944_v28 }
 0x761   : > { %v5940_v23 = vmax.f32 %v5924_v29, %v5932_v16  ;;  %v11996_v40 = vld [vmem:[#allocation5 + $0x3e0] ss:$8 sps:$4 sm:$0xff]   ;;  %v12001_v35 = vld [vmem:[#allocation5 + $0x294] ss:$8 sps:$4 sm:$0xff]   ;;  %v8215_v29 = vpack.c.bf16 %v8214_v3, %v8214_v3  ;;  %v12007_v16 = vld [vmem:[#allocation5 + $0x284] ss:$8 sps:$4 sm:$0xff]  }
 0x762   : > { %11102 = vmatmul.mubr.msk.bf16.vlgmr.msra.gmra.mxu0 %vm4498_vm9, %v6536_v14  ;;  %11167 = vmatmul.mubr.msk.bf16.vlgmr.msra.gmra.mxu1 %vm4498_vm9, %v7485_v43  ;;  %v12004_v28 = vld [vmem:[#allocation5 + $0x434] ss:$8 sps:$4 sm:$0xff]   ;;  %v12010_v14 = vld [vmem:[#allocation5 + $0x424] ss:$8 sps:$4 sm:$0xff]   ;;  %v12005_v43 = vld [vmem:[#allocation5 + $0x280] ss:$8 sps:$4 sm:$0xff]  }
 0x763   : > { %5950 = vst.msk [vmem:[#allocation2 + $0x30] sm:$0xff] %vm4498_vm9, %v5940_v23  ;;  %6724 = vmatpush1.bf16.msra.mxu0 %v11939_v44  ;;  %7673 = vmatpush1.bf16.msra.mxu1 %v11942_v21  ;;  %v11999_v44 = vld [vmem:[#allocation5 + $0x290] ss:$8 sps:$4 sm:$0xff]   ;;  %v12013_v23 = vld [vmem:[#allocation5 + $0x2d4] ss:$8 sps:$4 sm:$0xff]  }
 0x764   : > { %6725 = vmatprep.subr.bf16.mxu0 %v11947_v45  ;;  %7674 = vmatprep.subr.bf16.mxu1 %v11950_v34  ;;  %v12002_v21 = vld [vmem:[#allocation5 + $0x430] ss:$8 sps:$4 sm:$0xff]   ;;  %v7266_v45 = vpack.c.bf16 %v7265_v15, %v7265_v15  ;;  %v12008_v34 = vld [vmem:[#allocation5 + $0x420] ss:$8 sps:$4 sm:$0xff]  }
 0x765   : > { %6743 = vmatprep.mubr.bf16.mxu0 %v12340_v0  ;;  %7692 = vmatprep.mubr.bf16.mxu1 %v12340_v0  ;;  %v12038_v48 = vld [vmem:[#allocation5 + $0x4f0] ss:$8 sps:$4 sm:$0xff]  }
 0x766   : > { %v12050_v17 = vld [vmem:[#allocation5 + $0x530] ss:$8 sps:$4 sm:$0xff]  }
 0x767   : > { %6726 = vmatpush1.bf16.msra.mxu0 %v11945_v2  ;;  %7675 = vmatpush1.bf16.msra.mxu1 %v11948_v37  ;;  %v12016_v2 = vld [vmem:[#allocation5 + $0x474] ss:$8 sps:$4 sm:$0xff]   ;;  %v12062_v15 = vld [vmem:[#allocation5 + $0x570] ss:$8 sps:$4 sm:$0xff]  }
 0x768   : > { %6869 = vmatprep.subr.bf16.mxu0 %v11953_v27  ;;  %7818 = vmatprep.subr.bf16.mxu1 %v11956_v33  ;;  %v7411_v37 = vld [vmem:[#allocation2 + $0x14] sm:$0x1]  ;;  %v8360_v27 = vld [vmem:[#allocation2 + $0x21] sm:$0x1]  ;;  %v12011_v33 = vld [vmem:[#allocation5 + $0x2d0] ss:$8 sps:$4 sm:$0xff]  }
 0x769   : > { %v7412_v61 = vpack.c.bf16 %v7411_v37, %v7411_v37  ;;  %v12074_v37 = vld [vmem:[#allocation5 + $0x5b0] ss:$8 sps:$4 sm:$0xff]  }
 0x76a   : > { %11112 = vmatmul.mubr.msk.bf16.vlgmr.msra.gmra.mxu0 %vm4498_vm9, %v6682_v18  ;;  %11177 = vmatmul.mubr.msk.bf16.vlgmr.msra.gmra.mxu1 %vm4498_vm9, %v7631_v53  ;;  %v12022_v18 = vld [vmem:[#allocation5 + $0x464] ss:$8 sps:$4 sm:$0xff]   ;;  %v12017_v53 = vld [vmem:[#allocation5 + $0x2c0] ss:$8 sps:$4 sm:$0xff]  }
 0x76b   : > { %6870 = vmatpush1.bf16.msra.mxu0 %v11951_v50  ;;  %7819 = vmatpush1.bf16.msra.mxu1 %v11954_v56  ;;  %v8361_v50 = vpack.c.bf16 %v8360_v27, %v8360_v27  ;;  %v12019_v56 = vld [vmem:[#allocation5 + $0x2c4] ss:$8 sps:$4 sm:$0xff]  }
 0x76c   : > { %6871 = vmatprep.subr.bf16.mxu0 %v11959_v30  ;;  %7820 = vmatprep.subr.bf16.mxu1 %v11962_v5  ;;  %v12020_v30 = vld [vmem:[#allocation5 + $0x460] ss:$8 sps:$4 sm:$0xff]   ;;  %v12025_v5 = vld [vmem:[#allocation5 + $0x314] ss:$8 sps:$4 sm:$0xff]  }
 0x76d   : > { %6889 = vmatprep.mubr.bf16.mxu0 %v12340_v0  ;;  %7838 = vmatprep.mubr.bf16.mxu1 %v12340_v0 }
 0x76f   : > { %6872 = vmatpush1.bf16.msra.mxu0 %v11957_v10  ;;  %7821 = vmatpush1.bf16.msra.mxu1 %v11960_v4  ;;  %v12028_v10 = vld [vmem:[#allocation5 + $0x4b4] ss:$8 sps:$4 sm:$0xff]  }
 0x770   : > { %7015 = vmatprep.subr.bf16.mxu0 %v11965_v41  ;;  %7964 = vmatprep.subr.bf16.mxu1 %v11968_v25  ;;  %v7557_v4 = vld [vmem:[#allocation2 + $0x16] sm:$0x1]  ;;  %v8506_v41 = vld [vmem:[#allocation2 + $0x23] sm:$0x1]  ;;  %v12023_v25 = vld [vmem:[#allocation5 + $0x310] ss:$8 sps:$4 sm:$0xff]  }
 0x771   : > { %v7558_v63 = vpack.c.bf16 %v7557_v4, %v7557_v4  ;;  %v12086_v4 = vld [vmem:[#allocation5 + $0x5f0] ss:$8 sps:$4 sm:$0xff]  }
 0x772   : > { %11122 = vmatmul.mubr.msk.bf16.vlgmr.msra.gmra.mxu0 %vm4498_vm9, %v6828_v51  ;;  %11187 = vmatmul.mubr.msk.bf16.vlgmr.msra.gmra.mxu1 %vm4498_vm9, %v7777_v59  ;;  %v12034_v51 = vld [vmem:[#allocation5 + $0x4a4] ss:$8 sps:$4 sm:$0xff]   ;;  %v12029_v59 = vld [vmem:[#allocation5 + $0x300] ss:$8 sps:$4 sm:$0xff]  }
 0x773   : > { %7016 = vmatpush1.bf16.msra.mxu0 %v11963_v46  ;;  %7965 = vmatpush1.bf16.msra.mxu1 %v11966_v62  ;;  %v8507_v46 = vpack.c.bf16 %v8506_v41, %v8506_v41  ;;  %v12031_v62 = vld [vmem:[#allocation5 + $0x304] ss:$8 sps:$4 sm:$0xff]  }
 0x774   : > { %7017 = vmatprep.subr.bf16.mxu0 %v11971_v54  ;;  %7966 = vmatprep.subr.bf16.mxu1 %v11974_v26  ;;  %v12032_v54 = vld [vmem:[#allocation5 + $0x4a0] ss:$8 sps:$4 sm:$0xff]   ;;  %v12037_v26 = vld [vmem:[#allocation5 + $0x354] ss:$8 sps:$4 sm:$0xff]  }
 0x775   : > { %7035 = vmatprep.mubr.bf16.mxu0 %v12340_v0  ;;  %7984 = vmatprep.mubr.bf16.mxu1 %v12340_v0 }
 0x777   : > { %7018 = vmatpush1.bf16.msra.mxu0 %v11969_v39  ;;  %7967 = vmatpush1.bf16.msra.mxu1 %v11972_v22  ;;  %v12040_v39 = vld [vmem:[#allocation5 + $0x4f4] ss:$8 sps:$4 sm:$0xff]   ;;  %v7703_v22 = vld [vmem:[#allocation2 + $0x18] sm:$0x1] }
 0x778   : > { %7161 = vmatprep.subr.bf16.mxu0 %v11977_v38  ;;  %8110 = vmatprep.subr.bf16.mxu1 %v11980_v24  ;;  %v8652_v38 = vld [vmem:[#allocation2 + $0x25] sm:$0x1]  ;;  %v12035_v24 = vld [vmem:[#allocation5 + $0x350] ss:$8 sps:$4 sm:$0xff]   ;;  %v7704_v8 = vpack.c.bf16 %v7703_v22, %v7703_v22 }
 0x779   : > { %v12098_v22 = vld [vmem:[#allocation5 + $0x630] ss:$8 sps:$4 sm:$0xff]  }
 0x77a   : > { %11132 = vmatmul.mubr.msk.bf16.vlgmr.msra.gmra.mxu0 %vm4498_vm9, %v6974_v1  ;;  %11197 = vmatmul.mubr.msk.bf16.vlgmr.msra.gmra.mxu1 %vm4498_vm9, %v7923_v6  ;;  %v12046_v1 = vld [vmem:[#allocation5 + $0x4e4] ss:$8 sps:$4 sm:$0xff]   ;;  %v12041_v6 = vld [vmem:[#allocation5 + $0x340] ss:$8 sps:$4 sm:$0xff]  }
 0x77b   : > { %7162 = vmatpush1.bf16.msra.mxu0 %v11975_v19  ;;  %8111 = vmatpush1.bf16.msra.mxu1 %v11978_v42  ;;  %v8653_v19 = vpack.c.bf16 %v8652_v38, %v8652_v38  ;;  %v12043_v42 = vld [vmem:[#allocation5 + $0x344] ss:$8 sps:$4 sm:$0xff]  }
 0x77c   : > { %7163 = vmatprep.subr.bf16.mxu0 %v11983_v58  ;;  %8112 = vmatprep.subr.bf16.mxu1 %v11986_v52  ;;  %v12044_v58 = vld [vmem:[#allocation5 + $0x4e0] ss:$8 sps:$4 sm:$0xff]   ;;  %v12049_v52 = vld [vmem:[#allocation5 + $0x394] ss:$8 sps:$4 sm:$0xff]  }
 0x77d   : > { %7181 = vmatprep.mubr.bf16.mxu0 %v12340_v0  ;;  %8130 = vmatprep.mubr.bf16.mxu1 %v12340_v0 }
 0x77f   : > { %7164 = vmatpush1.bf16.msra.mxu0 %v11981_v12  ;;  %8113 = vmatpush1.bf16.msra.mxu1 %v11984_v49  ;;  %v12052_v12 = vld [vmem:[#allocation5 + $0x534] ss:$8 sps:$4 sm:$0xff]   ;;  %v7849_v49 = vld [vmem:[#allocation2 + $0x1a] sm:$0x1] }
 0x780   : > { %7307 = vmatprep.subr.bf16.mxu0 %v11989_v47  ;;  %8256 = vmatprep.subr.bf16.mxu1 %v11992_v9  ;;  %v8798_v47 = vld [vmem:[#allocation2 + $0x27] sm:$0x1]  ;;  %v12047_v9 = vld [vmem:[#allocation5 + $0x390] ss:$8 sps:$4 sm:$0xff]   ;;  %v7850_v32 = vpack.c.bf16 %v7849_v49, %v7849_v49 }
 0x781   : > { %v12110_v49 = vld [vmem:[#allocation5 + $0x670] ss:$8 sps:$4 sm:$0xff]  }
 0x782   : > { %11142 = vmatmul.mubr.msk.bf16.vlgmr.msra.gmra.mxu0 %vm4498_vm9, %v7120_v31  ;;  %11207 = vmatmul.mubr.msk.bf16.vlgmr.msra.gmra.mxu1 %vm4498_vm9, %v8069_v57  ;;  %v12058_v31 = vld [vmem:[#allocation5 + $0x524] ss:$8 sps:$4 sm:$0xff]   ;;  %v12053_v57 = vld [vmem:[#allocation5 + $0x380] ss:$8 sps:$4 sm:$0xff]  }
 0x783   : > { %7308 = vmatpush1.bf16.msra.mxu0 %v11987_v11  ;;  %8257 = vmatpush1.bf16.msra.mxu1 %v11990_v13  ;;  %v8799_v11 = vpack.c.bf16 %v8798_v47, %v8798_v47  ;;  %v12055_v13 = vld [vmem:[#allocation5 + $0x384] ss:$8 sps:$4 sm:$0xff]  }
 0x784   : > { %7309 = vmatprep.subr.bf16.mxu0 %v11995_v55  ;;  %8258 = vmatprep.subr.bf16.mxu1 %v11998_v36  ;;  %v12056_v55 = vld [vmem:[#allocation5 + $0x520] ss:$8 sps:$4 sm:$0xff]   ;;  %v12061_v36 = vld [vmem:[#allocation5 + $0x3d4] ss:$8 sps:$4 sm:$0xff]  }
 0x785   : > { %7327 = vmatprep.mubr.bf16.mxu0 %v12340_v0  ;;  %8276 = vmatprep.mubr.bf16.mxu1 %v12340_v0 }
 0x787   : > { %7310 = vmatpush1.bf16.msra.mxu0 %v11993_v7  ;;  %8259 = vmatpush1.bf16.msra.mxu1 %v11996_v40  ;;  %v12064_v7 = vld [vmem:[#allocation5 + $0x574] ss:$8 sps:$4 sm:$0xff]   ;;  %v7995_v40 = vld [vmem:[#allocation2 + $0x1c] sm:$0x1] }
 0x788   : > { %7453 = vmatprep.subr.bf16.mxu0 %v12001_v35  ;;  %8402 = vmatprep.subr.bf16.mxu1 %v12004_v28  ;;  %v8944_v35 = vld [vmem:[#allocation2 + $0x29] sm:$0x1]  ;;  %v7996_v3 = vpack.c.bf16 %v7995_v40, %v7995_v40 }
 0x789   : > { %v12059_v28 = vld [vmem:[#allocation5 + $0x3d0] ss:$8 sps:$4 sm:$0xff]  }
 0x78a   : > { %11152 = vmatmul.mubr.msk.bf16.vlgmr.msra.gmra.mxu0 %vm4498_vm9, %v7266_v45  ;;  %11217 = vmatmul.mubr.msk.bf16.vlgmr.msra.gmra.mxu1 %vm4498_vm9, %v8215_v29  ;;  %v12070_v45 = vld [vmem:[#allocation5 + $0x564] ss:$8 sps:$4 sm:$0xff]   ;;  %v12065_v29 = vld [vmem:[#allocation5 + $0x3c0] ss:$8 sps:$4 sm:$0xff]   ;;  %v12122_v40 = vld [vmem:[#allocation5 + $0x6b0] ss:$8 sps:$4 sm:$0xff]  }
 0x78b   : > { %7454 = vmatpush1.bf16.msra.mxu0 %v11999_v44  ;;  %8403 = vmatpush1.bf16.msra.mxu1 %v12002_v21  ;;  %v8945_v44 = vpack.c.bf16 %v8944_v35, %v8944_v35  ;;  %v12067_v21 = vld [vmem:[#allocation5 + $0x3c4] ss:$8 sps:$4 sm:$0xff]  }
 0x78c   : > { %7455 = vmatprep.subr.bf16.mxu0 %v12007_v16  ;;  %8404 = vmatprep.subr.bf16.mxu1 %v12010_v14  ;;  %v12068_v16 = vld [vmem:[#allocation5 + $0x560] ss:$8 sps:$4 sm:$0xff]   ;;  %v12073_v14 = vld [vmem:[#allocation5 + $0x414] ss:$8 sps:$4 sm:$0xff]  }
 0x78d   : > { %7473 = vmatprep.mubr.bf16.mxu0 %v12340_v0  ;;  %8422 = vmatprep.mubr.bf16.mxu1 %v12340_v0 }
 0x78f   : > { %7456 = vmatpush1.bf16.msra.mxu0 %v12005_v43  ;;  %8405 = vmatpush1.bf16.msra.mxu1 %v12008_v34  ;;  %v12076_v43 = vld [vmem:[#allocation5 + $0x5b4] ss:$8 sps:$4 sm:$0xff]   ;;  %v8141_v34 = vld [vmem:[#allocation2 + $0x1e] sm:$0x1] }
 0x790   : > { %7599 = vmatprep.subr.bf16.mxu0 %v12013_v23  ;;  %8548 = vmatprep.subr.bf16.mxu1 %v12016_v2  ;;  %v9090_v23 = vld [vmem:[#allocation2 + $0x2b] sm:$0x1]  ;;  %v8142_v27 = vpack.c.bf16 %v8141_v34, %v8141_v34 }
 0x791   : > { %v12071_v2 = vld [vmem:[#allocation5 + $0x410] ss:$8 sps:$4 sm:$0xff]  }
 0x792   : > { %11162 = vmatmul.mubr.msk.bf16.vlgmr.msra.gmra.mxu0 %vm4498_vm9, %v7412_v61  ;;  %11227 = vmatmul.mubr.msk.bf16.vlgmr.msra.gmra.mxu1 %vm4498_vm9, %v8361_v50  ;;  %v12082_v61 = vld [vmem:[#allocation5 + $0x5a4] ss:$8 sps:$4 sm:$0xff]   ;;  %v12077_v50 = vld [vmem:[#allocation5 + $0x400] ss:$8 sps:$4 sm:$0xff]   ;;  %v12134_v34 = vld [vmem:[#allocation5 + $0x6f0] ss:$8 sps:$4 sm:$0xff]  }
 0x793   : > { %7600 = vmatpush1.bf16.msra.mxu0 %v12011_v33  ;;  %8549 = vmatpush1.bf16.msra.mxu1 %v12014_v60  ;;  %v9091_v33 = vpack.c.bf16 %v9090_v23, %v9090_v23  ;;  %v12079_v60 = vld [vmem:[#allocation5 + $0x404] ss:$8 sps:$4 sm:$0xff]  }
 0x794   : > { %7601 = vmatprep.subr.bf16.mxu0 %v12019_v56  ;;  %8550 = vmatprep.subr.bf16.mxu1 %v12022_v18  ;;  %v12080_v56 = vld [vmem:[#allocation5 + $0x5a0] ss:$8 sps:$4 sm:$0xff]   ;;  %v12085_v18 = vld [vmem:[#allocation5 + $0x454] ss:$8 sps:$4 sm:$0xff]  }
 0x795   : > { %7619 = vmatprep.mubr.bf16.mxu0 %v12340_v0  ;;  %8568 = vmatprep.mubr.bf16.mxu1 %v12340_v0 }
 0x797   : > { %7602 = vmatpush1.bf16.msra.mxu0 %v12017_v53  ;;  %8551 = vmatpush1.bf16.msra.mxu1 %v12020_v30  ;;  %v12088_v53 = vld [vmem:[#allocation5 + $0x5f4] ss:$8 sps:$4 sm:$0xff]   ;;  %v8287_v30 = vld [vmem:[#allocation2 + $0x20] sm:$0x1] }
 0x798   : > { %7745 = vmatprep.subr.bf16.mxu0 %v12025_v5  ;;  %8694 = vmatprep.subr.bf16.mxu1 %v12028_v10  ;;  %v9236_v5 = vld [vmem:[#allocation2 + $0x2d] sm:$0x1]  ;;  %v12083_v10 = vld [vmem:[#allocation5 + $0x450] ss:$8 sps:$4 sm:$0xff]   ;;  %v8288_v41 = vpack.c.bf16 %v8287_v30, %v8287_v30 }
 0x799   : > { %v12146_v30 = vld [vmem:[#allocation5 + $0x730] ss:$8 sps:$4 sm:$0xff]  }
 0x79a   : > { %11172 = vmatmul.mubr.msk.bf16.vlgmr.msra.gmra.mxu0 %vm4498_vm9, %v7558_v63  ;;  %11237 = vmatmul.mubr.msk.bf16.vlgmr.msra.gmra.mxu1 %vm4498_vm9, %v8507_v46  ;;  %v12094_v63 = vld [vmem:[#allocation5 + $0x5e4] ss:$8 sps:$4 sm:$0xff]   ;;  %v12089_v46 = vld [vmem:[#allocation5 + $0x440] ss:$8 sps:$4 sm:$0xff]  }
 0x79b   : > { %7746 = vmatpush1.bf16.msra.mxu0 %v12023_v25  ;;  %8695 = vmatpush1.bf16.msra.mxu1 %v12026_v20  ;;  %v9237_v25 = vpack.c.bf16 %v9236_v5, %v9236_v5  ;;  %v12091_v20 = vld [vmem:[#allocation5 + $0x444] ss:$8 sps:$4 sm:$0xff]  }
 0x79c   : > { %7747 = vmatprep.subr.bf16.mxu0 %v12031_v62  ;;  %8696 = vmatprep.subr.bf16.mxu1 %v12034_v51  ;;  %v12092_v62 = vld [vmem:[#allocation5 + $0x5e0] ss:$8 sps:$4 sm:$0xff]   ;;  %v12097_v51 = vld [vmem:[#allocation5 + $0x494] ss:$8 sps:$4 sm:$0xff]  }
 0x79d   : > { %7765 = vmatprep.mubr.bf16.mxu0 %v12340_v0  ;;  %8714 = vmatprep.mubr.bf16.mxu1 %v12340_v0 }
 0x79f   : > { %7748 = vmatpush1.bf16.msra.mxu0 %v12029_v59  ;;  %8697 = vmatpush1.bf16.msra.mxu1 %v12032_v54  ;;  %v12100_v59 = vld [vmem:[#allocation5 + $0x634] ss:$8 sps:$4 sm:$0xff]   ;;  %v8433_v54 = vld [vmem:[#allocation2 + $0x22] sm:$0x1] }
 0x7a0   : > { %7891 = vmatprep.subr.bf16.mxu0 %v12037_v26  ;;  %8840 = vmatprep.subr.bf16.mxu1 %v12040_v39  ;;  %v9382_v26 = vld [vmem:[#allocation2 + $0x2f] sm:$0x1]  ;;  %v12095_v39 = vld [vmem:[#allocation5 + $0x490] ss:$8 sps:$4 sm:$0xff]   ;;  %v8434_v38 = vpack.c.bf16 %v8433_v54, %v8433_v54 }
 0x7a1   : > { %v12160_v54 = vld [vmem:[#allocation5 + $0x774] ss:$8 sps:$4 sm:$0xff]  }
 0x7a2   : > { %11182 = vmatmul.mubr.msk.bf16.vlgmr.msra.gmra.mxu0 %vm4498_vm9, %v7704_v8  ;;  %11247 = vmatmul.mubr.msk.bf16.vlgmr.msra.gmra.mxu1 %vm4498_vm9, %v8653_v19  ;;  %v12106_v8 = vld [vmem:[#allocation5 + $0x624] ss:$8 sps:$4 sm:$0xff]   ;;  %v12101_v19 = vld [vmem:[#allocation5 + $0x480] ss:$8 sps:$4 sm:$0xff]  }
 0x7a3   : > { %7892 = vmatpush1.bf16.msra.mxu0 %v12035_v24  ;;  %8841 = vmatpush1.bf16.msra.mxu1 %v12038_v48  ;;  %v9383_v24 = vpack.c.bf16 %v9382_v26, %v9382_v26  ;;  %v12103_v48 = vld [vmem:[#allocation5 + $0x484] ss:$8 sps:$4 sm:$0xff]   ;;  %v9163_v26 = vld [vmem:[#allocation2 + $0x2c] sm:$0x1] }
 0x7a4   : > { %7893 = vmatprep.subr.bf16.mxu0 %v12043_v42  ;;  %8842 = vmatprep.subr.bf16.mxu1 %v12046_v1  ;;  %v12104_v42 = vld [vmem:[#allocation5 + $0x620] ss:$8 sps:$4 sm:$0xff]   ;;  %v12109_v1 = vld [vmem:[#allocation5 + $0x4d4] ss:$8 sps:$4 sm:$0xff]  }
 0x7a5   : > { %7911 = vmatprep.mubr.bf16.mxu0 %v12340_v0  ;;  %8860 = vmatprep.mubr.bf16.mxu1 %v12340_v0 }
 0x7a7   : > { %7894 = vmatpush1.bf16.msra.mxu0 %v12041_v6  ;;  %8843 = vmatpush1.bf16.msra.mxu1 %v12044_v58  ;;  %v12112_v6 = vld [vmem:[#allocation5 + $0x674] ss:$8 sps:$4 sm:$0xff]   ;;  %v8579_v58 = vld [vmem:[#allocation2 + $0x24] sm:$0x1] }
 0x7a8   : > { %8037 = vmatprep.subr.bf16.mxu0 %v12049_v52  ;;  %8986 = vmatprep.subr.bf16.mxu1 %v12052_v12  ;;  %v9528_v52 = vld [vmem:[#allocation2 + $0x31] sm:$0x1]  ;;  %v8580_v47 = vpack.c.bf16 %v8579_v58, %v8579_v58  ;;  %v12166_v58 = vld [vmem:[#allocation5 + $0x764] ss:$8 sps:$4 sm:$0xff]  }
 0x7a9   : > { %v12107_v12 = vld [vmem:[#allocation5 + $0x4d0] ss:$8 sps:$4 sm:$0xff]  }
 0x7aa   : > { %11192 = vmatmul.mubr.msk.bf16.vlgmr.msra.gmra.mxu0 %vm4498_vm9, %v7850_v32  ;;  %11257 = vmatmul.mubr.msk.bf16.vlgmr.msra.gmra.mxu1 %vm4498_vm9, %v8799_v11  ;;  %v12118_v32 = vld [vmem:[#allocation5 + $0x664] ss:$8 sps:$4 sm:$0xff]   ;;  %v12113_v11 = vld [vmem:[#allocation5 + $0x4c0] ss:$8 sps:$4 sm:$0xff]  }
 0x7ab   : > { %8038 = vmatpush1.bf16.msra.mxu0 %v12047_v9  ;;  %8987 = vmatpush1.bf16.msra.mxu1 %v12050_v17  ;;  %v9529_v9 = vpack.c.bf16 %v9528_v52, %v9528_v52  ;;  %v12115_v17 = vld [vmem:[#allocation5 + $0x4c4] ss:$8 sps:$4 sm:$0xff]  }
 0x7ac   : > { %8039 = vmatprep.subr.bf16.mxu0 %v12055_v13  ;;  %8988 = vmatprep.subr.bf16.mxu1 %v12058_v31  ;;  %v12116_v13 = vld [vmem:[#allocation5 + $0x660] ss:$8 sps:$4 sm:$0xff]   ;;  %v12121_v31 = vld [vmem:[#allocation5 + $0x514] ss:$8 sps:$4 sm:$0xff]  }
 0x7ad   : > { %8057 = vmatprep.mubr.bf16.mxu0 %v12340_v0  ;;  %9006 = vmatprep.mubr.bf16.mxu1 %v12340_v0 }
 0x7af   : > { %8040 = vmatpush1.bf16.msra.mxu0 %v12053_v57  ;;  %8989 = vmatpush1.bf16.msra.mxu1 %v12056_v55  ;;  %v12124_v57 = vld [vmem:[#allocation5 + $0x6b4] ss:$8 sps:$4 sm:$0xff]   ;;  %v8725_v55 = vld [vmem:[#allocation2 + $0x26] sm:$0x1] }
 0x7b0   : > { %8183 = vmatprep.subr.bf16.mxu0 %v12061_v36  ;;  %9132 = vmatprep.subr.bf16.mxu1 %v12064_v7  ;;  %v9674_v36 = vld [vmem:[#allocation2 + $0x33] sm:$0x1]  ;;  %v8726_v35 = vpack.c.bf16 %v8725_v55, %v8725_v55 }
 0x7b1   : > { %v12119_v7 = vld [vmem:[#allocation5 + $0x510] ss:$8 sps:$4 sm:$0xff]  }
 0x7b2   : > { %11202 = vmatmul.mubr.msk.bf16.vlgmr.msra.gmra.mxu0 %vm4498_vm9, %v7996_v3  ;;  %11267 = vmatmul.mubr.msk.bf16.vlgmr.msra.gmra.mxu1 %vm4498_vm9, %v8945_v44  ;;  %v12130_v3 = vld [vmem:[#allocation5 + $0x6a4] ss:$8 sps:$4 sm:$0xff]   ;;  %v12125_v44 = vld [vmem:[#allocation5 + $0x500] ss:$8 sps:$4 sm:$0xff]  }
 0x7b3   : > { %8184 = vmatpush1.bf16.msra.mxu0 %v12059_v28  ;;  %9133 = vmatpush1.bf16.msra.mxu1 %v12062_v15  ;;  %v9675_v28 = vpack.c.bf16 %v9674_v36, %v9674_v36  ;;  %v12127_v15 = vld [vmem:[#allocation5 + $0x504] ss:$8 sps:$4 sm:$0xff]  }
 0x7b4   : > { %8185 = vmatprep.subr.bf16.mxu0 %v12067_v21  ;;  %9134 = vmatprep.subr.bf16.mxu1 %v12070_v45  ;;  %v12128_v21 = vld [vmem:[#allocation5 + $0x6a0] ss:$8 sps:$4 sm:$0xff]   ;;  %v12133_v45 = vld [vmem:[#allocation5 + $0x554] ss:$8 sps:$4 sm:$0xff]  }
 0x7b5   : > { %8203 = vmatprep.mubr.bf16.mxu0 %v12340_v0  ;;  %9152 = vmatprep.mubr.bf16.mxu1 %v12340_v0 }
 0x7b7   : > { %8186 = vmatpush1.bf16.msra.mxu0 %v12065_v29  ;;  %9135 = vmatpush1.bf16.msra.mxu1 %v12068_v16  ;;  %v12136_v29 = vld [vmem:[#allocation5 + $0x6f4] ss:$8 sps:$4 sm:$0xff]   ;;  %v8871_v16 = vld [vmem:[#allocation2 + $0x28] sm:$0x1] }
 0x7b8   : > { %8329 = vmatprep.subr.bf16.mxu0 %v12073_v14  ;;  %9278 = vmatprep.subr.bf16.mxu1 %v12076_v43  ;;  %v9820_v14 = vld [vmem:[#allocation2 + $0x35] sm:$0x1]  ;;  %v12131_v43 = vld [vmem:[#allocation5 + $0x550] ss:$8 sps:$4 sm:$0xff]   ;;  %v8872_v23 = vpack.c.bf16 %v8871_v16, %v8871_v16 }
 0x7ba   : > { %11212 = vmatmul.mubr.msk.bf16.vlgmr.msra.gmra.mxu0 %vm4498_vm9, %v8142_v27  ;;  %11277 = vmatmul.mubr.msk.bf16.vlgmr.msra.gmra.mxu1 %vm4498_vm9, %v9091_v33  ;;  %v12142_v27 = vld [vmem:[#allocation5 + $0x6e4] ss:$8 sps:$4 sm:$0xff]   ;;  %v12137_v33 = vld [vmem:[#allocation5 + $0x540] ss:$8 sps:$4 sm:$0xff]  }
 0x7bb   : > { %8330 = vmatpush1.bf16.msra.mxu0 %v12071_v2  ;;  %9279 = vmatpush1.bf16.msra.mxu1 %v12074_v37  ;;  %v9821_v2 = vpack.c.bf16 %v9820_v14, %v9820_v14  ;;  %v12139_v37 = vld [vmem:[#allocation5 + $0x544] ss:$8 sps:$4 sm:$0xff]  }
 0x7bc   : > { %8331 = vmatprep.subr.bf16.mxu0 %v12079_v60  ;;  %9280 = vmatprep.subr.bf16.mxu1 %v12082_v61  ;;  %v12140_v60 = vld [vmem:[#allocation5 + $0x6e0] ss:$8 sps:$4 sm:$0xff]   ;;  %v12145_v61 = vld [vmem:[#allocation5 + $0x594] ss:$8 sps:$4 sm:$0xff]  }
 0x7bd   : > { %8349 = vmatprep.mubr.bf16.mxu0 %v12340_v0  ;;  %9298 = vmatprep.mubr.bf16.mxu1 %v12340_v0 }
 0x7bf   : > { %8332 = vmatpush1.bf16.msra.mxu0 %v12077_v50  ;;  %9281 = vmatpush1.bf16.msra.mxu1 %v12080_v56  ;;  %v12148_v50 = vld [vmem:[#allocation5 + $0x734] ss:$8 sps:$4 sm:$0xff]   ;;  %v9017_v56 = vld [vmem:[#allocation2 + $0x2a] sm:$0x1] }
 0x7c0   : > { %8475 = vmatprep.subr.bf16.mxu0 %v12085_v18  ;;  %9424 = vmatprep.subr.bf16.mxu1 %v12088_v53  ;;  %v9966_v18 = vld [vmem:[#allocation2 + $0x37] sm:$0x1]  ;;  %v12143_v53 = vld [vmem:[#allocation5 + $0x590] ss:$8 sps:$4 sm:$0xff]   ;;  %v9018_v5 = vpack.c.bf16 %v9017_v56, %v9017_v56 }
 0x7c2   : > { %11222 = vmatmul.mubr.msk.bf16.vlgmr.msra.gmra.mxu0 %vm4498_vm9, %v8288_v41  ;;  %11287 = vmatmul.mubr.msk.bf16.vlgmr.msra.gmra.mxu1 %vm4498_vm9, %v9237_v25  ;;  %v12154_v41 = vld [vmem:[#allocation5 + $0x724] ss:$8 sps:$4 sm:$0xff]  }
 0x7c3   : > { %8476 = vmatpush1.bf16.msra.mxu0 %v12083_v10  ;;  %9425 = vmatpush1.bf16.msra.mxu1 %v12086_v4  ;;  %v9967_v10 = vpack.c.bf16 %v9966_v18, %v9966_v18  ;;  %v12151_v4 = vld [vmem:[#allocation5 + $0x584] ss:$8 sps:$4 sm:$0xff]  }
 0x7c4   : > { %8477 = vmatprep.subr.bf16.mxu0 %v12091_v20  ;;  %9426 = vmatprep.subr.bf16.mxu1 %v12094_v63  ;;  %v12149_v63 = vld [vmem:[#allocation5 + $0x580] ss:$8 sps:$4 sm:$0xff]  }
 0x7c5   : > { %8495 = vmatprep.mubr.bf16.mxu0 %v12340_v0  ;;  %9444 = vmatprep.mubr.bf16.mxu1 %v12340_v0 }
 0x7c7   : > { %8478 = vmatpush1.bf16.msra.mxu0 %v12089_v46  ;;  %9427 = vmatpush1.bf16.msra.mxu1 %v12092_v62  ;;  %v12152_v46 = vld [vmem:[#allocation5 + $0x720] ss:$8 sps:$4 sm:$0xff]  }
 0x7c8   : > { %8621 = vmatprep.subr.bf16.mxu0 %v12097_v51  ;;  %9570 = vmatprep.subr.bf16.mxu1 %v12100_v59  ;;  %v12157_v59 = vld [vmem:[#allocation5 + $0x5d4] ss:$8 sps:$4 sm:$0xff]  }
 0x7ca   : > { %11232 = vmatmul.mubr.msk.bf16.vlgmr.msra.gmra.mxu0 %vm4498_vm9, %v8434_v38  ;;  %11297 = vmatmul.mubr.msk.bf16.vlgmr.msra.gmra.mxu1 %vm4498_vm9, %v9383_v24  ;;  %v12155_v24 = vld [vmem:[#allocation5 + $0x5d0] ss:$8 sps:$4 sm:$0xff]  }
 0x7cb   : > { %8622 = vmatpush1.bf16.msra.mxu0 %v12095_v39  ;;  %9571 = vmatpush1.bf16.msra.mxu1 %v12098_v22  ;;  %v10112_v39 = vld [vmem:[#allocation2 + $0x39] sm:$0x1] }
 0x7cc   : > { %8623 = vmatprep.subr.bf16.mxu0 %v12103_v48  ;;  %9572 = vmatprep.subr.bf16.mxu1 %v12106_v8  ;;  %v12158_v48 = vld [vmem:[#allocation5 + $0x770] ss:$8 sps:$4 sm:$0xff]  }
 0x7cd   : > { %8641 = vmatprep.mubr.bf16.mxu0 %v12340_v0  ;;  %9590 = vmatprep.mubr.bf16.mxu1 %v12340_v0 }
 0x7cf   : > { %8624 = vmatpush1.bf16.msra.mxu0 %v12101_v19  ;;  %9573 = vmatpush1.bf16.msra.mxu1 %v12104_v42  ;;  %v9164_v42 = vpack.c.bf16 %v9163_v26, %v9163_v26 }
 0x7d0   : > { %8767 = vmatprep.subr.bf16.mxu0 %v12109_v1  ;;  %9716 = vmatprep.subr.bf16.mxu1 %v12112_v6  ;;  %v10113_v1 = vpack.c.bf16 %v10112_v39, %v10112_v39  ;;  %v12163_v6 = vld [vmem:[#allocation5 + $0x5c4] ss:$8 sps:$4 sm:$0xff]  }
 0x7d1   : > { %v12184_v39 = vld [vmem:[#allocation5 + $0x684] ss:$8 sps:$4 sm:$0xff]  }
 0x7d2   : > { %11242 = vmatmul.mubr.msk.bf16.vlgmr.msra.gmra.mxu0 %vm4498_vm9, %v8580_v47  ;;  %11307 = vmatmul.mubr.msk.bf16.vlgmr.msra.gmra.mxu1 %vm4498_vm9, %v9529_v9  ;;  %v12161_v47 = vld [vmem:[#allocation5 + $0x5c0] ss:$8 sps:$4 sm:$0xff]  }
 0x7d3   : > { %8768 = vmatpush1.bf16.msra.mxu0 %v12107_v12  ;;  %9717 = vmatpush1.bf16.msra.mxu1 %v12110_v49  ;;  %v12164_v9 = vld [vmem:[#allocation5 + $0x760] ss:$8 sps:$4 sm:$0xff]  }
 0x7d4   : > { %8769 = vmatprep.subr.bf16.mxu0 %v12115_v17  ;;  %9718 = vmatprep.subr.bf16.mxu1 %v12118_v32 }
 0x7d5   : > { %8787 = vmatprep.mubr.bf16.mxu0 %v12340_v0  ;;  %9736 = vmatprep.mubr.bf16.mxu1 %v12340_v0 }
 0x7d7   : > { %8770 = vmatpush1.bf16.msra.mxu0 %v12113_v11  ;;  %9719 = vmatpush1.bf16.msra.mxu1 %v12116_v13  ;;  %v12169_v11 = vld [vmem:[#allocation5 + $0x614] ss:$8 sps:$4 sm:$0xff]  }
 0x7d8   : > { %8913 = vmatprep.subr.bf16.mxu0 %v12121_v31  ;;  %9862 = vmatprep.subr.bf16.mxu1 %v12124_v57  ;;  %v9309_v31 = vld [vmem:[#allocation2 + $0x2e] sm:$0x1]  ;;  %v10258_v57 = vld [vmem:[#allocation2 + $0x3b] sm:$0x1] }
 0x7da   : > { %11252 = vmatmul.mubr.msk.bf16.vlgmr.msra.gmra.mxu0 %vm4498_vm9, %v8726_v35  ;;  %11317 = vmatmul.mubr.msk.bf16.vlgmr.msra.gmra.mxu1 %vm4498_vm9, %v9675_v28  ;;  %v9310_v28 = vpack.c.bf16 %v9309_v31, %v9309_v31 }
 0x7db   : > { %8914 = vmatpush1.bf16.msra.mxu0 %v12119_v7  ;;  %9863 = vmatpush1.bf16.msra.mxu1 %v12122_v40  ;;  %v12167_v7 = vld [vmem:[#allocation5 + $0x610] ss:$8 sps:$4 sm:$0xff]  }
 0x7dc   : > { %8915 = vmatprep.subr.bf16.mxu0 %v12127_v15  ;;  %9864 = vmatprep.subr.bf16.mxu1 %v12130_v3  ;;  %v10259_v15 = vpack.c.bf16 %v10258_v57, %v10258_v57  ;;  %v12172_v3 = vld [vmem:[#allocation5 + $0x604] ss:$8 sps:$4 sm:$0xff]  }
 0x7dd   : > { %8933 = vmatprep.mubr.bf16.mxu0 %v12340_v0  ;;  %9882 = vmatprep.mubr.bf16.mxu1 %v12340_v0 }
 0x7df   : > { %8916 = vmatpush1.bf16.msra.mxu0 %v12125_v44  ;;  %9865 = vmatpush1.bf16.msra.mxu1 %v12128_v21 }
 0x7e0   : > { %9059 = vmatprep.subr.bf16.mxu0 %v12133_v45  ;;  %10008 = vmatprep.subr.bf16.mxu1 %v12136_v29  ;;  %v12170_v29 = vld [vmem:[#allocation5 + $0x600] ss:$8 sps:$4 sm:$0xff]  }
 0x7e2   : > { %11262 = vmatmul.mubr.msk.bf16.vlgmr.msra.gmra.mxu0 %vm4498_vm9, %v8872_v23  ;;  %11327 = vmatmul.mubr.msk.bf16.vlgmr.msra.gmra.mxu1 %vm4498_vm9, %v9821_v2  ;;  %v9455_v23 = vld [vmem:[#allocation2 + $0x30] sm:$0x1] }
 0x7e3   : > { %9060 = vmatpush1.bf16.msra.mxu0 %v12131_v43  ;;  %10009 = vmatpush1.bf16.msra.mxu1 %v12134_v34  ;;  %v12175_v43 = vld [vmem:[#allocation5 + $0x654] ss:$8 sps:$4 sm:$0xff]  }
 0x7e4   : > { %9061 = vmatprep.subr.bf16.mxu0 %v12139_v37  ;;  %10010 = vmatprep.subr.bf16.mxu1 %v12142_v27  ;;  %v12173_v27 = vld [vmem:[#allocation5 + $0x650] ss:$8 sps:$4 sm:$0xff]  }
 0x7e5   : > { %9079 = vmatprep.mubr.bf16.mxu0 %v12340_v0  ;;  %10028 = vmatprep.mubr.bf16.mxu1 %v12340_v0 }
 0x7e7   : > { %9062 = vmatpush1.bf16.msra.mxu0 %v12137_v33  ;;  %10011 = vmatpush1.bf16.msra.mxu1 %v12140_v60 }
 0x7e8   : > { %9205 = vmatprep.subr.bf16.mxu0 %v12145_v61  ;;  %10154 = vmatprep.subr.bf16.mxu1 %v12148_v50  ;;  %v9456_v61 = vpack.c.bf16 %v9455_v23, %v9455_v23  ;;  %v12178_v50 = vld [vmem:[#allocation5 + $0x644] ss:$8 sps:$4 sm:$0xff]  }
 0x7ea   : > { %v6026_v25 = vpop.f32.mrf.mxu0  ;;  %v14739_v20 = vpop.f32.mrf.mxu1  ;;  %11272 = vmatmul.mubr.msk.bf16.vlgmr.msra.gmra.mxu0 %vm4498_vm9, %v9018_v5  ;;  %11337 = vmatmul.mubr.msk.bf16.vlgmr.msra.gmra.mxu1 %vm4498_vm9, %v9967_v10 }
 0x7eb   : > { %9206 = vmatpush1.bf16.msra.mxu0 %v12143_v53  ;;  %10155 = vmatpush1.bf16.msra.mxu1 %v12146_v30  ;;  %v12176_v30 = vld [vmem:[#allocation5 + $0x640] ss:$8 sps:$4 sm:$0xff]  }
 0x7ec   : > { %v6028_v62 = vpop.f32.mrf.mxu0  ;;  %v14743_v51 = vpop.f32.mrf.mxu1  ;;  %9207 = vmatprep.subr.bf16.mxu0 %v12151_v4  ;;  %10156 = vmatprep.subr.bf16.mxu1 %v12154_v41  ;;  %v12181_v4 = vld [vmem:[#allocation5 + $0x694] ss:$8 sps:$4 sm:$0xff]  }
 0x7ed   : > { %9225 = vmatprep.mubr.bf16.mxu0 %v12340_v0  ;;  %10174 = vmatprep.mubr.bf16.mxu1 %v12340_v0 }
 0x7ee   : > { %v6030_v22 = vpop.f32.mrf.mxu0  ;;  %v6530_v38 = vpop.f32.mrf.mxu1 }
 0x7ef   : > { %9208 = vmatpush1.bf16.msra.mxu0 %v12149_v63  ;;  %10157 = vmatpush1.bf16.msra.mxu1 %v12152_v46 }
 0x7f0   : > { %v6031_v8 = vpop.f32.mrf.mxu0  ;;  %v6531_v19 = vpop.f32.mrf.mxu1  ;;  %9351 = vmatprep.subr.bf16.mxu0 %v12157_v59  ;;  %10300 = vmatprep.subr.bf16.mxu1 %v12160_v54 }
 0x7f2   : > { %v6090_v52 = vpop.f32.mrf.mxu0  ;;  %v14747_v12 = vpop.f32.mrf.mxu1  ;;  %11282 = vmatmul.mubr.msk.bf16.vlgmr.msra.gmra.mxu0 %vm4498_vm9, %v9164_v42  ;;  %11347 = vmatmul.mubr.msk.bf16.vlgmr.msra.gmra.mxu1 %vm4498_vm9, %v10113_v1  ;;  %v12187_v42 = vld [vmem:[#allocation5 + $0x6d4] ss:$8 sps:$4 sm:$0xff]  }
 0x7f3   : > { %v6091_v49 = vadd.f32 %v6090_v52, %v6026_v25  ;;  %9352 = vmatpush1.bf16.msra.mxu0 %v12155_v24  ;;  %10301 = vmatpush1.bf16.msra.mxu1 %v12158_v48  ;;  %v9601_v25 = vld [vmem:[#allocation2 + $0x32] sm:$0x1]  ;;  %v12182_v48 = vld [vmem:[#allocation5 + $0x680] ss:$8 sps:$4 sm:$0xff]  }
 0x7f4   : > { %v6092_v17 = vpop.f32.mrf.mxu0  ;;  %v14751_v32 = vpop.f32.mrf.mxu1  ;;  %9353 = vmatprep.subr.bf16.mxu0 %v12163_v6  ;;  %10302 = vmatprep.subr.bf16.mxu1 %v12166_v58  ;;  %v9602_v26 = vpack.c.bf16 %v9601_v25, %v9601_v25  ;;  %v9747_v6 = vld [vmem:[#allocation2 + $0x34] sm:$0x1] }
 0x7f5   : > { %v6093_v13 = vadd.f32 %v6092_v17, %v6028_v62  ;;  %9371 = vmatprep.mubr.bf16.mxu0 %v12340_v0  ;;  %10320 = vmatprep.mubr.bf16.mxu1 %v12340_v0  ;;  %v12179_v62 = vld [vmem:[#allocation5 + $0x690] ss:$8 sps:$4 sm:$0xff]   ;;  %v9748_v17 = vpack.c.bf16 %v9747_v6, %v9747_v6 }
 0x7f6   : > { %v6094_v55 = vpop.f32.mrf.mxu0  ;;  %v6676_v36 = vpop.f32.mrf.mxu1 }
 0x7f7   : > { %9354 = vmatpush1.bf16.msra.mxu0 %v12161_v47  ;;  %10303 = vmatpush1.bf16.msra.mxu1 %v12164_v9  ;;  %v12188_v55 = vld [vmem:[#allocation5 + $0x6c0] ss:$8 sps:$4 sm:$0xff]  }
 0x7f8   : > { %v6095_v40 = vpop.f32.mrf.mxu0  ;;  %v6677_v35 = vpop.f32.mrf.mxu1  ;;  %9497 = vmatprep.subr.bf16.mxu0 %v12169_v11  ;;  %v12190_v11 = vld [vmem:[#allocation5 + $0x6c4] ss:$8 sps:$4 sm:$0xff]  }
 0x7f9   : > { %v12193_v40 = vld [vmem:[#allocation5 + $0x714] ss:$8 sps:$4 sm:$0xff]  }
 0x7fa   : > { %v6161_v44 = vpop.f32.mrf.mxu0  ;;  %v14755_v21 = vpop.f32.mrf.mxu1  ;;  %11292 = vmatmul.mubr.msk.bf16.vlgmr.msra.gmra.mxu0 %vm4498_vm9, %v9310_v28  ;;  %11357 = vmatmul.mubr.msk.bf16.vlgmr.msra.gmra.mxu1 %vm4498_vm9, %v10259_v15  ;;  %v9893_v28 = vld [vmem:[#allocation2 + $0x36] sm:$0x1] }
 0x7fb   : > { %v6168_v45 = vadd.f32 %v6161_v44, %v6091_v49  ;;  %9498 = vmatpush1.bf16.msra.mxu0 %v12167_v7  ;;  %9517 = vmatprep.mubr.bf16.mxu0 %v12340_v0  ;;  %v12185_v49 = vld [vmem:[#allocation5 + $0x6d0] ss:$8 sps:$4 sm:$0xff]  }
 0x7fc   : > { %v6163_v16 = vpop.f32.mrf.mxu0  ;;  %v14760_v14 = vpop.f32.mrf.mxu1  ;;  %9499 = vmatprep.subr.bf16.mxu0 %v12172_v3  ;;  %v12191_v44 = vld [vmem:[#allocation5 + $0x710] ss:$8 sps:$4 sm:$0xff]  }
 0x7fd   : > { %v6169_v34 = vadd.f32 %v6163_v16, %v6093_v13  ;;  %v9894_v16 = vpack.c.bf16 %v9893_v28, %v9893_v28 }
 0x7fe   : > { %v6165_v2 = vpop.f32.mrf.mxu0  ;;  %v6822_v37 = vpop.f32.mrf.mxu1 }
 0x7ff   : > { %9500 = vmatpush1.bf16.msra.mxu0 %v12170_v29  ;;  %v12194_v37 = vld [vmem:[#allocation5 + $0x700] ss:$8 sps:$4 sm:$0xff]  }
 0x800   : > { %v6166_v33 = vpop.f32.mrf.mxu0  ;;  %v6823_v60 = vpop.f32.mrf.mxu1  ;;  %9643 = vmatprep.subr.bf16.mxu0 %v12175_v43  ;;  %v12196_v43 = vld [vmem:[#allocation5 + $0x704] ss:$8 sps:$4 sm:$0xff]  }
 0x801   : > { %v12199_v60 = vld [vmem:[#allocation5 + $0x754] ss:$8 sps:$4 sm:$0xff]  }
 0x802   : > { %v6234_v56 = vpop.f32.mrf.mxu0  ;;  %v14762_v18 = vpop.f32.mrf.mxu1  ;;  %11302 = vmatmul.mubr.msk.bf16.vlgmr.msra.gmra.mxu0 %vm4498_vm9, %v9456_v61 }
 0x803   : > { %v6241_v53 = vadd.f32 %v6234_v56, %v6168_v45  ;;  %9644 = vmatpush1.bf16.msra.mxu0 %v12173_v27  ;;  %9663 = vmatprep.mubr.bf16.mxu0 %v12340_v0  ;;  %v10039_v56 = vld [vmem:[#allocation2 + $0x38] sm:$0x1] }
 0x804   : > { %v6236_v5 = vpop.f32.mrf.mxu0  ;;  %v14766_v10 = vpop.f32.mrf.mxu1  ;;  %9645 = vmatprep.subr.bf16.mxu0 %v12178_v50 }
 0x805   : > { %v6242_v41 = vadd.f32 %v6236_v5, %v6169_v34  ;;  %v12197_v5 = vld [vmem:[#allocation5 + $0x750] ss:$8 sps:$4 sm:$0xff]  }
 0x806   : > { %v6238_v63 = vpop.f32.mrf.mxu0  ;;  %v6968_v46 = vpop.f32.mrf.mxu1 }
 0x807   : > { %9646 = vmatpush1.bf16.msra.mxu0 %v12176_v30  ;;  %v10040_v63 = vpack.c.bf16 %v10039_v56, %v10039_v56  ;;  %v12202_v46 = vld [vmem:[#allocation5 + $0x744] ss:$8 sps:$4 sm:$0xff]  }
 0x808   : > { %v6239_v59 = vpop.f32.mrf.mxu0  ;;  %v6969_v54 = vpop.f32.mrf.mxu1  ;;  %9789 = vmatprep.subr.bf16.mxu0 %v12181_v4 }
 0x80a   : > { %v6307_v22 = vpop.f32.mrf.mxu0  ;;  %v14768_v38 = vpop.f32.mrf.mxu1  ;;  %11312 = vmatmul.mubr.msk.bf16.vlgmr.msra.gmra.mxu0 %vm4498_vm9, %v9602_v26 }
 0x80b   : > { %v6314_v24 = vadd.f32 %v6307_v22, %v6241_v53  ;;  %9790 = vmatpush1.bf16.msra.mxu0 %v12179_v62  ;;  %9809 = vmatprep.mubr.bf16.mxu0 %v12340_v0 }
 0x80c   : > { %v6309_v8 = vpop.f32.mrf.mxu0  ;;  %v14772_v19 = vpop.f32.mrf.mxu1  ;;  %9791 = vmatprep.subr.bf16.mxu0 %v12184_v39 }
 0x80d   : > { %v6315_v1 = vadd.f32 %v6309_v8, %v6242_v41 }
 0x80e   : > { %v6311_v58 = vpop.f32.mrf.mxu0  ;;  %v7114_v52 = vpop.f32.mrf.mxu1 }
 0x80f   : > { %9792 = vmatpush1.bf16.msra.mxu0 %v12182_v48 }
 0x810   : > { %v6312_v47 = vpop.f32.mrf.mxu0  ;;  %v7115_v9 = vpop.f32.mrf.mxu1  ;;  %9935 = vmatprep.subr.bf16.mxu0 %v12187_v42 }
 0x812   : > { %v6380_v13 = vpop.f32.mrf.mxu0  ;;  %v14774_v31 = vpop.f32.mrf.mxu1  ;;  %11322 = vmatmul.mubr.msk.bf16.vlgmr.msra.gmra.mxu0 %vm4498_vm9, %v9748_v17 }
 0x813   : > { %v6387_v57 = vadd.f32 %v6380_v13, %v6314_v24  ;;  %9936 = vmatpush1.bf16.msra.mxu0 %v12185_v49  ;;  %9955 = vmatprep.mubr.bf16.mxu0 %v12340_v0  ;;  %v10185_v24 = vld [vmem:[#allocation2 + $0x3a] sm:$0x1] }
 0x814   : > { %v6382_v36 = vpop.f32.mrf.mxu0  ;;  %v14778_v7 = vpop.f32.mrf.mxu1  ;;  %9937 = vmatprep.subr.bf16.mxu0 %v12190_v11  ;;  %v10186_v58 = vpack.c.bf16 %v10185_v24, %v10185_v24 }
 0x815   : > { %v6388_v35 = vadd.f32 %v6382_v36, %v6315_v1 }
 0x816   : > { %v6384_v15 = vpop.f32.mrf.mxu0  ;;  %v7260_v3 = vpop.f32.mrf.mxu1 }
 0x817   : > { %9938 = vmatpush1.bf16.msra.mxu0 %v12188_v55 }
 0x818   : > { %v6385_v45 = vpop.f32.mrf.mxu0  ;;  %v7261_v29 = vpop.f32.mrf.mxu1  ;;  %10081 = vmatprep.subr.bf16.mxu0 %v12193_v40 }
 0x81a   : > { %v6453_v34 = vpop.f32.mrf.mxu0  ;;  %v14780_v23 = vpop.f32.mrf.mxu1  ;;  %11332 = vmatmul.mubr.msk.bf16.vlgmr.msra.gmra.mxu0 %vm4498_vm9, %v9894_v16 }
 0x81b   : > { %v6460_v2 = vadd.f32 %v6453_v34, %v6387_v57  ;;  %10082 = vmatpush1.bf16.msra.mxu0 %v12191_v44  ;;  %10101 = vmatprep.mubr.bf16.mxu0 %v12340_v0 }
 0x81c   : > { %v6455_v27 = vpop.f32.mrf.mxu0  ;;  %v14784_v33 = vpop.f32.mrf.mxu1  ;;  %10083 = vmatprep.subr.bf16.mxu0 %v12196_v43 }
 0x81d   : > { %v6461_v61 = vadd.f32 %v6455_v27, %v6388_v35  ;;  %v6533_v50 = vadd.f32 %v14739_v20, %v6460_v2  ;;  %v12200_v20 = vld [vmem:[#allocation5 + $0x740] ss:$8 sps:$4 sm:$0xff]  }
 0x81e   : > { %v6457_v53 = vpop.f32.mrf.mxu0  ;;  %v7406_v30 = vpop.f32.mrf.mxu1 }
 0x81f   : > { %10084 = vmatpush1.bf16.msra.mxu0 %v12194_v37  ;;  %v6534_v4 = vadd.f32 %v14743_v51, %v6461_v61 }
 0x820   : > { %v6458_v41 = vpop.f32.mrf.mxu0  ;;  %v7407_v25 = vpop.f32.mrf.mxu1  ;;  %10227 = vmatprep.subr.bf16.mxu0 %v12199_v60 }
 0x822   : > { %v6599_v62 = vpop.f32.mrf.mxu0  ;;  %v14788_v59 = vpop.f32.mrf.mxu1  ;;  %11342 = vmatmul.mubr.msk.bf16.vlgmr.msra.gmra.mxu0 %vm4498_vm9, %v10040_v63 }
 0x823   : > { %v6606_v54 = vadd.f32 %v6599_v62, %v6533_v50  ;;  %10228 = vmatpush1.bf16.msra.mxu0 %v12197_v5  ;;  %10247 = vmatprep.mubr.bf16.mxu0 %v12340_v0 }
 0x824   : > { %v6601_v26 = vpop.f32.mrf.mxu0  ;;  %v14792_v39 = vpop.f32.mrf.mxu1  ;;  %10229 = vmatprep.subr.bf16.mxu0 %v12202_v46 }
 0x825   : > { %v6607_v51 = vadd.f32 %v6601_v26, %v6534_v4  ;;  %v6679_v22 = vadd.f32 %v14747_v12, %v6606_v54 }
 0x826   : > { %v6603_v48 = vpop.f32.mrf.mxu0  ;;  %v7552_v8 = vpop.f32.mrf.mxu1 }
 0x827   : > { %10230 = vmatpush1.bf16.msra.mxu0 %v12200_v20  ;;  %v6680_v42 = vadd.f32 %v14751_v32, %v6607_v51 }
 0x828   : > { %v6604_v1 = vpop.f32.mrf.mxu0  ;;  %v7553_v6 = vpop.f32.mrf.mxu1 }
 0x82a   : > { %v6745_v52 = vpop.f32.mrf.mxu0  ;;  %v14796_v49 = vpop.f32.mrf.mxu1  ;;  %11352 = vmatmul.mubr.msk.bf16.vlgmr.msra.gmra.mxu0 %vm4498_vm9, %v10186_v58 }
 0x82b   : > { %v6752_v0 = vadd.f32 %v6745_v52, %v6679_v22 }
 0x82c   : > { %v6747_v47 = vpop.f32.mrf.mxu0  ;;  %v14799_v9 = vpop.f32.mrf.mxu1 }
 0x82d   : > { %v6753_v17 = vadd.f32 %v6747_v47, %v6680_v42  ;;  %v6825_v12 = vadd.f32 %v14755_v21, %v6752_v0 }
 0x82e   : > { %v6749_v11 = vpop.f32.mrf.mxu0  ;;  %v7698_v13 = vpop.f32.mrf.mxu1 }
 0x82f   : > { %v6826_v57 = vadd.f32 %v14760_v14, %v6753_v17 }
 0x830   : > { %v6750_v32 = vpop.f32.mrf.mxu0  ;;  %v7699_v55 = vpop.f32.mrf.mxu1 }
 0x832   : > { %v6891_v36 = vpop.f32.mrf.mxu0  ;;  %v14803_v40 = vpop.f32.mrf.mxu1 }
 0x833   : > { %v6898_v35 = vadd.f32 %v6891_v36, %v6825_v12 }
 0x834   : > { %v6893_v28 = vpop.f32.mrf.mxu0  ;;  %v14805_v15 = vpop.f32.mrf.mxu1 }
 0x835   : > { %v6899_v3 = vadd.f32 %v6893_v28, %v6826_v57  ;;  %v6971_v44 = vadd.f32 %v14762_v18, %v6898_v35  ;;  %v12204_v35 = vld [vmem:[%s15071_s13 + $0x38] sm:$0xff]  }
 0x836   : > { %v6895_v45 = vpop.f32.mrf.mxu0  ;;  %v7844_v29 = vpop.f32.mrf.mxu1 }
 0x837   : > { %v6972_v21 = vadd.f32 %v14766_v10, %v6899_v3 }
 0x838   : > { %v6896_v16 = vpop.f32.mrf.mxu0  ;;  %v7845_v43 = vpop.f32.mrf.mxu1 }
 0x839   : > { %v12206_v16 = vld [vmem:[%s15071_s13 + $0x30] sm:$0xff]  }
 0x83a   : > { %v7037_v34 = vpop.f32.mrf.mxu0  ;;  %v14809_v14 = vpop.f32.mrf.mxu1 }
 0x83b   : > { %v7044_v2 = vadd.f32 %v7037_v34, %v6971_v44 }
 0x83c   : > { %v7039_v37 = vpop.f32.mrf.mxu0  ;;  %v14811_v27 = vpop.f32.mrf.mxu1 }
 0x83d   : > { %v7045_v60 = vadd.f32 %v7039_v37, %v6972_v21  ;;  %v7117_v61 = vadd.f32 %v14768_v38, %v7044_v2  ;;  %v12205_v21 = vld [vmem:[%s15071_s13 + $0x70] sm:$0xff]  }
 0x83e   : > { %v7041_v50 = vpop.f32.mrf.mxu0  ;;  %v7990_v56 = vpop.f32.mrf.mxu1 }
 0x83f   : > { %v7118_v18 = vadd.f32 %v14772_v19, %v7045_v60 }
 0x840   : > { %v7042_v53 = vpop.f32.mrf.mxu0  ;;  %v7991_v30 = vpop.f32.mrf.mxu1 }
 0x842   : > { %v7183_v5 = vpop.f32.mrf.mxu0  ;;  %v14815_v10 = vpop.f32.mrf.mxu1 }
 0x843   : > { %v7190_v4 = vadd.f32 %v7183_v5, %v7117_v61  ;;  %v12208_v61 = vld [vmem:[%s15071_s13 + $0x28] sm:$0xff]  }
 0x844   : > { %v7185_v41 = vpop.f32.mrf.mxu0  ;;  %v14817_v25 = vpop.f32.mrf.mxu1 }
 0x845   : > { %v7191_v63 = vadd.f32 %v7185_v41, %v7118_v18  ;;  %v7263_v46 = vadd.f32 %v14774_v31, %v7190_v4  ;;  %v12209_v4 = vld [vmem:[%s15071_s13 + $0x60] sm:$0xff]  }
 0x846   : > { %v7187_v62 = vpop.f32.mrf.mxu0  ;;  %v8136_v54 = vpop.f32.mrf.mxu1  ;;  %v12210_v41 = vld [vmem:[%s15071_s13 + $0x20] sm:$0xff]  }
 0x847   : > { %v7264_v38 = vadd.f32 %v14778_v7, %v7191_v63 }
 0x848   : > { %v7188_v20 = vpop.f32.mrf.mxu0  ;;  %v8137_v26 = vpop.f32.mrf.mxu1 }
 0x849   : > { %v12212_v20 = vld [vmem:[%s15071_s13 + $0x18] sm:$0xff]  }
 0x84a   : > { %v7329_v51 = vpop.f32.mrf.mxu0  ;;  %v14821_v19 = vpop.f32.mrf.mxu1 }
 0x84b   : > { %v7336_v22 = vadd.f32 %v7329_v51, %v7263_v46 }
 0x84c   : > { %v7331_v24 = vpop.f32.mrf.mxu0  ;;  %v14823_v48 = vpop.f32.mrf.mxu1 }
 0x84d   : > { %v7337_v8 = vadd.f32 %v7331_v24, %v7264_v38  ;;  %v7409_v42 = vadd.f32 %v14780_v23, %v7336_v22 }
 0x84e   : > { %v7333_v1 = vpop.f32.mrf.mxu0  ;;  %v8282_v6 = vpop.f32.mrf.mxu1 }
 0x84f   : > { %v7410_v31 = vadd.f32 %v14784_v33, %v7337_v8  ;;  %v12203_v33 = vld [vmem:[%s15071_s13 + $0x78] sm:$0xff]  }
 0x850   : > { %v7334_v58 = vpop.f32.mrf.mxu0  ;;  %v8283_v52 = vpop.f32.mrf.mxu1  ;;  %11510 = vmatprep.subr.bf16.mxu0 %v12203_v33  ;;  %v12216_v33 = vld [vmem:[%s15071_s13 + $0x8] sm:$0xff]  }
 0x851   : > { %11511 = vmatpush3.bf16.msra.mxu0 %v12204_v35 }
 0x852   : > { %v7475_v0 = vpop.f32.mrf.mxu0  ;;  %v14827_v7 = vpop.f32.mrf.mxu1  ;;  %11512 = vmatprep.subr.bf16.mxu0 %v12205_v21 }
 0x853   : > { %v7482_v47 = vadd.f32 %v7475_v0, %v7409_v42 }
 0x854   : > { %v7477_v17 = vpop.f32.mrf.mxu0  ;;  %v14829_v12 = vpop.f32.mrf.mxu1 }
 0x855   : > { %v7483_v11 = vadd.f32 %v7477_v17, %v7410_v31  ;;  %v7555_v13 = vadd.f32 %v14788_v59, %v7482_v47  ;;  %11513 = vmatpush3.bf16.msra.mxu0 %v12206_v16  ;;  %v12220_v16 = vld [vmem:[%s15073_s15 + $0x30] sm:$0xff]  }
 0x856   : > { %v7479_v57 = vpop.f32.mrf.mxu0  ;;  %v8428_v32 = vpop.f32.mrf.mxu1 }
 0x857   : > { %v7556_v23 = vadd.f32 %v14792_v39, %v7483_v11  ;;  %v12213_v11 = vld [vmem:[%s15071_s13 + $0x50] sm:$0xff]  }
 0x858   : > { %v7480_v55 = vpop.f32.mrf.mxu0  ;;  %v8429_v36 = vpop.f32.mrf.mxu1 }
 0x85a   : > { %v7621_v28 = vpop.f32.mrf.mxu0  ;;  %v14839_v3 = vpop.f32.mrf.mxu1 }
 0x85b   : > { %v7628_v44 = vadd.f32 %v7621_v28, %v7555_v13  ;;  %v12214_v13 = vld [vmem:[%s15071_s13 + $0x10] sm:$0xff]   ;;  %v12217_v28 = vld [vmem:[%s15071_s13 + $0x40] sm:$0xff]  }
 0x85c   : > { %v7623_v59 = vpop.f32.mrf.mxu0  ;;  %v14841_v45 = vpop.f32.mrf.mxu1 }
 0x85d   : > { %v7629_v39 = vadd.f32 %v7623_v59, %v7556_v23  ;;  %v7701_v29 = vadd.f32 %v14796_v49, %v7628_v44  ;;  %v12207_v49 = vld [vmem:[%s15071_s13 + $0x68] sm:$0xff]  }
 0x85e   : > { %v7625_v43 = vpop.f32.mrf.mxu0  ;;  %v8574_v34 = vpop.f32.mrf.mxu1  ;;  %11514 = vmatprep.subr.bf16.mxu0 %v12207_v49 }
 0x85f   : > { %v7702_v2 = vadd.f32 %v14799_v9, %v7629_v39  ;;  %11515 = vmatpush3.bf16.msra.mxu0 %v12208_v61  ;;  %v12344_v39 = vmov 0.0  }
 0x860   : > { %v7626_v37 = vpop.f32.mrf.mxu0  ;;  %v8575_v60 = vpop.f32.mrf.mxu1  ;;  %11516 = vmatprep.subr.bf16.mxu0 %v12209_v4  ;;  %11597 = vmatprep.subr.bf16.mxu1 %v12344_v39 }
 0x861   : > { %11613 = vmatprep.mubr.msk.bf16.mxu1 %vm12345_vm5, %v12344_v39 }
 0x862   : > { %v7767_v50 = vpop.f32.mrf.mxu0  ;;  %v14857_v56 = vpop.f32.mrf.mxu1 }
 0x863   : > { %v7774_v18 = vadd.f32 %v7767_v50, %v7701_v29  ;;  %11517 = vmatpush3.bf16.msra.mxu0 %v12210_v41  ;;  %v12221_v50 = vld [vmem:[%s15073_s15 + $0x28] sm:$0xff]  }
 0x864   : > { %v7769_v53 = vpop.f32.mrf.mxu0  ;;  %v14859_v30 = vpop.f32.mrf.mxu1 }
 0x865   : > { %v7775_v9 = vadd.f32 %v7769_v53, %v7702_v2  ;;  %v7847_v5 = vadd.f32 %v14803_v40, %v7774_v18  ;;  %v12211_v40 = vld [vmem:[%s15071_s13 + $0x58] sm:$0xff]  }
 0x866   : > { %v7771_v63 = vpop.f32.mrf.mxu0  ;;  %v8720_v46 = vpop.f32.mrf.mxu1  ;;  %11518 = vmatprep.subr.bf16.mxu0 %v12211_v40  ;;  %v12223_v40 = vld [vmem:[%s15073_s15 + $0x18] sm:$0xff]  }
 0x867   : > { %v7848_v62 = vadd.f32 %v14805_v15, %v7775_v9  ;;  %11519 = vmatpush3.bf16.msra.mxu0 %v12212_v20 }
 0x868   : > { %v7772_v54 = vpop.f32.mrf.mxu0  ;;  %v8721_v38 = vpop.f32.mrf.mxu1  ;;  %11520 = vmatprep.subr.bf16.mxu0 %v12213_v11 }
 0x86a   : > { %v7913_v26 = vpop.f32.mrf.mxu0  ;;  %v14875_v51 = vpop.f32.mrf.mxu1 }
 0x86b   : > { %v7920_v22 = vadd.f32 %v7913_v26, %v7847_v5  ;;  %11521 = vmatpush3.bf16.msra.mxu0 %v12214_v13 }
 0x86c   : > { %v7915_v24 = vpop.f32.mrf.mxu0  ;;  %v14877_v8 = vpop.f32.mrf.mxu1 }
 0x86d   : > { %v7921_v15 = vadd.f32 %v7915_v24, %v7848_v62  ;;  %v7993_v42 = vadd.f32 %v14809_v14, %v7920_v22  ;;  %v12215_v14 = vld [vmem:[%s15071_s13 + $0x48] sm:$0xff]  }
 0x86e   : > { %v7917_v1 = vpop.f32.mrf.mxu0  ;;  %v8866_v6 = vpop.f32.mrf.mxu1  ;;  %11522 = vmatprep.subr.bf16.mxu0 %v12215_v14 }
 0x86f   : > { %v7994_v31 = vadd.f32 %v14811_v27, %v7921_v15  ;;  %11523 = vmatpush3.bf16.msra.mxu0 %v12216_v33 }
 0x870   : > { %v7918_v58 = vpop.f32.mrf.mxu0  ;;  %v8867_v52 = vpop.f32.mrf.mxu1  ;;  %11524 = vmatprep.subr.bf16.mxu0 %v12217_v28 }
 0x872   : > { %v8059_v0 = vpop.f32.mrf.mxu0  ;;  %v14881_v47 = vpop.f32.mrf.mxu1 }
 0x873   : > { %v8066_v17 = vadd.f32 %v8059_v0, %v7993_v42 }
 0x874   : > { %v8061_v57 = vpop.f32.mrf.mxu0  ;;  %v14892_v27 = vpop.f32.mrf.mxu1 }
 0x875   : > { %v8067_v32 = vadd.f32 %v8061_v57, %v7994_v31  ;;  %v8139_v23 = vadd.f32 %v14815_v10, %v8066_v17  ;;  %v12219_v10 = vld [vmem:[%s15073_s15 + $0x38] sm:$0xff]  }
 0x876   : > { %v8063_v55 = vpop.f32.mrf.mxu0  ;;  %v9012_v36 = vpop.f32.mrf.mxu1  ;;  %11598 = vmatpush3.bf16.msra.mxu1 %v12219_v10 }
 0x877   : > { %v8140_v35 = vadd.f32 %v14817_v25, %v8067_v32  ;;  %v12218_v25 = vld [vmem:[%s15071_s13] sm:$0xff]   ;;  %11599 = vmatprep.subr.bf16.mxu1 %v12344_v39 }
 0x878   : > { %v8064_v44 = vpop.f32.mrf.mxu0  ;;  %v9013_v59 = vpop.f32.mrf.mxu1  ;;  %11525 = vmatpush3.bf16.msra.mxu0 %v12218_v25 }
 0x87a   : > { %v8205_v29 = vpop.f32.mrf.mxu0  ;;  %v14906_v21 = vpop.f32.mrf.mxu1  ;;  %11600 = vmatpush3.bf16.msra.mxu1 %v12220_v16 }
 0x87b   : > { %v8212_v43 = vadd.f32 %v8205_v29, %v8139_v23  ;;  %11601 = vmatprep.subr.bf16.mxu1 %v12344_v39 }
 0x87c   : > { %v8207_v34 = vpop.f32.mrf.mxu0  ;;  %v14915_v2 = vpop.f32.mrf.mxu1 }
 0x87d   : > { %v8213_v37 = vadd.f32 %v8207_v34, %v8140_v35  ;;  %v8285_v60 = vadd.f32 %v14821_v19, %v8212_v43  ;;  %v12222_v19 = vld [vmem:[%s15073_s15 + $0x20] sm:$0xff]  }
 0x87e   : > { %v8209_v49 = vpop.f32.mrf.mxu0  ;;  %v9158_v61 = vpop.f32.mrf.mxu1  ;;  %11602 = vmatpush3.bf16.msra.mxu1 %v12221_v50 }
 0x87f   : > { %v8286_v18 = vadd.f32 %v14823_v48, %v8213_v37  ;;  %11603 = vmatprep.subr.bf16.mxu1 %v12344_v39 }
 0x880   : > { %v8210_v53 = vpop.f32.mrf.mxu0  ;;  %v9159_v9 = vpop.f32.mrf.mxu1 }
 0x882   : > { %v8351_v5 = vpop.f32.mrf.mxu0  ;;  %v14923_v4 = vpop.f32.mrf.mxu1  ;;  %11604 = vmatpush3.bf16.msra.mxu1 %v12222_v19 }
 0x883   : > { %v8358_v41 = vadd.f32 %v8351_v5, %v8285_v60  ;;  %11605 = vmatprep.subr.bf16.mxu1 %v12344_v39 }
 0x884   : > { %v8353_v63 = vpop.f32.mrf.mxu0  ;;  %v14929_v46 = vpop.f32.mrf.mxu1 }
 0x885   : > { %v8359_v62 = vadd.f32 %v8353_v63, %v8286_v18  ;;  %v8431_v48 = vadd.f32 %v14827_v7, %v8358_v41 }
 0x886   : > { %v8355_v54 = vpop.f32.mrf.mxu0  ;;  %v9304_v38 = vpop.f32.mrf.mxu1  ;;  %11606 = vmatpush3.bf16.msra.mxu1 %v12223_v40 }
 0x887   : > { %v8432_v20 = vadd.f32 %v14829_v12, %v8359_v62  ;;  %11607 = vmatprep.subr.bf16.mxu1 %v12344_v39 }
 0x888   : > { %v8356_v26 = vpop.f32.mrf.mxu0  ;;  %v9305_v22 = vpop.f32.mrf.mxu1 }
 0x88a   : > { %v8497_v24 = vpop.f32.mrf.mxu0  ;;  %v14937_v15 = vpop.f32.mrf.mxu1 }
 0x88b   : > { %v8504_v42 = vadd.f32 %v8497_v24, %v8431_v48 }
 0x88c   : > { %v8499_v7 = vpop.f32.mrf.mxu0  ;;  %v14940_v1 = vpop.f32.mrf.mxu1 }
 0x88d   : > { %v8505_v6 = vadd.f32 %v8499_v7, %v8432_v20  ;;  %v8577_v31 = vadd.f32 %v14839_v3, %v8504_v42 }
 0x88e   : > { %v8501_v58 = vpop.f32.mrf.mxu0  ;;  %v9450_v52 = vpop.f32.mrf.mxu1 }
 0x88f   : > { %v8578_v12 = vadd.f32 %v14841_v45, %v8505_v6 }
 0x890   : > { %v8502_v0 = vpop.f32.mrf.mxu0  ;;  %v9451_v17 = vpop.f32.mrf.mxu1 }
 0x892   : > { %v8643_v11 = vpop.f32.mrf.mxu0  ;;  %v14944_v13 = vpop.f32.mrf.mxu1 }
 0x893   : > { %v8650_v14 = vadd.f32 %v8643_v11, %v8577_v31 }
 0x894   : > { %v8645_v57 = vpop.f32.mrf.mxu0  ;;  %v14946_v32 = vpop.f32.mrf.mxu1 }
 0x895   : > { %v8651_v23 = vadd.f32 %v8645_v57, %v8578_v12  ;;  %v8723_v55 = vadd.f32 %v14857_v56, %v8650_v14 }
 0x896   : > { %v8647_v36 = vpop.f32.mrf.mxu0  ;;  %v9596_v33 = vpop.f32.mrf.mxu1 }
 0x897   : > { %v8724_v3 = vadd.f32 %v14859_v30, %v8651_v23 }
 0x898   : > { %v8648_v35 = vpop.f32.mrf.mxu0  ;;  %v9597_v28 = vpop.f32.mrf.mxu1 }
 0x89a   : > { %v8789_v44 = vpop.f32.mrf.mxu0  ;;  %v14950_v45 = vpop.f32.mrf.mxu1 }
 0x89b   : > { %v8796_v59 = vadd.f32 %v8789_v44, %v8723_v55 }
 0x89c   : > { %v8791_v10 = vpop.f32.mrf.mxu0  ;;  %v14952_v29 = vpop.f32.mrf.mxu1 }
 0x89d   : > { %v8797_v25 = vadd.f32 %v8791_v10, %v8724_v3  ;;  %v8869_v16 = vadd.f32 %v14875_v51, %v8796_v59 }
 0x89e   : > { %v8793_v43 = vpop.f32.mrf.mxu0  ;;  %v9742_v34 = vpop.f32.mrf.mxu1 }
 0x89f   : > { %v8870_v56 = vadd.f32 %v14877_v8, %v8797_v25 }
 0x8a0   : > { %v8794_v37 = vpop.f32.mrf.mxu0  ;;  %v9743_v60 = vpop.f32.mrf.mxu1 }
 0x8a2   : > { %v8935_v49 = vpop.f32.mrf.mxu0  ;;  %v14956_v30 = vpop.f32.mrf.mxu1 }
 0x8a3   : > { %v8942_v61 = vadd.f32 %v8935_v49, %v8869_v16 }
 0x8a4   : > { %v8937_v50 = vpop.f32.mrf.mxu0  ;;  %v14958_v18 = vpop.f32.mrf.mxu1 }
 0x8a5   : > { %v8943_v53 = vadd.f32 %v8937_v50, %v8870_v56  ;;  %v9015_v9 = vadd.f32 %v14881_v47, %v8942_v61 }
 0x8a6   : > { %v8939_v5 = vpop.f32.mrf.mxu0  ;;  %v9888_v19 = vpop.f32.mrf.mxu1 }
 0x8a7   : > { %v9016_v51 = vadd.f32 %v14892_v27, %v8943_v53 }
 0x8a8   : > { %v8940_v41 = vpop.f32.mrf.mxu0  ;;  %v9889_v63 = vpop.f32.mrf.mxu1 }
 0x8aa   : > { %v9081_v62 = vpop.f32.mrf.mxu0  ;;  %v14962_v8 = vpop.f32.mrf.mxu1 }
 0x8ab   : > { %v9088_v48 = vadd.f32 %v9081_v62, %v9015_v9 }
 0x8ac   : > { %v9083_v54 = vpop.f32.mrf.mxu0  ;;  %v14964_v38 = vpop.f32.mrf.mxu1 }
 0x8ad   : > { %v9089_v40 = vadd.f32 %v9083_v54, %v9016_v51  ;;  %v9161_v20 = vadd.f32 %v14906_v21, %v9088_v48 }
 0x8ae   : > { %v9085_v26 = vpop.f32.mrf.mxu0  ;;  %v10034_v22 = vpop.f32.mrf.mxu1 }
 0x8af   : > { %v9162_v47 = vadd.f32 %v14915_v2, %v9089_v40  ;;  %v10333_v26 = vlaneseq }
 0x8b0   : > { %v9086_v24 = vpop.f32.mrf.mxu0  ;;  %v10035_v42 = vpop.f32.mrf.mxu1 }
 0x8b1   : > { %v10334_v24 = vshrl.u32 %v10333_v26, 7 }
 0x8b2   : > { %v9227_v7 = vpop.f32.mrf.mxu0  ;;  %v14968_v27 = vpop.f32.mrf.mxu1 }
 0x8b3   : > { %v9234_v6 = vadd.f32 %v9227_v7, %v9161_v20 }
 0x8b4   : > { %v9229_v31 = vpop.f32.mrf.mxu0  ;;  %v14970_v58 = vpop.f32.mrf.mxu1 }
 0x8b5   : > { %v9235_v52 = vadd.f32 %v9229_v31, %v9162_v47  ;;  %v9307_v12 = vadd.f32 %v14923_v4, %v9234_v6 }
 0x8b6   : > { %v9231_v0 = vpop.f32.mrf.mxu0  ;;  %v10180_v17 = vpop.f32.mrf.mxu1 }
 0x8b7   : > { %v9308_v21 = vadd.f32 %v14929_v46, %v9235_v52  ;;  %v10335_v52 = vsub.s32 0, %v10334_v24  ;;  %v10331_v0 = vld [vmem:[%s15070_s12] sm:$0x3]  ;;  %v10339_v17 = vsub.s32 1, %v10334_v24 }
 0x8b8   : > { %v9232_v11 = vpop.f32.mrf.mxu0  ;;  %v10181_v14 = vpop.f32.mrf.mxu1 }
 0x8b9   : > { %v10336_v14 = vrot.slane %v10331_v0, %v10335_v52 }
 0x8ba   : > { %v9373_v57 = vpop.f32.mrf.mxu0  ;;  %v10322_v2 = vpop.f32.mrf.mxu1 }
 0x8bb   : > { %v9380_v23 = vadd.f32 %v9373_v57, %v9307_v12 }
 0x8bc   : > { %v9375_v55 = vpop.f32.mrf.mxu0  ;;  %v10324_v36 = vpop.f32.mrf.mxu1 }
 0x8bd   : > { %v9381_v33 = vadd.f32 %v9375_v55, %v9308_v21  ;;  %v9453_v3 = vadd.f32 %v14937_v15, %v9380_v23 }
 0x8be   : > { %v9377_v35 = vpop.f32.mrf.mxu0  ;;  %v10326_v28 = vpop.f32.mrf.mxu1 }
 0x8bf   : > { %v9454_v44 = vadd.f32 %v14940_v1, %v9381_v33 }
 0x8c0   : > { %v9378_v59 = vpop.f32.mrf.mxu0  ;;  %v10327_v4 = vpop.f32.mrf.mxu1 }
 0x8c2   : > { %v9519_v10 = vpop.f32.mrf.mxu0 }
 0x8c3   : > { %v9526_v25 = vadd.f32 %v9519_v10, %v9453_v3 }
 0x8c4   : > { %v9521_v16 = vpop.f32.mrf.mxu0 }
 0x8c5   : > { %v9527_v46 = vadd.f32 %v9521_v16, %v9454_v44  ;;  %v9599_v43 = vadd.f32 %v14944_v13, %v9526_v25  ;;  %v10381_v16 = vld [vmem:[%s15072_s14] sm:$0x1] }
 0x8c6   : > { %v9523_v34 = vpop.f32.mrf.mxu0 }
 0x8c7   : > { %v9600_v56 = vadd.f32 %v14946_v32, %v9527_v46 }
 0x8c8   : > { %v9524_v37 = vpop.f32.mrf.mxu0 }
 0x8ca   : > { %v9665_v60 = vpop.f32.mrf.mxu0 }
 0x8cb   : > { %v9672_v49 = vadd.f32 %v9665_v60, %v9599_v43 }
 0x8cc   : > { %v9667_v61 = vpop.f32.mrf.mxu0 }
 0x8cd   : > { %v9673_v15 = vadd.f32 %v9667_v61, %v9600_v56  ;;  %v9745_v50 = vadd.f32 %v14950_v45, %v9672_v49 }
 0x8ce   : > { %v9669_v53 = vpop.f32.mrf.mxu0 }
 0x8cf   : > { %v9746_v1 = vadd.f32 %v14952_v29, %v9673_v15 }
 0x8d0   : > { %v9670_v9 = vpop.f32.mrf.mxu0 }
 0x8d2   : > { %v9811_v5 = vpop.f32.mrf.mxu0 }
 0x8d3   : > { %v9818_v19 = vadd.f32 %v9811_v5, %v9745_v50 }
 0x8d4   : > { %v9813_v51 = vpop.f32.mrf.mxu0 }
 0x8d5   : > { %v9891_v41 = vadd.f32 %v14956_v30, %v9818_v19  ;;  %v9819_v32 = vadd.f32 %v9813_v51, %v9746_v1 }
 0x8d6   : > { %v9815_v13 = vpop.f32.mrf.mxu0 }
 0x8d7   : > { %v9892_v20 = vadd.f32 %v14958_v18, %v9819_v32 }
 0x8d8   : > { %v9816_v63 = vpop.f32.mrf.mxu0 }
 0x8da   : > { %v9957_v62 = vpop.f32.mrf.mxu0 }
 0x8db   : > { %v9964_v40 = vadd.f32 %v9957_v62, %v9891_v41 }
 0x8dc   : > { %v9959_v48 = vpop.f32.mrf.mxu0 }
 0x8dd   : > { %v9965_v22 = vadd.f32 %v9959_v48, %v9892_v20  ;;  %v10037_v29 = vadd.f32 %v14962_v8, %v9964_v40 }
 0x8de   : > { %v9961_v54 = vpop.f32.mrf.mxu0 }
 0x8df   : > { %v10038_v30 = vadd.f32 %v14964_v38, %v9965_v22  ;;  %v10340_v38 = vrot.slane %v10331_v0, %v10339_v17 }
 0x8e0   : > { %v9962_v45 = vpop.f32.mrf.mxu0 }
 0x8e2   : > { %v10103_v47 = vpop.f32.mrf.mxu0 }
 0x8e3   : > { %v10110_v7 = vadd.f32 %v10103_v47, %v10037_v29 }
 0x8e4   : > { %v10105_v42 = vpop.f32.mrf.mxu0 }
 0x8e5   : > { %v10111_v31 = vadd.f32 %v10105_v42, %v10038_v30  ;;  %v10183_v18 = vadd.f32 %v14968_v27, %v10110_v7  ;;  %v12224_v27 = vld [vmem:[%s15073_s15 + $0x10] sm:$0xff]  }
 0x8e6   : > { %v10107_v6 = vpop.f32.mrf.mxu0  ;;  %11608 = vmatpush3.bf16.msra.mxu1 %v12224_v27 }
 0x8e7   : > { %v10184_v8 = vadd.f32 %v14970_v58, %v10111_v31  ;;  %11609 = vmatprep.subr.bf16.mxu1 %v12344_v39  ;;  %v12225_v58 = vld [vmem:[%s15073_s15 + $0x8] sm:$0xff]  }
 0x8e8   : > { %v10108_v12 = vpop.f32.mrf.mxu0 }
 0x8ea   : > { %v10249_v21 = vpop.f32.mrf.mxu0  ;;  %11610 = vmatpush3.bf16.msra.mxu1 %v12225_v58 }
 0x8eb   : > { %v10256_v11 = vadd.f32 %v10249_v21, %v10183_v18  ;;  %11611 = vmatprep.subr.bf16.mxu1 %v12344_v39  ;;  %v10536_v39 = vld [vmem:[%s15074_s16] sm:$0x1] }
 0x8ec   : > { %v10251_v57 = vpop.f32.mrf.mxu0 }
 0x8ed   : > { %v10329_v23 = vadd.f32 %v10322_v2, %v10256_v11  ;;  %v10257_v55 = vadd.f32 %v10251_v57, %v10184_v8  ;;  %v12226_v2 = vld [vmem:[%s15073_s15] sm:$0xff]  }
 0x8ee   : > { %v10253_v33 = vpop.f32.mrf.mxu0  ;;  %11612 = vmatpush3.bf16.msra.mxu1 %v12226_v2 }
 0x8ef   : > { %v10343_v3 = vadd.f32 %v10336_v14, %v10329_v23  ;;  %v10330_v35 = vadd.f32 %v10324_v36, %v10257_v55 }
 0x8f0   : > { %v10254_v28 = vpop.f32.mrf.mxu0 }
 0x8f1   : > { %v10344_v44 = vadd.f32 %v10340_v38, %v10330_v35  ;;  %v10345_v59 = vmax.f32 %v10343_v3, 0.0 }
 0x8f3   : > { %v10346_v4 = vmax.f32 %v10344_v44, 0.0  ;;  %v10347_v25 = vpack.c.bf16 %v10345_v59, %v10345_v59 }
 0x8f5   : > { %v10348_v10 = vpack.c.bf16 %v10346_v4, %v10346_v4 }
 0x8f7   : > { %10510 = vmatprep.mubr.bf16.mxu0 %v10348_v10 }
 0x8f8   : > { %10511 = vmatmul.mubr.bf16.vlgmr.msra.gmra.mxu0 %v10347_v25 }
 0x9b8   : > { %v11526_v36 = vpop.f32.mrf.mxu0 }
 0x9ba   : > { %v11527_v46 = vpop.f32.mrf.mxu0 }
 0x9bb   : > { %v11528_v43 = vadd.f32 %v11527_v46, %v11526_v36 }
 0x9bc   : > { %v11529_v34 = vpop.f32.mrf.mxu0 }
 0x9bd   : > { %v10513_v56 = vadd.f32 %v11528_v43, %v10381_v16 }
 0x9be   : > { %v11530_v37 = vpop.f32.mrf.mxu0 }
 0x9bf   : > { %v10518_v60 = vmax.f32 %v10513_v56, 0.0 }
 0x9c1   : > { %v10519_v49 = vpack.c.bf16 %v10518_v60, %v10518_v60 }
 0x9c3   : > { %11614 = vmatmul.mubr.bf16.vlgmr.msra.gmra.mxu1 %v10519_v49 }
 0xa83   : > { %v10619_v61 = vpop.f32.mrf.mxu1 }
 0xa84   : > { %v10620_v15 = vadd.f32 %v10619_v61, %v10536_v39 }
 0xa85   : > { %v11615_v50 = vpop.f32.mrf.mxu1 }
 0xa86   : > { %10625 = vst [vmem:[%s572_s30] sm:$0x1] %v10620_v15 }
 0xa87   : > { %v10622_v53 = vpop.f32.mrf.mxu1 }
 0xa88   : > { %12268 = shalt.err (!%p12265_p3)
}
 0xa89   : > { %s12269_s0 = scalar_lea.hbm %s15012_s24, 16  ;;  %s12273_s22 = scalar_lea.hbm %s15075_s17, 32 }
 0xa8a   : > { %p12270_p5 = scmp.ne.s32.totalorder %s15012_s24, %s12269_s0  ;;  %p12274_p9 = scmp.lt.s32.totalorder %s15012_s24, %s15075_s17 }
 0xa8b   : > { %p12275_p12 = scmp.lt.s32.totalorder %s12273_s22, %s12269_s0 }
 0xa8c   : > { %p12271_p6 = pnand %p12270_p5, %p12477_p4 }
 0xa8d   : > { %p12276_p10 = por %p12275_p12, %p12274_p9 }
 0xa8e   : > { %p12272_p7 = pneg %p12271_p6 }
 0xa90   : > { %p12277_p11 = pnand %p12276_p10, %p12272_p7 }
 0xa92   : > { %12280 = shalt.err (!%p12277_p11)
}
 0xa93   : > { %11621 = dma.vmem_to_hbm [thread:$0]  (%p12477_p4), %s15014_s18, 16, %s15012_s24, %s10627_s20   ;;  %v11616_v1 = vpop.f32.mrf.mxu1 }
 0xa94 PF: > { %s15109_s2 = sld [smem:[#allocation11_spill]]  ;;  %p11633_p13 = scmp.ge.s32.totalorder %s12335_s29, 2 }
 0xa96   : > { %p11628_p0 = pnand %p11633_p13, %p12484_p8 }
 0xa98   : > { %p11629_p1 = pneg %p11628_p0 }
 0xa9a   : > { %s10651_s28 = sand.u32 1, %s15109_s2  }
 0xa9b   : > { %s10652_s3 = scalar_lea.sflag [#allocation7], %s10651_s28 }
 0xa9c   : > { %12310 = dma.done.wait (%p11629_p1), %s10652_s3, 16  }
 0xa9d   : > { %12312 = vsyncadd (%p11629_p1), %s10652_s3, 4294967280  ;;  %s31_s29 = sadd.s32 1, %s12335_s29   ;;  %s15110_s1 = sld [smem:[#allocation14_spill]] }
 0xa9e   : > { %p28_p2 = scmp.ge.s32.totalorder %s31_s29, 4   ;;  %s15111_s27 = sld [smem:[#allocation12_spill]] }
 0xa9f   : > { %s15112_s28 = sld [smem:[#allocation13_spill]]  ;;  %s15113_s24 = smov %s12319_s25 }
 0xaa0   : > { %s15114_s25 = smov %s12323_s26  ;;  %30 = sbr.rel (!%p28_p2) target bundleno = 10 (0xa), region = 223 }
 0xaa3   : > { %s15115_s26 = smov %s15110_s1 }
 0xaa5   :  { %10656 = vsyncpa [#allocation6], 1 }
 0xaa6   :  { %10658 = vsyncpa [#allocation6 + $0x1], 1 }
 0xaa7   :  { %10659 = vsyncpa [#allocation7], 1 }
 0xaa8   :  { %10661 = vsyncpa [#allocation7 + $0x1], 1 }

</bundles_post_ra>
